<compile_context>
chip_gen: v5e
topology: v5e:2x2
jax: 0.10.0
libtpu: 0.0.40
codegen_flags: <defaults>
</compile_context>

<pallas_src>
import functools
import math

import jax
import jax.numpy as jnp
from jax.experimental import pallas as pl
from jax.experimental.pallas import tpu as pltpu

EPS = 1e-5                       # nn.LayerNorm default eps
VMEM_LIMIT = 32 * 1024 * 1024    # explicit scoped-VMEM limit (safe on v5e/v6e/v7x)


def _layernorm(y, g, b):
    # f32 normalization (keep non-matmul math in f32, esp. for v5e).
    mu = jnp.mean(y, axis=-1, keepdims=True)
    var = jnp.mean((y - mu) ** 2, axis=-1, keepdims=True)
    return (y - mu) * jax.lax.rsqrt(var + EPS) * g + b


# ---------------------------------------------------------------------------
# Fused multi-layer kernel.
# grid = (batch_blocks, num_layers); the layer axis is "arbitrary" (sequential
# carry in VMEM scratch), the batch-block axis is "parallel".
# ---------------------------------------------------------------------------
def layers_kernel(x_ref, wqkv_ref, bqkv_ref, wo_ref, w1_ref, bf1_ref, w2_ref,
                  ev_ref, o_ref, h_ref, *, num_heads):
    l = pl.program_id(1)
    Bb, S, E = x_ref.shape
    R = Bb * S
    H = num_heads
    Dh = E // H
    scale = 1.0 / math.sqrt(Dh)

    # Load the input activations into the f32 carry at the first layer.
    @pl.when(l == 0)
    def _():
        h_ref[...] = x_ref[...].reshape(R, E)

    x = h_ref[...]                                  # (R, E) f32 carry
    x_bf = x.astype(jnp.bfloat16)

    # ---- fused QKV projection: one (R,E) x (E,3E) MXU matmul ----
    qkv = (jnp.dot(x_bf, wqkv_ref[0], preferred_element_type=jnp.float32)
           + bqkv_ref[0])                           # (R, 3E) f32
    q = qkv[:, 0 * E:1 * E]
    k = qkv[:, 1 * E:2 * E]
    v = qkv[:, 2 * E:3 * E]

    # split heads: (R, E) -> (Bb, S, H, Dh); Dh is a full 128-lane group here.
    qh = q.reshape(Bb, S, H, Dh).astype(jnp.bfloat16)
    kh = k.reshape(Bb, S, H, Dh).astype(jnp.bfloat16)
    vh = v.reshape(Bb, S, H, Dh).astype(jnp.bfloat16)

    # ---- score / context per batch sample (static unroll), batched over H ----
    ctx_rows = []
    for b in range(Bb):
        s = jnp.einsum('shd,thd->hst', qh[b], kh[b],
                       preferred_element_type=jnp.float32) * scale
        s = s - jnp.max(s, axis=-1, keepdims=True)
        p = jnp.exp(s)
        p = p / jnp.sum(p, axis=-1, keepdims=True)      # exact softmax (f32)
        c = jnp.einsum('hst,thd->shd', p.astype(jnp.bfloat16), vh[b],
                       preferred_element_type=jnp.float32)
        ctx_rows.append(c.reshape(S, E))
    ctx = jnp.concatenate(ctx_rows, axis=0).astype(jnp.bfloat16)   # (R, E)

    # packed (1,E) params: rows = [bo, g1, be1, bf2, g2, be2]
    ev = ev_ref[0]                                   # (6, E) f32
    bo, g1, be1 = ev[0:1, :], ev[1:2, :], ev[2:3, :]
    bf2, g2, be2 = ev[3:4, :], ev[4:5, :], ev[5:6, :]

    # output projection + residual + LayerNorm 1 (dropout == identity)
    proj = jnp.dot(ctx, wo_ref[0], preferred_element_type=jnp.float32) + bo
    h1 = _layernorm(x + proj, g1, be1)

    # ---- feed-forward (bf16 matmuls, f32 accumulation) ----
    f = (jnp.dot(h1.astype(jnp.bfloat16), w1_ref[0],
                 preferred_element_type=jnp.float32) + bf1_ref[0])
    f = jnp.maximum(f, 0.0)
    f = (jnp.dot(f.astype(jnp.bfloat16), w2_ref[0],
                 preferred_element_type=jnp.float32) + bf2)

    # residual + LayerNorm 2 -> carry stays f32 in VMEM
    h2 = _layernorm(h1 + f, g2, be2)
    h_ref[...] = h2

    # Only the last layer writes the (bf16) output block back to HBM.
    @pl.when(l == pl.num_programs(1) - 1)
    def _():
        o_ref[...] = h2.reshape(Bb, S, E).astype(o_ref.dtype)


# ---------------------------------------------------------------------------
# fc_out: rows = flattened (B*S) tiled at <=256, vocab tiled lane-dense.
# Input is already bf16 (emitted by the last layer), weights bf16, out f32.
# ---------------------------------------------------------------------------
def fc_out_kernel(x_ref, w_ref, b_ref, o_ref):
    o_ref[...] = (jnp.dot(x_ref[...], w_ref[...],
                          preferred_element_type=jnp.float32) + b_ref[...])


# ---------------------------------------------------------------------------
# Wrappers
# ---------------------------------------------------------------------------
def run_layers(x, params, num_heads, *, batch_block=None):
    B, S, E = x.shape
    wqkv, bqkv, wo, w1, bf1, w2, ev = params
    L = wqkv.shape[0]
    F = w1.shape[-1]
    Bb = B if batch_block is None else batch_block
    assert B % Bb == 0
    NB = B // Bb
    R = Bb * S

    # Weight blocks are indexed by the layer axis, so the default
    # double-buffering is exactly the desired "prefetch next layer's weights
    # while computing the current layer" behaviour (no full residency).
    in_specs = [
        pl.BlockSpec((Bb, S, E), lambda bb, l: (bb, 0, 0)),        # x
        pl.BlockSpec((1, E, 3 * E), lambda bb, l: (l, 0, 0)),      # wqkv
        pl.BlockSpec((1, 1, 3 * E), lambda bb, l: (l, 0, 0)),      # bqkv
        pl.BlockSpec((1, E, E), lambda bb, l: (l, 0, 0)),          # wo
        pl.BlockSpec((1, E, F), lambda bb, l: (l, 0, 0)),          # w1
        pl.BlockSpec((1, 1, F), lambda bb, l: (l, 0, 0)),          # bf1
        pl.BlockSpec((1, F, E), lambda bb, l: (l, 0, 0)),          # w2
        pl.BlockSpec((1, 6, E), lambda bb, l: (l, 0, 0)),          # packed LN/bias
    ]
    return pl.pallas_call(
        functools.partial(layers_kernel, num_heads=num_heads),
        out_shape=jax.ShapeDtypeStruct((B, S, E), jnp.bfloat16),
        grid=(NB, L),
        in_specs=in_specs,
        out_specs=pl.BlockSpec((Bb, S, E), lambda bb, l: (bb, 0, 0)),
        scratch_shapes=[pltpu.VMEM((R, E), jnp.float32)],          # f32 carry
        compiler_params=pltpu.CompilerParams(
            dimension_semantics=("parallel", "arbitrary"),
            vmem_limit_bytes=VMEM_LIMIT),
    )(x, wqkv, bqkv, wo, w1, bf1, w2, ev)


def run_fc_out(x_bf16, w, b, *, row_tile=256, v_tile=2048):
    B, S, E = x_bf16.shape
    V = w.shape[1]
    R = B * S
    x2 = x_bf16.reshape(R, E)                  # flatten (B,S) into the row axis
    rt = min(row_tile, R)
    vt = min(v_tile, V)
    grid = (pl.cdiv(R, rt), pl.cdiv(V, vt))
    out = pl.pallas_call(
        fc_out_kernel,
        out_shape=jax.ShapeDtypeStruct((R, V), jnp.float32),
        grid=grid,
        in_specs=[pl.BlockSpec((rt, E), lambda r, vv: (r, 0)),
                  pl.BlockSpec((E, vt), lambda r, vv: (0, vv)),
                  pl.BlockSpec((1, vt), lambda r, vv: (0, vv))],
        out_specs=pl.BlockSpec((rt, vt), lambda r, vv: (r, vv)),
        compiler_params=pltpu.CompilerParams(
            dimension_semantics=("parallel", "parallel"),
            vmem_limit_bytes=VMEM_LIMIT),
    )(x2, w, b)
    return out.reshape(B, S, V)


# ---------------------------------------------------------------------------
# Parameter construction (deterministic, in-script)
# ---------------------------------------------------------------------------
def positional_encoding(d_model, max_len):
    position = jnp.arange(max_len, dtype=jnp.float32)[:, None]
    div_term = jnp.exp(jnp.arange(0, d_model, 2, dtype=jnp.float32)
                       * (-math.log(10000.0) / d_model))
    pe = jnp.zeros((max_len, d_model), jnp.float32)
    pe = pe.at[:, 0::2].set(jnp.sin(position * div_term))
    pe = pe.at[:, 1::2].set(jnp.cos(position * div_term))
    return pe[None]                                # (1, max_len, d_model)


def init_params(key, embed_size, ffn_hidden, num_layers, vocab_size):
    E, F, L, V = embed_size, ffn_hidden, num_layers, vocab_size
    keys = jax.random.split(key, 3)
    emb = jax.random.normal(keys[0], (V, E), jnp.float32) * 0.1
    # matmul weights in bf16 (MXU), biases / LN params in f32.
    fc_w = (jax.random.normal(keys[1], (E, V), jnp.float32) * 0.05
            ).astype(jnp.bfloat16)
    fc_b = jax.random.normal(keys[2], (1, V), jnp.float32) * 0.05

    s = 0.08
    lkeys = jax.random.split(jax.random.fold_in(key, 7), L)
    wqkv_l, bqkv_l, wo_l, w1_l, bf1_l, w2_l, ev_l = [], [], [], [], [], [], []
    for li in range(L):
        k = jax.random.split(lkeys[li], 8)
        # fused per-head projections: columns [0:E)=Q, [E:2E)=K, [2E:3E)=V,
        # each itself the concat of per-head (E, E/H) weights.
        wqkv_l.append((jax.random.normal(k[0], (E, 3 * E), jnp.float32) * s
                       ).astype(jnp.bfloat16))
        bqkv_l.append(jax.random.normal(k[1], (1, 3 * E), jnp.float32) * s)
        wo_l.append((jax.random.normal(k[2], (E, E), jnp.float32) * s
                     ).astype(jnp.bfloat16))
        bo = jax.random.normal(k[3], (1, E), jnp.float32) * s
        w1_l.append((jax.random.normal(k[4], (E, F), jnp.float32) * s
                     ).astype(jnp.bfloat16))
        bf1_l.append(jax.random.normal(k[5], (1, F), jnp.float32) * s)
        w2_l.append((jax.random.normal(k[6], (F, E), jnp.float32) * s
                     ).astype(jnp.bfloat16))
        bf2 = jax.random.normal(k[7], (1, E), jnp.float32) * s
        g1, be1 = jnp.ones((1, E), jnp.float32), jnp.zeros((1, E), jnp.float32)
        g2, be2 = jnp.ones((1, E), jnp.float32), jnp.zeros((1, E), jnp.float32)
        # packed (1,E)-shaped params: [bo, g1, be1, bf2, g2, be2]
        ev_l.append(jnp.concatenate([bo, g1, be1, bf2, g2, be2], axis=0))

    stacked = (jnp.stack(wqkv_l), jnp.stack(bqkv_l), jnp.stack(wo_l),
               jnp.stack(w1_l), jnp.stack(bf1_l), jnp.stack(w2_l),
               jnp.stack(ev_l))
    return emb, stacked, fc_w, fc_b


def transformer_forward(tokens, emb, pe, stacked, fc_w, fc_b, num_heads):
    B, S = tokens.shape
    E = emb.shape[1]
    # Embedding gather + scale + positional encoding (glue, plain JAX).
    # TODO(synk): data-dependent embedding gather is not expressible as a
    #             rectangular BlockSpec; dropout is identity in eval mode.
    x = jnp.take(emb, tokens, axis=0) * math.sqrt(E) + pe[:, :S, :]
    x = run_layers(x, stacked, num_heads)          # bf16 (B, S, E)
    return run_fc_out(x, fc_w, fc_b)


if __name__ == "__main__":
    # E, FFN, V multiples of 256 (MXU-friendly contractions on v6e/v7x,
    # native on v5e); H=2 -> Dh=128 so each head occupies a full lane group.
    EMBED, FFN, HEADS, LAYERS, VOCAB, MAXLEN = 256, 512, 2, 2, 512, 16
    B, S = 2, 8

    key = jax.random.PRNGKey(0)
    kp, kt = jax.random.split(key)
    emb, stacked, fc_w, fc_b = init_params(kp, EMBED, FFN, LAYERS, VOCAB)
    pe = positional_encoding(EMBED, MAXLEN)
    tokens = jax.random.randint(kt, (B, S), 0, VOCAB, dtype=jnp.int32)

    out = transformer_forward(tokens, emb, pe, stacked, fc_w, fc_b, HEADS)
    jax.block_until_ready(out)
    assert out.shape == (B, S, VOCAB), out.shape
    assert bool(jnp.all(jnp.isfinite(out)))
    print("KERNEL_OK")
</pallas_src>

<mosaic_0001>
module attributes {stable_mosaic.version = 11 : i64} {
  func.func @layers_kernel(%arg0: i32, %arg1: i32, %arg2: memref<2x8x256xf32, #tpu.memory_space<vmem>>, %arg3: memref<1x256x768xbf16, #tpu.memory_space<vmem>>, %arg4: memref<1x1x768xf32, #tpu.memory_space<vmem>>, %arg5: memref<1x256x256xbf16, #tpu.memory_space<vmem>>, %arg6: memref<1x256x512xbf16, #tpu.memory_space<vmem>>, %arg7: memref<1x1x512xf32, #tpu.memory_space<vmem>>, %arg8: memref<1x512x256xbf16, #tpu.memory_space<vmem>>, %arg9: memref<1x6x256xf32, #tpu.memory_space<vmem>>, %arg10: memref<2x8x256xbf16, #tpu.memory_space<vmem>>, %arg11: memref<16x256xf32, #tpu.memory_space<vmem>>) attributes {dimension_semantics = [#tpu.dimension_semantics<parallel>, #tpu.dimension_semantics<arbitrary>], iteration_bounds = array<i64: 1, 2>, scalar_prefetch = 0 : i64, scratch_operands = 1 : i64, tpu.core_type = #tpu.core_type<tc>, window_params = [{transform_indices = @transform_0, window_bounds = array<i64: 2, 8, 256>}, {transform_indices = @transform_1, window_bounds = array<i64: 1, 256, 768>}, {transform_indices = @transform_2, window_bounds = array<i64: 1, 1, 768>}, {transform_indices = @transform_3, window_bounds = array<i64: 1, 256, 256>}, {transform_indices = @transform_4, window_bounds = array<i64: 1, 256, 512>}, {transform_indices = @transform_5, window_bounds = array<i64: 1, 1, 512>}, {transform_indices = @transform_6, window_bounds = array<i64: 1, 512, 256>}, {transform_indices = @transform_7, window_bounds = array<i64: 1, 6, 256>}, {transform_indices = @transform_8, window_bounds = array<i64: 2, 8, 256>}]} {
    %c0_i32 = arith.constant 0 : i32
    %0 = arith.cmpi eq, %arg1, %c0_i32 : i32
    %1 = arith.extui %0 : i1 to i32
    %c0_i32_0 = arith.constant 0 : i32
    %2 = arith.cmpi ne, %1, %c0_i32_0 : i32
    scf.if %2 {
      %c0_50 = arith.constant 0 : index
      %c0_51 = arith.constant 0 : index
      %c0_52 = arith.constant 0 : index
      %146 = vector.load %arg2[%c0_50, %c0_51, %c0_52] : memref<2x8x256xf32, #tpu.memory_space<vmem>>, vector<2x8x256xf32>
      %147 = vector.shape_cast %146 : vector<2x8x256xf32> to vector<16x256xf32>
      %c0_53 = arith.constant 0 : index
      %c0_54 = arith.constant 0 : index
      %148 = vector.load %arg11[%c0_53, %c0_54] : memref<16x256xf32, #tpu.memory_space<vmem>>, vector<16x256xf32>
      tpu.vector_store %arg11[%c0_53, %c0_54], %147 {strides = array<i32>} : memref<16x256xf32, #tpu.memory_space<vmem>>, vector<16x256xf32>,
    } else {
    }
    %c0 = arith.constant 0 : index
    %c0_1 = arith.constant 0 : index
    %3 = vector.load %arg11[%c0, %c0_1] : memref<16x256xf32, #tpu.memory_space<vmem>>, vector<16x256xf32>
    %4 = arith.truncf %3 : vector<16x256xf32> to vector<16x256xbf16>
    %c0_2 = arith.constant 0 : index
    %c0_3 = arith.constant 0 : index
    %c0_4 = arith.constant 0 : index
    %5 = vector.load %arg3[%c0_2, %c0_3, %c0_4] : memref<1x256x768xbf16, #tpu.memory_space<vmem>>, vector<1x256x768xbf16>
    %6 = vector.shape_cast %5 : vector<1x256x768xbf16> to vector<256x768xbf16>
    %cst = arith.constant dense<0.000000e+00> : vector<16x768xf32>
    %7 = tpu.matmul %4, %6, %cst {dimension_numbers = #tpu.dot_dimension_numbers<[1], [0], [0], [1], [0, 0, 1, 1], [], []>} : vector<16x256xbf16>, vector<256x768xbf16>, vector<16x768xf32> -> vector<16x768xf32>
    %c0_5 = arith.constant 0 : index
    %c0_6 = arith.constant 0 : index
    %c0_7 = arith.constant 0 : index
    %8 = vector.load %arg4[%c0_5, %c0_6, %c0_7] : memref<1x1x768xf32, #tpu.memory_space<vmem>>, vector<1x1x768xf32>
    %9 = vector.shape_cast %8 : vector<1x1x768xf32> to vector<1x768xf32>
    %10 = vector.broadcast %9 : vector<1x768xf32> to vector<16x768xf32>
    %11 = arith.addf %7, %10 : vector<16x768xf32>
    %12 = vector.extract_strided_slice %11 {offsets = [0, 0], sizes = [16, 256], strides = [1, 1]} : vector<16x768xf32> to vector<16x256xf32>
    %13 = vector.extract_strided_slice %11 {offsets = [0, 256], sizes = [16, 256], strides = [1, 1]} : vector<16x768xf32> to vector<16x256xf32>
    %14 = vector.extract_strided_slice %11 {offsets = [0, 512], sizes = [16, 256], strides = [1, 1]} : vector<16x768xf32> to vector<16x256xf32>
    %15 = vector.shape_cast %12 : vector<16x256xf32> to vector<2x8x2x128xf32>
    %16 = arith.truncf %15 : vector<2x8x2x128xf32> to vector<2x8x2x128xbf16>
    %17 = vector.shape_cast %13 : vector<16x256xf32> to vector<2x8x2x128xf32>
    %18 = arith.truncf %17 : vector<2x8x2x128xf32> to vector<2x8x2x128xbf16>
    %19 = vector.shape_cast %14 : vector<16x256xf32> to vector<2x8x2x128xf32>
    %20 = arith.truncf %19 : vector<2x8x2x128xf32> to vector<2x8x2x128xbf16>
    %21 = vector.extract_strided_slice %16 {offsets = [0, 0, 0, 0], sizes = [1, 8, 2, 128], strides = [1, 1, 1, 1]} : vector<2x8x2x128xbf16> to vector<1x8x2x128xbf16>
    %22 = vector.shape_cast %21 : vector<1x8x2x128xbf16> to vector<8x2x128xbf16>
    %23 = vector.extract_strided_slice %18 {offsets = [0, 0, 0, 0], sizes = [1, 8, 2, 128], strides = [1, 1, 1, 1]} : vector<2x8x2x128xbf16> to vector<1x8x2x128xbf16>
    %24 = vector.shape_cast %23 : vector<1x8x2x128xbf16> to vector<8x2x128xbf16>
    "tpu.trace_start"() <{level = 10 : i32, message = "shd,thd->hst"}> : () -> ()
    %cst_8 = arith.constant dense<0.000000e+00> : vector<2x8x8xf32>
    %25 = tpu.matmul %22, %24, %cst_8 {dimension_numbers = #tpu.dot_dimension_numbers<[2], [2], [0], [0], [0, 1, 0, 0, 1, 0], [1], [1]>} : vector<8x2x128xbf16>, vector<8x2x128xbf16>, vector<2x8x8xf32> -> vector<2x8x8xf32>
    "tpu.trace_stop"() : () -> ()
    %cst_9 = arith.constant 0.0883883461 : f32
    %26 = vector.broadcast %cst_9 : f32 to vector<2x8x8xf32>
    %27 = arith.mulf %25, %26 : vector<2x8x8xf32>
    %cst_10 = arith.constant dense<0xFF800000> : vector<2x8xf32>
    %28 = vector.multi_reduction <maximumf>, %27, %cst_10 [2] : vector<2x8x8xf32> to vector<2x8xf32>
    %29 = vector.shape_cast %28 : vector<2x8xf32> to vector<2x8x1xf32>
    %30 = vector.broadcast %29 : vector<2x8x1xf32> to vector<2x8x8xf32>
    %31 = arith.subf %27, %30 : vector<2x8x8xf32>
    %32 = math.exp %31 : vector<2x8x8xf32>
    %cst_11 = arith.constant dense<0.000000e+00> : vector<2x8xf32>
    %33 = vector.multi_reduction <add>, %32, %cst_11 [2] : vector<2x8x8xf32> to vector<2x8xf32>
    %34 = vector.shape_cast %33 : vector<2x8xf32> to vector<2x8x1xf32>
    %35 = vector.broadcast %34 : vector<2x8x1xf32> to vector<2x8x8xf32>
    %36 = arith.divf %32, %35 : vector<2x8x8xf32>
    %37 = arith.truncf %36 : vector<2x8x8xf32> to vector<2x8x8xbf16>
    %38 = vector.extract_strided_slice %20 {offsets = [0, 0, 0, 0], sizes = [1, 8, 2, 128], strides = [1, 1, 1, 1]} : vector<2x8x2x128xbf16> to vector<1x8x2x128xbf16>
    %39 = vector.shape_cast %38 : vector<1x8x2x128xbf16> to vector<8x2x128xbf16>
    "tpu.trace_start"() <{level = 10 : i32, message = "hst,thd->shd"}> : () -> ()
    %cst_12 = arith.constant dense<0.000000e+00> : vector<2x128x8xf32>
    %40 = tpu.matmul %39, %37, %cst_12 {dimension_numbers = #tpu.dot_dimension_numbers<[0], [2], [2], [1], [0, 1, 0, 2, 1, 1], [1], [0]>} : vector<8x2x128xbf16>, vector<2x8x8xbf16>, vector<2x128x8xf32> -> vector<2x128x8xf32>
    %41 = tpu.transpose %40, [2, 0, 1] : vector<2x128x8xf32> -> vector<8x2x128xf32>
    "tpu.trace_stop"() : () -> ()
    %42 = vector.shape_cast %41 : vector<8x2x128xf32> to vector<8x256xf32>
    %43 = vector.extract_strided_slice %16 {offsets = [1, 0, 0, 0], sizes = [1, 8, 2, 128], strides = [1, 1, 1, 1]} : vector<2x8x2x128xbf16> to vector<1x8x2x128xbf16>
    %44 = vector.shape_cast %43 : vector<1x8x2x128xbf16> to vector<8x2x128xbf16>
    %45 = vector.extract_strided_slice %18 {offsets = [1, 0, 0, 0], sizes = [1, 8, 2, 128], strides = [1, 1, 1, 1]} : vector<2x8x2x128xbf16> to vector<1x8x2x128xbf16>
    %46 = vector.shape_cast %45 : vector<1x8x2x128xbf16> to vector<8x2x128xbf16>
    "tpu.trace_start"() <{level = 10 : i32, message = "shd,thd->hst"}> : () -> ()
    %cst_13 = arith.constant dense<0.000000e+00> : vector<2x8x8xf32>
    %47 = tpu.matmul %44, %46, %cst_13 {dimension_numbers = #tpu.dot_dimension_numbers<[2], [2], [0], [0], [0, 1, 0, 0, 1, 0], [1], [1]>} : vector<8x2x128xbf16>, vector<8x2x128xbf16>, vector<2x8x8xf32> -> vector<2x8x8xf32>
    "tpu.trace_stop"() : () -> ()
    %cst_14 = arith.constant 0.0883883461 : f32
    %48 = vector.broadcast %cst_14 : f32 to vector<2x8x8xf32>
    %49 = arith.mulf %47, %48 : vector<2x8x8xf32>
    %cst_15 = arith.constant dense<0xFF800000> : vector<2x8xf32>
    %50 = vector.multi_reduction <maximumf>, %49, %cst_15 [2] : vector<2x8x8xf32> to vector<2x8xf32>
    %51 = vector.shape_cast %50 : vector<2x8xf32> to vector<2x8x1xf32>
    %52 = vector.broadcast %51 : vector<2x8x1xf32> to vector<2x8x8xf32>
    %53 = arith.subf %49, %52 : vector<2x8x8xf32>
    %54 = math.exp %53 : vector<2x8x8xf32>
    %cst_16 = arith.constant dense<0.000000e+00> : vector<2x8xf32>
    %55 = vector.multi_reduction <add>, %54, %cst_16 [2] : vector<2x8x8xf32> to vector<2x8xf32>
    %56 = vector.shape_cast %55 : vector<2x8xf32> to vector<2x8x1xf32>
    %57 = vector.broadcast %56 : vector<2x8x1xf32> to vector<2x8x8xf32>
    %58 = arith.divf %54, %57 : vector<2x8x8xf32>
    %59 = arith.truncf %58 : vector<2x8x8xf32> to vector<2x8x8xbf16>
    %60 = vector.extract_strided_slice %20 {offsets = [1, 0, 0, 0], sizes = [1, 8, 2, 128], strides = [1, 1, 1, 1]} : vector<2x8x2x128xbf16> to vector<1x8x2x128xbf16>
    %61 = vector.shape_cast %60 : vector<1x8x2x128xbf16> to vector<8x2x128xbf16>
    "tpu.trace_start"() <{level = 10 : i32, message = "hst,thd->shd"}> : () -> ()
    %cst_17 = arith.constant dense<0.000000e+00> : vector<2x128x8xf32>
    %62 = tpu.matmul %61, %59, %cst_17 {dimension_numbers = #tpu.dot_dimension_numbers<[0], [2], [2], [1], [0, 1, 0, 2, 1, 1], [1], [0]>} : vector<8x2x128xbf16>, vector<2x8x8xbf16>, vector<2x128x8xf32> -> vector<2x128x8xf32>
    %63 = tpu.transpose %62, [2, 0, 1] : vector<2x128x8xf32> -> vector<8x2x128xf32>
    "tpu.trace_stop"() : () -> ()
    %64 = vector.shape_cast %63 : vector<8x2x128xf32> to vector<8x256xf32>
    %65 = tpu.concatenate %42, %64 in 0 : vector<8x256xf32>, vector<8x256xf32> -> vector<16x256xf32>
    %66 = arith.truncf %65 : vector<16x256xf32> to vector<16x256xbf16>
    %c0_18 = arith.constant 0 : index
    %c0_19 = arith.constant 0 : index
    %c0_20 = arith.constant 0 : index
    %67 = vector.load %arg9[%c0_18, %c0_19, %c0_20] : memref<1x6x256xf32, #tpu.memory_space<vmem>>, vector<1x6x256xf32>
    %68 = vector.shape_cast %67 : vector<1x6x256xf32> to vector<6x256xf32>
    %69 = vector.extract_strided_slice %68 {offsets = [0, 0], sizes = [1, 256], strides = [1, 1]} : vector<6x256xf32> to vector<1x256xf32>
    %70 = vector.extract_strided_slice %68 {offsets = [1, 0], sizes = [1, 256], strides = [1, 1]} : vector<6x256xf32> to vector<1x256xf32>
    %71 = vector.extract_strided_slice %68 {offsets = [2, 0], sizes = [1, 256], strides = [1, 1]} : vector<6x256xf32> to vector<1x256xf32>
    %72 = vector.extract_strided_slice %68 {offsets = [3, 0], sizes = [1, 256], strides = [1, 1]} : vector<6x256xf32> to vector<1x256xf32>
    %73 = vector.extract_strided_slice %68 {offsets = [4, 0], sizes = [1, 256], strides = [1, 1]} : vector<6x256xf32> to vector<1x256xf32>
    %74 = vector.extract_strided_slice %68 {offsets = [5, 0], sizes = [1, 256], strides = [1, 1]} : vector<6x256xf32> to vector<1x256xf32>
    %c0_21 = arith.constant 0 : index
    %c0_22 = arith.constant 0 : index
    %c0_23 = arith.constant 0 : index
    %75 = vector.load %arg5[%c0_21, %c0_22, %c0_23] : memref<1x256x256xbf16, #tpu.memory_space<vmem>>, vector<1x256x256xbf16>
    %76 = vector.shape_cast %75 : vector<1x256x256xbf16> to vector<256x256xbf16>
    %cst_24 = arith.constant dense<0.000000e+00> : vector<16x256xf32>
    %77 = tpu.matmul %66, %76, %cst_24 {dimension_numbers = #tpu.dot_dimension_numbers<[1], [0], [0], [1], [0, 0, 1, 1], [], []>} : vector<16x256xbf16>, vector<256x256xbf16>, vector<16x256xf32> -> vector<16x256xf32>
    %78 = vector.broadcast %69 : vector<1x256xf32> to vector<16x256xf32>
    %79 = arith.addf %77, %78 : vector<16x256xf32>
    %80 = arith.addf %3, %79 : vector<16x256xf32>
    %cst_25 = arith.constant dense<0.000000e+00> : vector<16xf32>
    %81 = vector.multi_reduction <add>, %80, %cst_25 [1] : vector<16x256xf32> to vector<16xf32>
    %82 = vector.shape_cast %81 : vector<16xf32> to vector<16x1xf32>
    %cst_26 = arith.constant 2.560000e+02 : f32
    %83 = vector.broadcast %cst_26 : f32 to vector<16x1xf32>
    %84 = arith.divf %82, %83 : vector<16x1xf32>
    %85 = vector.broadcast %84 : vector<16x1xf32> to vector<16x256xf32>
    %86 = arith.subf %80, %85 : vector<16x256xf32>
    %87 = arith.mulf %86, %86 : vector<16x256xf32>
    %cst_27 = arith.constant dense<0.000000e+00> : vector<16xf32>
    %88 = vector.multi_reduction <add>, %87, %cst_27 [1] : vector<16x256xf32> to vector<16xf32>
    %89 = vector.shape_cast %88 : vector<16xf32> to vector<16x1xf32>
    %cst_28 = arith.constant 2.560000e+02 : f32
    %90 = vector.broadcast %cst_28 : f32 to vector<16x1xf32>
    %91 = arith.divf %89, %90 : vector<16x1xf32>
    %92 = vector.broadcast %84 : vector<16x1xf32> to vector<16x256xf32>
    %93 = arith.subf %80, %92 : vector<16x256xf32>
    %cst_29 = arith.constant 9.99999974E-6 : f32
    %94 = vector.broadcast %cst_29 : f32 to vector<16x1xf32>
    %95 = arith.addf %91, %94 : vector<16x1xf32>
    %96 = math.rsqrt %95 : vector<16x1xf32>
    %97 = vector.broadcast %96 : vector<16x1xf32> to vector<16x256xf32>
    %98 = arith.mulf %93, %97 : vector<16x256xf32>
    %99 = vector.broadcast %70 : vector<1x256xf32> to vector<16x256xf32>
    %100 = arith.mulf %98, %99 : vector<16x256xf32>
    %101 = vector.broadcast %71 : vector<1x256xf32> to vector<16x256xf32>
    %102 = arith.addf %100, %101 : vector<16x256xf32>
    %103 = arith.truncf %102 : vector<16x256xf32> to vector<16x256xbf16>
    %c0_30 = arith.constant 0 : index
    %c0_31 = arith.constant 0 : index
    %c0_32 = arith.constant 0 : index
    %104 = vector.load %arg6[%c0_30, %c0_31, %c0_32] : memref<1x256x512xbf16, #tpu.memory_space<vmem>>, vector<1x256x512xbf16>
    %105 = vector.shape_cast %104 : vector<1x256x512xbf16> to vector<256x512xbf16>
    %cst_33 = arith.constant dense<0.000000e+00> : vector<16x512xf32>
    %106 = tpu.matmul %103, %105, %cst_33 {dimension_numbers = #tpu.dot_dimension_numbers<[1], [0], [0], [1], [0, 0, 1, 1], [], []>} : vector<16x256xbf16>, vector<256x512xbf16>, vector<16x512xf32> -> vector<16x512xf32>
    %c0_34 = arith.constant 0 : index
    %c0_35 = arith.constant 0 : index
    %c0_36 = arith.constant 0 : index
    %107 = vector.load %arg7[%c0_34, %c0_35, %c0_36] : memref<1x1x512xf32, #tpu.memory_space<vmem>>, vector<1x1x512xf32>
    %108 = vector.shape_cast %107 : vector<1x1x512xf32> to vector<1x512xf32>
    %109 = vector.broadcast %108 : vector<1x512xf32> to vector<16x512xf32>
    %110 = arith.addf %106, %109 : vector<16x512xf32>
    %cst_37 = arith.constant 0.000000e+00 : f32
    %111 = vector.broadcast %cst_37 : f32 to vector<16x512xf32>
    %112 = arith.maximumf %110, %111 : vector<16x512xf32>
    %113 = arith.truncf %112 : vector<16x512xf32> to vector<16x512xbf16>
    %c0_38 = arith.constant 0 : index
    %c0_39 = arith.constant 0 : index
    %c0_40 = arith.constant 0 : index
    %114 = vector.load %arg8[%c0_38, %c0_39, %c0_40] : memref<1x512x256xbf16, #tpu.memory_space<vmem>>, vector<1x512x256xbf16>
    %115 = vector.shape_cast %114 : vector<1x512x256xbf16> to vector<512x256xbf16>
    %cst_41 = arith.constant dense<0.000000e+00> : vector<16x256xf32>
    %116 = tpu.matmul %113, %115, %cst_41 {dimension_numbers = #tpu.dot_dimension_numbers<[1], [0], [0], [1], [0, 0, 1, 1], [], []>} : vector<16x512xbf16>, vector<512x256xbf16>, vector<16x256xf32> -> vector<16x256xf32>
    %117 = vector.broadcast %72 : vector<1x256xf32> to vector<16x256xf32>
    %118 = arith.addf %116, %117 : vector<16x256xf32>
    %119 = arith.addf %102, %118 : vector<16x256xf32>
    %cst_42 = arith.constant dense<0.000000e+00> : vector<16xf32>
    %120 = vector.multi_reduction <add>, %119, %cst_42 [1] : vector<16x256xf32> to vector<16xf32>
    %121 = vector.shape_cast %120 : vector<16xf32> to vector<16x1xf32>
    %cst_43 = arith.constant 2.560000e+02 : f32
    %122 = vector.broadcast %cst_43 : f32 to vector<16x1xf32>
    %123 = arith.divf %121, %122 : vector<16x1xf32>
    %124 = vector.broadcast %123 : vector<16x1xf32> to vector<16x256xf32>
    %125 = arith.subf %119, %124 : vector<16x256xf32>
    %126 = arith.mulf %125, %125 : vector<16x256xf32>
    %cst_44 = arith.constant dense<0.000000e+00> : vector<16xf32>
    %127 = vector.multi_reduction <add>, %126, %cst_44 [1] : vector<16x256xf32> to vector<16xf32>
    %128 = vector.shape_cast %127 : vector<16xf32> to vector<16x1xf32>
    %cst_45 = arith.constant 2.560000e+02 : f32
    %129 = vector.broadcast %cst_45 : f32 to vector<16x1xf32>
    %130 = arith.divf %128, %129 : vector<16x1xf32>
    %131 = vector.broadcast %123 : vector<16x1xf32> to vector<16x256xf32>
    %132 = arith.subf %119, %131 : vector<16x256xf32>
    %cst_46 = arith.constant 9.99999974E-6 : f32
    %133 = vector.broadcast %cst_46 : f32 to vector<16x1xf32>
    %134 = arith.addf %130, %133 : vector<16x1xf32>
    %135 = math.rsqrt %134 : vector<16x1xf32>
    %136 = vector.broadcast %135 : vector<16x1xf32> to vector<16x256xf32>
    %137 = arith.mulf %132, %136 : vector<16x256xf32>
    %138 = vector.broadcast %73 : vector<1x256xf32> to vector<16x256xf32>
    %139 = arith.mulf %137, %138 : vector<16x256xf32>
    %140 = vector.broadcast %74 : vector<1x256xf32> to vector<16x256xf32>
    %141 = arith.addf %139, %140 : vector<16x256xf32>
    %c0_47 = arith.constant 0 : index
    %c0_48 = arith.constant 0 : index
    %142 = vector.load %arg11[%c0_47, %c0_48] : memref<16x256xf32, #tpu.memory_space<vmem>>, vector<16x256xf32>
    tpu.vector_store %arg11[%c0_47, %c0_48], %141 {strides = array<i32>} : memref<16x256xf32, #tpu.memory_space<vmem>>, vector<16x256xf32>,
    %c1_i32 = arith.constant 1 : i32
    %143 = arith.cmpi eq, %arg1, %c1_i32 : i32
    %144 = arith.extui %143 : i1 to i32
    %c0_i32_49 = arith.constant 0 : i32
    %145 = arith.cmpi ne, %144, %c0_i32_49 : i32
    scf.if %145 {
      %146 = vector.shape_cast %141 : vector<16x256xf32> to vector<2x8x256xf32>
      %147 = arith.truncf %146 : vector<2x8x256xf32> to vector<2x8x256xbf16>
      %c0_50 = arith.constant 0 : index
      %c0_51 = arith.constant 0 : index
      %c0_52 = arith.constant 0 : index
      %148 = vector.load %arg10[%c0_50, %c0_51, %c0_52] : memref<2x8x256xbf16, #tpu.memory_space<vmem>>, vector<2x8x256xbf16>
      tpu.vector_store %arg10[%c0_50, %c0_51, %c0_52], %147 {strides = array<i32>} : memref<2x8x256xbf16, #tpu.memory_space<vmem>>, vector<2x8x256xbf16>,
    } else {
    }
    return
  }
  func.func @transform_0(%arg0: i32, %arg1: i32) -> (i32, i32, i32) {
    %c0_i32 = arith.constant 0 : i32
    %c0_i32_0 = arith.constant 0 : i32
    %c0_i32_1 = arith.constant 0 : i32
    return %arg0, %c0_i32, %c0_i32_0 : i32, i32, i32
  }
  func.func @transform_1(%arg0: i32, %arg1: i32) -> (i32, i32, i32) {
    %c0_i32 = arith.constant 0 : i32
    %c0_i32_0 = arith.constant 0 : i32
    %c0_i32_1 = arith.constant 0 : i32
    return %arg1, %c0_i32, %c0_i32_0 : i32, i32, i32
  }
  func.func @transform_2(%arg0: i32, %arg1: i32) -> (i32, i32, i32) {
    %c0_i32 = arith.constant 0 : i32
    %c0_i32_0 = arith.constant 0 : i32
    %c0_i32_1 = arith.constant 0 : i32
    return %arg1, %c0_i32, %c0_i32_0 : i32, i32, i32
  }
  func.func @transform_3(%arg0: i32, %arg1: i32) -> (i32, i32, i32) {
    %c0_i32 = arith.constant 0 : i32
    %c0_i32_0 = arith.constant 0 : i32
    %c0_i32_1 = arith.constant 0 : i32
    return %arg1, %c0_i32, %c0_i32_0 : i32, i32, i32
  }
  func.func @transform_4(%arg0: i32, %arg1: i32) -> (i32, i32, i32) {
    %c0_i32 = arith.constant 0 : i32
    %c0_i32_0 = arith.constant 0 : i32
    %c0_i32_1 = arith.constant 0 : i32
    return %arg1, %c0_i32, %c0_i32_0 : i32, i32, i32
  }
  func.func @transform_5(%arg0: i32, %arg1: i32) -> (i32, i32, i32) {
    %c0_i32 = arith.constant 0 : i32
    %c0_i32_0 = arith.constant 0 : i32
    %c0_i32_1 = arith.constant 0 : i32
    return %arg1, %c0_i32, %c0_i32_0 : i32, i32, i32
  }
  func.func @transform_6(%arg0: i32, %arg1: i32) -> (i32, i32, i32) {
    %c0_i32 = arith.constant 0 : i32
    %c0_i32_0 = arith.constant 0 : i32
    %c0_i32_1 = arith.constant 0 : i32
    return %arg1, %c0_i32, %c0_i32_0 : i32, i32, i32
  }
  func.func @transform_7(%arg0: i32, %arg1: i32) -> (i32, i32, i32) {
    %c0_i32 = arith.constant 0 : i32
    %c0_i32_0 = arith.constant 0 : i32
    %c0_i32_1 = arith.constant 0 : i32
    return %arg1, %c0_i32, %c0_i32_0 : i32, i32, i32
  }
  func.func @transform_8(%arg0: i32, %arg1: i32) -> (i32, i32, i32) {
    %c0_i32 = arith.constant 0 : i32
    %c0_i32_0 = arith.constant 0 : i32
    %c0_i32_1 = arith.constant 0 : i32
    return %arg0, %c0_i32, %c0_i32_0 : i32, i32, i32
  }
}

</mosaic_0001>

<bundles_post_ra>
// kernel: tpu_custom_call.1
= control target key start
LH: loop header
LB: loop body
LE: loop exit
PB: predicated region body
PF: predicated region fallthrough
CT: control target
= control target key end

     0   :  { %s29196_s0 = inlined_call_operand.vmem [shape: f32[2,8,256], index: 0, kind: input, shape index: {}]   ;;  %s29197_s1 = inlined_call_operand.hbm [shape: bf16[2,256,768], index: 1, kind: input, shape index: {}]   ;;  %s29198_s2 = inlined_call_operand.vmem [shape: f32[2,1,768], index: 2, kind: input, shape index: {}]   ;;  %s29199_s3 = inlined_call_operand.hbm [shape: bf16[2,256,256], index: 3, kind: input, shape index: {}]   ;;  %s29200_s4 = inlined_call_operand.hbm [shape: bf16[2,256,512], index: 4, kind: input, shape index: {}]   ;;  %s29201_s5 = inlined_call_operand.vmem [shape: f32[2,1,512], index: 5, kind: input, shape index: {}]   ;;  %s29202_s6 = inlined_call_operand.hbm [shape: bf16[2,512,256], index: 6, kind: input, shape index: {}]   ;;  %s29203_s7 = inlined_call_operand.vmem [shape: f32[2,6,256], index: 7, kind: input, shape index: {}]   ;;  %s29204_s8 = inlined_call_operand.hbm [shape: bf16[2,8,256], index: 8, kind: output, shape index: {}]  }
   0x1   :  { %29246 = sst [smem:[#allocation44_spill]] %s29196_s0 }
   0x2   :  { %29247 = sst [smem:[#allocation45_spill]] %s29197_s1 }
   0x3   :  { %29248 = sst [smem:[#allocation46_spill]] %s29199_s3 }
   0x4   :  { %29249 = sst [smem:[#allocation47_spill]] %s29204_s8 }
   0x5   :  { %13 = vsyncpa [#allocation4], 0 }
   0x6   :  { %15 = vsyncpa [#allocation4 + $0x1], 0 }
   0x7   :  { %16 = vsyncpa [#allocation7], 0 }
   0x8   :  { %18 = vsyncpa [#allocation7 + $0x1], 0 }
   0x9   :  { %19 = vsyncpa [#allocation10], 0 }
   0xa   :  { %21 = vsyncpa [#allocation10 + $0x1], 0 }
   0xb   :  { %22 = vsyncpa [#allocation5], 0  ;;  %s22966_s27 = smov 0   ;;  %s22968_s28 = smov 0  }
   0xc   :  { %s22970_s29 = smov 0   ;;  %s22972_s30 = smov 0  }
   0xd   :  { %s22974_s9 = smov 0   ;;  %s22976_s10 = smov 0  }
   0xe LB: > { %29250 = sst [smem:[#allocation16_spill]] %s22895_s29  ;;  %s22995_s11 = sadd.s32 4294967295, %s22907_s10   ;;  %s22907_s10 = sphi %s22976_s10, %s28_s10   ;;  %s22903_s9 = sphi %s22974_s9, %s29396_s9   ;;  %s22899_s30 = sphi %s22972_s30, %s29395_s30   ;;  %s22895_s29 = sphi %s22970_s29, %s29391_s29   ;;  %s22891_s28 = sphi %s22968_s28, %s29394_s28   ;;  %s22887_s27 = sphi %s22966_s27, %s29393_s27  }
   0xf   : > { %29251 = sst [smem:[#allocation17_spill]] %s22907_s10  ;;  %s37_s12 = sadd.s32 1, %s22903_s9 }
  0x10   : > { %p38_p0 = scmp.ge.s32.totalorder %s37_s12, 2  ;;  %s73_s13 = sadd.s32 1, %s22895_s29 }
  0x11   : > { %p80_p1 = scmp.ne.s32.totalorder %s22895_s29, %s22891_s28  ;;  %p81_p2 = scmp.eq.s32.totalorder %s22907_s10, 0 }
  0x12   : > { %s29398_s12 = smov (%p38_p0, %s37_s12), 0  ;;  %p86_p4 = scmp.ne.s32.totalorder %s22891_s28, %s22887_s27 }
  0x13   : > { %29252 = sst [smem:[#allocation18_spill]] %s29398_s12  ;;  %p82_p3 = por %p81_p2, %p80_p1 }
  0x14   : > { %s70_s14 = ssub.s32 %s22903_s9, %s29398_s12  ;;  %p87_p5 = scmp.eq.s32.totalorder %s22995_s11, 0 }
  0x15   : > { %p71_p6 = scmp.eq.s32.totalorder %s70_s14, 0  ;;  %p21486_p8 = scmp.lt.s32.totalorder %s22907_s10, 2 }
  0x16   : > { %p23008_p7 = por %p87_p5, %p86_p4  ;;  %s23017_s17 = sand.u32 1, %s22895_s29  }
  0x17   : > { %s23014_s16 = scalar_select %p71_p6, %s22895_s29, %s73_s13  }
  0x18   : > { %p23019_p9 = pnand %p21486_p8, %p82_p3  ;;  %s331_s19 = sand.u32 1, %s22907_s10  }
  0x19   : > { %29254 = sst [smem:[#allocation19_spill]] %s23014_s16  ;;  %s20119_s20 = sshll.u32 %s23017_s17, 8 }
  0x1a   : > { %s21197_s21 = sshll.u32 %s22903_s9, 8  ;;  %s29256_s3 = sld [smem:[#allocation46_spill]] }
  0x1b   : > { %s335_s25 = scalar_lea.vmem [#allocation6], %s20119_s20  ;;  %p20128_p10 = scmp.ge.s32.totalorder %s22907_s10, 1 }
  0x1c   : > { %s343_s26 = sshll.u32 %s335_s25, 4  ;;  %s23030_s13 = scalar_lea.sflag [#allocation7], %s331_s19  ;;  %s344_s26 = int_to_ptr.vmem [resolvable:$true] %s343_s26 }
  0x1d   : > { %s29206_s14 = smov 128   ;;  %s29207_s12 = smov 8  }
  0x1e   : > { %p410_p11 = scmp.lt.s32.totalorder %s22907_s10, 3  ;;  %s21458_s22 = smul.u32 768, %s22903_s9 }
  0x1f   : > { %s29258_s1 = sld [smem:[#allocation45_spill]]  ;;  %s21198_s29 = sshll.u32 %s22903_s9, 9 }
  0x20   : > { %s340_s24 = scalar_lea.hbm %s29256_s3, %s21197_s21  ;;  %p23039_p12 = pnand %p20128_p10, %p410_p11 }
  0x21   : > { %s341_s27 = sshll.u32 %s340_s24, 4  ;;  %s21457_s21 = smul.u32 768, %s23017_s17  ;;  %s342_s27 = int_to_ptr.hbm [resolvable:$true] %s341_s27 }
  0x22   : > { %21479 = dma.hbm_to_vmem [thread:$0]  (!%p23019_p9), %s342_s27, 4096, %s344_s26, %s23030_s13, %s29206_s14, %s29206_s14, %s29207_s12  }
  0x23   : > { %s306_s25 = scalar_lea.vmem [#allocation3], %s21457_s21  ;;  %s20122_s26 = sshll.u32 %s23017_s17, 9 }
  0x24   : > { %s314_s3 = sshll.u32 %s306_s25, 4  ;;  %s303_s27 = scalar_lea.sflag [#allocation4], %s23017_s17  ;;  %s315_s3 = int_to_ptr.vmem [resolvable:$true] %s314_s3 }
  0x25   : > { %s311_s24 = scalar_lea.hbm %s29258_s1, %s21458_s22  ;;  %s22911_s14 = smov 384  }
  0x26   : > { %s312_s16 = sshll.u32 %s311_s24, 4  ;;  %s22912_s12 = smov 24   ;;  %s313_s16 = int_to_ptr.hbm [resolvable:$true] %s312_s16 }
  0x27   : > { %21476 = dma.hbm_to_vmem [thread:$0]  (!%p23019_p9), %s313_s16, 12288, %s315_s3, %s303_s27, %s22911_s14, %s22911_s14, %s22912_s12  }
  0x28   : > { %s362_s23 = scalar_lea.hbm %s29200_s4, %s21198_s29  ;;  %s357_s21 = scalar_lea.vmem [#allocation8], %s20122_s26 }
  0x29   : > { %s365_s22 = sshll.u32 %s357_s21, 4  ;;  %s363_s19 = sshll.u32 %s362_s23, 4  ;;  %s366_s22 = int_to_ptr.vmem [resolvable:$true] %s365_s22  ;;  %s364_s19 = int_to_ptr.hbm [resolvable:$true] %s363_s19 }
  0x2a   : > { %s22913_s24 = smov 256   ;;  %s22914_s25 = smov 16  }
  0x2b   : > { %21482 = dma.hbm_to_vmem [thread:$0]  (!%p23019_p9), %s364_s19, 8192, %s366_s22, %s23030_s13, %s22913_s24, %s22913_s24, %s22914_s25  }
  0x2c   : > { %s391_s3 = scalar_lea.hbm %s29202_s6, %s21198_s29  ;;  %s386_s16 = scalar_lea.vmem [#allocation9], %s20122_s26 }
  0x2d   : > { %s392_s12 = sshll.u32 %s391_s3, 4  ;;  %s394_s14 = sshll.u32 %s386_s16, 4  ;;  %s393_s12 = int_to_ptr.hbm [resolvable:$true] %s392_s12  ;;  %s395_s14 = int_to_ptr.vmem [resolvable:$true] %s394_s14 }
  0x2e   : > { %s383_s8 = scalar_lea.sflag [#allocation10], %s23017_s17  ;;  %s29259_s10 = smov 8  }
  0x2f   : > { %s29260_s27 = smov 128   ;;  %414 = sbr.rel (%p23039_p12) target bundleno = 5513 (0x1589), region = 52 }
  0x30   : > { %21485 = dma.hbm_to_vmem [thread:$0]  (!%p23019_p9), %s393_s12, 8192, %s395_s14, %s383_s8, %s29260_s27, %s29260_s27, %s29259_s10  }
  0x34   : > { %s416_s13 = sand.u32 1, %s22891_s28  }
  0x35   : > { %s21459_s23 = smul.u32 768, %s416_s13  ;;  %s417_s0 = scalar_lea.sflag [#allocation4], %s416_s13 }
  0x37   : > { %s23071_s1 = scalar_lea.vmem [#allocation3], %s21459_s23 }
  0x38   : > { %22870 = dma.done.wait (%p23008_p7), %s417_s0, 12288  }
  0x39   : > { %22872 = vsyncadd (%p23008_p7), %s417_s0, 4294955008  ;;  %s426_s29 = sand.u32 1, %s22995_s11   ;;  %s20129_s17 = sshll.u32 %s416_s13, 8 }
  0x3a   : > { %s427_s18 = scalar_lea.sflag [#allocation7], %s426_s29  ;;  %s23078_s26 = scalar_lea.vmem [#allocation6], %s20129_s17 }
  0x3b   : > { %22874 = dma.done.wait (%p23008_p7), %s427_s18, 12288  }
  0x3c   : > { %22876 = vsyncadd (%p23008_p7), %s427_s18, 4294955008  ;;  %s20130_s20 = sshll.u32 %s416_s13, 9  ;;  %s447_s22 = scalar_lea.sflag [#allocation10], %s416_s13 }
  0x3d   : > { %s23084_s21 = scalar_lea.vmem [#allocation8], %s20130_s20  ;;  %s23086_s19 = scalar_lea.vmem [#allocation9], %s20130_s20 }
  0x3e   : > { %22878 = dma.done.wait (%p23008_p7), %s447_s22, 8192  }
  0x3f   : > { %22880 = vsyncadd (%p23008_p7), %s447_s22, 4294959104  ;;  %p520_p13 = scmp.lt.s32.totalorder %s22899_s30, 1  ;;  %p20135_p0 = scmp.ne.s32.totalorder %s22899_s30, 0 }
  0x40   : > { %s29261_s18 = sld [smem:[#allocation44_spill]] (!%p20135_p0) }
  0x41   : > { %s521_s24 = scalar_select %p520_p13, %s22899_s30, 1 }
  0x42   : > { %538 = sbr.rel (%p20135_p0) target bundleno = 76 (0x4c), region = 72 }
  0x43   : > { %s21460_s25 = smul.u32 6, %s521_s24  ;;  %s20132_s3 = sshll.u32 %s521_s24, 2 }
  0x44   : > { %s23097_s14 = scalar_lea.vmem %s29201_s5, %s20132_s3  ;;  %s21200_s8 = sshll.u32 %s521_s24, 4 }
  0x45   : > { %s23102_s13 = scalar_lea.vmem %s29198_s2, %s21460_s25  ;;  %s23107_s0 = scalar_lea.vmem %s29203_s7, %s21200_s8 }
  0x47   : > { %v539_v0 = vld [vmem:[%s29261_s18] sm:$0xff]  ;;  %v540_v1 = vld [vmem:[%s29261_s18 + $0x8] sm:$0xff]  ;;  %v541_v2 = vld [vmem:[%s29261_s18 + $0x10] sm:$0xff] }
  0x48   : > { %543 = vst [vmem:[#allocation2 + $0x10] sm:$0xff] %v539_v0  ;;  %v542_v3 = vld [vmem:[%s29261_s18 + $0x18] sm:$0xff] }
  0x49   : > { %544 = vst [vmem:[#allocation2] sm:$0xff] %v540_v1 }
  0x4a   : > { %545 = vst [vmem:[#allocation2 + $0x18] sm:$0xff] %v541_v2 }
  0x4b   : > { %546 = vst [vmem:[#allocation2 + $0x8] sm:$0xff] %v542_v3 }
  0x4c PF: > { %v20306_v4 = vld [vmem:[%s23071_s1 + $0x150] sm:$0xf]  ;;  %v21246_v5 = vld [vmem:[%s23071_s1 + $0x164] sm:$0xf0]  ;;  %v21243_v9 = vld [vmem:[%s23071_s1 + $0x154] sm:$0xf] }
  0x4d   : > { %v20498_v6 = vld [vmem:[%s23071_s1 + $0x2d0] sm:$0xf]  ;;  %v20307_v7 = vor.u32 %v21246_v5, %v20306_v4  ;;  %v21294_v8 = vld [vmem:[%s23071_s1 + $0x2e4] sm:$0xf0]  ;;  %v20308_v10 = vld [vmem:[%s23071_s1 + $0x168] sm:$0xf0] }
  0x4e   : > { %v20499_v11 = vor.u32 %v21294_v8, %v20498_v6  ;;  %v20311_v12 = vor.u32 %v21243_v9, %v20308_v10  ;;  %v21291_v13 = vld [vmem:[%s23071_s1 + $0x2d4] sm:$0xf]  ;;  %v20500_v14 = vld [vmem:[%s23071_s1 + $0x2e8] sm:$0xf0]  ;;  %v20282_v15 = vld [vmem:[%s23071_s1 + $0x120] sm:$0xf] }
  0x4f   : > { %1143 = vmatpush.bf16.msra.mxu0 %v20307_v7  ;;  %v20503_v16 = vor.u32 %v21291_v13, %v20500_v14  ;;  %v21240_v17 = vld [vmem:[%s23071_s1 + $0x134] sm:$0xf0]  ;;  %v20474_v18 = vld [vmem:[%s23071_s1 + $0x2a0] sm:$0xf]  ;;  %v21237_v22 = vld [vmem:[%s23071_s1 + $0x124] sm:$0xf] }
  0x50   : > { %v21288_v19 = vld [vmem:[%s23071_s1 + $0x2b4] sm:$0xf0]  ;;  %1157 = vmatpush.bf16.msra.mxu1 %v20499_v11  ;;  %1171 = vmatpush.bf16.msra.mxu2 %v20311_v12  ;;  %v20283_v20 = vor.u32 %v21240_v17, %v20282_v15  ;;  %v20284_v23 = vld [vmem:[%s23071_s1 + $0x138] sm:$0xf0]  ;;  %v21285_v24 = vld [vmem:[%s23071_s1 + $0x2a4] sm:$0xf] }
  0x51   : > { %v20475_v21 = vor.u32 %v21288_v19, %v20474_v18  ;;  %1185 = vmatpush.bf16.msra.mxu3 %v20503_v16  ;;  %v20287_v25 = vor.u32 %v21237_v22, %v20284_v23  ;;  %v20476_v26 = vld [vmem:[%s23071_s1 + $0x2b8] sm:$0xf0]  ;;  %v20258_v27 = vld [vmem:[%s23071_s1 + $0xf0] sm:$0xf]  ;;  %v21234_v28 = vld [vmem:[%s23071_s1 + $0x104] sm:$0xf0] }
  0x52   : > { %v20479_v29 = vor.u32 %v21285_v24, %v20476_v26  ;;  %v20450_v30 = vld [vmem:[%s23071_s1 + $0x270] sm:$0xf]  ;;  %v21282_v31 = vld [vmem:[%s23071_s1 + $0x284] sm:$0xf0]  ;;  %v21231_v32 = vld [vmem:[%s23071_s1 + $0xf4] sm:$0xf]  ;;  %v20259_v33 = vor.u32 %v21234_v28, %v20258_v27 }
  0x53   : > { %1144 = vmatpush.bf16.msra.mxu0 %v20283_v20  ;;  %v20260_v34 = vld [vmem:[%s23071_s1 + $0x108] sm:$0xf0]  ;;  %v21279_v35 = vld [vmem:[%s23071_s1 + $0x274] sm:$0xf]  ;;  %v20451_v37 = vor.u32 %v21282_v31, %v20450_v30  ;;  %v20234_v39 = vld [vmem:[%s23071_s1 + $0xc0] sm:$0xf] }
  0x54   : > { %v20452_v36 = vld [vmem:[%s23071_s1 + $0x288] sm:$0xf0]  ;;  %1158 = vmatpush.bf16.msra.mxu1 %v20475_v21  ;;  %1172 = vmatpush.bf16.msra.mxu2 %v20287_v25  ;;  %v20263_v38 = vor.u32 %v21231_v32, %v20260_v34  ;;  %v21228_v40 = vld [vmem:[%s23071_s1 + $0xd4] sm:$0xf0]  ;;  %v20426_v41 = vld [vmem:[%s23071_s1 + $0x240] sm:$0xf] }
  0x55   : > { %1186 = vmatpush.bf16.msra.mxu3 %v20479_v29  ;;  %v20455_v42 = vor.u32 %v21279_v35, %v20452_v36  ;;  %v21276_v43 = vld [vmem:[%s23071_s1 + $0x254] sm:$0xf0]  ;;  %v21225_v44 = vld [vmem:[%s23071_s1 + $0xc4] sm:$0xf]  ;;  %v20236_v45 = vld [vmem:[%s23071_s1 + $0xd8] sm:$0xf0]  ;;  %v20235_v48 = vor.u32 %v21228_v40, %v20234_v39 }
  0x56   : > { %v21273_v46 = vld [vmem:[%s23071_s1 + $0x244] sm:$0xf]  ;;  %v20428_v47 = vld [vmem:[%s23071_s1 + $0x258] sm:$0xf0]  ;;  %v20427_v49 = vor.u32 %v21276_v43, %v20426_v41  ;;  %v20239_v50 = vor.u32 %v21225_v44, %v20236_v45  ;;  %v20210_v51 = vld [vmem:[%s23071_s1 + $0x90] sm:$0xf] }
  0x57   : > { %1145 = vmatpush.bf16.msra.mxu0 %v20259_v33  ;;  %v21222_v52 = vld [vmem:[%s23071_s1 + $0xa4] sm:$0xf0]  ;;  %v20402_v53 = vld [vmem:[%s23071_s1 + $0x210] sm:$0xf]  ;;  %v20431_v54 = vor.u32 %v21273_v46, %v20428_v47  ;;  %v21219_v56 = vld [vmem:[%s23071_s1 + $0x94] sm:$0xf] }
  0x58   : > { %1159 = vmatpush.bf16.msra.mxu1 %v20451_v37  ;;  %1173 = vmatpush.bf16.msra.mxu2 %v20263_v38  ;;  %v21270_v55 = vld [vmem:[%s23071_s1 + $0x224] sm:$0xf0]  ;;  %v20212_v57 = vld [vmem:[%s23071_s1 + $0xa8] sm:$0xf0]  ;;  %v21267_v58 = vld [vmem:[%s23071_s1 + $0x214] sm:$0xf]  ;;  %v20211_v60 = vor.u32 %v21222_v52, %v20210_v51 }
  0x59   : > { %1187 = vmatpush.bf16.msra.mxu3 %v20455_v42  ;;  %v20404_v59 = vld [vmem:[%s23071_s1 + $0x228] sm:$0xf0]  ;;  %v20403_v61 = vor.u32 %v21270_v55, %v20402_v53  ;;  %v20215_v62 = vor.u32 %v21219_v56, %v20212_v57  ;;  %v20186_v63 = vld [vmem:[%s23071_s1 + $0x60] sm:$0xf]  ;;  %v21216_v0 = vld [vmem:[%s23071_s1 + $0x74] sm:$0xf0] }
  0x5a   : > { %v20378_v1 = vld [vmem:[%s23071_s1 + $0x1e0] sm:$0xf]  ;;  %v20407_v2 = vor.u32 %v21267_v58, %v20404_v59  ;;  %v21264_v3 = vld [vmem:[%s23071_s1 + $0x1f4] sm:$0xf0]  ;;  %v21213_v4 = vld [vmem:[%s23071_s1 + $0x64] sm:$0xf]  ;;  %v20187_v8 = vor.u32 %v21216_v0, %v20186_v63 }
  0x5b   : > { %1146 = vmatpush.bf16.msra.mxu0 %v20235_v48  ;;  %v20188_v5 = vld [vmem:[%s23071_s1 + $0x78] sm:$0xf0]  ;;  %v21261_v6 = vld [vmem:[%s23071_s1 + $0x1e4] sm:$0xf]  ;;  %v20379_v9 = vor.u32 %v21264_v3, %v20378_v1  ;;  %v20162_v11 = vld [vmem:[%s23071_s1 + $0x30] sm:$0xf] }
  0x5c   : > { %1160 = vmatpush.bf16.msra.mxu1 %v20427_v49  ;;  %1174 = vmatpush.bf16.msra.mxu2 %v20239_v50  ;;  %v20380_v7 = vld [vmem:[%s23071_s1 + $0x1f8] sm:$0xf0]  ;;  %v20191_v10 = vor.u32 %v21213_v4, %v20188_v5  ;;  %v21210_v12 = vld [vmem:[%s23071_s1 + $0x44] sm:$0xf0]  ;;  %v20354_v13 = vld [vmem:[%s23071_s1 + $0x1b0] sm:$0xf] }
  0x5d   : > { %1188 = vmatpush.bf16.msra.mxu3 %v20431_v54  ;;  %v20383_v14 = vor.u32 %v21261_v6, %v20380_v7  ;;  %v21258_v15 = vld [vmem:[%s23071_s1 + $0x1c4] sm:$0xf0]  ;;  %v21207_v16 = vld [vmem:[%s23071_s1 + $0x34] sm:$0xf]  ;;  %v20164_v17 = vld [vmem:[%s23071_s1 + $0x48] sm:$0xf0]  ;;  %v20163_v21 = vor.u32 %v21210_v12, %v20162_v11 }
  0x5e   : > { %v21255_v18 = vld [vmem:[%s23071_s1 + $0x1b4] sm:$0xf]  ;;  %v20356_v19 = vld [vmem:[%s23071_s1 + $0x1c8] sm:$0xf0]  ;;  %v20138_v20 = vld [vmem:[%s23071_s1] sm:$0xf]  ;;  %v20355_v25 = vor.u32 %v21258_v15, %v20354_v13  ;;  %v20167_v26 = vor.u32 %v21207_v16, %v20164_v17 }
  0x5f   : > { %1147 = vmatpush.bf16.msra.mxu0 %v20211_v60  ;;  %v21204_v22 = vld [vmem:[%s23071_s1 + $0x14] sm:$0xf0]  ;;  %v20330_v23 = vld [vmem:[%s23071_s1 + $0x180] sm:$0xf]  ;;  %v21201_v27 = vld [vmem:[%s23071_s1 + $0x4] sm:$0xf]  ;;  %v20359_v29 = vor.u32 %v21255_v18, %v20356_v19 }
  0x60   : > { %1161 = vmatpush.bf16.msra.mxu1 %v20403_v61  ;;  %1175 = vmatpush.bf16.msra.mxu2 %v20215_v62  ;;  %v21252_v24 = vld [vmem:[%s23071_s1 + $0x194] sm:$0xf0]  ;;  %v20140_v28 = vld [vmem:[%s23071_s1 + $0x18] sm:$0xf0]  ;;  %v21249_v30 = vld [vmem:[%s23071_s1 + $0x184] sm:$0xf]  ;;  %v20139_v36 = vor.u32 %v21204_v22, %v20138_v20 }
  0x61   : > { %1189 = vmatpush.bf16.msra.mxu3 %v20407_v2  ;;  %v20332_v31 = vld [vmem:[%s23071_s1 + $0x198] sm:$0xf0]  ;;  %v20314_v32 = vld [vmem:[%s23071_s1 + $0x158] sm:$0xf]  ;;  %v21247_v33 = vld [vmem:[%s23071_s1 + $0x16c] sm:$0xf0]  ;;  %v20331_v40 = vor.u32 %v21252_v24, %v20330_v23  ;;  %v20143_v41 = vor.u32 %v21201_v27, %v20140_v28 }
  0x62   : > { %v20506_v34 = vld [vmem:[%s23071_s1 + $0x2d8] sm:$0xf]  ;;  %v21295_v35 = vld [vmem:[%s23071_s1 + $0x2ec] sm:$0xf0]  ;;  %v21244_v37 = vld [vmem:[%s23071_s1 + $0x15c] sm:$0xf]  ;;  %v20335_v45 = vor.u32 %v21249_v30, %v20332_v31  ;;  %v20315_v46 = vor.u32 %v21247_v33, %v20314_v32 }
  0x63   : > { %1148 = vmatpush.bf16.msra.mxu0 %v20187_v8  ;;  %v20316_v38 = vld [vmem:[%s23071_s1 + $0x170] sm:$0xf0]  ;;  %v21292_v39 = vld [vmem:[%s23071_s1 + $0x2dc] sm:$0xf]  ;;  %v548_v47 = vld [vmem:[#allocation2] sm:$0xff]  ;;  %v20507_v49 = vor.u32 %v21295_v35, %v20506_v34  ;;  %vm1312_vm0 = vcmask 1047556  }
  0x64   : > { %1162 = vmatpush.bf16.msra.mxu1 %v20379_v9  ;;  %1176 = vmatpush.bf16.msra.mxu2 %v20191_v10  ;;  %v20508_v42 = vld [vmem:[%s23071_s1 + $0x2f0] sm:$0xf0]  ;;  %v549_v44 = vld [vmem:[#allocation2 + $0x18] sm:$0xff]  ;;  %v550_v48 = vld [vmem:[#allocation2 + $0x8] sm:$0xff]  ;;  %v20319_v50 = vor.u32 %v21244_v37, %v20316_v38  ;;  %vm5745_vm1 = vcmask 64512   ;;  %p21192_p1 = scmp.ne.s32.totalorder %s22899_s30, 1 }
  0x65   : > { %1190 = vmatpush.bf16.msra.mxu3 %v20383_v14  ;;  %v547_v43 = vld [vmem:[#allocation2 + $0x10] sm:$0xff]  ;;  %v20290_v51 = vld [vmem:[%s23071_s1 + $0x128] sm:$0xf]  ;;  %v21241_v52 = vld [vmem:[%s23071_s1 + $0x13c] sm:$0xf0]  ;;  %v20511_v54 = vor.u32 %v21292_v39, %v20508_v42  ;;  %v23202_v59 = vpack.c.bf16 %v550_v48, %v548_v47 }
  0x66   : > { %v20482_v53 = vld [vmem:[%s23071_s1 + $0x2a8] sm:$0xf]  ;;  %v23197_v55 = vpack.c.bf16 %v549_v44, %v547_v43  ;;  %v21289_v56 = vld [vmem:[%s23071_s1 + $0x2bc] sm:$0xf0]  ;;  %v21238_v57 = vld [vmem:[%s23071_s1 + $0x12c] sm:$0xf]  ;;  %v20291_v62 = vor.u32 %v21241_v52, %v20290_v51 }
  0x67   : > { %1149 = vmatpush.bf16.msra.mxu0 %v20163_v21  ;;  %v20292_v58 = vld [vmem:[%s23071_s1 + $0x140] sm:$0xf0]  ;;  %29263 = vst [vmem:[#allocation21_spill] sm:$0xff] %v23202_v59  ;;  %v21286_v60 = vld [vmem:[%s23071_s1 + $0x2ac] sm:$0xf]  ;;  %v20483_v63 = vor.u32 %v21289_v56, %v20482_v53 }
  0x68   : > { %1163 = vmatpush.bf16.msra.mxu1 %v20355_v25  ;;  %1177 = vmatpush.bf16.msra.mxu2 %v20167_v26  ;;  %29262 = vst [vmem:[#allocation20_spill] sm:$0xff] %v23197_v55  ;;  %v20484_v61 = vld [vmem:[%s23071_s1 + $0x2c0] sm:$0xf0]  ;;  %v20295_v0 = vor.u32 %v21238_v57, %v20292_v58  ;;  %v20266_v1 = vld [vmem:[%s23071_s1 + $0xf8] sm:$0xf] }
  0x69   : > { %1191 = vmatpush.bf16.msra.mxu3 %v20359_v29  ;;  %v21235_v2 = vld [vmem:[%s23071_s1 + $0x10c] sm:$0xf0]  ;;  %v20458_v3 = vld [vmem:[%s23071_s1 + $0x278] sm:$0xf]  ;;  %v20487_v4 = vor.u32 %v21286_v60, %v20484_v61  ;;  %v21232_v6 = vld [vmem:[%s23071_s1 + $0xfc] sm:$0xf] }
  0x6a   : > { %v21283_v5 = vld [vmem:[%s23071_s1 + $0x28c] sm:$0xf0]  ;;  %v20268_v7 = vld [vmem:[%s23071_s1 + $0x110] sm:$0xf0]  ;;  %v21280_v8 = vld [vmem:[%s23071_s1 + $0x27c] sm:$0xf]  ;;  %v20267_v10 = vor.u32 %v21235_v2, %v20266_v1 }
  0x6b   : > { %1150 = vmatpush.bf16.msra.mxu0 %v20139_v36  ;;  %v20460_v9 = vld [vmem:[%s23071_s1 + $0x290] sm:$0xf0]  ;;  %v20459_v11 = vor.u32 %v21283_v5, %v20458_v3  ;;  %v20271_v12 = vor.u32 %v21232_v6, %v20268_v7  ;;  %v20242_v13 = vld [vmem:[%s23071_s1 + $0xc8] sm:$0xf]  ;;  %v21229_v14 = vld [vmem:[%s23071_s1 + $0xdc] sm:$0xf0] }
  0x6c   : > { %1164 = vmatpush.bf16.msra.mxu1 %v20331_v40  ;;  %1178 = vmatpush.bf16.msra.mxu2 %v20143_v41  ;;  %v20434_v15 = vld [vmem:[%s23071_s1 + $0x248] sm:$0xf]  ;;  %v20463_v16 = vor.u32 %v21280_v8, %v20460_v9  ;;  %v21277_v17 = vld [vmem:[%s23071_s1 + $0x25c] sm:$0xf0]  ;;  %v21226_v18 = vld [vmem:[%s23071_s1 + $0xcc] sm:$0xf]  ;;  %v20243_v22 = vor.u32 %v21229_v14, %v20242_v13 }
  0x6d   : > { %1192 = vmatpush.bf16.msra.mxu3 %v20335_v45  ;;  %v20244_v19 = vld [vmem:[%s23071_s1 + $0xe0] sm:$0xf0]  ;;  %v21274_v20 = vld [vmem:[%s23071_s1 + $0x24c] sm:$0xf]  ;;  %v20435_v23 = vor.u32 %v21277_v17, %v20434_v15  ;;  %v20218_v25 = vld [vmem:[%s23071_s1 + $0x98] sm:$0xf] }
  0x6e   : > { %1151 = vmatmul.bf16.vlgmr.msra.gmra.mxu0 %v23197_v55  ;;  %v20436_v21 = vld [vmem:[%s23071_s1 + $0x260] sm:$0xf0]  ;;  %v20247_v24 = vor.u32 %v21226_v18, %v20244_v19  ;;  %v21223_v26 = vld [vmem:[%s23071_s1 + $0xac] sm:$0xf0]  ;;  %v20410_v27 = vld [vmem:[%s23071_s1 + $0x218] sm:$0xf] }
  0x6f   : > { %1199 = vmatpush.bf16.msrb.mxu0 %v20315_v46  ;;  %1179 = vmatmul.bf16.vlgmr.msra.gmra.mxu2 %v23197_v55  ;;  %v20439_v28 = vor.u32 %v21274_v20, %v20436_v21  ;;  %v21271_v29 = vld [vmem:[%s23071_s1 + $0x22c] sm:$0xf0]  ;;  %v21220_v30 = vld [vmem:[%s23071_s1 + $0x9c] sm:$0xf]  ;;  %v20220_v31 = vld [vmem:[%s23071_s1 + $0xb0] sm:$0xf0]  ;;  %v20219_v34 = vor.u32 %v21223_v26, %v20218_v25 }
  0x70   : > { %1213 = vmatpush.bf16.msrb.mxu1 %v20507_v49  ;;  %1227 = vmatpush.bf16.msrb.mxu2 %v20319_v50  ;;  %v21268_v32 = vld [vmem:[%s23071_s1 + $0x21c] sm:$0xf]  ;;  %v20412_v33 = vld [vmem:[%s23071_s1 + $0x230] sm:$0xf0]  ;;  %v20411_v35 = vor.u32 %v21271_v29, %v20410_v27  ;;  %v20223_v36 = vor.u32 %v21220_v30, %v20220_v31  ;;  %v20194_v37 = vld [vmem:[%s23071_s1 + $0x68] sm:$0xf] }
  0x71   : > { %1241 = vmatpush.bf16.msrb.mxu3 %v20511_v54  ;;  %1165 = vmatmul.bf16.vlgmr.msra.gmra.mxu1 %v23202_v59  ;;  %v21217_v38 = vld [vmem:[%s23071_s1 + $0x7c] sm:$0xf0]  ;;  %v20386_v39 = vld [vmem:[%s23071_s1 + $0x1e8] sm:$0xf]  ;;  %v20415_v40 = vor.u32 %v21268_v32, %v20412_v33  ;;  %v21214_v42 = vld [vmem:[%s23071_s1 + $0x6c] sm:$0xf] }
  0x72   : > { %1193 = vmatmul.bf16.vlgmr.msra.gmra.mxu3 %v23202_v59  ;;  %v21265_v41 = vld [vmem:[%s23071_s1 + $0x1fc] sm:$0xf0]  ;;  %v20196_v43 = vld [vmem:[%s23071_s1 + $0x80] sm:$0xf0]  ;;  %v21262_v44 = vld [vmem:[%s23071_s1 + $0x1ec] sm:$0xf]  ;;  %v20195_v46 = vor.u32 %v21217_v38, %v20194_v37 }
  0x73   : > { %1200 = vmatpush.bf16.msrb.mxu0 %v20291_v62  ;;  %v20388_v45 = vld [vmem:[%s23071_s1 + $0x200] sm:$0xf0]  ;;  %v20387_v47 = vor.u32 %v21265_v41, %v20386_v39  ;;  %v20199_v48 = vor.u32 %v21214_v42, %v20196_v43  ;;  %v20170_v49 = vld [vmem:[%s23071_s1 + $0x38] sm:$0xf]  ;;  %v21211_v50 = vld [vmem:[%s23071_s1 + $0x4c] sm:$0xf0] }
  0x74   : > { %1214 = vmatpush.bf16.msrb.mxu1 %v20483_v63  ;;  %1228 = vmatpush.bf16.msrb.mxu2 %v20295_v0  ;;  %v20362_v51 = vld [vmem:[%s23071_s1 + $0x1b8] sm:$0xf]  ;;  %v20391_v52 = vor.u32 %v21262_v44, %v20388_v45  ;;  %v21259_v53 = vld [vmem:[%s23071_s1 + $0x1cc] sm:$0xf0]  ;;  %v21208_v54 = vld [vmem:[%s23071_s1 + $0x3c] sm:$0xf]  ;;  %v20171_v60 = vor.u32 %v21211_v50, %v20170_v49 }
  0x75   : > { %1242 = vmatpush.bf16.msrb.mxu3 %v20487_v4  ;;  %v20172_v56 = vld [vmem:[%s23071_s1 + $0x50] sm:$0xf0]  ;;  %v21256_v57 = vld [vmem:[%s23071_s1 + $0x1bc] sm:$0xf]  ;;  %v20363_v61 = vor.u32 %v21259_v53, %v20362_v51  ;;  %v20146_v63 = vld [vmem:[%s23071_s1 + $0x8] sm:$0xf] }
  0x76   : > { %v20364_v58 = vld [vmem:[%s23071_s1 + $0x1d0] sm:$0xf0]  ;;  %v20175_v62 = vor.u32 %v21208_v54, %v20172_v56  ;;  %v21205_v0 = vld [vmem:[%s23071_s1 + $0x1c] sm:$0xf0]  ;;  %v20338_v1 = vld [vmem:[%s23071_s1 + $0x188] sm:$0xf] }
  0x77   : > { %1201 = vmatpush.bf16.msrb.mxu0 %v20267_v10  ;;  %v20367_v2 = vor.u32 %v21256_v57, %v20364_v58  ;;  %v21253_v3 = vld [vmem:[%s23071_s1 + $0x19c] sm:$0xf0]  ;;  %v21202_v4 = vld [vmem:[%s23071_s1 + $0xc] sm:$0xf]  ;;  %v20148_v5 = vld [vmem:[%s23071_s1 + $0x20] sm:$0xf0]  ;;  %v20147_v8 = vor.u32 %v21205_v0, %v20146_v63 }
  0x78   : > { %1215 = vmatpush.bf16.msrb.mxu1 %v20459_v11  ;;  %1229 = vmatpush.bf16.msrb.mxu2 %v20271_v12  ;;  %v21250_v6 = vld [vmem:[%s23071_s1 + $0x18c] sm:$0xf]  ;;  %v20340_v7 = vld [vmem:[%s23071_s1 + $0x1a0] sm:$0xf0]  ;;  %v20339_v9 = vor.u32 %v21253_v3, %v20338_v1  ;;  %v20151_v10 = vor.u32 %v21202_v4, %v20148_v5  ;;  %v22915_v14 = vmov 1983009808  }
  0x79   : > { %1243 = vmatpush.bf16.msrb.mxu3 %v20463_v16  ;;  %v20343_v11 = vor.u32 %v21250_v6, %v20340_v7  ;;  %v23263_v12 = vld [vmem:[%s23102_s13] sm:$0x3f]  ;;  %v1315_v15 = vunpack.c.l.s4 %v22915_v14 }
  0x7a   : > { %v651_v13 = vperm.slane %v23263_v12, 0  ;;  %v652_v19 = vperm.slane %v23263_v12, 1 }
  0x7b   : > { %1202 = vmatpush.bf16.msrb.mxu0 %v20243_v22  ;;  %v23267_v21 = vunpack.c.0.s8 %v1315_v15 }
  0x7c   : > { %1216 = vmatpush.bf16.msrb.mxu1 %v20435_v23  ;;  %1230 = vmatpush.bf16.msrb.mxu2 %v20247_v24 }
  0x7d   : > { %1244 = vmatpush.bf16.msrb.mxu3 %v20439_v28  ;;  %v22916_v28 = vmov 1934713408  }
  0x7e   : > { %v1337_v29 = vunpack.c.l.s4 %v22916_v28 }
  0x7f   : > { %1203 = vmatpush.bf16.msrb.mxu0 %v20219_v34 }
  0x80   : > { %1217 = vmatpush.bf16.msrb.mxu1 %v20411_v35  ;;  %1231 = vmatpush.bf16.msrb.mxu2 %v20223_v36  ;;  %v23273_v39 = vunpack.c.0.s8 %v1337_v29 }
  0x81   : > { %1245 = vmatpush.bf16.msrb.mxu3 %v20415_v40 }
  0x83   : > { %1204 = vmatpush.bf16.msrb.mxu0 %v20195_v46 }
  0x84   : > { %1218 = vmatpush.bf16.msrb.mxu1 %v20387_v47  ;;  %1232 = vmatpush.bf16.msrb.mxu2 %v20199_v48 }
  0x85   : > { %1246 = vmatpush.bf16.msrb.mxu3 %v20391_v52 }
  0x87   : > { %1205 = vmatpush.bf16.msrb.mxu0 %v20171_v60 }
  0x88   : > { %1219 = vmatpush.bf16.msrb.mxu1 %v20363_v61  ;;  %1233 = vmatpush.bf16.msrb.mxu2 %v20175_v62 }
  0x89   : > { %1247 = vmatpush.bf16.msrb.mxu3 %v20367_v2 }
  0x8b   : > { %1206 = vmatpush.bf16.msrb.mxu0 %v20147_v8 }
  0x8c   : > { %1220 = vmatpush.bf16.msrb.mxu1 %v20339_v9  ;;  %1234 = vmatpush.bf16.msrb.mxu2 %v20151_v10 }
  0x8d   : > { %1248 = vmatpush.bf16.msrb.mxu3 %v20343_v11 }
  0x8e   : > { %1207 = vmatmul.bf16.vlgmr.msrb.gmra.mxu0 %v23197_v55 }
  0x8f   : > { %1221 = vmatmul.bf16.vlgmr.msrb.gmra.mxu1 %v23202_v59  ;;  %1235 = vmatmul.bf16.vlgmr.msrb.gmra.mxu2 %v23197_v55 }
  0x90   : > { %1249 = vmatmul.bf16.vlgmr.msrb.gmra.mxu3 %v23202_v59 }
  0xeb   : > { %v1152_v16 = vpop.f32.mrf.mxu0 }
  0xec   : > { %v1153_v17 = vadd.f32 %v1152_v16, %v651_v13 }
  0xee   : > { %v1166_v18 = vpop.f32.mrf.mxu1 }
  0xef   : > { %v1167_v20 = vadd.f32 %v1166_v18, %v1153_v17 }
  0xf1   : > { %v1311_v22 = vrot.slane %v1167_v20, 4  ;;  %v1317_v23 = vperm.slane %v1167_v20, %v23267_v21 }
  0xf2   : > { %v1180_v24 = vpop.f32.mrf.mxu2 }
  0xf3   : > { %v1181_v25 = vadd.f32 %v1180_v24, %v652_v19  ;;  %v1313_v27 = vsel %vm1312_vm0, 0.0, %v1311_v22  ;;  %v1334_v31 = vrot.slane %v1317_v23, 4  ;;  %v1154_v33 = vpop.f32.mrf.mxu0 }
  0xf4   : > { %v1321_v30 = vperm.slane %v1313_v27, %v23267_v21  ;;  %v1155_v34 = vadd.f32 %v1154_v33, %v651_v13 }
  0xf5   : > { %v1194_v26 = vpop.f32.mrf.mxu3 }
  0xf6   : > { %v1195_v32 = vadd.f32 %v1194_v26, %v1181_v25  ;;  %v1168_v35 = vpop.f32.mrf.mxu1  ;;  %v1346_v38 = vrot.slane %v1321_v30, 4 }
  0xf7   : > { %v1169_v40 = vadd.f32 %v1168_v35, %v1155_v34 }
  0xf8   : > { %v1322_v36 = vrot.slane %v1195_v32, 4  ;;  %v1327_v37 = vperm.slane %v1195_v32, %v23267_v21  ;;  %v653_v32 = vperm.slane %v23263_v12, 2 }
  0xf9   : > { %v1364_v46 = vrot.slane %v1169_v40, 4  ;;  %v1369_v49 = vperm.slane %v1169_v40, %v23267_v21 }
  0xfa   : > { %v1323_v41 = vsel %vm1312_vm0, 0.0, %v1322_v36  ;;  %v1332_v42 = vrot.slane %v1327_v37, 4  ;;  %v1335_v43 = vsel %vm1312_vm0, %v1327_v37, %v1334_v31  ;;  %v1182_v47 = vpop.f32.mrf.mxu2 }
  0xfb   : > { %v1331_v44 = vperm.slane %v1323_v41, %v23267_v21  ;;  %v1343_v45 = vperm.slane %v1335_v43, %v23273_v39  ;;  %v1183_v50 = vadd.f32 %v1182_v47, %v652_v19  ;;  %v1365_v57 = vsel %vm1312_vm0, 0.0, %v1364_v46 }
  0xfc   : > { %v1333_v48 = vsel %vm1312_vm0, %v1332_v42, %v1317_v23  ;;  %v1386_v3 = vrot.slane %v1369_v49, 4  ;;  %v1373_v6 = vperm.slane %v1365_v57, %v23267_v21 }
  0xfd   : > { %v1339_v51 = vperm.slane %v1333_v48, %v23273_v39  ;;  %v1344_v52 = vrot.slane %v1331_v44, 4  ;;  %v1347_v53 = vsel %vm1312_vm0, %v1331_v44, %v1346_v38  ;;  %v1358_v54 = vrot.slane %v1343_v45, 4  ;;  %v1196_v58 = vpop.f32.mrf.mxu3 }
  0xfe   : > { %v1355_v56 = vperm.slane %v1347_v53, %v23273_v39  ;;  %v1418_v63 = vpack.c.bf16 %v1343_v45, %v1343_v45  ;;  %v1197_v7 = vadd.f32 %v1196_v58, %v1183_v50  ;;  %v1398_v19 = vrot.slane %v1373_v6, 4 }
  0xff   : > { %v1345_v60 = vsel %vm1312_vm0, %v1344_v52, %v1321_v30  ;;  %v1356_v61 = vrot.slane %v1339_v51, 4  ;;  %v1359_v62 = vsel %vm1312_vm0, 0.0, %v1358_v54  ;;  %v1416_v5 = vpack.c.bf16 %v1339_v51, %v1339_v51 }
 0x100   : > { %v1351_v0 = vperm.slane %v1345_v60, %v23273_v39  ;;  %v1362_v1 = vrot.slane %v1355_v56, 4  ;;  %v1422_v2 = vpack.c.bf16 %v1355_v56, %v1355_v56  ;;  %v1419_v10 = vpack.c.bf16 %v1359_v62, %v1359_v62 }
 0x101   : > { %v1357_v4 = vsel %vm1312_vm0, 0.0, %v1356_v61  ;;  %v1374_v16 = vrot.slane %v1197_v7, 4  ;;  %v1379_v20 = vperm.slane %v1197_v7, %v23267_v21  ;;  %v654_v52 = vperm.slane %v23263_v12, 3 }
 0x102   : > { %v1360_v8 = vrot.slane %v1351_v0, 4  ;;  %v1363_v9 = vsel %vm1312_vm0, 0.0, %v1362_v1  ;;  %v1420_v11 = vpack.c.bf16 %v1351_v0, %v1351_v0  ;;  %v1417_v13 = vpack.c.bf16 %v1357_v4, %v1357_v4 }
 0x103   : > { %v1423_v14 = vpack.c.bf16 %v1363_v9, %v1363_v9  ;;  %v1679_v15 = vrot.slane %v1422_v2, 4  ;;  %v1375_v25 = vsel %vm1312_vm0, 0.0, %v1374_v16  ;;  %v1384_v27 = vrot.slane %v1379_v20, 4 }
 0x104   : > { %v1361_v17 = vsel %vm1312_vm0, 0.0, %v1360_v8  ;;  %v1672_v18 = vrot.slane %v1420_v11, 4  ;;  %v1383_v26 = vperm.slane %v1375_v25, %v23267_v21  ;;  %v1387_v28 = vsel %vm1312_vm0, %v1379_v20, %v1386_v3 }
 0x105   : > { %v1421_v22 = vpack.c.bf16 %v1361_v17, %v1361_v17  ;;  %v1680_v23 = vsel %vm1312_vm0, %v1679_v15, %v1418_v63  ;;  %v1697_v24 = vrot.slane %v1423_v14, 4  ;;  %v23299_v31 = vperm.slane %v1387_v28, %v23273_v39 }
 0x106   : > { %v1674_v29 = vsel %vm1312_vm0, %v1672_v18, %v1416_v5  ;;  %v1684_v33 = vperm.slane %v1680_v23, %v23267_v21  ;;  %v1385_v34 = vsel %vm1312_vm0, %v1384_v27, %v1369_v49  ;;  %v1396_v35 = vrot.slane %v1383_v26, 4 }
 0x107   : > { %v1691_v30 = vrot.slane %v1421_v22, 4  ;;  %v1399_v36 = vsel %vm1312_vm0, %v1383_v26, %v1398_v19  ;;  %v1698_v37 = vsel %vm1312_vm0, %v1697_v24, %v1419_v10  ;;  %v1678_v44 = vperm.slane %v1674_v29, %v23267_v21 }
 0x108   : > { %v1407_v38 = vperm.slane %v1399_v36, %v23273_v39  ;;  %v1397_v40 = vsel %vm1312_vm0, %v1396_v35, %v1373_v6  ;;  %v1685_v45 = vrot.slane %v1684_v33, 4  ;;  %v1426_v46 = vpack.c.bf16 %v23299_v31, %v23299_v31 }
 0x109   : > { %v1692_v42 = vsel %vm1312_vm0, %v1691_v30, %v1417_v13  ;;  %v1702_v49 = vperm.slane %v1698_v37, %v23267_v21  ;;  %v1403_v2 = vperm.slane %v1397_v40, %v23273_v39  ;;  %v23332_v11 = vperm.slane %v1385_v34, %v23273_v39 }
 0x10a   : > { %v1430_v47 = vpack.c.bf16 %v1407_v38, %v1407_v38  ;;  %v1686_v53 = vsel %vm1312_vm0, %v1685_v45, %v1678_v44  ;;  %v1696_v54 = vperm.slane %v1692_v42, %v23267_v21  ;;  %v1414_v13 = vrot.slane %v1407_v38, 4 }
 0x10b   : > { %v1208_v41 = vpop.f32.mrf.mxu0  ;;  %v23321_v61 = vperm.slane %v1686_v53, %v23273_v39  ;;  %v1703_v62 = vrot.slane %v1702_v49, 4  ;;  %v1412_v19 = vrot.slane %v1403_v2, 4  ;;  %v1408_v28 = vrot.slane %v23332_v11, 4 }
 0x10c   : > { %v1222_v43 = vpop.f32.mrf.mxu1  ;;  %v1209_v48 = vadd.f32 %v1208_v41, %v653_v32  ;;  %v10092_v50 = vrot.slane %v1430_v47, 4  ;;  %v1410_v29 = vrot.slane %v23299_v31, 4  ;;  %v1415_v34 = vsel %vm1312_vm0, 0.0, %v1414_v13 }
 0x10d   : > { %29264 = vst [vmem:[#allocation22_spill] sm:$0xff] %v23321_v61  ;;  %v1704_v5 = vsel %vm1312_vm0, %v1703_v62, %v1696_v54  ;;  %v1713_v10 = vshrl.u32 %v23321_v61, 16  ;;  %v1428_v38 = vpack.c.bf16 %v1403_v2, %v1403_v2  ;;  %v1413_v31 = vsel %vm1312_vm0, 0.0, %v1412_v19 }
 0x10e   : > { %v1223_v51 = vadd.f32 %v1222_v43, %v1209_v48  ;;  %v23317_v56 = vsel %vm1312_vm0, %v10092_v50, %v1426_v46  ;;  %v23328_v9 = vperm.slane %v1704_v5, %v23273_v39  ;;  %v1409_v5 = vsel %vm1312_vm0, 0.0, %v1408_v28 }
 0x110   : > { %v1432_v57 = vrot.slane %v1223_v51, 4  ;;  %v1437_v58 = vperm.slane %v1223_v51, %v23267_v21  ;;  %29265 = vst [vmem:[#allocation23_spill] sm:$0xff] %v23328_v9  ;;  %v1714_v18 = vshrl.u32 %v23328_v9, 16 }
 0x112   : > { %v1236_v60 = vpop.f32.mrf.mxu2  ;;  %v1433_v63 = vsel %vm1312_vm0, 0.0, %v1432_v57  ;;  %v1454_v6 = vrot.slane %v1437_v58, 4  ;;  %v23341_v27 = vpack.i.b16 %v1714_v18, %v1713_v10  ;;  %v1411_v57 = vsel %vm1312_vm0, 0.0, %v1410_v29 }
 0x113   : > { %v1237_v0 = vadd.f32 %v1236_v60, %v654_v52  ;;  %v1250_v1 = vpop.f32.mrf.mxu3  ;;  %v1210_v12 = vpop.f32.mrf.mxu0  ;;  %v1441_v3 = vperm.slane %v1433_v63, %v23267_v21  ;;  %v10086_v60 = vrot.slane %v1428_v38, 4  ;;  %v1425_v18 = vpack.c.bf16 %v1409_v5, %v1409_v5 }
 0x114   : > { %v1211_v4 = vadd.f32 %v1210_v12, %v653_v32  ;;  %v1224_v8 = vpop.f32.mrf.mxu1  ;;  %29266 = vst [vmem:[#allocation24_spill] sm:$0xff] %v23341_v27  ;;  %v1431_v12 = vpack.c.bf16 %v1415_v34, %v1415_v34  ;;  %v1427_v19 = vpack.c.bf16 %v1411_v57, %v1411_v57 }
 0x115   : > { %v1251_v7 = vadd.f32 %v1250_v1, %v1237_v0  ;;  %v1466_v20 = vrot.slane %v1441_v3, 4 }
 0x116   : > { %v1225_v14 = vadd.f32 %v1224_v8, %v1211_v4 }
 0x117   : > { %v1442_v15 = vrot.slane %v1251_v7, 4  ;;  %v1447_v16 = vperm.slane %v1251_v7, %v23267_v21 }
 0x118   : > { %v1484_v22 = vrot.slane %v1225_v14, 4  ;;  %v1489_v23 = vperm.slane %v1225_v14, %v23267_v21 }
 0x119   : > { %v1443_v24 = vsel %vm1312_vm0, 0.0, %v1442_v15  ;;  %v1452_v25 = vrot.slane %v1447_v16, 4  ;;  %v1455_v26 = vsel %vm1312_vm0, %v1447_v16, %v1454_v6  ;;  %v1424_v6 = vpack.c.bf16 %v23332_v11, %v23332_v11 }
 0x11a   : > { %v1451_v30 = vperm.slane %v1443_v24, %v23267_v21  ;;  %v1238_v32 = vpop.f32.mrf.mxu2  ;;  %v1463_v33 = vperm.slane %v1455_v26, %v23273_v39  ;;  %v1485_v35 = vsel %vm1312_vm0, 0.0, %v1484_v22  ;;  %v1506_v44 = vrot.slane %v1489_v23, 4 }
 0x11b   : > { %v1239_v36 = vadd.f32 %v1238_v32, %v654_v52  ;;  %v1453_v37 = vsel %vm1312_vm0, %v1452_v25, %v1437_v58  ;;  %v1252_v41 = vpop.f32.mrf.mxu3  ;;  %v1493_v47 = vperm.slane %v1485_v35, %v23267_v21  ;;  %v1429_v58 = vpack.c.bf16 %v1413_v31, %v1413_v31 }
 0x11c   : > { %v1464_v40 = vrot.slane %v1451_v30, 4  ;;  %v1478_v42 = vrot.slane %v1463_v33, 4  ;;  %v1467_v43 = vsel %vm1312_vm0, %v1451_v30, %v1466_v20  ;;  %v1538_v49 = vpack.c.bf16 %v1463_v33, %v1463_v33 }
 0x11d   : > { %v1253_v45 = vadd.f32 %v1252_v41, %v1239_v36  ;;  %v1475_v46 = vperm.slane %v1467_v43, %v23273_v39  ;;  %v1518_v7 = vrot.slane %v1493_v47, 4  ;;  %v10104_v10 = vrot.slane %v1429_v58, 4 }
 0x11e   : > { %v1479_v48 = vsel %vm1312_vm0, 0.0, %v1478_v42  ;;  %v1465_v50 = vsel %vm1312_vm0, %v1464_v40, %v1441_v3  ;;  %v10087_v15 = vsel %vm1312_vm0, %v10086_v60, %v1424_v6  ;;  %v10097_v16 = vperm.slane %v23317_v56, %v23267_v21 }
 0x11f   : > { %v1494_v51 = vrot.slane %v1253_v45, 4  ;;  %v1499_v52 = vperm.slane %v1253_v45, %v23267_v21  ;;  %v1539_v53 = vpack.c.bf16 %v1479_v48, %v1479_v48  ;;  %v1482_v54 = vrot.slane %v1475_v46, 4 }
 0x120   : > { %v1542_v3 = vpack.c.bf16 %v1475_v46, %v1475_v46  ;;  %v10110_v20 = vrot.slane %v1431_v12, 4  ;;  %v10091_v22 = vperm.slane %v10087_v15, %v23267_v21  ;;  %v10105_v24 = vsel %vm1312_vm0, %v10104_v10, %v1425_v18 }
 0x121   : > { %v1495_v62 = vsel %vm1312_vm0, 0.0, %v1494_v51  ;;  %v1504_v63 = vrot.slane %v1499_v52, 4  ;;  %v23360_v0 = vsel %vm1312_vm0, %v1499_v52, %v1506_v44  ;;  %21550 = vxpose.binary.xlu0.c.b16.start.end [1/2] (short) %v1539_v53, %v1538_v49, 128  ;;  %v1483_v1 = vsel %vm1312_vm0, 0.0, %v1482_v54 }
 0x122   : > { %29267 = vst [vmem:[#allocation25_spill] sm:$0xff] %v23360_v0  ;;  %v1503_v2 = vperm.slane %v1495_v62, %v23267_v21  ;;  %v1543_v4 = vpack.c.bf16 %v1483_v1, %v1483_v1  ;;  %v10111_v26 = vsel %vm1312_vm0, %v10110_v20, %v1427_v19  ;;  %v10109_v28 = vperm.slane %v10105_v24, %v23267_v21 }
 0x123   : > { %v23368_v8 = vsel %vm1312_vm0, %v1504_v63, %v1489_v23  ;;  %v10098_v23 = vrot.slane %v10097_v16, 4  ;;  %v10115_v29 = vperm.slane %v10111_v26, %v23267_v21  ;;  %v1459_v40 = vperm.slane %v1453_v37, %v23273_v39 }
 0x124   : > { %29268 = vst [vmem:[#allocation26_spill] sm:$0xff] %v23368_v8  ;;  %v1516_v13 = vrot.slane %v1503_v2, 4  ;;  %21584 = vxpose.binary.xlu1.c.b16.start.end [1/2] (short) %v1543_v4, %v1542_v3, 128  ;;  %v23371_v14 = vsel %vm1312_vm0, %v1503_v2, %v1518_v7  ;;  %v1471_v41 = vperm.slane %v1465_v50, %v23273_v39 }
 0x125   : > { %29269 = vst [vmem:[#allocation27_spill] sm:$0xff] %v23371_v14  ;;  %v10099_v25 = vsel %vm1312_vm0, %v10098_v23, %v10091_v22  ;;  %v10116_v56 = vrot.slane %v10115_v29, 4  ;;  %v1476_v42 = vrot.slane %v1459_v40, 4  ;;  %v1536_v44 = vpack.c.bf16 %v1459_v40, %v1459_v40 }
 0x126   : > { %v23377_v11 = vsel %vm1312_vm0, %v1516_v13, %v1493_v47  ;;  %v23386_v30 = vperm.slane %v10099_v25, %v23273_v39  ;;  %v1480_v43 = vrot.slane %v1471_v41, 4  ;;  %v1540_v47 = vpack.c.bf16 %v1471_v41, %v1471_v41 }
 0x127   : > { %29270 = vst [vmem:[#allocation28_spill] sm:$0xff] %v23377_v11  ;;  %v10117_v32 = vsel %vm1312_vm0, %v10116_v56, %v10109_v28  ;;  %v1477_v31 = vsel %vm1312_vm0, 0.0, %v1476_v42 }
 0x128   : > { %29271 = vst [vmem:[#allocation29_spill] sm:$0xff] %v23386_v30  ;;  %v23390_v33 = vperm.slane %v10117_v32, %v23273_v39  ;;  %v10126_v35 = vshrl.u32 %v23386_v30, 16  ;;  %v1537_v45 = vpack.c.bf16 %v1477_v31, %v1477_v31  ;;  %v1481_v46 = vsel %vm1312_vm0, 0.0, %v1480_v43 }
 0x129   : > { %v1541_v48 = vpack.c.bf16 %v1481_v46, %v1481_v46 }
 0x12a   : > { %29272 = vst [vmem:[#allocation30_spill] sm:$0xff] %v23390_v33  ;;  %v10127_v36 = vshrl.u32 %v23390_v33, 16 }
 0x12c   : > { %v23396_v38 = vpack.i.b16 %v10127_v36, %v10126_v35 }
 0x12e   : > { %29273 = vst [vmem:[#allocation31_spill] sm:$0xff] %v23396_v38 }
 0x1a1   : > { %21567 = vxpose.binary.xlu0.c.b16.start.end [1/2] (short) %v1537_v45, %v1536_v44, 128 }
 0x1a4   : > { %21601 = vxpose.binary.xlu1.c.b16.start.end [1/2] (short) %v1541_v48, %v1540_v47, 128 }
 0x1cd   : > { %v21551_v49 = vpop.trf.xlu0 }
 0x1ce   : > { %v1857_v53 = vshrl.u32 %v21551_v49, 16 }
 0x1d0   : > { %v21585_v51 = vpop.trf.xlu1 }
 0x1d1   : > { %v1873_v60 = vshrl.u32 %v21585_v51, 16 }
 0x1d5   : > { %v21552_v52 = vpop.trf.xlu0 }
 0x1d6   : > { %v1855_v54 = vpack.i.b16 %v21552_v52, %v21551_v49  ;;  %v1858_v37 = vshrl.u32 %v21552_v52, 16 }
 0x1d8   : > { %v1859_v57 = vpack.i.b16 %v1858_v37, %v1857_v53  ;;  %v2115_v50 = vrot.slane %v1855_v54, 4  ;;  %v21586_v58 = vpop.trf.xlu1 }
 0x1d9   : > { %v1871_v62 = vpack.i.b16 %v21586_v58, %v21585_v51  ;;  %v1874_v63 = vshrl.u32 %v21586_v58, 16 }
 0x1da   : > { %v2171_v1 = vrot.slane %v1859_v57, 4 }
 0x1db   : > { %v1875_v12 = vpack.i.b16 %v1874_v63, %v1873_v60  ;;  %v2113_v2 = vrot.slane %v1871_v62, 4  ;;  %v23403_v3 = vsel %vm1312_vm0, %v1871_v62, %v2115_v50 }
 0x1dd   : > { %v23406_v4 = vsel %vm1312_vm0, %v2113_v2, %v1855_v54  ;;  %v2169_v5 = vrot.slane %v1875_v12, 4  ;;  %v23409_v6 = vsel %vm1312_vm0, %v1875_v12, %v2171_v1  ;;  %v21553_v7 = vpop.trf.xlu0 }
 0x1de   : > { %v1889_v16 = vshrl.u32 %v21553_v7, 16  ;;  %v23501_v34 = vperm.slane %v23409_v6, %v23267_v21 }
 0x1df   : > { %v23412_v10 = vsel %vm1312_vm0, %v2169_v5, %v1859_v57 }
 0x1e0   : > { %v21587_v13 = vpop.trf.xlu1 }
 0x1e1   : > { %v1905_v24 = vshrl.u32 %v21587_v13, 16 }
 0x1e5   : > { %v21554_v15 = vpop.trf.xlu0 }
 0x1e6   : > { %v1887_v18 = vpack.i.b16 %v21554_v15, %v21553_v7  ;;  %v1890_v19 = vshrl.u32 %v21554_v15, 16 }
 0x1e8   : > { %v1891_v20 = vpack.i.b16 %v1890_v19, %v1889_v16  ;;  %v2227_v22 = vrot.slane %v1887_v18, 4  ;;  %v21588_v23 = vpop.trf.xlu1 }
 0x1e9   : > { %v1903_v25 = vpack.i.b16 %v21588_v23, %v21587_v13  ;;  %v1906_v26 = vshrl.u32 %v21588_v23, 16 }
 0x1ea   : > { %v2283_v28 = vrot.slane %v1891_v20, 4 }
 0x1eb   : > { %v1907_v29 = vpack.i.b16 %v1906_v26, %v1905_v24  ;;  %v2225_v56 = vrot.slane %v1903_v25, 4  ;;  %v23415_v32 = vsel %vm1312_vm0, %v1903_v25, %v2227_v22 }
 0x1ed   : > { %v23418_v35 = vsel %vm1312_vm0, %v2225_v56, %v1887_v18  ;;  %v2281_v36 = vrot.slane %v1907_v29, 4  ;;  %v23421_v40 = vsel %vm1312_vm0, %v1907_v29, %v2283_v28  ;;  %v21555_v41 = vpop.trf.xlu0 }
 0x1ee   : > { %v1921_v44 = vshrl.u32 %v21555_v41, 16 }
 0x1ef   : > { %v23424_v42 = vsel %vm1312_vm0, %v2281_v36, %v1891_v20 }
 0x1f0   : > { %v21589_v43 = vpop.trf.xlu1 }
 0x1f1   : > { %v1937_v51 = vshrl.u32 %v21589_v43, 16 }
 0x1f5   : > { %v21556_v31 = vpop.trf.xlu0 }
 0x1f6   : > { %v1919_v45 = vpack.i.b16 %v21556_v31, %v21555_v41  ;;  %v1922_v46 = vshrl.u32 %v21556_v31, 16 }
 0x1f8   : > { %v1923_v47 = vpack.i.b16 %v1922_v46, %v1921_v44  ;;  %v2339_v48 = vrot.slane %v1919_v45, 4  ;;  %v21590_v49 = vpop.trf.xlu1 }
 0x1f9   : > { %v1935_v52 = vpack.i.b16 %v21590_v49, %v21589_v43  ;;  %v1938_v53 = vshrl.u32 %v21590_v49, 16 }
 0x1fa   : > { %v2395_v54 = vrot.slane %v1923_v47, 4 }
 0x1fb   : > { %v1939_v37 = vpack.i.b16 %v1938_v53, %v1937_v51  ;;  %v2337_v57 = vrot.slane %v1935_v52, 4  ;;  %v23427_v50 = vsel %vm1312_vm0, %v1935_v52, %v2339_v48 }
 0x1fd   : > { %v23430_v58 = vsel %vm1312_vm0, %v2337_v57, %v1919_v45  ;;  %v2393_v60 = vrot.slane %v1939_v37, 4  ;;  %v23433_v62 = vsel %vm1312_vm0, %v1939_v37, %v2395_v54  ;;  %v21557_v63 = vpop.trf.xlu0 }
 0x1fe   : > { %v1953_v5 = vshrl.u32 %v21557_v63, 16 }
 0x1ff   : > { %v23436_v1 = vsel %vm1312_vm0, %v2393_v60, %v1923_v47 }
 0x200   : > { %v21591_v12 = vpop.trf.xlu1 }
 0x201   : > { %v1969_v19 = vshrl.u32 %v21591_v12, 16 }
 0x205   : > { %v21558_v2 = vpop.trf.xlu0 }
 0x206   : > { %v1951_v7 = vpack.i.b16 %v21558_v2, %v21557_v63  ;;  %v1954_v13 = vshrl.u32 %v21558_v2, 16 }
 0x208   : > { %v1955_v15 = vpack.i.b16 %v1954_v13, %v1953_v5  ;;  %v2451_v16 = vrot.slane %v1951_v7, 4  ;;  %v21592_v18 = vpop.trf.xlu1 }
 0x209   : > { %v1967_v20 = vpack.i.b16 %v21592_v18, %v21591_v12  ;;  %v1970_v22 = vshrl.u32 %v21592_v18, 16 }
 0x20a   : > { %v2507_v23 = vrot.slane %v1955_v15, 4 }
 0x20b   : > { %v1971_v24 = vpack.i.b16 %v1970_v22, %v1969_v19  ;;  %v2449_v25 = vrot.slane %v1967_v20, 4  ;;  %v23439_v26 = vsel %vm1312_vm0, %v1967_v20, %v2451_v16 }
 0x20d   : > { %v23442_v28 = vsel %vm1312_vm0, %v2449_v25, %v1951_v7  ;;  %v2505_v29 = vrot.slane %v1971_v24, 4  ;;  %v23445_v56 = vsel %vm1312_vm0, %v1971_v24, %v2507_v23  ;;  %v21559_v36 = vpop.trf.xlu0 }
 0x20e   : > { %v1985_v44 = vshrl.u32 %v21559_v36, 16 }
 0x20f   : > { %v23448_v41 = vsel %vm1312_vm0, %v2505_v29, %v1955_v15 }
 0x210   : > { %v21593_v43 = vpop.trf.xlu1 }
 0x211   : > { %v2001_v51 = vshrl.u32 %v21593_v43, 16 }
 0x215   : > { %v21560_v31 = vpop.trf.xlu0 }
 0x216   : > { %v1983_v45 = vpack.i.b16 %v21560_v31, %v21559_v36  ;;  %v1986_v46 = vshrl.u32 %v21560_v31, 16 }
 0x218   : > { %v1987_v47 = vpack.i.b16 %v1986_v46, %v1985_v44  ;;  %v2563_v48 = vrot.slane %v1983_v45, 4  ;;  %v21594_v49 = vpop.trf.xlu1 }
 0x219   : > { %v1999_v52 = vpack.i.b16 %v21594_v49, %v21593_v43  ;;  %v2002_v53 = vshrl.u32 %v21594_v49, 16 }
 0x21a   : > { %v2619_v54 = vrot.slane %v1987_v47, 4 }
 0x21b   : > { %v2003_v37 = vpack.i.b16 %v2002_v53, %v2001_v51  ;;  %v2561_v57 = vrot.slane %v1999_v52, 4  ;;  %v23451_v60 = vsel %vm1312_vm0, %v1999_v52, %v2563_v48 }
 0x21d   : > { %v23454_v63 = vsel %vm1312_vm0, %v2561_v57, %v1983_v45  ;;  %v2617_v12 = vrot.slane %v2003_v37, 4  ;;  %v23457_v2 = vsel %vm1312_vm0, %v2003_v37, %v2619_v54  ;;  %v21561_v5 = vpop.trf.xlu0 }
 0x21e   : > { %v2017_v16 = vshrl.u32 %v21561_v5, 16 }
 0x21f   : > { %v23460_v7 = vsel %vm1312_vm0, %v2617_v12, %v1987_v47 }
 0x220   : > { %v21595_v13 = vpop.trf.xlu1 }
 0x221   : > { %v2033_v24 = vshrl.u32 %v21595_v13, 16 }
 0x225   : > { %v21562_v15 = vpop.trf.xlu0 }
 0x226   : > { %v2015_v18 = vpack.i.b16 %v21562_v15, %v21561_v5  ;;  %v2018_v19 = vshrl.u32 %v21562_v15, 16 }
 0x228   : > { %v2019_v20 = vpack.i.b16 %v2018_v19, %v2017_v16  ;;  %v2675_v22 = vrot.slane %v2015_v18, 4  ;;  %v21596_v23 = vpop.trf.xlu1 }
 0x229   : > { %v2031_v25 = vpack.i.b16 %v21596_v23, %v21595_v13  ;;  %v2034_v29 = vshrl.u32 %v21596_v23, 16 }
 0x22a   : > { %v2731_v36 = vrot.slane %v2019_v20, 4 }
 0x22b   : > { %v2035_v43 = vpack.i.b16 %v2034_v29, %v2033_v24  ;;  %v2673_v31 = vrot.slane %v2031_v25, 4  ;;  %v23463_v44 = vsel %vm1312_vm0, %v2031_v25, %v2675_v22 }
 0x22d   : > { %v23466_v45 = vsel %vm1312_vm0, %v2673_v31, %v2015_v18  ;;  %v2729_v46 = vrot.slane %v2035_v43, 4  ;;  %v23469_v47 = vsel %vm1312_vm0, %v2035_v43, %v2731_v36  ;;  %v21563_v48 = vpop.trf.xlu0 }
 0x22e   : > { %v2049_v53 = vshrl.u32 %v21563_v48, 16 }
 0x22f   : > { %v23472_v49 = vsel %vm1312_vm0, %v2729_v46, %v2019_v20 }
 0x230   : > { %v21597_v51 = vpop.trf.xlu1 }
 0x231   : > { %v2065_v13 = vshrl.u32 %v21597_v51, 16 }
 0x235   : > { %v21564_v52 = vpop.trf.xlu0 }
 0x236   : > { %v2047_v54 = vpack.i.b16 %v21564_v52, %v21563_v48  ;;  %v2050_v37 = vshrl.u32 %v21564_v52, 16 }
 0x238   : > { %v2051_v57 = vpack.i.b16 %v2050_v37, %v2049_v53  ;;  %v2787_v12 = vrot.slane %v2047_v54, 4  ;;  %v21598_v5 = vpop.trf.xlu1 }
 0x239   : > { %v2063_v15 = vpack.i.b16 %v21598_v5, %v21597_v51  ;;  %v2066_v16 = vshrl.u32 %v21598_v5, 16 }
 0x23a   : > { %v2843_v18 = vrot.slane %v2051_v57, 4 }
 0x23b   : > { %v2067_v19 = vpack.i.b16 %v2066_v16, %v2065_v13  ;;  %v2785_v22 = vrot.slane %v2063_v15, 4  ;;  %v23475_v23 = vsel %vm1312_vm0, %v2063_v15, %v2787_v12  ;;  %v23496_v15 = vperm.slane %v23403_v3, %v23267_v21 }
 0x23d   : > { %v23478_v20 = vsel %vm1312_vm0, %v2785_v22, %v2047_v54  ;;  %v2841_v24 = vrot.slane %v2067_v19, 4  ;;  %v23481_v25 = vsel %vm1312_vm0, %v2067_v19, %v2843_v18  ;;  %v23483_v29 = vpop.trf.xlu0 }
 0x23e   : > { %29274 = vst [vmem:[#allocation32_spill] sm:$0xff] %v23483_v29 }
 0x23f   : > { %v23486_v36 = vsel %vm1312_vm0, %v2841_v24, %v2051_v57 }
 0x240   : > { %v23488_v43 = vpop.trf.xlu1 }
 0x245   : > { %v23490_v31 = vpop.trf.xlu0 }
 0x246   : > { %29275 = vst [vmem:[#allocation33_spill] sm:$0xff] %v23490_v31  ;;  %v2348_v31 = vperm.slane %v23427_v50, %v23267_v21 }
 0x248   : > { %v23492_v46 = vpop.trf.xlu1  ;;  %v2361_v50 = vrot.slane %v2348_v31, 4 }
 0x24d   : > { %v21568_v48 = vpop.trf.xlu0 }
 0x24e   : > { %v1849_v53 = vshrl.u32 %v21568_v48, 16 }
 0x250   : > { %v21602_v51 = vpop.trf.xlu1 }
 0x251   : > { %v1865_v57 = vshrl.u32 %v21602_v51, 16 }
 0x255   : > { %v21569_v52 = vpop.trf.xlu0 }
 0x256   : > { %v1847_v54 = vpack.i.b16 %v21569_v52, %v21568_v48  ;;  %v1850_v37 = vshrl.u32 %v21569_v52, 16 }
 0x258   : > { %v1851_v12 = vpack.i.b16 %v1850_v37, %v1849_v53  ;;  %v2103_v5 = vrot.slane %v1847_v54, 4  ;;  %v21603_v13 = vpop.trf.xlu1  ;;  %v2137_v53 = vrot.slane %v23496_v15, 4 }
 0x259   : > { %v1863_v16 = vpack.i.b16 %v21603_v13, %v21602_v51  ;;  %v1866_v18 = vshrl.u32 %v21603_v13, 16 }
 0x25a   : > { %v2159_v19 = vrot.slane %v1851_v12, 4 }
 0x25b   : > { %v1867_v22 = vpack.i.b16 %v1866_v18, %v1865_v57  ;;  %v2104_v24 = vsel %vm1312_vm0, %v1863_v16, %v2103_v5  ;;  %v2193_v5 = vrot.slane %v23501_v34, 4 }
 0x25c   : > { %v23504_v48 = vperm.slane %v2104_v24, %v23267_v21  ;;  %v2101_v24 = vrot.slane %v1863_v16, 4  ;;  %v2236_v16 = vperm.slane %v23415_v32, %v23267_v21 }
 0x25d   : > { %v21570_v52 = vpop.trf.xlu0  ;;  %v2160_v3 = vsel %vm1312_vm0, %v1867_v22, %v2159_v19  ;;  %v2157_v19 = vrot.slane %v1867_v22, 4 }
 0x25e   : > { %v2138_v51 = vsel %vm1312_vm0, %v2137_v53, %v23504_v48  ;;  %v23511_v37 = vperm.slane %v2160_v3, %v23267_v21  ;;  %v1881_v17 = vshrl.u32 %v21570_v52, 16  ;;  %v23526_v3 = vperm.slane %v23406_v4, %v23267_v21 }
 0x25f   : > { %v23517_v57 = vperm.slane %v2138_v51, %v23273_v39  ;;  %v23530_v51 = vperm.slane %v23412_v10, %v23267_v21  ;;  %v2158_v22 = vsel %vm1312_vm0, %v2157_v19, %v1851_v12  ;;  %v2232_v4 = vperm.slane %v23418_v35, %v23267_v21 }
 0x260   : > { %v21604_v13 = vpop.trf.xlu1  ;;  %v2194_v6 = vsel %vm1312_vm0, %v2193_v5, %v23511_v37  ;;  %v2102_v5 = vsel %vm1312_vm0, %v2101_v24, %v1847_v54  ;;  %v2292_v10 = vperm.slane %v23421_v40, %v23267_v21  ;;  %v2125_v24 = vrot.slane %v23526_v3, 4 }
 0x261   : > { %v23520_v18 = vperm.slane %v2194_v6, %v23273_v39  ;;  %v1897_v6 = vshrl.u32 %v21604_v13, 16  ;;  %v23541_v0 = vperm.slane %v2102_v5, %v23267_v21  ;;  %v2249_v12 = vrot.slane %v2236_v16, 4 }
 0x262   : > { %v2288_v40 = vperm.slane %v23424_v42, %v23267_v21 }
 0x263   : > { %21618 = vxpose.binary.xlu2.c.b16.start.end [1/2] (short) (narrow) %v23520_v18, %v23517_v57, 16 }
 0x264   : > { %v2293_v9 = vrot.slane %v2288_v40, 4 }
 0x265   : > { %v21571_v53 = vpop.trf.xlu0 }
 0x266   : > { %v1879_v38 = vpack.i.b16 %v21571_v53, %v21570_v52  ;;  %v1882_v30 = vshrl.u32 %v21571_v53, 16 }
 0x268   : > { %v1883_v33 = vpack.i.b16 %v1882_v30, %v1881_v17  ;;  %v2215_v14 = vrot.slane %v1879_v38, 4  ;;  %v21605_v11 = vpop.trf.xlu1  ;;  %v23546_v30 = vperm.slane %v2158_v22, %v23267_v21 }
 0x269   : > { %v1895_v52 = vpack.i.b16 %v21605_v11, %v21604_v13  ;;  %v1898_v53 = vshrl.u32 %v21605_v11, 16  ;;  %v2181_v11 = vrot.slane %v23530_v51, 4 }
 0x26a   : > { %v2271_v54 = vrot.slane %v1883_v33, 4 }
 0x26b   : > { %v1899_v32 = vpack.i.b16 %v1898_v53, %v1897_v6  ;;  %v2213_v8 = vrot.slane %v1895_v52, 4  ;;  %v2216_v17 = vsel %vm1312_vm0, %v1895_v52, %v2215_v14  ;;  %v2237_v53 = vrot.slane %v2232_v4, 4 }
 0x26c   : > { %v2224_v35 = vperm.slane %v2216_v17, %v23267_v21  ;;  %v2126_v17 = vsel %vm1312_vm0, %v2125_v24, %v23541_v0  ;;  %v2182_v42 = vsel %vm1312_vm0, %v2181_v11, %v23546_v30 }
 0x26d   : > { %v2214_v13 = vsel %vm1312_vm0, %v2213_v8, %v1879_v38  ;;  %v2269_v19 = vrot.slane %v1899_v32, 4  ;;  %v2272_v5 = vsel %vm1312_vm0, %v1899_v32, %v2271_v54  ;;  %v21572_v6 = vpop.trf.xlu0  ;;  %v2305_v38 = vrot.slane %v2292_v10, 4 }
 0x26e   : > { %v2220_v14 = vperm.slane %v2214_v13, %v23267_v21  ;;  %v2251_v52 = vrot.slane %v2224_v35, 4  ;;  %v2280_v22 = vperm.slane %v2272_v5, %v23267_v21  ;;  %v23562_v8 = vsel %vm1312_vm0, %v2249_v12, %v2224_v35 }
 0x26f   : > { %v2270_v27 = vsel %vm1312_vm0, %v2269_v19, %v1883_v33  ;;  %v23567_v5 = vperm.slane %v2126_v17, %v23273_v39  ;;  %v23579_v35 = vperm.slane %v2182_v42, %v23273_v39  ;;  %v1913_v17 = vshrl.u32 %v21572_v6, 16 }
 0x270   : > { %v2276_v54 = vperm.slane %v2270_v27, %v23267_v21  ;;  %v21606_v32 = vpop.trf.xlu1  ;;  %v2239_v61 = vrot.slane %v2220_v14, 4  ;;  %v2238_v13 = vsel %vm1312_vm0, %v2237_v53, %v2220_v14  ;;  %v23573_v33 = vsel %vm1312_vm0, %v2305_v38, %v2280_v22 }
 0x271   : > { %v23570_v24 = vperm.slane %v2238_v13, %v23273_v39  ;;  %v23576_v12 = vsel %vm1312_vm0, %v2236_v16, %v2251_v52  ;;  %v2307_v52 = vrot.slane %v2280_v22, 4 }
 0x272   : > { %v2240_v27 = vsel %vm1312_vm0, %v2232_v4, %v2239_v61  ;;  %v2295_v11 = vrot.slane %v2276_v54, 4  ;;  %v2294_v19 = vsel %vm1312_vm0, %v2293_v9, %v2276_v54 }
 0x273   : > { %v2261_v53 = vrot.slane %v23570_v24, 4  ;;  %v23585_v14 = vperm.slane %v2294_v19, %v23273_v39  ;;  %21621 = vxpose.binary.xlu2.c.b16.start.end [1/2] (short) (narrow) %v23579_v35, %v23567_v5, 16  ;;  %v23591_v42 = vperm.slane %v2240_v27, %v23273_v39  ;;  %v23598_v13 = vsel %vm1312_vm0, %v2292_v10, %v2307_v52 }
 0x274   : > { %v2296_v16 = vsel %vm1312_vm0, %v2288_v40, %v2295_v11  ;;  %v1929_v19 = vshrl.u32 %v21606_v32, 16  ;;  %v2195_v10 = vrot.slane %v23511_v37, 4 }
 0x275   : > { %v21573_v38 = vpop.trf.xlu0  ;;  %v23594_v61 = vperm.slane %v2296_v16, %v23273_v39  ;;  %v2317_v9 = vrot.slane %v23585_v14, 4  ;;  %v2262_v40 = vsel %vm1312_vm0, 0, %v2261_v53  ;;  %v2404_v53 = vperm.slane %v23433_v62, %v23267_v21 }
 0x276   : > { %v1911_v4 = vpack.i.b16 %v21573_v38, %v21572_v6  ;;  %v1914_v54 = vshrl.u32 %v21573_v38, 16  ;;  %v2139_v6 = vrot.slane %v23504_v48, 4  ;;  %v2196_v37 = vsel %vm1312_vm0, %v23501_v34, %v2195_v10 }
 0x277   : > { %21654 = vxpose.binary.xlu1.c.b16.start.end [1/2] (short) (narrow) %v23594_v61, %v23591_v42, 16  ;;  %v2318_v22 = vsel %vm1312_vm0, 0, %v2317_v9 }
 0x278   : > { %v1915_v27 = vpack.i.b16 %v1914_v54, %v1913_v17  ;;  %v2327_v11 = vrot.slane %v1911_v4, 4  ;;  %21657 = vxpose.binary.xlu0.c.b16.start.end [1/2] (short) (narrow) %v2318_v22, %v2262_v40, 16  ;;  %v21607_v16 = vpop.trf.xlu1 }
 0x279   : > { %v1927_v59 = vpack.i.b16 %v21607_v16, %v21606_v32  ;;  %v1930_v55 = vshrl.u32 %v21607_v16, 16 }
 0x27a   : > { %v2383_v29 = vrot.slane %v1915_v27, 4 }
 0x27b   : > { %v1931_v52 = vpack.i.b16 %v1930_v55, %v1929_v19  ;;  %v2328_v38 = vsel %vm1312_vm0, %v1927_v59, %v2327_v11  ;;  %v2325_v17 = vrot.slane %v1927_v59, 4  ;;  %v2140_v55 = vsel %vm1312_vm0, %v23496_v15, %v2139_v6 }
 0x27c   : > { %v2336_v9 = vperm.slane %v2328_v38, %v23267_v21  ;;  %v2417_v59 = vrot.slane %v2404_v53, 4 }
 0x27d   : > { %v2381_v54 = vrot.slane %v1931_v52, 4  ;;  %v2384_v32 = vsel %vm1312_vm0, %v1931_v52, %v2383_v29  ;;  %v21574_v40 = vpop.trf.xlu0  ;;  %v2326_v19 = vsel %vm1312_vm0, %v2325_v17, %v1911_v4  ;;  %v23621_v29 = vperm.slane %v2140_v55, %v23273_v39 }
 0x27e   : > { %v2392_v48 = vperm.slane %v2384_v32, %v23267_v21  ;;  %v2363_v22 = vrot.slane %v2336_v9, 4  ;;  %v23624_v52 = vperm.slane %v2196_v37, %v23273_v39  ;;  %v2362_v38 = vsel %vm1312_vm0, %v2361_v50, %v2336_v9 }
 0x27f   : > { %v2382_v11 = vsel %vm1312_vm0, %v2381_v54, %v1915_v27  ;;  %v23629_v34 = vperm.slane %v2326_v19, %v23267_v21  ;;  %v23639_v17 = vperm.slane %v2362_v38, %v23273_v39  ;;  %v23652_v55 = vperm.slane %v23430_v58, %v23267_v21 }
 0x280   : > { %v21608_v62 = vpop.trf.xlu1  ;;  %v2419_v16 = vrot.slane %v2392_v48, 4  ;;  %v2418_v15 = vsel %vm1312_vm0, %v2417_v59, %v2392_v48  ;;  %v2364_v4 = vsel %vm1312_vm0, %v2348_v31, %v2363_v22  ;;  %v23634_v27 = vperm.slane %v2382_v11, %v23267_v21 }
 0x281   : > { %29277 = vst [vmem:[#allocation35_spill] sm:$0xff] %v23639_v17  ;;  %v23642_v9 = vperm.slane %v2418_v15, %v23273_v39  ;;  %v2372_v54 = vperm.slane %v2364_v4, %v23273_v39  ;;  %v2351_v31 = vrot.slane %v23629_v34, 4  ;;  %v23656_v50 = vperm.slane %v23436_v1, %v23267_v21 }
 0x282   : > { %v2420_v6 = vsel %vm1312_vm0, %v2404_v53, %v2419_v16  ;;  %29276 = vst [vmem:[#allocation34_spill] sm:$0xff] %v23634_v27  ;;  %v1945_v53 = vshrl.u32 %v21574_v40, 16  ;;  %v2407_v22 = vrot.slane %v23634_v27, 4  ;;  %v1961_v19 = vshrl.u32 %v21608_v62, 16 }
 0x283   : > { %21624 = vxpose.binary.xlu2.c.b16.start.end [1/2] (short) (narrow) %v23624_v52, %v23621_v29, 16  ;;  %29278 = vst [vmem:[#allocation36_spill] sm:$0xff] %v23642_v9  ;;  %v2428_v32 = vperm.slane %v2420_v6, %v23273_v39  ;;  %v2352_v59 = vsel %vm1312_vm0, %v23652_v55, %v2351_v31  ;;  %v2209_v4 = vrot.slane %v23520_v18, 4  ;;  %v2153_v58 = vrot.slane %v23517_v57, 4 }
 0x284   : > { %v2408_v15 = vsel %vm1312_vm0, %v23656_v50, %v2407_v22  ;;  %v23665_v6 = vperm.slane %v2352_v59, %v23273_v39 }
 0x285   : > { %v21575_v10 = vpop.trf.xlu0  ;;  %v23668_v1 = vperm.slane %v2408_v15, %v23273_v39  ;;  %v23678_v15 = vperm.slane %v23439_v26, %v23267_v21 }
 0x286   : > { %v1946_v48 = vshrl.u32 %v21575_v10, 16  ;;  %v1943_v11 = vpack.i.b16 %v21575_v10, %v21574_v40  ;;  %v2379_v40 = vrot.slane %v2372_v54, 4  ;;  %v2435_v10 = vrot.slane %v2428_v32, 4 }
 0x287   : > { %21666 = vxpose.binary.xlu1.c.b16.start.end [1/2] (short) (narrow) %v23642_v9, %v23639_v17, 16  ;;  %v2375_v18 = vrot.slane %v23665_v6, 4  ;;  %v2431_v57 = vrot.slane %v23668_v1, 4 }
 0x288   : > { %21672 = vxpose.binary.xlu0.c.b16.start.end [1/2] (short) (narrow) %v2428_v32, %v2372_v54, 16  ;;  %v21609_v37 = vpop.trf.xlu1  ;;  %v1947_v16 = vpack.i.b16 %v1946_v48, %v1945_v53  ;;  %v2439_v9 = vrot.slane %v1943_v11, 4  ;;  %v2154_v53 = vsel %vm1312_vm0, 0, %v2153_v58  ;;  %v2210_v48 = vsel %vm1312_vm0, 0, %v2209_v4 }
 0x289   : > { %v1962_v38 = vshrl.u32 %v21609_v37, 16  ;;  %v1959_v27 = vpack.i.b16 %v21609_v37, %v21608_v62  ;;  %v23682_v62 = vperm.slane %v23445_v56, %v23267_v21  ;;  %v2380_v54 = vsel %vm1312_vm0, 0, %v2379_v40 }
 0x28a   : > { %v2495_v17 = vrot.slane %v1947_v16, 4  ;;  %v2436_v32 = vsel %vm1312_vm0, 0, %v2435_v10  ;;  %v2432_v26 = vsel %vm1312_vm0, 0, %v2431_v57  ;;  %v2183_v4 = vrot.slane %v23546_v30, 4 }
 0x28b   : > { %v1963_v31 = vpack.i.b16 %v1962_v38, %v1961_v19  ;;  %v2440_v22 = vsel %vm1312_vm0, %v1959_v27, %v2439_v9  ;;  %v2473_v19 = vrot.slane %v23678_v15, 4  ;;  %v2529_v56 = vrot.slane %v23682_v62, 4 }
 0x28c   : > { %v23687_v37 = vperm.slane %v2440_v22, %v23267_v21  ;;  %v2127_v38 = vrot.slane %v23541_v0, 4  ;;  %v2437_v57 = vrot.slane %v1959_v27, 4 }
 0x28d   : > { %v2496_v59 = vsel %vm1312_vm0, %v1963_v31, %v2495_v17  ;;  %v2376_v17 = vsel %vm1312_vm0, 0, %v2375_v18  ;;  %v2184_v18 = vsel %vm1312_vm0, %v23530_v51, %v2183_v4  ;;  %v2493_v0 = vrot.slane %v1963_v31, 4 }
 0x28e   : > { %v23690_v9 = vperm.slane %v2496_v59, %v23267_v21  ;;  %v2474_v58 = vsel %vm1312_vm0, %v2473_v19, %v23687_v37  ;;  %v23712_v59 = vperm.slane %v2184_v18, %v23273_v39  ;;  %v2456_v51 = vperm.slane %v23442_v28, %v23267_v21 }
 0x28f   : > { %v2480_v10 = vperm.slane %v2474_v58, %v23273_v39 }
 0x290   : > { %v2530_v40 = vsel %vm1312_vm0, %v2529_v56, %v23690_v9  ;;  %v21610_v22 = vpop.trf.xlu1 }
 0x293   : > { %21627 = vxpose.binary.xlu2.c.b16.start.end [1/2] (short) (narrow) %v2210_v48, %v2154_v53, 16  ;;  %v2536_v53 = vperm.slane %v2530_v40, %v23273_v39  ;;  %v2128_v48 = vsel %vm1312_vm0, %v23526_v3, %v2127_v38  ;;  %v2494_v3 = vsel %vm1312_vm0, %v2493_v0, %v1947_v16  ;;  %v21576_v38 = vpop.trf.xlu0  ;;  %v2149_v40 = vrot.slane %v23567_v5, 4 }
 0x294   : > { %v23709_v30 = vperm.slane %v2128_v48, %v23273_v39  ;;  %v2500_v56 = vperm.slane %v2494_v3, %v23267_v21  ;;  %v2205_v48 = vrot.slane %v23579_v35, 4 }
 0x297   : > { %21684 = vxpose.binary.xlu1.c.b16.start.end [1/2] (short) (narrow) %v2436_v32, %v2380_v54, 16  ;;  %v2489_v54 = vrot.slane %v2480_v10, 4  ;;  %v2545_v32 = vrot.slane %v2536_v53, 4 }
 0x298   : > { %21687 = vxpose.binary.xlu0.c.b16.start.end [1/2] (short) (narrow) %v2432_v26, %v2376_v17, 16  ;;  %v2438_v17 = vsel %vm1312_vm0, %v2437_v57, %v1943_v11  ;;  %v2512_v26 = vperm.slane %v23448_v41, %v23267_v21  ;;  %v2461_v11 = vrot.slane %v2456_v51, 4  ;;  %v21611_v16 = vpop.trf.xlu1  ;;  %v2519_v41 = vrot.slane %v2500_v56, 4 }
 0x299   : > { %v2490_v27 = vsel %vm1312_vm0, 0, %v2489_v54  ;;  %v2546_v31 = vsel %vm1312_vm0, 0, %v2545_v32  ;;  %v2444_v19 = vperm.slane %v2438_v17, %v23267_v21  ;;  %v1993_v57 = vshrl.u32 %v21610_v22, 16 }
 0x29a   : > { %v2517_v4 = vrot.slane %v2512_v26, 4  ;;  %v1994_v0 = vshrl.u32 %v21611_v16, 16  ;;  %v2150_v32 = vsel %vm1312_vm0, 0, %v2149_v40  ;;  %v2206_v17 = vsel %vm1312_vm0, 0, %v2205_v48 }
 0x29b   : > { %v2462_v58 = vsel %vm1312_vm0, %v2461_v11, %v2444_v19  ;;  %v2463_v18 = vrot.slane %v2444_v19, 4  ;;  %v2520_v5 = vsel %vm1312_vm0, %v2512_v26, %v2519_v41  ;;  %v23740_v35 = vpack.i.b16 %v21611_v16, %v21610_v22 }
 0x29c   : > { %v2518_v28 = vsel %vm1312_vm0, %v2517_v4, %v2500_v56  ;;  %v23731_v54 = vperm.slane %v2462_v58, %v23273_v39  ;;  %v1977_v56 = vshrl.u32 %v21576_v38, 16  ;;  %v23750_v58 = vperm.slane %v2520_v5, %v23273_v39 }
 0x29d   : > { %v2464_v3 = vsel %vm1312_vm0, %v2456_v51, %v2463_v18  ;;  %v2549_v51 = vrot.slane %v23740_v35, 4  ;;  %v2531_v40 = vrot.slane %v23690_v9, 4 }
 0x29e   : > { %v23747_v4 = vperm.slane %v2464_v3, %v23273_v39  ;;  %v2211_v3 = vrot.slane %v23624_v52, 4 }
 0x2a3   : > { %21630 = vxpose.binary.xlu2.c.b16.start.end [1/2] (short) (narrow) %v23712_v59, %v23709_v30, 16 }
 0x2a7   : > { %21699 = vxpose.binary.xlu1.c.b16.start.end [1/2] (short) (narrow) %v2546_v31, %v2490_v27, 16  ;;  %v23742_v27 = vpack.i.b16 %v1994_v0, %v1993_v57  ;;  %v2485_v31 = vrot.slane %v23731_v54, 4  ;;  %v2568_v0 = vperm.slane %v23454_v63, %v23267_v21 }
 0x2a8   : > { %21690 = vxpose.binary.xlu0.c.b16.start.end [1/2] (short) (narrow) %v2536_v53, %v2480_v10, 16  ;;  %v23734_v10 = vperm.slane %v2518_v28, %v23273_v39  ;;  %v21577_v53 = vpop.trf.xlu0  ;;  %v2475_v28 = vrot.slane %v23687_v37, 4  ;;  %v2532_v37 = vsel %vm1312_vm0, %v23682_v62, %v2531_v40  ;;  %v21612_v40 = vpop.trf.xlu1 }
 0x2a9   : > { %v1978_v11 = vshrl.u32 %v21577_v53, 16  ;;  %v2605_v22 = vrot.slane %v23742_v27, 4  ;;  %v2486_v26 = vsel %vm1312_vm0, 0, %v2485_v31  ;;  %v1975_v48 = vpack.i.b16 %v21577_v53, %v21576_v38 }
 0x2aa   : > { %v2541_v19 = vrot.slane %v23734_v10, 4  ;;  %v2155_v53 = vrot.slane %v23621_v29, 4  ;;  %v23778_v63 = vperm.slane %v2532_v37, %v23273_v39 }
 0x2ab   : > { %v1979_v18 = vpack.i.b16 %v1978_v11, %v1977_v56  ;;  %v2550_v41 = vsel %vm1312_vm0, %v2549_v51, %v1975_v48  ;;  %v2212_v56 = vsel %vm1312_vm0, 0, %v2211_v3  ;;  %v2207_v3 = vrot.slane %v23712_v59, 4 }
 0x2ac   : > { %v2542_v16 = vsel %vm1312_vm0, 0, %v2541_v19  ;;  %v2556_v9 = vperm.slane %v2550_v41, %v23267_v21  ;;  %v2156_v19 = vsel %vm1312_vm0, 0, %v2155_v53  ;;  %v2547_v52 = vrot.slane %v23778_v63, 4 }
 0x2ad   : > { %v2606_v57 = vsel %vm1312_vm0, %v2605_v22, %v1979_v18  ;;  %v2151_v53 = vrot.slane %v23709_v30, 4  ;;  %v2572_v30 = vperm.slane %v23451_v60, %v23267_v21  ;;  %v2628_v59 = vperm.slane %v23457_v2, %v23267_v21 }
 0x2ae   : > { %v2612_v38 = vperm.slane %v2606_v57, %v23267_v21 }
 0x2b3   : > { %21633 = vxpose.binary.xlu2.c.b16.start.end [1/2] (short) (narrow) %v2206_v17, %v2150_v32, 16  ;;  %v2624_v32 = vperm.slane %v23460_v7, %v23267_v21  ;;  %v2476_v17 = vsel %vm1312_vm0, %v23678_v15, %v2475_v28  ;;  %v2573_v7 = vrot.slane %v2568_v0, 4  ;;  %v2631_v28 = vrot.slane %v2612_v38, 4 }
 0x2b4   : > { %v23775_v5 = vperm.slane %v2476_v17, %v23273_v39 }
 0x2b5   : > { %v2629_v31 = vrot.slane %v2624_v32, 4  ;;  %v2574_v15 = vsel %vm1312_vm0, %v2573_v7, %v2556_v9  ;;  %v2632_v57 = vsel %vm1312_vm0, %v2624_v32, %v2631_v28  ;;  %v2551_v7 = vrot.slane %v1975_v48, 4 }
 0x2b6   : > { %v2491_v29 = vrot.slane %v23775_v5, 4  ;;  %v23787_v11 = vperm.slane %v2574_v15, %v23273_v39  ;;  %v2640_v37 = vperm.slane %v2632_v57, %v23273_v39  ;;  %v21578_v15 = vpop.trf.xlu0 }
 0x2b7   : > { %21702 = vxpose.binary.xlu1.c.b16.start.end [1/2] (short) (narrow) %v23750_v58, %v23747_v4, 16  ;;  %v2630_v62 = vsel %vm1312_vm0, %v2629_v31, %v2612_v38  ;;  %v2607_v31 = vrot.slane %v1979_v18, 4  ;;  %v2152_v38 = vsel %vm1312_vm0, 0, %v2151_v53  ;;  %v2009_v53 = vshrl.u32 %v21578_v15, 16 }
 0x2b8   : > { %21705 = vxpose.binary.xlu0.c.b16.start.end [1/2] (short) (narrow) %v2542_v16, %v2486_v26, 16  ;;  %v23790_v51 = vperm.slane %v2630_v62, %v23273_v39  ;;  %v2492_v22 = vsel %vm1312_vm0, 0, %v2491_v29  ;;  %v2548_v26 = vsel %vm1312_vm0, 0, %v2547_v52  ;;  %v2575_v16 = vrot.slane %v2556_v9, 4 }
 0x2b9   : > { %v2655_v9 = vrot.slane %v2640_v37, 4  ;;  %v2608_v32 = vsel %vm1312_vm0, %v23742_v27, %v2607_v31  ;;  %v2585_v27 = vrot.slane %v2572_v30, 4 }
 0x2ba   : > { %v2576_v41 = vsel %vm1312_vm0, %v2568_v0, %v2575_v16  ;;  %v2552_v0 = vsel %vm1312_vm0, %v23740_v35, %v2551_v7  ;;  %v2616_v52 = vperm.slane %v2608_v32, %v23267_v21  ;;  %v2025_v35 = vshrl.u32 %v21612_v40, 16 }
 0x2bb   : > { %v2584_v17 = vperm.slane %v2576_v41, %v23273_v39  ;;  %v2656_v18 = vsel %vm1312_vm0, 0, %v2655_v9  ;;  %v2560_v29 = vperm.slane %v2552_v0, %v23267_v21  ;;  %v23830_v9 = vperm.slane %v23573_v33, %v23273_v39 }
 0x2bc   : > { %v2643_v7 = vrot.slane %v2616_v52, 4  ;;  %v2736_v33 = vperm.slane %v23472_v49, %v23267_v21 }
 0x2bd   : > { %v2599_v62 = vrot.slane %v2584_v17, 4  ;;  %v2586_v41 = vsel %vm1312_vm0, %v2585_v27, %v2560_v29  ;;  %v2587_v57 = vrot.slane %v2560_v29, 4 }
 0x2be   : > { %v21579_v16 = vpop.trf.xlu0  ;;  %v23819_v31 = vperm.slane %v2586_v41, %v23273_v39  ;;  %v2644_v32 = vsel %vm1312_vm0, %v2628_v59, %v2643_v7  ;;  %v2741_v49 = vrot.slane %v2736_v33, 4 }
 0x2bf   : > { %v2600_v48 = vsel %vm1312_vm0, 0, %v2599_v62  ;;  %v2588_v0 = vsel %vm1312_vm0, %v2572_v30, %v2587_v57  ;;  %v23848_v30 = vperm.slane %v2644_v32, %v23273_v39 }
 0x2c3   : > { %21636 = vxpose.binary.xlu2.c.b16.start.end [1/2] (short) (narrow) %v2212_v56, %v2156_v19, 16  ;;  %v2208_v19 = vsel %vm1312_vm0, 0, %v2207_v3  ;;  %v21613_v56 = vpop.trf.xlu1  ;;  %v2010_v3 = vshrl.u32 %v21579_v16, 16 }
 0x2c4   : > { %v2023_v28 = vpack.i.b16 %v21613_v56, %v21612_v40  ;;  %v23826_v40 = vperm.slane %v23562_v8, %v23273_v39  ;;  %v2680_v8 = vperm.slane %v23466_v45, %v23267_v21 }
 0x2c7   : > { %21714 = vxpose.binary.xlu1.c.b16.start.end [1/2] (short) (narrow) %v23790_v51, %v23787_v11, 16 }
 0x2c8   : > { %21708 = vxpose.binary.xlu0.c.b16.start.end [1/2] (short) (narrow) %v2548_v26, %v2492_v22, 16  ;;  %v2026_v22 = vshrl.u32 %v21613_v56, 16  ;;  %v2641_v26 = vrot.slane %v2628_v59, 4  ;;  %v2601_v56 = vrot.slane %v23819_v31, 4 }
 0x2ca   : > { %v2027_v60 = vpack.i.b16 %v2026_v22, %v2025_v35  ;;  %v2642_v2 = vsel %vm1312_vm0, %v2641_v26, %v2616_v52  ;;  %v2602_v35 = vsel %vm1312_vm0, 0, %v2601_v56  ;;  %v2685_v22 = vrot.slane %v2680_v8, 4 }
 0x2cb   : > { %v23822_v62 = vperm.slane %v2642_v2, %v23273_v39 }
 0x2d3   : > { %21639 = vxpose.binary.xlu2.c.b16.start.end [1/2] (short) (narrow) %v2208_v19, %v2152_v38, 16  ;;  %v2007_v38 = vpack.i.b16 %v21579_v16, %v21578_v15  ;;  %v2011_v19 = vpack.i.b16 %v2010_v3, %v2009_v53  ;;  %v23845_v15 = vperm.slane %v2588_v0, %v23273_v39 }
 0x2d5   : > { %v2663_v7 = vrot.slane %v2007_v38, 4 }
 0x2d7   : > { %21723 = vxpose.binary.xlu1.c.b16.start.end [1/2] (short) (narrow) %v2656_v18, %v2600_v48, 16  ;;  %v2657_v48 = vrot.slane %v23822_v62, 4  ;;  %v2664_v32 = vsel %vm1312_vm0, %v2023_v28, %v2663_v7 }
 0x2d8   : > { %21717 = vxpose.binary.xlu0.c.b16.start.end [1/2] (short) (narrow) %v2640_v37, %v2584_v17, 16  ;;  %v2661_v17 = vrot.slane %v2023_v28, 4  ;;  %v2717_v37 = vrot.slane %v2027_v60, 4 }
 0x2d9   : > { %v2658_v45 = vsel %vm1312_vm0, 0, %v2657_v48  ;;  %v2684_v48 = vperm.slane %v23463_v44, %v23267_v21 }
 0x2da   : > { %v2662_v18 = vsel %vm1312_vm0, %v2661_v17, %v2007_v38  ;;  %v2718_v29 = vsel %vm1312_vm0, %v2717_v37, %v2011_v19  ;;  %v2719_v17 = vrot.slane %v2011_v19, 4  ;;  %v2672_v19 = vperm.slane %v2664_v32, %v23267_v21 }
 0x2db   : > { %v2668_v59 = vperm.slane %v2662_v18, %v23267_v21  ;;  %v2724_v52 = vperm.slane %v2718_v29, %v23267_v21 }
 0x2dc   : > { %v2720_v56 = vsel %vm1312_vm0, %v2027_v60, %v2719_v17  ;;  %v2697_v60 = vrot.slane %v2684_v48, 4 }
 0x2dd   : > { %v2686_v27 = vsel %vm1312_vm0, %v2685_v22, %v2668_v59  ;;  %v2742_v26 = vsel %vm1312_vm0, %v2741_v49, %v2724_v52  ;;  %v2687_v37 = vrot.slane %v2668_v59, 4  ;;  %v2743_v0 = vrot.slane %v2724_v52, 4  ;;  %v21580_v52 = vpop.trf.xlu0 }
 0x2de   : > { %v2692_v16 = vperm.slane %v2686_v27, %v23273_v39  ;;  %v2748_v41 = vperm.slane %v2742_v26, %v23273_v39  ;;  %v2728_v29 = vperm.slane %v2720_v56, %v23267_v21  ;;  %v2699_v26 = vrot.slane %v2672_v19, 4 }
 0x2df   : > { %v2688_v18 = vsel %vm1312_vm0, %v2680_v8, %v2687_v37  ;;  %v2744_v38 = vsel %vm1312_vm0, %v2736_v33, %v2743_v0  ;;  %v23886_v8 = vperm.slane %v23598_v13, %v23273_v39  ;;  %v2698_v33 = vsel %vm1312_vm0, %v2697_v60, %v2672_v19 }
 0x2e0   : > { %v2709_v2 = vrot.slane %v2692_v16, 4  ;;  %v2765_v57 = vrot.slane %v2748_v41, 4  ;;  %v23875_v59 = vperm.slane %v2688_v18, %v23273_v39  ;;  %v23878_v28 = vperm.slane %v2744_v38, %v23273_v39 }
 0x2e1   : > { %v2041_v38 = vshrl.u32 %v21580_v52, 16  ;;  %v2321_v60 = vrot.slane %v23830_v9, 4 }
 0x2e2   : > { %v2710_v53 = vsel %vm1312_vm0, 0, %v2709_v2  ;;  %v2766_v3 = vsel %vm1312_vm0, 0, %v2765_v57  ;;  %v2767_v22 = vrot.slane %v23878_v28, 4 }
 0x2e3   : > { %21642 = vxpose.binary.xlu2.c.b16.start.end [1/2] (short) (narrow) %v23830_v9, %v23826_v40, 16  ;;  %v2848_v9 = vperm.slane %v23486_v36, %v23267_v21 }
 0x2e4   : > { %v2768_v2 = vsel %vm1312_vm0, 0, %v2767_v22  ;;  %v2322_v22 = vsel %vm1312_vm0, 0, %v2321_v60 }
 0x2e5   : > { %v21581_v17 = vpop.trf.xlu0 }
 0x2e6   : > { %v2042_v19 = vshrl.u32 %v21581_v17, 16 }
 0x2e7   : > { %21732 = vxpose.binary.xlu1.c.b16.start.end [1/2] (short) (narrow) %v23848_v30, %v23845_v15, 16 }
 0x2e8   : > { %21729 = vxpose.binary.xlu0.c.b16.start.end [1/2] (short) (narrow) %v2658_v45, %v2602_v35, 16  ;;  %v2711_v45 = vrot.slane %v23875_v59, 4 }
 0x2f3   : > { %21645 = vxpose.binary.xlu2.c.b16.start.end [1/2] (short) (narrow) %v23585_v14, %v23570_v24, 16  ;;  %v2740_v24 = vperm.slane %v23469_v47, %v23267_v21  ;;  %v21614_v14 = vpop.trf.xlu1  ;;  %v23882_v47 = vperm.slane %v23576_v12, %v23273_v39  ;;  %v23897_v12 = vperm.slane %v2698_v33, %v23273_v39 }
 0x2f4   : > { %v2057_v57 = vshrl.u32 %v21614_v14, 16 }
 0x2f5   : > { %v2753_v44 = vrot.slane %v2740_v24, 4 }
 0x2f7   : > { %21741 = vxpose.binary.xlu1.c.b16.start.end [1/2] (short) (narrow) %v2766_v3, %v2710_v53, 16  ;;  %v2754_v35 = vsel %vm1312_vm0, %v2753_v44, %v2728_v29  ;;  %v2700_v3 = vsel %vm1312_vm0, %v2684_v48, %v2699_v26 }
 0x2f8   : > { %21738 = vxpose.binary.xlu0.c.b16.start.end [1/2] (short) (narrow) %v2748_v41, %v2692_v16, 16  ;;  %v23900_v27 = vperm.slane %v2754_v35, %v23273_v39  ;;  %v2755_v16 = vrot.slane %v2728_v29, 4  ;;  %v2712_v41 = vsel %vm1312_vm0, 0, %v2711_v45  ;;  %v2708_v56 = vperm.slane %v2700_v3, %v23273_v39 }
 0x2f9   : > { %v2265_v29 = vrot.slane %v23826_v40, 4  ;;  %v2043_v45 = vpack.i.b16 %v2042_v19, %v2041_v38  ;;  %v2792_v40 = vperm.slane %v23478_v20, %v23267_v21  ;;  %v2853_v3 = vrot.slane %v2848_v9, 4 }
 0x2fa   : > { %v2756_v7 = vsel %vm1312_vm0, %v2740_v24, %v2755_v16  ;;  %v2715_v48 = vrot.slane %v2708_v56, 4  ;;  %v2039_v24 = vpack.i.b16 %v21581_v17, %v21580_v52  ;;  %v2267_v19 = vrot.slane %v23882_v47, 4 }
 0x2fb   : > { %v21615_v13 = vpop.trf.xlu1  ;;  %v2764_v18 = vperm.slane %v2756_v7, %v23273_v39 }
 0x2fc   : > { %v2058_v53 = vshrl.u32 %v21615_v13, 16  ;;  %v2055_v37 = vpack.i.b16 %v21615_v13, %v21614_v14  ;;  %v2266_v14 = vsel %vm1312_vm0, 0, %v2265_v29  ;;  %v2716_v52 = vsel %vm1312_vm0, 0, %v2715_v48 }
 0x2fd   : > { %v2771_v35 = vrot.slane %v2764_v18, 4  ;;  %v2323_v29 = vrot.slane %v23886_v8, 4 }
 0x2fe   : > { %v2059_v0 = vpack.i.b16 %v2058_v53, %v2057_v57  ;;  %v2773_v44 = vrot.slane %v2055_v37, 4  ;;  %v2797_v53 = vrot.slane %v2792_v40, 4 }
 0x300   : > { %v2829_v33 = vrot.slane %v2059_v0, 4  ;;  %v2774_v13 = vsel %vm1312_vm0, %v2773_v44, %v2039_v24 }
 0x302   : > { %v2830_v26 = vsel %vm1312_vm0, %v2829_v33, %v2043_v45 }
 0x303   : > { %21648 = vxpose.binary.xlu2.c.b16.start.end [1/2] (short) (narrow) %v23886_v8, %v23882_v47, 16  ;;  %v2836_v57 = vperm.slane %v2830_v26, %v23267_v21  ;;  %v21616_v33 = vpop.trf.xlu1 }
 0x304   : > { %v23894_v49 = vpop.trf.xlu2 }
 0x305   : > { %29279 = vst [vmem:[#allocation37_spill] sm:$0xff] %v23894_v49  ;;  %v2854_v17 = vsel %vm1312_vm0, %v2853_v3, %v2836_v57  ;;  %v2855_v36 = vrot.slane %v2836_v57, 4 }
 0x306   : > { %v23938_v44 = vperm.slane %v2854_v17, %v23273_v39  ;;  %v2098_v17 = vshrl.u32 %v23492_v46, 16 }
 0x307   : > { %21750 = vxpose.binary.xlu1.c.b16.start.end [1/2] (short) (narrow) %v23900_v27, %v23897_v12, 16 }
 0x308   : > { %21747 = vxpose.binary.xlu0.c.b16.start.end [1/2] (short) (narrow) %v2768_v2, %v2712_v41, 16  ;;  %v2772_v41 = vsel %vm1312_vm0, 0, %v2771_v35  ;;  %v2780_v2 = vperm.slane %v2774_v13, %v23267_v21  ;;  %v2856_v35 = vsel %vm1312_vm0, %v2848_v9, %v2855_v36  ;;  %v2877_v8 = vrot.slane %v23938_v44, 4 }
 0x309   : > { %v2097_v36 = vshrl.u32 %v23488_v43, 16 }
 0x30a   : > { %v2798_v7 = vsel %vm1312_vm0, %v2797_v53, %v2780_v2  ;;  %v2799_v38 = vrot.slane %v2780_v2, 4 }
 0x30b   : > { %v23935_v60 = vperm.slane %v2798_v7, %v23273_v39  ;;  %v21617_v7 = vpop.trf.xlu1 }
 0x30c   : > { %v23908_v32 = vpop.trf.xlu2  ;;  %v2800_v48 = vsel %vm1312_vm0, %v2792_v40, %v2799_v38 }
 0x30d   : > { %v2821_v47 = vrot.slane %v23935_v60, 4  ;;  %v23959_v9 = vperm.slane %v2800_v48, %v23273_v39  ;;  %v2090_v48 = vshrl.u32 %v21617_v7, 16 }
 0x313   : > { %21651 = vxpose.binary.xlu2.c.b16.start.end [1/2] (short) (narrow) %v2322_v22, %v2266_v14, 16  ;;  %v2268_v14 = vsel %vm1312_vm0, 0, %v2267_v19  ;;  %v2324_v22 = vsel %vm1312_vm0, 0, %v2323_v29 }
 0x314   : > { %v23918_v16 = vpop.trf.xlu2 }
 0x315   : > { %29280 = vst [vmem:[#allocation38_spill] sm:$0xff] %v23918_v16 }
 0x317   : > { %21759 = vxpose.binary.xlu1.c.b16.start.end [1/2] (short) (narrow) %v2772_v41, %v2716_v52, 16  ;;  %v23962_v52 = vperm.slane %v2856_v35, %v23273_v39  ;;  %v21582_v41 = vpop.trf.xlu0  ;;  %v2263_v35 = vrot.slane %v23591_v42, 4 }
 0x318   : > { %21756 = vxpose.binary.xlu0.c.b16.start.end [1/2] (short) (narrow) %v2764_v18, %v2708_v56, 16  ;;  %v2775_v56 = vrot.slane %v2039_v24, 4  ;;  %v2831_v18 = vrot.slane %v2043_v45, 4  ;;  %v23950_v24 = vperm.slane %v23475_v23, %v23267_v21  ;;  %v23954_v45 = vperm.slane %v23481_v25, %v23267_v21 }
 0x319   : > { %v2822_v23 = vsel %vm1312_vm0, 0, %v2821_v47  ;;  %v2878_v25 = vsel %vm1312_vm0, 0, %v2877_v8  ;;  %v23986_v47 = vpack.i.b16 %v23492_v46, %v23488_v43  ;;  %v23988_v8 = vpack.i.b16 %v2098_v17, %v2097_v36 }
 0x31a   : > { %v2776_v13 = vsel %vm1312_vm0, %v2055_v37, %v2775_v56  ;;  %v2832_v26 = vsel %vm1312_vm0, %v2059_v0, %v2831_v18  ;;  %v2809_v2 = vrot.slane %v23950_v24, 4  ;;  %v2865_v57 = vrot.slane %v23954_v45, 4 }
 0x31b   : > { %v2784_v37 = vperm.slane %v2776_v13, %v23267_v21  ;;  %v2840_v0 = vperm.slane %v2832_v26, %v23267_v21  ;;  %v2089_v18 = vshrl.u32 %v21616_v33, 16  ;;  %v29282_v13 = vld [vmem:[#allocation33_spill] sm:$0xff]  ;;  %v2897_v43 = vrot.slane %v23986_v47, 4 }
 0x31c   : > { %v23930_v20 = vpop.trf.xlu2  ;;  %v2082_v26 = vshrl.u32 %v29282_v13, 16  ;;  %v2953_v46 = vrot.slane %v23988_v8, 4  ;;  %v2073_v17 = vshrl.u32 %v21582_v41, 16 }
 0x31d   : > { %v2810_v53 = vsel %vm1312_vm0, %v2809_v2, %v2784_v37  ;;  %v2866_v3 = vsel %vm1312_vm0, %v2865_v57, %v2840_v0  ;;  %v23991_v57 = vpack.i.b16 %v21617_v7, %v21616_v33  ;;  %v23993_v42 = vpack.i.b16 %v2090_v48, %v2089_v18 }
 0x31e   : > { %v2816_v29 = vperm.slane %v2810_v53, %v23273_v39  ;;  %v2872_v56 = vperm.slane %v2866_v3, %v23273_v39  ;;  %v29283_v53 = vld [vmem:[#allocation32_spill] sm:$0xff] }
 0x31f   : > { %v2081_v3 = vshrl.u32 %v29283_v53, 16  ;;  %v2885_v48 = vrot.slane %v23991_v57, 4 }
 0x320   : > { %v2881_v2 = vrot.slane %v2872_v56, 4 }
 0x321   : > { %v2083_v18 = vpack.i.b16 %v2082_v26, %v2081_v3 }
 0x322   : > { %v2882_v7 = vsel %vm1312_vm0, 0, %v2881_v2 }
 0x323   : > { %21660 = vxpose.binary.xlu2.c.b16.start.end [1/2] (short) (narrow) %v2324_v22, %v2268_v14, 16  ;;  %v2319_v14 = vrot.slane %v23594_v61, 4  ;;  %v2264_v61 = vsel %vm1312_vm0, 0, %v2263_v35  ;;  %v2941_v35 = vrot.slane %v23993_v42, 4  ;;  %v2954_v16 = vsel %vm1312_vm0, %v2953_v46, %v2083_v18 }
 0x324   : > { %v23956_v40 = vpop.trf.xlu2  ;;  %v2960_v26 = vperm.slane %v2954_v16, %v23267_v21  ;;  %v29284_v16 = vld [vmem:[#allocation34_spill] sm:$0xff] }
 0x325   : > { %29281 = vst [vmem:[#allocation39_spill] sm:$0xff] %v23956_v40 }
 0x327   : > { %21768 = vxpose.binary.xlu1.c.b16.start.end [1/2] (short) (narrow) %v23962_v52, %v23959_v9, 16 }
 0x328   : > { %21765 = vxpose.binary.xlu0.c.b16.start.end [1/2] (short) (narrow) %v2878_v25, %v2822_v23, 16  ;;  %v21583_v23 = vpop.trf.xlu0  ;;  %v2825_v25 = vrot.slane %v2816_v29, 4 }
 0x329   : > { %v2071_v49 = vpack.i.b16 %v21583_v23, %v21582_v41  ;;  %v2405_v41 = vrot.slane %v23656_v50, 4 }
 0x32a   : > { %v2826_v33 = vsel %vm1312_vm0, 0, %v2825_v25 }
 0x32b   : > { %v2886_v2 = vsel %vm1312_vm0, %v2885_v48, %v2071_v49 }
 0x32c   : > { %v21626_v38 = vpop.trf.xlu2 }
 0x32d   : > { %v5095_v19 = vrot.slane %v21626_v38, 4  ;;  %v2074_v38 = vshrl.u32 %v21583_v23, 16 }
 0x32f   : > { %v23982_v22 = vsel %vm1312_vm0, %v5095_v19, %v23908_v32  ;;  %v2320_v32 = vsel %vm1312_vm0, 0, %v2319_v14  ;;  %v2079_v19 = vpack.i.b16 %v29282_v13, %v29283_v53  ;;  %v2811_v14 = vrot.slane %v2784_v37, 4 }
 0x330   : > { %v2075_v25 = vpack.i.b16 %v2074_v38, %v2073_v17 }
 0x331   : > { %v2812_v53 = vsel %vm1312_vm0, %v23950_v24, %v2811_v14 }
 0x332   : > { %v2942_v40 = vsel %vm1312_vm0, %v2941_v35, %v2075_v25  ;;  %v24029_v24 = vperm.slane %v2812_v53, %v23273_v39 }
 0x333   : > { %21663 = vxpose.binary.xlu2.c.b16.start.end [1/2] (short) (narrow) %v2320_v32, %v2264_v61, 16  ;;  %v2867_v61 = vrot.slane %v2840_v0, 4  ;;  %v2898_v32 = vsel %vm1312_vm0, %v2897_v43, %v2079_v19  ;;  %v2948_v23 = vperm.slane %v2942_v40, %v23267_v21  ;;  %v2406_v43 = vsel %vm1312_vm0, %v2405_v41, %v29284_v16 }
 0x334   : > { %v24000_v36 = vpop.trf.xlu2  ;;  %v2904_v13 = vperm.slane %v2898_v32, %v23267_v21  ;;  %v24038_v17 = vperm.slane %v2406_v43, %v23273_v39  ;;  %v2827_v38 = vrot.slane %v24029_v24, 4  ;;  %v2899_v43 = vrot.slane %v2079_v19, 4 }
 0x335   : > { %v2868_v37 = vsel %vm1312_vm0, %v23954_v45, %v2867_v61 }
 0x336   : > { %v24032_v45 = vperm.slane %v2868_v37, %v23273_v39  ;;  %v2909_v46 = vrot.slane %v2904_v13, 4  ;;  %v2828_v14 = vsel %vm1312_vm0, 0, %v2827_v38 }
 0x337   : > { %21777 = vxpose.binary.xlu1.c.b16.start.end [1/2] (short) (narrow) %v2882_v7, %v2826_v33, 16 }
 0x338   : > { %21774 = vxpose.binary.xlu0.c.b16.start.end [1/2] (short) (narrow) %v2872_v56, %v2816_v29, 16  ;;  %v2349_v29 = vrot.slane %v23652_v55, 4  ;;  %v2892_v56 = vperm.slane %v2886_v2, %v23267_v21  ;;  %v2965_v55 = vrot.slane %v2960_v26, 4  ;;  %v2883_v33 = vrot.slane %v24032_v45, 4 }
 0x339   : > { %v2967_v2 = vrot.slane %v2948_v23, 4 }
 0x33a   : > { %v2350_v3 = vsel %vm1312_vm0, %v2349_v29, %v23629_v34  ;;  %v2910_v40 = vsel %vm1312_vm0, %v2909_v46, %v2892_v56  ;;  %v2966_v34 = vsel %vm1312_vm0, %v2965_v55, %v2948_v23  ;;  %v2884_v61 = vsel %vm1312_vm0, 0, %v2883_v33  ;;  %v29285_v55 = vld [vmem:[#allocation35_spill] sm:$0xff] }
 0x33b   : > { %v24035_v50 = vperm.slane %v2350_v3, %v23273_v39  ;;  %v24049_v48 = vperm.slane %v2910_v40, %v23273_v39  ;;  %v24052_v35 = vperm.slane %v2966_v34, %v23273_v39  ;;  %v2911_v32 = vrot.slane %v2892_v56, 4  ;;  %v29286_v34 = vld [vmem:[#allocation36_spill] sm:$0xff] }
 0x33c   : > { %v24018_v0 = vpop.trf.xlu2  ;;  %v2968_v37 = vsel %vm1312_vm0, %v2960_v26, %v2967_v2  ;;  %v2955_v46 = vrot.slane %v2083_v18, 4  ;;  %v2377_v40 = vrot.slane %v29285_v55, 4  ;;  %v2433_v38 = vrot.slane %v29286_v34, 4 }
 0x33d   : > { %v2912_v53 = vsel %vm1312_vm0, %v2904_v13, %v2911_v32  ;;  %v2976_v16 = vperm.slane %v2968_v37, %v23273_v39  ;;  %v2887_v23 = vrot.slane %v2071_v49, 4  ;;  %v2943_v13 = vrot.slane %v2075_v25, 4 }
 0x33e   : > { %v2920_v3 = vperm.slane %v2912_v53, %v23273_v39  ;;  %v2378_v19 = vsel %vm1312_vm0, 0, %v2377_v40  ;;  %v2434_v18 = vsel %vm1312_vm0, 0, %v2433_v38 }
 0x33f   : > { %v2991_v26 = vrot.slane %v2976_v16, 4  ;;  %v2888_v32 = vsel %vm1312_vm0, %v23991_v57, %v2887_v23  ;;  %v2944_v49 = vsel %vm1312_vm0, %v23993_v42, %v2943_v13 }
 0x340   : > { %v2935_v33 = vrot.slane %v2920_v3, 4  ;;  %v2896_v53 = vperm.slane %v2888_v32, %v23267_v21  ;;  %v2952_v37 = vperm.slane %v2944_v49, %v23267_v21 }
 0x342   : > { %v2936_v2 = vsel %vm1312_vm0, 0, %v2935_v33  ;;  %v2979_v55 = vrot.slane %v2952_v37, 4 }
 0x343   : > { %21669 = vxpose.binary.xlu2.c.b16.start.end [1/2] (short) (narrow) %v24038_v17, %v24035_v50, 16 }
 0x344   : > { %v24046_v7 = vpop.trf.xlu2 }
 0x347   : > { %21786 = vxpose.binary.xlu1.c.b16.start.end [1/2] (short) (narrow) %v24052_v35, %v24049_v48, 16 }
 0x348   : > { %21783 = vxpose.binary.xlu0.c.b16.start.end [1/2] (short) (narrow) %v2884_v61, %v2828_v14, 16  ;;  %v2900_v14 = vsel %vm1312_vm0, %v23986_v47, %v2899_v43  ;;  %v2956_v61 = vsel %vm1312_vm0, %v23988_v8, %v2955_v46  ;;  %v2992_v8 = vsel %vm1312_vm0, 0, %v2991_v26  ;;  %v2923_v46 = vrot.slane %v2896_v53, 4 }
 0x349   : > { %v2908_v25 = vperm.slane %v2900_v14, %v23267_v21  ;;  %v2964_v47 = vperm.slane %v2956_v61, %v23267_v21 }
 0x34b   : > { %v2921_v57 = vrot.slane %v2908_v25, 4  ;;  %v2924_v38 = vsel %vm1312_vm0, %v2908_v25, %v2923_v46  ;;  %v2980_v23 = vsel %vm1312_vm0, %v2964_v47, %v2979_v55  ;;  %v5100_v25 = vperm.slane %v23982_v22, %v23267_v21 }
 0x34c   : > { %v21632_v29 = vpop.trf.xlu2  ;;  %v24103_v33 = vperm.slane %v2924_v38, %v23273_v39  ;;  %v24106_v26 = vperm.slane %v2980_v23, %v23273_v39 }
 0x34d   : > { %v5083_v41 = vrot.slane %v21632_v29, 4  ;;  %v2977_v29 = vrot.slane %v2964_v47, 4  ;;  %v2922_v42 = vsel %vm1312_vm0, %v2921_v57, %v2896_v53 }
 0x34e   : > { %v24089_v40 = vperm.slane %v2922_v42, %v23273_v39 }
 0x34f   : > { %v24066_v56 = vsel %vm1312_vm0, %v5083_v41, %v23930_v20  ;;  %v2978_v41 = vsel %vm1312_vm0, %v2977_v29, %v2952_v37 }
 0x350   : > { %v24092_v34 = vperm.slane %v2978_v41, %v23273_v39  ;;  %v5088_v22 = vperm.slane %v24066_v56, %v23267_v21  ;;  %v2487_v56 = vrot.slane %v23747_v4, 4 }
 0x353   : > { %21675 = vxpose.binary.xlu2.c.b16.start.end [1/2] (short) (narrow) %v2434_v18, %v2378_v19, 16 }
 0x354   : > { %v24078_v20 = vpop.trf.xlu2 }
 0x357   : > { %21795 = vxpose.binary.xlu1.c.b16.start.end [1/2] (short) (narrow) %v2992_v8, %v2936_v2, 16 }
 0x358   : > { %21792 = vxpose.binary.xlu0.c.b16.start.end [1/2] (short) (narrow) %v2976_v16, %v2920_v3, 16  ;;  %v2937_v3 = vrot.slane %v24089_v40, 4  ;;  %v2993_v16 = vrot.slane %v24092_v34, 4 }
 0x35a   : > { %v2938_v14 = vsel %vm1312_vm0, 0, %v2937_v3  ;;  %v2994_v61 = vsel %vm1312_vm0, 0, %v2993_v16 }
 0x35c   : > { %v21635_v43 = vpop.trf.xlu2 }
 0x363   : > { %21678 = vxpose.binary.xlu2.c.b16.start.end [1/2] (short) (narrow) %v23668_v1, %v23665_v6, 16  ;;  %v2373_v6 = vrot.slane %v24035_v50, 4  ;;  %v2429_v1 = vrot.slane %v24038_v17, 4 }
 0x364   : > { %v24100_v13 = vpop.trf.xlu2 }
 0x365   : > { %v2374_v2 = vsel %vm1312_vm0, 0, %v2373_v6  ;;  %v2430_v8 = vsel %vm1312_vm0, 0, %v2429_v1 }
 0x367   : > { %21804 = vxpose.binary.xlu1.c.b16.start.end [1/2] (short) (narrow) %v24106_v26, %v24103_v33, 16 }
 0x368   : > { %21801 = vxpose.binary.xlu0.c.b16.start.end [1/2] (short) (narrow) %v2994_v61, %v2938_v14, 16 }
 0x36c   : > { %v21638_v19 = vpop.trf.xlu2 }
 0x36d   : > { %v5101_v18 = vrot.slane %v21638_v19, 4 }
 0x36f   : > { %v5102_v32 = vsel %vm1312_vm0, %v5101_v18, %v24018_v0 }
 0x370   : > { %v5106_v49 = vperm.slane %v5102_v32, %v23267_v21 }
 0x372   : > { %v5113_v47 = vrot.slane %v5106_v49, 4 }
 0x373   : > { %21681 = vxpose.binary.xlu2.c.b16.start.end [1/2] (short) (narrow) %v2430_v8, %v2374_v2, 16  ;;  %v21655_v2 = vpop.trf.xlu1 }
 0x374   : > { %v24121_v53 = vpop.trf.xlu2  ;;  %v5114_v50 = vsel %vm1312_vm0, %v5113_v47, %v5100_v25  ;;  %v21658_v47 = vpop.trf.xlu0 }
 0x375   : > { %v5118_v29 = vperm.slane %v5114_v50, %v23273_v39 }
 0x377   : > { %v5119_v38 = vrot.slane %v5118_v29, 4 }
 0x37c   : > { %v21641_v37 = vpop.trf.xlu2 }
 0x37d   : > { %v5089_v17 = vrot.slane %v21641_v37, 4 }
 0x37f   : > { %v5090_v57 = vsel %vm1312_vm0, %v5089_v17, %v21635_v43 }
 0x380   : > { %v5094_v0 = vperm.slane %v5090_v57, %v23267_v21  ;;  %v21659_v57 = vpop.trf.xlu0 }
 0x382   : > { %v5107_v42 = vrot.slane %v5094_v0, 4 }
 0x383   : > { %21693 = vxpose.binary.xlu2.c.b16.start.end [1/2] (short) (narrow) %v23734_v10, %v23731_v54, 16  ;;  %v2543_v54 = vrot.slane %v23750_v58, 4  ;;  %v2488_v10 = vsel %vm1312_vm0, 0, %v2487_v56 }
 0x384   : > { %v21643_v41 = vpop.trf.xlu2  ;;  %v5108_v46 = vsel %vm1312_vm0, %v5107_v42, %v5088_v22  ;;  %v21656_v22 = vpop.trf.xlu1 }
 0x385   : > { %v5112_v55 = vperm.slane %v5108_v46, %v23273_v39  ;;  %v2544_v14 = vsel %vm1312_vm0, 0, %v2543_v54  ;;  %v2659_v46 = vrot.slane %v23848_v30, 4  ;;  %v5121_v54 = vrot.slane %v21655_v2, 4 }
 0x387   : > { %v24134_v23 = vsel %vm1312_vm0, %v5119_v38, %v5112_v55  ;;  %v2660_v56 = vsel %vm1312_vm0, 0, %v2659_v46 }
 0x38c   : > { %v21644_v43 = vpop.trf.xlu2  ;;  %v24166_v30 = vpop.trf.xlu1 }
 0x393   : > { %21696 = vxpose.binary.xlu2.c.b16.start.end [1/2] (short) (narrow) %v23778_v63, %v23775_v5, 16  ;;  %v2597_v5 = vrot.slane %v23787_v11, 4  ;;  %v2653_v63 = vrot.slane %v23790_v51, 4 }
 0x394   : > { %v21646_v3 = vpop.trf.xlu2 }
 0x395   : > { %v2598_v4 = vsel %vm1312_vm0, 0, %v2597_v5  ;;  %v2654_v58 = vsel %vm1312_vm0, 0, %v2653_v63 }
 0x39c   : > { %v24138_v16 = vpop.trf.xlu2 }
 0x3a3   : > { %21711 = vxpose.binary.xlu2.c.b16.start.end [1/2] (short) (narrow) %v2544_v14, %v2488_v10, 16  ;;  %v24163_v10 = vpop.trf.xlu0 }
 0x3a4   : > { %v21649_v61 = vpop.trf.xlu2 }
 0x3a5   : > { %v5133_v19 = vrot.slane %v21649_v61, 4 }
 0x3a7   : > { %v5134_v18 = vsel %vm1312_vm0, %v5133_v19, %v21643_v41  ;;  %v2603_v41 = vrot.slane %v23845_v15, 4  ;;  %v5122_v19 = vsel %vm1312_vm0, %v5121_v54, %v21646_v3  ;;  %v2713_v54 = vrot.slane %v23897_v12, 4 }
 0x3a8   : > { %v5138_v37 = vperm.slane %v5134_v18, %v23267_v21  ;;  %v5126_v5 = vperm.slane %v5122_v19, %v23267_v21 }
 0x3ab   : > { %v21674_v2 = vpop.trf.xlu0 }
 0x3ac   : > { %v21650_v6 = vpop.trf.xlu2 }
 0x3ad   : > { %v5171_v1 = vrot.slane %v21650_v6, 4 }
 0x3af   : > { %v5172_v32 = vsel %vm1312_vm0, %v5171_v1, %v21644_v43  ;;  %v2604_v43 = vsel %vm1312_vm0, 0, %v2603_v41 }
 0x3b0   : > { %v5176_v55 = vperm.slane %v5172_v32, %v23267_v21  ;;  %v5159_v32 = vrot.slane %v21656_v22, 4 }
 0x3b2   : > { %v5160_v3 = vsel %vm1312_vm0, %v5159_v32, %v24138_v16 }
 0x3b3   : > { %21720 = vxpose.binary.xlu2.c.b16.start.end [1/2] (short) (narrow) %v2654_v58, %v2598_v4, 16  ;;  %v24189_v41 = vpop.trf.xlu0 }
 0x3b4   : > { %v21652_v49 = vpop.trf.xlu2 }
 0x3bc   : > { %v21653_v25 = vpop.trf.xlu2 }
 0x3c3   : > { %21726 = vxpose.binary.xlu2.c.b16.start.end [1/2] (short) (narrow) %v23822_v62, %v23819_v31, 16 }
 0x3c4   : > { %v21661_v8 = vpop.trf.xlu2 }
 0x3c5   : > { %v5139_v50 = vrot.slane %v21661_v8, 4 }
 0x3c7   : > { %v5140_v11 = vsel %vm1312_vm0, %v5139_v50, %v21652_v49  ;;  %v5247_v50 = vrot.slane %v21674_v2, 4 }
 0x3c8   : > { %v5144_v51 = vperm.slane %v5140_v11, %v23267_v21  ;;  %v21668_v11 = vpop.trf.xlu1 }
 0x3ca   : > { %v5151_v17 = vrot.slane %v5144_v51, 4 }
 0x3cc   : > { %v21662_v0 = vpop.trf.xlu2  ;;  %v5152_v29 = vsel %vm1312_vm0, %v5151_v17, %v5138_v37  ;;  %v5248_v17 = vsel %vm1312_vm0, %v5247_v50, %v21668_v11  ;;  %v20324_v11 = vld [vmem:[%s23071_s1 + $0x178] sm:$0xf0] }
 0x3cd   : > { %v5177_v42 = vrot.slane %v21662_v0, 4  ;;  %v5156_v1 = vperm.slane %v5152_v29, %v23273_v39  ;;  %v5164_v29 = vperm.slane %v5160_v3, %v23267_v21  ;;  %v5252_v12 = vperm.slane %v5248_v17, %v23267_v21 }
 0x3cf   : > { %v5178_v31 = vsel %vm1312_vm0, %v5177_v42, %v21653_v25  ;;  %v5157_v8 = vrot.slane %v5156_v1, 4 }
 0x3d0   : > { %v5182_v62 = vperm.slane %v5178_v31, %v23267_v21 }
 0x3d2   : > { %v5189_v38 = vrot.slane %v5182_v62, 4 }
 0x3d3   : > { %21735 = vxpose.binary.xlu2.c.b16.start.end [1/2] (short) (narrow) %v2660_v56, %v2604_v43, 16  ;;  %v24202_v56 = vpop.trf.xlu0 }
 0x3d4   : > { %v21664_v14 = vpop.trf.xlu2  ;;  %v5190_v15 = vsel %vm1312_vm0, %v5189_v38, %v5176_v55 }
 0x3d5   : > { %v5127_v61 = vrot.slane %v21664_v14, 4  ;;  %v5194_v0 = vperm.slane %v5190_v15, %v23273_v39  ;;  %v2769_v14 = vrot.slane %v23900_v27, 4  ;;  %v2714_v15 = vsel %vm1312_vm0, 0, %v2713_v54  ;;  %v20300_v54 = vld [vmem:[%s23071_s1 + $0x148] sm:$0xf0] }
 0x3d7   : > { %v5128_v18 = vsel %vm1312_vm0, %v5127_v61, %v21658_v47  ;;  %v5195_v46 = vrot.slane %v5194_v0, 4  ;;  %v2770_v61 = vsel %vm1312_vm0, 0, %v2769_v14  ;;  %v5209_v0 = vrot.slane %v24163_v10, 4  ;;  %v21287_v14 = vld [vmem:[%s23071_s1 + $0x2b4] sm:$0xf] }
 0x3d8   : > { %v5132_v6 = vperm.slane %v5128_v18, %v23267_v21 }
 0x3da   : > { %v5145_v63 = vrot.slane %v5132_v6, 4 }
 0x3db   : > { %v24208_v18 = vpop.trf.xlu0 }
 0x3dc   : > { %v5146_v4 = vsel %vm1312_vm0, %v5145_v63, %v5126_v5  ;;  %v21665_v58 = vpop.trf.xlu2 }
 0x3dd   : > { %v5150_v49 = vperm.slane %v5146_v4, %v23273_v39  ;;  %v5165_v25 = vrot.slane %v21665_v58, 4 }
 0x3df   : > { %v5166_v47 = vsel %vm1312_vm0, %v5165_v25, %v21659_v57  ;;  %v24179_v51 = vsel %vm1312_vm0, %v5157_v8, %v5150_v49 }
 0x3e0   : > { %v5170_v37 = vperm.slane %v5166_v47, %v23267_v21  ;;  %v5665_v55 = vshrl.u32 %v24179_v51, 16  ;;  %v21245_v47 = vld [vmem:[%s23071_s1 + $0x164] sm:$0xf] }
 0x3e1   : > { %v20327_v17 = vor.u32 %v21245_v47, %v20324_v11  ;;  %v5241_v47 = vrot.slane %v24202_v56, 4 }
 0x3e2   : > { %v5183_v22 = vrot.slane %v5170_v37, 4 }
 0x3e3   : > { %21744 = vxpose.binary.xlu2.c.b16.start.end [1/2] (short) (narrow) %v23878_v28, %v23875_v59, 16  ;;  %v21685_v28 = vpop.trf.xlu1  ;;  %v24211_v32 = vpop.trf.xlu0 }
 0x3e4   : > { %v5184_v16 = vsel %vm1312_vm0, %v5183_v22, %v5164_v29  ;;  %v21670_v42 = vpop.trf.xlu2  ;;  %v5215_v49 = vrot.slane %v21685_v28, 4  ;;  %1283 = vmatpush.bf16.msra.mxu2 %v20327_v17  ;;  %v5210_v22 = vsel %vm1312_vm0, %v5209_v0, %v24166_v30  ;;  %v20322_v30 = vld [vmem:[%s23071_s1 + $0x160] sm:$0xf] }
 0x3e5   : > { %v5188_v57 = vperm.slane %v5184_v16, %v23273_v39  ;;  %v20514_v0 = vld [vmem:[%s23071_s1 + $0x2e0] sm:$0xf] }
 0x3e7   : > { %v24192_v31 = vsel %vm1312_vm0, %v5195_v46, %v5188_v57  ;;  %v2879_v57 = vrot.slane %v23962_v52, 4  ;;  %v21293_v46 = vld [vmem:[%s23071_s1 + $0x2e4] sm:$0xf] }
 0x3e8   : > { %v5663_v62 = vpack.i.b16 %v24192_v31, %v24179_v51  ;;  %v5666_v38 = vshrl.u32 %v24192_v31, 16 }
 0x3ea   : > { %v24198_v43 = vpack.i.b16 %v5666_v38, %v5665_v55  ;;  %v20516_v55 = vld [vmem:[%s23071_s1 + $0x2f8] sm:$0xf0]  ;;  %v21239_v38 = vld [vmem:[%s23071_s1 + $0x134] sm:$0xf] }
 0x3eb   : > { %v21686_v6 = vpop.trf.xlu1  ;;  %v24222_v50 = vpop.trf.xlu0  ;;  %v20519_v28 = vor.u32 %v21293_v46, %v20516_v55  ;;  %v20468_v55 = vld [vmem:[%s23071_s1 + $0x298] sm:$0xf0] }
 0x3ec   : > { %v24200_v59 = vpop.trf.xlu2  ;;  %v5253_v1 = vrot.slane %v21686_v6, 4  ;;  %v21248_v6 = vld [vmem:[%s23071_s1 + $0x174] sm:$0xf0] }
 0x3ed   : > { %1297 = vmatpush.bf16.msra.mxu3 %v20519_v28  ;;  %v21242_v28 = vld [vmem:[%s23071_s1 + $0x144] sm:$0xf0] }
 0x3f3   : > { %21753 = vxpose.binary.xlu2.c.b16.start.end [1/2] (short) (narrow) %v2770_v61, %v2714_v15, 16  ;;  %v24215_v58 = vpop.trf.xlu1  ;;  %v24238_v10 = vpop.trf.xlu0  ;;  %v20492_v15 = vld [vmem:[%s23071_s1 + $0x2c8] sm:$0xf0]  ;;  %v5214_v61 = vperm.slane %v5210_v22, %v23267_v21  ;;  %v21281_v22 = vld [vmem:[%s23071_s1 + $0x284] sm:$0xf] }
 0x3f4   : > { %v21676_v19 = vpop.trf.xlu2  ;;  %v20495_v52 = vor.u32 %v21287_v14, %v20492_v15  ;;  %v20471_v56 = vor.u32 %v21281_v22, %v20468_v55 }
 0x3f5   : > { %v5216_v3 = vsel %vm1312_vm0, %v5215_v49, %v21676_v19  ;;  %v20303_v19 = vor.u32 %v21239_v38, %v20300_v54  ;;  %v20298_v38 = vld [vmem:[%s23071_s1 + $0x130] sm:$0xf]  ;;  %v21227_v54 = vld [vmem:[%s23071_s1 + $0xd4] sm:$0xf] }
 0x3f6   : > { %1298 = vmatpush.bf16.msra.mxu3 %v20495_v52  ;;  %v20299_v15 = vor.u32 %v21242_v28, %v20298_v38  ;;  %v20444_v52 = vld [vmem:[%s23071_s1 + $0x268] sm:$0xf0] }
 0x3f7   : > { %1284 = vmatpush.bf16.msra.mxu2 %v20303_v19  ;;  %v21290_v19 = vld [vmem:[%s23071_s1 + $0x2c4] sm:$0xf0] }
 0x3fa   : > { %1299 = vmatpush.bf16.msra.mxu3 %v20471_v56 }
 0x3fc   : > { %v21677_v5 = vpop.trf.xlu2 }
 0x3fd   : > { %v5254_v63 = vsel %vm1312_vm0, %v5253_v1, %v21677_v5  ;;  %v21233_v1 = vld [vmem:[%s23071_s1 + $0x104] sm:$0xf]  ;;  %v20323_v5 = vor.u32 %v21248_v6, %v20322_v30 }
 0x3fe   : > { %v5258_v27 = vperm.slane %v5254_v63, %v23267_v21  ;;  %v20276_v63 = vld [vmem:[%s23071_s1 + $0x118] sm:$0xf0] }
 0x3ff   : > { %1255 = vmatpush.bf16.msra.mxu0 %v20323_v5 }
 0x400   : > { %v5265_v4 = vrot.slane %v5258_v27, 4  ;;  %v2880_v27 = vsel %vm1312_vm0, 0, %v2879_v57 }
 0x402   : > { %v24218_v25 = vsel %vm1312_vm0, %v5265_v4, %v5252_v12  ;;  %v20279_v4 = vor.u32 %v21233_v1, %v20276_v63 }
 0x403   : > { %21762 = vxpose.binary.xlu2.c.b16.start.end [1/2] (short) (narrow) %v23938_v44, %v23935_v60, 16  ;;  %v5220_v60 = vperm.slane %v5216_v3, %v23267_v21  ;;  %v24230_v44 = vpop.trf.xlu1  ;;  %v24258_v3 = vpop.trf.xlu0 }
 0x404   : > { %v21679_v2 = vpop.trf.xlu2  ;;  %1285 = vmatpush.bf16.msra.mxu2 %v20279_v4  ;;  %1256 = vmatpush.bf16.msra.mxu0 %v20299_v15  ;;  %v21221_v4 = vld [vmem:[%s23071_s1 + $0xa4] sm:$0xf]  ;;  %v21230_v15 = vld [vmem:[%s23071_s1 + $0xe4] sm:$0xf0] }
 0x405   : > { %v5197_v8 = vrot.slane %v21679_v2, 4  ;;  %v5227_v16 = vrot.slane %v5220_v60, 4  ;;  %v21296_v60 = vld [vmem:[%s23071_s1 + $0x2f4] sm:$0xf0] }
 0x406   : > { %v20515_v46 = vor.u32 %v21296_v60, %v20514_v0 }
 0x407   : > { %v5198_v37 = vsel %vm1312_vm0, %v5197_v8, %v21670_v42  ;;  %v2823_v42 = vrot.slane %v23959_v9, 4  ;;  %v5203_v9 = vrot.slane %v24189_v41, 4  ;;  %v5228_v49 = vsel %vm1312_vm0, %v5227_v16, %v5214_v61  ;;  %v20252_v61 = vld [vmem:[%s23071_s1 + $0xe8] sm:$0xf0] }
 0x408   : > { %v5232_v17 = vperm.slane %v5228_v49, %v23273_v39  ;;  %v5202_v16 = vperm.slane %v5198_v37, %v23267_v21  ;;  %1269 = vmatpush.bf16.msra.mxu1 %v20515_v46  ;;  %v20490_v37 = vld [vmem:[%s23071_s1 + $0x2b0] sm:$0xf]  ;;  %v20255_v6 = vor.u32 %v21227_v54, %v20252_v61  ;;  %v21269_v46 = vld [vmem:[%s23071_s1 + $0x224] sm:$0xf]  ;;  %v20420_v54 = vld [vmem:[%s23071_s1 + $0x238] sm:$0xf0] }
 0x409   : > { %v2824_v12 = vsel %vm1312_vm0, 0, %v2823_v42  ;;  %v20491_v1 = vor.u32 %v21290_v19, %v20490_v37  ;;  %v21215_v61 = vld [vmem:[%s23071_s1 + $0x74] sm:$0xf]  ;;  %v20204_v37 = vld [vmem:[%s23071_s1 + $0x88] sm:$0xf0] }
 0x40a   : > { %1286 = vmatpush.bf16.msra.mxu2 %v20255_v6  ;;  %v21278_v6 = vld [vmem:[%s23071_s1 + $0x264] sm:$0xf0] }
 0x40b   : > { %v24255_v8 = vpop.trf.xlu1 }
 0x40c   : > { %v24232_v29 = vpop.trf.xlu2  ;;  %1270 = vmatpush.bf16.msra.mxu1 %v20491_v1  ;;  %v21263_v1 = vld [vmem:[%s23071_s1 + $0x1f4] sm:$0xf] }
 0x40d   : > { %v5235_v42 = vrot.slane %v24232_v29, 4  ;;  %v5233_v29 = vrot.slane %v5232_v17, 4  ;;  %v20228_v17 = vld [vmem:[%s23071_s1 + $0xb8] sm:$0xf0] }
 0x40f   : > { %v5236_v49 = vsel %vm1312_vm0, %v5235_v42, %v24200_v59  ;;  %v20231_v59 = vor.u32 %v21221_v4, %v20228_v17  ;;  %v20466_v42 = vld [vmem:[%s23071_s1 + $0x280] sm:$0xf] }
 0x410   : > { %v5240_v55 = vperm.slane %v5236_v49, %v23267_v21  ;;  %v21224_v49 = vld [vmem:[%s23071_s1 + $0xb4] sm:$0xf0] }
 0x411   : > { %1287 = vmatpush.bf16.msra.mxu2 %v20231_v59 }
 0x413   : > { %21771 = vxpose.binary.xlu2.c.b16.start.end [1/2] (short) (narrow) %v2880_v27, %v2824_v12, 16  ;;  %v20274_v12 = vld [vmem:[%s23071_s1 + $0x100] sm:$0xf]  ;;  %v21236_v27 = vld [vmem:[%s23071_s1 + $0x114] sm:$0xf0]  ;;  %v24290_v22 = vpop.trf.xlu1 }
 0x414   : > { %v21682_v2 = vpop.trf.xlu2 }
 0x415   : > { %v5204_v41 = vsel %vm1312_vm0, %v5203_v9, %v21682_v2  ;;  %v21275_v9 = vld [vmem:[%s23071_s1 + $0x254] sm:$0xf] }
 0x416   : > { %v5208_v11 = vperm.slane %v5204_v41, %v23267_v21  ;;  %v20447_v63 = vor.u32 %v21275_v9, %v20444_v52  ;;  %v21710_v41 = vpop.trf.xlu0 }
 0x418   : > { %v5221_v57 = vrot.slane %v5208_v11, 4  ;;  %v20275_v11 = vor.u32 %v21236_v27, %v20274_v12  ;;  %1300 = vmatpush.bf16.msra.mxu3 %v20447_v63  ;;  %v20396_v63 = vld [vmem:[%s23071_s1 + $0x208] sm:$0xf0]  ;;  %v20226_v12 = vld [vmem:[%s23071_s1 + $0xa0] sm:$0xf] }
 0x419   : > { %v20399_v4 = vor.u32 %v21263_v1, %v20396_v63  ;;  %v20178_v1 = vld [vmem:[%s23071_s1 + $0x40] sm:$0xf] }
 0x41a   : > { %v5222_v14 = vsel %vm1312_vm0, %v5221_v57, %v5202_v16  ;;  %v5329_v16 = vrot.slane %v21710_v41, 4  ;;  %v21284_v57 = vld [vmem:[%s23071_s1 + $0x294] sm:$0xf0]  ;;  %1257 = vmatpush.bf16.msra.mxu0 %v20275_v11  ;;  %v20180_v41 = vld [vmem:[%s23071_s1 + $0x58] sm:$0xf0]  ;;  %v20227_v11 = vor.u32 %v21224_v49, %v20226_v12  ;;  %v2933_v12 = vrot.slane %v24049_v48, 4 }
 0x41b   : > { %v5226_v30 = vperm.slane %v5222_v14, %v23273_v39  ;;  %v20467_v28 = vor.u32 %v21284_v57, %v20466_v42  ;;  %v20250_v14 = vld [vmem:[%s23071_s1 + $0xd0] sm:$0xf]  ;;  %v21272_v42 = vld [vmem:[%s23071_s1 + $0x234] sm:$0xf0]  ;;  %v21257_v57 = vld [vmem:[%s23071_s1 + $0x1c4] sm:$0xf] }
 0x41c   : > { %v21683_v5 = vpop.trf.xlu2  ;;  %v24300_v38 = vsel %vm1312_vm0, %v5329_v16, %v24230_v44  ;;  %v20207_v44 = vor.u32 %v21215_v61, %v20204_v37  ;;  %v20156_v37 = vld [vmem:[%s23071_s1 + $0x28] sm:$0xf0] }
 0x41d   : > { %v5242_v2 = vsel %vm1312_vm0, %v5241_v47, %v21683_v5  ;;  %v24287_v0 = vsel %vm1312_vm0, %v5233_v29, %v5226_v30  ;;  %v5270_v47 = vperm.slane %v24218_v25, %v23273_v39  ;;  %v20423_v25 = vor.u32 %v21269_v46, %v20420_v54  ;;  %1271 = vmatpush.bf16.msra.mxu1 %v20467_v28  ;;  %v20442_v30 = vld [vmem:[%s23071_s1 + $0x250] sm:$0xf] }
 0x41e   : > { %v5246_v60 = vperm.slane %v5242_v2, %v23267_v21  ;;  %v20251_v29 = vor.u32 %v21230_v15, %v20250_v14  ;;  %v20443_v5 = vor.u32 %v21278_v6, %v20442_v30  ;;  %v21209_v2 = vld [vmem:[%s23071_s1 + $0x44] sm:$0xf]  ;;  %1288 = vmatpush.bf16.msra.mxu2 %v20207_v44  ;;  %v5673_v16 = vshrl.u32 %v24287_v0, 16  ;;  %v20202_v14 = vld [vmem:[%s23071_s1 + $0x70] sm:$0xf] }
 0x41f   : > { %v5271_v9 = vrot.slane %v5270_v47, 4  ;;  %1301 = vmatpush.bf16.msra.mxu3 %v20423_v25  ;;  %v20183_v17 = vor.u32 %v21209_v2, %v20180_v41  ;;  %v20418_v47 = vld [vmem:[%s23071_s1 + $0x220] sm:$0xf]  ;;  %v5291_v46 = vrot.slane %v24258_v3, 4  ;;  %v21218_v25 = vld [vmem:[%s23071_s1 + $0x84] sm:$0xf0] }
 0x420   : > { %v5259_v56 = vrot.slane %v5246_v60, 4  ;;  %1258 = vmatpush.bf16.msra.mxu0 %v20251_v29  ;;  %v21203_v15 = vld [vmem:[%s23071_s1 + $0x14] sm:$0xf]  ;;  %v20203_v61 = vor.u32 %v21218_v25, %v20202_v14  ;;  %v21266_v3 = vld [vmem:[%s23071_s1 + $0x204] sm:$0xf0]  ;;  %v29288_v14 = vld [vmem:[#allocation21_spill] sm:$0xff] }
 0x421   : > { %1272 = vmatpush.bf16.msra.mxu1 %v20443_v5  ;;  %v20159_v29 = vor.u32 %v21203_v15, %v20156_v37  ;;  %v21251_v30 = vld [vmem:[%s23071_s1 + $0x194] sm:$0xf]  ;;  %v20348_v6 = vld [vmem:[%s23071_s1 + $0x1a8] sm:$0xf0]  ;;  %v21212_v5 = vld [vmem:[%s23071_s1 + $0x54] sm:$0xf0]  ;;  %v5292_v49 = vsel %vm1312_vm0, %v5291_v46, %v24215_v58 }
 0x422   : > { %v5260_v19 = vsel %vm1312_vm0, %v5259_v56, %v5240_v55  ;;  %v20419_v55 = vor.u32 %v21272_v42, %v20418_v47  ;;  %v20372_v56 = vld [vmem:[%s23071_s1 + $0x1d8] sm:$0xf0]  ;;  %1289 = vmatpush.bf16.msra.mxu2 %v20183_v17  ;;  %v20179_v63 = vor.u32 %v21212_v5, %v20178_v1  ;;  %v20370_v2 = vld [vmem:[%s23071_s1 + $0x1c0] sm:$0xf]  ;;  %v21260_v41 = vld [vmem:[%s23071_s1 + $0x1d4] sm:$0xf0]  ;;  %v5296_v48 = vperm.slane %v5292_v49, %v23267_v21 }
 0x423   : > { %v5264_v52 = vperm.slane %v5260_v19, %v23273_v39  ;;  %21780 = vxpose.binary.xlu2.c.b16.start.end [1/2] (short) (narrow) %v24032_v45, %v24029_v24, 16  ;;  %v24324_v45 = vpop.trf.xlu1  ;;  %v20375_v54 = vor.u32 %v21257_v57, %v20372_v56  ;;  %v20394_v19 = vld [vmem:[%s23071_s1 + $0x1f0] sm:$0xf]  ;;  %v21206_v47 = vld [vmem:[%s23071_s1 + $0x24] sm:$0xf0] }
 0x424   : > { %v24316_v27 = vpop.trf.xlu2  ;;  %1302 = vmatpush.bf16.msra.mxu3 %v20399_v4  ;;  %1259 = vmatpush.bf16.msra.mxu0 %v20227_v11  ;;  %v20395_v44 = vor.u32 %v21266_v3, %v20394_v19  ;;  %v2989_v4 = vrot.slane %v24052_v35, 4  ;;  %v29287_v11 = vld [vmem:[#allocation20_spill] sm:$0xff]  ;;  %v2934_v35 = vsel %vm1312_vm0, 0, %v2933_v12  ;;  %v21254_v46 = vld [vmem:[%s23071_s1 + $0x1a4] sm:$0xf0]  ;;  %v5303_v15 = vrot.slane %v5296_v48, 4 }
 0x425   : > { %v24322_v24 = vsel %vm1312_vm0, %v5271_v9, %v5264_v52  ;;  %1273 = vmatpush.bf16.msra.mxu1 %v20419_v55  ;;  %v20351_v52 = vor.u32 %v21251_v30, %v20348_v6  ;;  %v20346_v58 = vld [vmem:[%s23071_s1 + $0x190] sm:$0xf]  ;;  %v21718_v55 = vpop.trf.xlu0  ;;  %v5334_v3 = vperm.slane %v24300_v38, %v23267_v21 }
 0x426   : > { %v5671_v60 = vpack.i.b16 %v24322_v24, %v24287_v0  ;;  %v5674_v59 = vshrl.u32 %v24322_v24, 16  ;;  %1290 = vmatpush.bf16.msra.mxu2 %v20159_v29  ;;  %v2990_v42 = vsel %vm1312_vm0, 0, %v2989_v4  ;;  %v20347_v56 = vor.u32 %v21254_v46, %v20346_v58  ;;  %v29296_v0 = vld [vmem:[#allocation23_spill] sm:$0xff]  ;;  %v29297_v24 = vld [vmem:[#allocation22_spill] sm:$0xff] }
 0x427   : > { %v5273_v4 = vrot.slane %v24255_v8, 4 }
 0x428   : > { %v24335_v28 = vpack.i.b16 %v5674_v59, %v5673_v16  ;;  %1303 = vmatpush.bf16.msra.mxu3 %v20375_v54  ;;  %1260 = vmatpush.bf16.msra.mxu0 %v20203_v61  ;;  %v20371_v16 = vor.u32 %v21260_v41, %v20370_v2  ;;  %v20154_v59 = vld [vmem:[%s23071_s1 + $0x10] sm:$0xf] }
 0x429   : > { %1274 = vmatpush.bf16.msra.mxu1 %v20395_v44  ;;  %1291 = vmatmul.bf16.vlgmr.msra.gmra.mxu2 %v29287_v11  ;;  %v20155_v57 = vor.u32 %v21206_v47, %v20154_v59 }
 0x42b   : > { %v21716_v17 = vpop.trf.xlu1 }
 0x42c   : > { %v24346_v9 = vpop.trf.xlu2  ;;  %1304 = vmatpush.bf16.msra.mxu3 %v20351_v52  ;;  %1261 = vmatpush.bf16.msra.mxu0 %v20179_v63  ;;  %v5341_v52 = vrot.slane %v5334_v3, 4 }
 0x42d   : > { %1275 = vmatpush.bf16.msra.mxu1 %v20371_v16  ;;  %v21719_v44 = vpop.trf.xlu0 }
 0x42e   : > { %v5387_v6 = vrot.slane %v21719_v44, 4 }
 0x42f   : > { %1305 = vmatmul.bf16.vlgmr.msra.gmra.mxu3 %v29288_v14 }
 0x430   : > { %1262 = vmatpush.bf16.msra.mxu0 %v20155_v57  ;;  %v24373_v5 = vsel %vm1312_vm0, %v5387_v6, %v21716_v17  ;;  %v2995_v57 = vrot.slane %v24106_v26, 4 }
 0x431   : > { %1276 = vmatpush.bf16.msra.mxu1 %v20347_v56  ;;  %v5349_v56 = vrot.slane %v21718_v55, 4 }
 0x433   : > { %21789 = vxpose.binary.xlu2.c.b16.start.end [1/2] (short) (narrow) %v2990_v42, %v2934_v35, 16  ;;  %v21724_v29 = vpop.trf.xlu1 }
 0x434   : > { %v21697_v54 = vpop.trf.xlu2  ;;  %1263 = vmatmul.bf16.vlgmr.msra.gmra.mxu0 %v29287_v11  ;;  %1277 = vmatmul.bf16.vlgmr.msra.gmra.mxu1 %v29288_v14  ;;  %v5274_v11 = vsel %vm1312_vm0, %v5273_v4, %v24316_v27 }
 0x435   : > { %v5285_v25 = vrot.slane %v21697_v54, 4  ;;  %v24382_v38 = vpop.trf.xlu0  ;;  %v5278_v8 = vperm.slane %v5274_v11, %v23267_v21 }
 0x437   : > { %v5286_v61 = vsel %vm1312_vm0, %v5285_v25, %v24208_v18  ;;  %v5355_v25 = vrot.slane %v21724_v29, 4 }
 0x438   : > { %v5290_v37 = vperm.slane %v5286_v61, %v23267_v21 }
 0x43a   : > { %v5304_v19 = vsel %vm1312_vm0, %v5303_v15, %v5290_v37  ;;  %v2996_v37 = vsel %vm1312_vm0, 0, %v2995_v57 }
 0x43b   : > { %v21725_v2 = vpop.trf.xlu1  ;;  %v5308_v16 = vperm.slane %v5304_v19, %v23273_v39 }
 0x43c   : > { %v21698_v30 = vpop.trf.xlu2  ;;  %v5393_v4 = vrot.slane %v21725_v2, 4 }
 0x43d   : > { %v5323_v1 = vrot.slane %v21698_v30, 4  ;;  %v5309_v42 = vrot.slane %v5308_v16, 4  ;;  %v5392_v16 = vperm.slane %v24373_v5, %v23267_v21 }
 0x43f   : > { %v5324_v18 = vsel %vm1312_vm0, %v5323_v1, %v24211_v32 }
 0x440   : > { %v5328_v63 = vperm.slane %v5324_v18, %v23267_v21 }
 0x442   : > { %v5342_v12 = vsel %vm1312_vm0, %v5341_v52, %v5328_v63 }
 0x443   : > { %21798 = vxpose.binary.xlu2.c.b16.start.end [1/2] (short) (narrow) %v24092_v34, %v24089_v40, 16  ;;  %v5311_v40 = vrot.slane %v24290_v22, 4  ;;  %v24392_v34 = vpop.trf.xlu0  ;;  %v21733_v58 = vpop.trf.xlu1  ;;  %v5346_v15 = vperm.slane %v5342_v12, %v23273_v39 }
 0x444   : > { %v21712_v49 = vpop.trf.xlu2 }
 0x445   : > { %v5279_v41 = vrot.slane %v21712_v49, 4  ;;  %v5312_v46 = vsel %vm1312_vm0, %v5311_v40, %v24346_v9  ;;  %v5350_v9 = vsel %vm1312_vm0, %v5349_v56, %v24324_v45  ;;  %v5347_v44 = vrot.slane %v5346_v15, 4 }
 0x446   : > { %v5354_v30 = vperm.slane %v5350_v9, %v23267_v21 }
 0x447   : > { %v5280_v32 = vsel %vm1312_vm0, %v5279_v41, %v24222_v50  ;;  %v2939_v50 = vrot.slane %v24103_v33, 4  ;;  %v5316_v33 = vperm.slane %v5312_v46, %v23267_v21 }
 0x448   : > { %v5284_v17 = vperm.slane %v5280_v32, %v23267_v21 }
 0x449   : > { %v2940_v26 = vsel %vm1312_vm0, 0, %v2939_v50  ;;  %v5361_v50 = vrot.slane %v21733_v58, 4 }
 0x44a   : > { %v5297_v59 = vrot.slane %v5284_v17, 4 }
 0x44b   : > { %v21734_v45 = vpop.trf.xlu1 }
 0x44c   : > { %v21713_v47 = vpop.trf.xlu2  ;;  %v5298_v48 = vsel %vm1312_vm0, %v5297_v59, %v5278_v8 }
 0x44d   : > { %v5317_v35 = vrot.slane %v21713_v47, 4  ;;  %v5302_v27 = vperm.slane %v5298_v48, %v23273_v39 }
 0x44f   : > { %v5318_v22 = vsel %vm1312_vm0, %v5317_v35, %v24238_v10  ;;  %v24403_v54 = vsel %vm1312_vm0, %v5309_v42, %v5302_v27  ;;  %v24412_v10 = vpop.trf.xlu0 }
 0x450   : > { %v5322_v14 = vperm.slane %v5318_v22, %v23267_v21  ;;  %v5681_v63 = vshrl.u32 %v24403_v54, 16 }
 0x452   : > { %v5335_v61 = vrot.slane %v5322_v14, 4 }
 0x453   : > { %21807 = vxpose.binary.xlu2.c.b16.start.end [1/2] (short) (narrow) %v2996_v37, %v2940_v26, 16  ;;  %v21742_v47 = vpop.trf.xlu1 }
 0x454   : > { %v21721_v55 = vpop.trf.xlu2  ;;  %v5336_v19 = vsel %vm1312_vm0, %v5335_v61, %v5316_v33  ;;  %v5399_v61 = vrot.slane %v21734_v45, 4 }
 0x455   : > { %v5356_v3 = vsel %vm1312_vm0, %v5355_v25, %v21721_v55  ;;  %v5340_v29 = vperm.slane %v5336_v19, %v23273_v39 }
 0x456   : > { %v5360_v6 = vperm.slane %v5356_v3, %v23267_v21 }
 0x457   : > { %v24420_v1 = vsel %vm1312_vm0, %v5347_v44, %v5340_v29  ;;  %v24429_v32 = vpop.trf.xlu0 }
 0x458   : > { %v5373_v52 = vrot.slane %v5360_v6, 4  ;;  %v5679_v18 = vpack.i.b16 %v24420_v1, %v24403_v54  ;;  %v5682_v12 = vshrl.u32 %v24420_v1, 16  ;;  %v5658_v54 = vshrl.u32 %v24134_v23, 16 }
 0x45a   : > { %v5374_v49 = vsel %vm1312_vm0, %v5373_v52, %v5354_v30  ;;  %v24427_v41 = vpack.i.b16 %v5682_v12, %v5681_v63 }
 0x45b   : > { %v21743_v27 = vpop.trf.xlu1  ;;  %v5378_v19 = vperm.slane %v5374_v49, %v23273_v39 }
 0x45c   : > { %v21722_v11 = vpop.trf.xlu2 }
 0x45d   : > { %v5394_v17 = vsel %vm1312_vm0, %v5393_v4, %v21722_v11 }
 0x45e   : > { %v5398_v8 = vperm.slane %v5394_v17, %v23267_v21 }
 0x45f   : > { %v21748_v2 = vpop.trf.xlu0 }
 0x460   : > { %v5411_v59 = vrot.slane %v5398_v8, 4  ;;  %v5431_v26 = vrot.slane %v21748_v2, 4 }
 0x462   : > { %v5412_v40 = vsel %vm1312_vm0, %v5411_v59, %v5392_v16  ;;  %v5432_v29 = vsel %vm1312_vm0, %v5431_v26, %v21742_v47 }
 0x463   : > { %v21751_v22 = vpop.trf.xlu1  ;;  %v5436_v12 = vperm.slane %v5432_v29, %v23267_v21  ;;  %v5416_v8 = vperm.slane %v5412_v40, %v23273_v39 }
 0x464   : > { %v21727_v48 = vpop.trf.xlu2 }
 0x465   : > { %v5362_v56 = vsel %vm1312_vm0, %v5361_v50, %v21727_v48  ;;  %v5449_v16 = vrot.slane %v5436_v12, 4 }
 0x466   : > { %v5366_v25 = vperm.slane %v5362_v56, %v23267_v21 }
 0x467   : > { %v21749_v42 = vpop.trf.xlu0 }
 0x46b   : > { %v21752_v6 = vpop.trf.xlu1 }
 0x46c   : > { %v21728_v35 = vpop.trf.xlu2 }
 0x46d   : > { %v5400_v3 = vsel %vm1312_vm0, %v5399_v61, %v21728_v35 }
 0x46e   : > { %v5404_v45 = vperm.slane %v5400_v3, %v23267_v21 }
 0x46f   : > { %v21757_v33 = vpop.trf.xlu0 }
 0x473   : > { %v21760_v35 = vpop.trf.xlu1 }
 0x474   : > { %v21736_v57 = vpop.trf.xlu2 }
 0x475   : > { %v5367_v46 = vrot.slane %v21736_v57, 4 }
 0x477   : > { %v5368_v5 = vsel %vm1312_vm0, %v5367_v46, %v24382_v38  ;;  %v21758_v49 = vpop.trf.xlu0 }
 0x478   : > { %v5372_v14 = vperm.slane %v5368_v5, %v23267_v21 }
 0x47a   : > { %v5379_v15 = vrot.slane %v5372_v14, 4  ;;  %v5437_v14 = vrot.slane %v21757_v33, 4 }
 0x47c   : > { %v21737_v37 = vpop.trf.xlu2  ;;  %v5380_v9 = vsel %vm1312_vm0, %v5379_v15, %v5366_v25  ;;  %v5443_v25 = vrot.slane %v21760_v35, 4  ;;  %v5469_v15 = vrot.slane %v21749_v42, 4  ;;  %v5438_v61 = vsel %vm1312_vm0, %v5437_v14, %v21751_v22 }
 0x47d   : > { %v5405_v58 = vrot.slane %v21737_v37, 4  ;;  %v5384_v55 = vperm.slane %v5380_v9, %v23273_v39  ;;  %v21761_v37 = vpop.trf.xlu1 }
 0x47e   : > { %v5481_v33 = vrot.slane %v21761_v37, 4 }
 0x47f   : > { %v5406_v38 = vsel %vm1312_vm0, %v5405_v58, %v24392_v34  ;;  %v5385_v44 = vrot.slane %v5384_v55, 4  ;;  %v5442_v58 = vperm.slane %v5438_v61, %v23267_v21 }
 0x480   : > { %v5410_v30 = vperm.slane %v5406_v38, %v23267_v21  ;;  %v5475_v38 = vrot.slane %v21758_v49, 4 }
 0x481   : > { %v24450_v52 = vsel %vm1312_vm0, %v5385_v44, %v5378_v19  ;;  %v5470_v19 = vsel %vm1312_vm0, %v5469_v15, %v21743_v27 }
 0x482   : > { %v5417_v63 = vrot.slane %v5410_v30, 4  ;;  %v5689_v46 = vshrl.u32 %v24450_v52, 16  ;;  %v5474_v42 = vperm.slane %v5470_v19, %v23267_v21 }
 0x484   : > { %v21745_v4 = vpop.trf.xlu2  ;;  %v5418_v11 = vsel %vm1312_vm0, %v5417_v63, %v5404_v45  ;;  %v5476_v63 = vsel %vm1312_vm0, %v5475_v38, %v21752_v6 }
 0x485   : > { %v5425_v17 = vrot.slane %v21745_v4, 4  ;;  %v5422_v34 = vperm.slane %v5418_v11, %v23273_v39  ;;  %v5487_v11 = vrot.slane %v5474_v42, 4 }
 0x487   : > { %v5426_v59 = vsel %vm1312_vm0, %v5425_v17, %v24412_v10  ;;  %v5423_v47 = vrot.slane %v5422_v34, 4  ;;  %v21766_v10 = vpop.trf.xlu0  ;;  %v5480_v34 = vperm.slane %v5476_v63, %v23267_v21 }
 0x488   : > { %v5430_v48 = vperm.slane %v5426_v59, %v23267_v21 }
 0x489   : > { %v24461_v2 = vsel %vm1312_vm0, %v5423_v47, %v5416_v8  ;;  %v21769_v8 = vpop.trf.xlu1 }
 0x48a   : > { %v5450_v50 = vsel %vm1312_vm0, %v5449_v16, %v5430_v48  ;;  %v5687_v57 = vpack.i.b16 %v24461_v2, %v24450_v52  ;;  %v5690_v56 = vshrl.u32 %v24461_v2, 16  ;;  %v5501_v38 = vrot.slane %v21769_v8, 4 }
 0x48b   : > { %v5454_v49 = vperm.slane %v5450_v50, %v23273_v39 }
 0x48c   : > { %v21746_v40 = vpop.trf.xlu2  ;;  %v24468_v5 = vpack.i.b16 %v5690_v56, %v5689_v46 }
 0x48d   : > { %v5463_v3 = vrot.slane %v21746_v40, 4 }
 0x48f   : > { %v24475_v44 = vpop.trf.xlu0  ;;  %v5464_v30 = vsel %vm1312_vm0, %v5463_v3, %v24429_v32 }
 0x490   : > { %v5468_v17 = vperm.slane %v5464_v30, %v23267_v21 }
 0x491   : > { %v24498_v14 = vpop.trf.xlu1 }
 0x492   : > { %v5488_v48 = vsel %vm1312_vm0, %v5487_v11, %v5468_v17 }
 0x493   : > { %v5492_v56 = vperm.slane %v5488_v48, %v23273_v39 }
 0x494   : > { %v21754_v26 = vpop.trf.xlu2 }
 0x495   : > { %v5444_v9 = vsel %vm1312_vm0, %v5443_v25, %v21754_v26 }
 0x496   : > { %v5448_v55 = vperm.slane %v5444_v9, %v23267_v21 }
 0x497   : > { %v21775_v47 = vpop.trf.xlu0 }
 0x498   : > { %v5455_v29 = vrot.slane %v5448_v55, 4 }
 0x499   : > { %v21778_v19 = vpop.trf.xlu1 }
 0x49a   : > { %v5456_v22 = vsel %vm1312_vm0, %v5455_v29, %v5442_v58  ;;  %v24507_v58 = vld [vmem:[%s23102_s13] sm:$0x3f] }
 0x49b   : > { %v5460_v45 = vperm.slane %v5456_v22, %v23273_v39  ;;  %v656_v55 = vperm.slane %v24507_v58, 5  ;;  %v655_v3 = vperm.slane %v24507_v58, 4 }
 0x49c   : > { %v21755_v12 = vpop.trf.xlu2 }
 0x49d   : > { %v5461_v4 = vrot.slane %v5460_v45, 4  ;;  %v5482_v27 = vsel %vm1312_vm0, %v5481_v33, %v21755_v12 }
 0x49e   : > { %v5486_v16 = vperm.slane %v5482_v27, %v23267_v21 }
 0x49f   : > { %v24489_v32 = vsel %vm1312_vm0, %v5461_v4, %v5454_v49  ;;  %v21776_v9 = vpop.trf.xlu0 }
 0x4a0   : > { %v5493_v59 = vrot.slane %v5486_v16, 4  ;;  %v5697_v15 = vshrl.u32 %v24489_v32, 16 }
 0x4a2   : > { %v5494_v6 = vsel %vm1312_vm0, %v5493_v59, %v5480_v34 }
 0x4a3   : > { %v5498_v35 = vperm.slane %v5494_v6, %v23273_v39 }
 0x4a4   : > { %v21763_v50 = vpop.trf.xlu2 }
 0x4a5   : > { %v5499_v46 = vrot.slane %v5498_v35, 4  ;;  %v5502_v4 = vsel %vm1312_vm0, %v5501_v38, %v21763_v50  ;;  %v21779_v35 = vpop.trf.xlu1 }
 0x4a6   : > { %v5506_v16 = vperm.slane %v5502_v4, %v23267_v21 }
 0x4a7   : > { %v24496_v40 = vsel %vm1312_vm0, %v5499_v46, %v5492_v56  ;;  %v21784_v45 = vpop.trf.xlu0 }
 0x4a8   : > { %v5695_v25 = vpack.i.b16 %v24496_v40, %v24489_v32  ;;  %v5698_v61 = vshrl.u32 %v24496_v40, 16  ;;  %v5519_v6 = vrot.slane %v21784_v45, 4 }
 0x4aa   : > { %v24504_v26 = vpack.i.b16 %v5698_v61, %v5697_v15  ;;  %v5520_v61 = vsel %vm1312_vm0, %v5519_v6, %v21778_v19 }
 0x4ac   : > { %v21764_v37 = vpop.trf.xlu2  ;;  %v1292_v29 = vpop.f32.mrf.mxu2 }
 0x4ad   : > { %v1293_v42 = vadd.f32 %v1292_v29, %v656_v55 }
 0x4b1   : > { %v1264_v30 = vpop.f32.mrf.mxu0  ;;  %v1278_v12 = vpop.f32.mrf.mxu1 }
 0x4b2   : > { %v1265_v63 = vadd.f32 %v1264_v30, %v655_v3  ;;  %v1306_v49 = vpop.f32.mrf.mxu3 }
 0x4b3   : > { %v24518_v17 = vadd.f32 %v1306_v49, %v1293_v42 }
 0x4b4   : > { %v21772_v33 = vpop.trf.xlu2  ;;  %v24520_v34 = vadd.f32 %v1278_v12, %v1265_v63 }
 0x4b5   : > { %v5507_v22 = vrot.slane %v21772_v33, 4  ;;  %v1567_v59 = vperm.slane %v24518_v17, %v23267_v21  ;;  %v21785_v33 = vpop.trf.xlu0 }
 0x4b6   : > { %v1557_v48 = vperm.slane %v24520_v34, %v23267_v21  ;;  %v5557_v63 = vrot.slane %v21785_v33, 4 }
 0x4b7   : > { %v5508_v27 = vsel %vm1312_vm0, %v5507_v22, %v21766_v10  ;;  %v1572_v10 = vrot.slane %v1567_v59, 4  ;;  %v5524_v22 = vperm.slane %v5520_v61, %v23267_v21 }
 0x4b8   : > { %v5512_v11 = vperm.slane %v5508_v27, %v23267_v21  ;;  %v1574_v56 = vrot.slane %v1557_v48, 4 }
 0x4b9   : > { %v1573_v15 = vsel %vm1312_vm0, %v1572_v10, %v1557_v48  ;;  %v5539_v48 = vrot.slane %v24498_v14, 4 }
 0x4ba   : > { %v5525_v8 = vrot.slane %v5512_v11, 4  ;;  %v24531_v38 = vsel %vm1312_vm0, %v1567_v59, %v1574_v56  ;;  %v1579_v29 = vperm.slane %v1573_v15, %v23273_v39  ;;  %v5531_v11 = vrot.slane %v5524_v22, 4 }
 0x4bb   : > { %v5558_v59 = vsel %vm1312_vm0, %v5557_v63, %v21779_v35  ;;  %v5540_v61 = vsel %vm1312_vm0, %v5539_v48, %v21764_v37 }
 0x4bc   : > { %v21773_v50 = vpop.trf.xlu2  ;;  %v5526_v46 = vsel %vm1312_vm0, %v5525_v8, %v5506_v16  ;;  %v1596_v42 = vrot.slane %v1579_v29, 4  ;;  %v1656_v30 = vpack.c.bf16 %v1579_v29, %v1579_v29  ;;  %v21787_v16 = vpop.trf.xlu1  ;;  %v5562_v56 = vperm.slane %v5558_v59, %v23267_v21 }
 0x4bd   : > { %v5545_v45 = vrot.slane %v21773_v50, 4 }
 0x4be   : > { %v1597_v12 = vsel %vm1312_vm0, 0.0, %v1596_v42  ;;  %v5544_v42 = vperm.slane %v5540_v61, %v23267_v21 }
 0x4bf   : > { %v1657_v27 = vpack.c.bf16 %v1597_v12, %v1597_v12  ;;  %v5546_v19 = vsel %vm1312_vm0, %v5545_v45, %v24475_v44  ;;  %v5530_v12 = vperm.slane %v5526_v46, %v23273_v39 }
 0x4c0   : > { %v5550_v50 = vperm.slane %v5546_v19, %v23267_v21 }
 0x4c1   : > { %21810 = vxpose.binary.xlu1.c.b16.start.end [1/2] (short) %v1657_v27, %v1656_v30, 128 }
 0x4c2   : > { %v5563_v33 = vrot.slane %v5550_v50, 4  ;;  %v21793_v50 = vpop.trf.xlu0 }
 0x4c4   : > { %v21781_v4 = vpop.trf.xlu2  ;;  %v21788_v22 = vpop.trf.xlu1  ;;  %v5564_v45 = vsel %vm1312_vm0, %v5563_v33, %v5544_v42 }
 0x4c5   : > { %v5513_v49 = vrot.slane %v21781_v4, 4 }
 0x4c7   : > { %v5514_v8 = vsel %vm1312_vm0, %v5513_v49, %v21775_v47  ;;  %v5569_v47 = vrot.slane %v5562_v56, 4 }
 0x4c8   : > { %v5518_v6 = vperm.slane %v5514_v8, %v23267_v21 }
 0x4ca   : > { %v5532_v10 = vsel %vm1312_vm0, %v5531_v11, %v5518_v6 }
 0x4cb   : > { %v5536_v44 = vperm.slane %v5532_v10, %v23273_v39 }
 0x4cc   : > { %v21782_v15 = vpop.trf.xlu2  ;;  %v21796_v46 = vpop.trf.xlu1 }
 0x4cd   : > { %v5551_v29 = vrot.slane %v21782_v15, 4  ;;  %v5537_v30 = vrot.slane %v5536_v44, 4  ;;  %v21794_v15 = vpop.trf.xlu0  ;;  %v5583_v33 = vrot.slane %v21796_v46, 4 }
 0x4cf   : > { %v5552_v35 = vsel %vm1312_vm0, %v5551_v29, %v21776_v9  ;;  %v24555_v27 = vsel %vm1312_vm0, %v5537_v30, %v5530_v12  ;;  %v5568_v9 = vperm.slane %v5564_v45, %v23273_v39  ;;  %v5577_v30 = vrot.slane %v21793_v50, 4 }
 0x4d0   : > { %v5556_v14 = vperm.slane %v5552_v35, %v23267_v21  ;;  %v5705_v8 = vshrl.u32 %v24555_v27, 16 }
 0x4d1   : > { %v5578_v50 = vsel %vm1312_vm0, %v5577_v30, %v21787_v16 }
 0x4d2   : > { %v5570_v63 = vsel %vm1312_vm0, %v5569_v47, %v5556_v14 }
 0x4d3   : > { %v5574_v37 = vperm.slane %v5570_v63, %v23273_v39 }
 0x4d4   : > { %v21790_v4 = vpop.trf.xlu2  ;;  %v21797_v10 = vpop.trf.xlu1 }
 0x4d5   : > { %v5575_v49 = vrot.slane %v5574_v37, 4  ;;  %v21802_v44 = vpop.trf.xlu0  ;;  %v5621_v42 = vrot.slane %v21797_v10, 4  ;;  %v5584_v45 = vsel %vm1312_vm0, %v5583_v33, %v21790_v4  ;;  %v1562_v10 = vrot.slane %v24518_v17, 4 }
 0x4d7   : > { %v24559_v11 = vsel %vm1312_vm0, %v5575_v49, %v5568_v9  ;;  %v5615_v49 = vrot.slane %v21794_v15, 4 }
 0x4d8   : > { %v5703_v19 = vpack.i.b16 %v24559_v11, %v24555_v27  ;;  %v5706_v59 = vshrl.u32 %v24559_v11, 16  ;;  %v29291_v11 = vld [vmem:[#allocation37_spill] sm:$0xff] }
 0x4d9   : > { %v5616_v15 = vsel %vm1312_vm0, %v5615_v49, %v21788_v22 }
 0x4da   : > { %v24565_v6 = vpack.i.b16 %v5706_v59, %v5705_v8  ;;  %v5588_v59 = vperm.slane %v5584_v45, %v23267_v21  ;;  %v1563_v45 = vsel %vm1312_vm0, 0.0, %v1562_v10 }
 0x4db   : > { %v24588_v22 = vperm.slane %v1563_v45, %v23267_v21 }
 0x4dc   : > { %v21791_v48 = vpop.trf.xlu2  ;;  %v21805_v29 = vpop.trf.xlu1 }
 0x4dd   : > { %v5589_v47 = vrot.slane %v21805_v29, 4  ;;  %v5622_v8 = vsel %vm1312_vm0, %v5621_v42, %v21791_v48  ;;  %v1552_v48 = vrot.slane %v24520_v34, 4  ;;  %v5582_v42 = vperm.slane %v5578_v50, %v23267_v21 }
 0x4de   : > { %v1584_v50 = vrot.slane %v24588_v22, 4 }
 0x4e4   : > { %v21799_v56 = vpop.trf.xlu2  ;;  %v21806_v37 = vpop.trf.xlu1 }
 0x4e5   : > { %v5590_v63 = vsel %vm1312_vm0, %v5589_v47, %v21799_v56  ;;  %v5627_v4 = vrot.slane %v21806_v37, 4  ;;  %v5626_v56 = vperm.slane %v5622_v8, %v23267_v21  ;;  %v21803_v47 = vpop.trf.xlu0  ;;  %v1553_v8 = vsel %vm1312_vm0, 0.0, %v1552_v48 }
 0x4e6   : > { %v5594_v46 = vperm.slane %v5590_v63, %v23267_v21  ;;  %v5620_v63 = vperm.slane %v5616_v15, %v23267_v21 }
 0x4ec   : > { %v21800_v61 = vpop.trf.xlu2 }
 0x4ed   : > { %v5628_v17 = vsel %vm1312_vm0, %v5627_v4, %v21800_v61  ;;  %v24599_v4 = vperm.slane %v1553_v8, %v23267_v21  ;;  %v29289_v8 = vld [vmem:[#allocation39_spill] sm:$0xff] }
 0x4ef   : > { %v1585_v15 = vsel %vm1312_vm0, %v1584_v50, %v24599_v4 }
 0x4f4   : > { %v21808_v35 = vpop.trf.xlu2 }
 0x4f5   : > { %v5595_v14 = vrot.slane %v21808_v35, 4 }
 0x4f7   : > { %v5596_v12 = vsel %vm1312_vm0, %v5595_v14, %v21802_v44  ;;  %v5601_v14 = vrot.slane %v5588_v59, 4 }
 0x4f8   : > { %v5600_v9 = vperm.slane %v5596_v12, %v23267_v21  ;;  %v5639_v12 = vrot.slane %v5626_v56, 4 }
 0x4f9   : > { %v5602_v34 = vsel %vm1312_vm0, %v5601_v14, %v5582_v42  ;;  %v5063_v14 = vrot.slane %v24100_v13, 4 }
 0x4fa   : > { %v5607_v29 = vrot.slane %v5600_v9, 4  ;;  %v5632_v9 = vperm.slane %v5628_v17, %v23267_v21  ;;  %v5640_v59 = vsel %vm1312_vm0, %v5639_v12, %v5620_v63  ;;  %v5051_v17 = vrot.slane %v24121_v53, 4  ;;  %v1280_v63 = vpop.f32.mrf.mxu1 }
 0x4fb   : > { %v5644_v56 = vperm.slane %v5640_v59, %v23273_v39 }
 0x4fc   : > { %v5608_v44 = vsel %vm1312_vm0, %v5607_v29, %v5594_v46  ;;  %v21809_v33 = vpop.trf.xlu2  ;;  %v5606_v29 = vperm.slane %v5602_v34, %v23273_v39  ;;  %v1308_v34 = vpop.f32.mrf.mxu3  ;;  %v5052_v59 = vsel %vm1312_vm0, %v5051_v17, %v24078_v20 }
 0x4fd   : > { %v5633_v35 = vrot.slane %v21809_v33, 4  ;;  %v5612_v16 = vperm.slane %v5608_v44, %v23273_v39  ;;  %v5056_v20 = vperm.slane %v5052_v59, %v23267_v21 }
 0x4ff   : > { %v5634_v30 = vsel %vm1312_vm0, %v5633_v35, %v21803_v47  ;;  %v5613_v61 = vrot.slane %v5612_v16, 4  ;;  %v1591_v16 = vperm.slane %v1585_v15, %v23273_v39  ;;  %v29293_v15 = vld [vmem:[#allocation38_spill] sm:$0xff] }
 0x500   : > { %v5638_v37 = vperm.slane %v5634_v30, %v23267_v21  ;;  %v1266_v30 = vpop.f32.mrf.mxu0 }
 0x501   : > { %v5614_v33 = vsel %vm1312_vm0, %v5613_v61, %v5606_v29  ;;  %v1267_v12 = vadd.f32 %v1266_v30, %v655_v3  ;;  %v5057_v61 = vrot.slane %v29289_v8, 4 }
 0x502   : > { %v5645_v49 = vrot.slane %v5638_v37, 4  ;;  %v5713_v48 = vshrl.u32 %v5614_v33, 16  ;;  %v1294_v37 = vpop.f32.mrf.mxu2 }
 0x503   : > { %v1295_v13 = vadd.f32 %v1294_v37, %v656_v55  ;;  %v1281_v53 = vadd.f32 %v1280_v63, %v1267_v12 }
 0x504   : > { %v5646_v46 = vsel %vm1312_vm0, %v5645_v49, %v5632_v9  ;;  %v5064_v9 = vsel %vm1312_vm0, %v5063_v14, %v24000_v36  ;;  %v1600_v49 = vrot.slane %v1591_v16, 4 }
 0x505   : > { %v5650_v10 = vperm.slane %v5646_v46, %v23273_v39  ;;  %v1660_v46 = vpack.c.bf16 %v1591_v16, %v1591_v16  ;;  %v1309_v29 = vadd.f32 %v1308_v34, %v1295_v13  ;;  %v5068_v36 = vperm.slane %v5064_v9, %v23267_v21 }
 0x506   : > { %v1601_v3 = vsel %vm1312_vm0, 0.0, %v1600_v49  ;;  %v1604_v55 = vrot.slane %v1281_v53, 4 }
 0x507   : > { %v5651_v44 = vrot.slane %v5650_v10, 4  ;;  %v1661_v58 = vpack.c.bf16 %v1601_v3, %v1601_v3  ;;  %v5045_v10 = vrot.slane %v24046_v7, 4  ;;  %v1614_v50 = vrot.slane %v1309_v29, 4 }
 0x508   : > { %v24626_v27 = vperm.slane %v1309_v29, %v23267_v21  ;;  %v1583_v3 = vperm.slane %v24531_v38, %v23273_v39 }
 0x509   : > { %v5652_v47 = vsel %vm1312_vm0, %v5651_v44, %v5644_v56  ;;  %21844 = vxpose.binary.xlu2.c.b16.start.end [1/2] (short) %v1661_v58, %v1660_v46, 128  ;;  %v24636_v56 = vperm.slane %v1281_v53, %v23267_v21  ;;  %v1615_v7 = vsel %vm1312_vm0, 0.0, %v1614_v50 }
 0x50a   : > { %v5711_v35 = vpack.i.b16 %v5652_v47, %v5614_v33  ;;  %v5714_v42 = vshrl.u32 %v5652_v47, 16  ;;  %29290 = vst [vmem:[#allocation33_spill] sm:$0xff] %v24626_v27  ;;  %v1624_v44 = vrot.slane %v24626_v27, 4  ;;  %v5075_v33 = vrot.slane %v5068_v36, 4 }
 0x50b   : > { %29292 = vst [vmem:[#allocation32_spill] sm:$0xff] %v24636_v56  ;;  %v1623_v47 = vperm.slane %v1615_v7, %v23267_v21  ;;  %v1598_v46 = vrot.slane %v1583_v3, 4  ;;  %v1658_v58 = vpack.c.bf16 %v1583_v3, %v1583_v3 }
 0x50c   : > { %5717 = vmatpush.bf16.msrb.mxu0 %v5711_v35  ;;  %v5715_v45 = vpack.i.b16 %v5714_v42, %v5713_v48  ;;  %v5046_v35 = vsel %vm1312_vm0, %v5045_v10, %v29293_v15  ;;  %v24646_v32 = vsel %vm1312_vm0, %v1624_v44, %v24636_v56 }
 0x50d   : > { %29294 = vst [vmem:[#allocation34_spill] sm:$0xff] %v24646_v32  ;;  %v1636_v42 = vrot.slane %v1623_v47, 4  ;;  %v1599_v29 = vsel %vm1312_vm0, 0.0, %v1598_v46 }
 0x50e   : > { %5730 = vmatpush.bf16.msrb.mxu1 %v5715_v45 }
 0x510   : > { %5718 = vmatpush.bf16.msrb.mxu0 %v5703_v19  ;;  %v5058_v19 = vsel %vm1312_vm0, %v5057_v61, %v29291_v11 }
 0x511   : > { %v5062_v40 = vperm.slane %v5058_v19, %v23267_v21 }
 0x512   : > { %5731 = vmatpush.bf16.msrb.mxu1 %v24565_v6  ;;  %v1605_v6 = vsel %vm1312_vm0, 0.0, %v1604_v55  ;;  %v1659_v55 = vpack.c.bf16 %v1599_v29, %v1599_v29 }
 0x513   : > { %v1613_v48 = vperm.slane %v1605_v6, %v23267_v21  ;;  %v5076_v14 = vsel %vm1312_vm0, %v5075_v33, %v5062_v40 }
 0x514   : > { %5719 = vmatpush.bf16.msrb.mxu0 %v5695_v25  ;;  %v5069_v25 = vrot.slane %v5056_v20, 4  ;;  %v5080_v52 = vperm.slane %v5076_v14, %v23273_v39 }
 0x515   : > { %v24657_v45 = vsel %vm1312_vm0, %v1636_v42, %v1613_v48  ;;  %v1638_v31 = vrot.slane %v1613_v48, 4 }
 0x516   : > { %5732 = vmatpush.bf16.msrb.mxu1 %v24504_v26  ;;  %v5050_v26 = vperm.slane %v5046_v35, %v23267_v21  ;;  %29295 = vst [vmem:[#allocation35_spill] sm:$0xff] %v24657_v45 }
 0x518   : > { %5720 = vmatpush.bf16.msrb.mxu0 %v5687_v57  ;;  %v5070_v17 = vsel %vm1312_vm0, %v5069_v25, %v5050_v26  ;;  %v5081_v57 = vrot.slane %v5080_v52, 4 }
 0x519   : > { %v5074_v2 = vperm.slane %v5070_v17, %v23273_v39 }
 0x51a   : > { %5733 = vmatpush.bf16.msrb.mxu1 %v24468_v5 }
 0x51b   : > { %v5082_v5 = vsel %vm1312_vm0, %v5081_v57, %v5074_v2 }
 0x51c   : > { %5721 = vmatpush.bf16.msrb.mxu0 %v5679_v18  ;;  %v5655_v1 = vpack.i.b16 %v24134_v23, %v5082_v5  ;;  %v5657_v18 = vshrl.u32 %v5082_v5, 16 }
 0x51e   : > { %5734 = vmatpush.bf16.msrb.mxu1 %v24427_v41  ;;  %v5659_v41 = vpack.i.b16 %v5658_v54, %v5657_v18 }
 0x520   : > { %5722 = vmatpush.bf16.msrb.mxu0 %v5671_v60  ;;  %v29298_v60 = vpack.i.b16 %v29296_v0, %v29297_v24 }
 0x522   : > { %5735 = vmatpush.bf16.msrb.mxu1 %v24335_v28  ;;  %v29299_v28 = vld [vmem:[#allocation24_spill] sm:$0xff] }
 0x524   : > { %5723 = vmatpush.bf16.msrb.mxu0 %v5663_v62  ;;  %v24682_v62 = vsel %vm1312_vm0, %v1623_v47, %v1638_v31 }
 0x525   : > { %29300 = vst [vmem:[#allocation36_spill] sm:$0xff] %v24682_v62 }
 0x526   : > { %5736 = vmatpush.bf16.msrb.mxu1 %v24198_v43 }
 0x528   : > { %5724 = vmatpush.bf16.msrb.mxu0 %v5655_v1 }
 0x52a   : > { %5737 = vmatpush.bf16.msrb.mxu1 %v5659_v41 }
 0x52b   : > { %5725 = vmatmul.bf16.vlgmr.msrb.gmra.mxu0 %v29298_v60 }
 0x52d   : > { %5738 = vmatmul.bf16.vlgmr.msrb.gmra.mxu1 %v29299_v28 }
 0x56d   : > { %v21811_v16 = vpop.trf.xlu1 }
 0x56e   : > { %v5928_v6 = vshrl.u32 %v21811_v16, 16 }
 0x575   : > { %v21812_v30 = vpop.trf.xlu1 }
 0x576   : > { %v5929_v7 = vshrl.u32 %v21812_v30, 16  ;;  %v5926_v38 = vpack.i.b16 %v21812_v30, %v21811_v16 }
 0x578   : > { %v5930_v44 = vpack.i.b16 %v5929_v7, %v5928_v6  ;;  %v6182_v47 = vrot.slane %v5926_v38, 4 }
 0x57a   : > { %v6238_v40 = vrot.slane %v5930_v44, 4 }
 0x57d   : > { %v21813_v51 = vpop.trf.xlu1 }
 0x57e   : > { %v5960_v1 = vshrl.u32 %v21813_v51, 16 }
 0x585   : > { %v21814_v43 = vpop.trf.xlu1 }
 0x586   : > { %v5961_v18 = vshrl.u32 %v21814_v43, 16  ;;  %v5958_v41 = vpack.i.b16 %v21814_v43, %v21813_v51 }
 0x588   : > { %v5962_v0 = vpack.i.b16 %v5961_v18, %v5960_v1  ;;  %v6294_v24 = vrot.slane %v5958_v41, 4 }
 0x58a   : > { %v6350_v16 = vrot.slane %v5962_v0, 4 }
 0x58d   : > { %v24686_v12 = vpop.trf.xlu1 }
 0x58e   : > { %v5992_v46 = vshrl.u32 %v24686_v12, 16 }
 0x595   : > { %v24694_v61 = vpop.trf.xlu1 }
 0x596   : > { %v5993_v29 = vshrl.u32 %v24694_v61, 16 }
 0x59d   : > { %v24696_v53 = vpop.trf.xlu1 }
 0x5a5   : > { %v24698_v59 = vpop.trf.xlu1 }
 0x5a8   : > { %v5726_v63 = vpop.f32.mrf.mxu0 }
 0x5a9   : > { %v24684_v23 = vmul.f32 0.088388346, %v5726_v63 }
 0x5aa   : > { %v5739_v37 = vpop.f32.mrf.mxu1  ;;  %v21845_v20 = vpop.trf.xlu2 }
 0x5ab   : > { %v24688_v34 = vmul.f32 0.088388346, %v5739_v37  ;;  %v5746_v9 = vsel %vm5745_vm1, %v24684_v23, -inf  ;;  %v5944_v15 = vshrl.u32 %v21845_v20, 16 }
 0x5ac   : > { %5747 = vmax.xlane.f32.xlu0 %v5746_v9 }
 0x5ad   : > { %v5749_v49 = vsel %vm5745_vm1, %v24688_v34, -inf  ;;  %v24703_v36 = vpop.trf.xlu1 }
 0x5ae   : > { %5750 = vmax.xlane.f32.xlu1 %v5749_v49 }
 0x5b0   : > { %v5728_v13 = vpop.f32.mrf.mxu0 }
 0x5b2   : > { %v5741_v8 = vpop.f32.mrf.mxu1  ;;  %v21846_v35 = vpop.trf.xlu2 }
 0x5b3   : > { %v5942_v25 = vpack.i.b16 %v21846_v35, %v21845_v20  ;;  %v5945_v48 = vshrl.u32 %v21846_v35, 16  ;;  %v5990_v20 = vpack.i.b16 %v24694_v61, %v24686_v12 }
 0x5b5   : > { %v24705_v10 = vpop.trf.xlu1  ;;  %v5946_v42 = vpack.i.b16 %v5945_v48, %v5944_v15  ;;  %v6180_v26 = vrot.slane %v5942_v25, 4  ;;  %v24716_v14 = vsel %vm1312_vm0, %v5942_v25, %v6182_v47  ;;  %v6406_v15 = vrot.slane %v5990_v20, 4 }
 0x5b7   : > { %v24719_v17 = vsel %vm1312_vm0, %v6180_v26, %v5926_v38  ;;  %v6236_v52 = vrot.slane %v5946_v42, 4  ;;  %v24722_v2 = vsel %vm1312_vm0, %v5946_v42, %v6238_v40 }
 0x5b8   : > { %v6247_v56 = vperm.slane %v24722_v2, %v23267_v21 }
 0x5b9   : > { %v24727_v5 = vsel %vm1312_vm0, %v6236_v52, %v5930_v44  ;;  %v5994_v44 = vpack.i.b16 %v5993_v29, %v5992_v46 }
 0x5ba   : > { %v21847_v54 = vpop.trf.xlu2 }
 0x5bb   : > { %v5976_v60 = vshrl.u32 %v21847_v54, 16  ;;  %v6462_v25 = vrot.slane %v5994_v44, 4 }
 0x5bd   : > { %v24707_v50 = vpop.trf.xlu1 }
 0x5c2   : > { %v21848_v28 = vpop.trf.xlu2 }
 0x5c3   : > { %v5974_v31 = vpack.i.b16 %v21848_v28, %v21847_v54  ;;  %v5977_v63 = vshrl.u32 %v21848_v28, 16  ;;  %v6025_v28 = vshrl.u32 %v24698_v59, 16 }
 0x5c5   : > { %v24709_v11 = vpop.trf.xlu1  ;;  %v5978_v37 = vpack.i.b16 %v5977_v63, %v5976_v60  ;;  %v6292_v9 = vrot.slane %v5974_v31, 4  ;;  %v24732_v49 = vsel %vm1312_vm0, %v5974_v31, %v6294_v24  ;;  %v6024_v60 = vshrl.u32 %v24696_v53, 16 }
 0x5c7   : > { %v24735_v13 = vsel %vm1312_vm0, %v6292_v9, %v5958_v41  ;;  %v6348_v8 = vrot.slane %v5978_v37, 4  ;;  %v24738_v51 = vsel %vm1312_vm0, %v5978_v37, %v6350_v16  ;;  %v6022_v16 = vpack.i.b16 %v24698_v59, %v24696_v53 }
 0x5c8   : > { %v6026_v31 = vpack.i.b16 %v6025_v28, %v6024_v60 }
 0x5c9   : > { %v24741_v43 = vsel %vm1312_vm0, %v6348_v8, %v5962_v0  ;;  %v6518_v63 = vrot.slane %v6022_v16, 4 }
 0x5ca   : > { %v21849_v3 = vpop.trf.xlu2  ;;  %v6574_v8 = vrot.slane %v6026_v31, 4 }
 0x5cb   : > { %v6008_v35 = vshrl.u32 %v21849_v3, 16 }
 0x5cd   : > { %v24711_v19 = vpop.trf.xlu1 }
 0x5d2   : > { %v21850_v40 = vpop.trf.xlu2 }
 0x5d3   : > { %v6006_v48 = vpack.i.b16 %v21850_v40, %v21849_v3  ;;  %v6009_v42 = vshrl.u32 %v21850_v40, 16 }
 0x5d5   : > { %21827 = vxpose.binary.xlu0.c.b16.start.end [1/2] (short) %v1659_v55, %v1658_v58, 128  ;;  %v24713_v33 = vpop.trf.xlu1  ;;  %v6010_v26 = vpack.i.b16 %v6009_v42, %v6008_v35  ;;  %v6404_v52 = vrot.slane %v6006_v48, 4 }
 0x5d7   : > { %v24757_v61 = vsel %vm1312_vm0, %v6404_v52, %v5990_v20  ;;  %v6460_v54 = vrot.slane %v6010_v26, 4  ;;  %v24760_v1 = vsel %vm1312_vm0, %v6010_v26, %v6462_v25 }
 0x5d9   : > { %v24767_v0 = vsel %vm1312_vm0, %v6460_v54, %v5994_v44  ;;  %v6057_v44 = vshrl.u32 %v24705_v10, 16 }
 0x5da   : > { %v21851_v24 = vpop.trf.xlu2 }
 0x5db   : > { %v6040_v37 = vshrl.u32 %v21851_v24, 16 }
 0x5dd   : > { %v24724_v57 = vpop.trf.xlu1 }
 0x5e2   : > { %v21852_v9 = vpop.trf.xlu2 }
 0x5e3   : > { %v6038_v3 = vpack.i.b16 %v21852_v9, %v21851_v24  ;;  %v6041_v46 = vshrl.u32 %v21852_v9, 16  ;;  %v6086_v9 = vpack.i.b16 %v24709_v11, %v24707_v50 }
 0x5e5   : > { %v24729_v30 = vpop.trf.xlu1  ;;  %v6042_v29 = vpack.i.b16 %v6041_v46, %v6040_v37 }
 0x5ea   : > { %v21853_v59 = vpop.trf.xlu2 }
 0x5f2   : > { %v21854_v42 = vpop.trf.xlu2 }
 0x5f3   : > { %v6070_v52 = vpack.i.b16 %v21854_v42, %v21853_v59 }
 0x5f5   : > { %v6628_v24 = vrot.slane %v6070_v52, 4 }
 0x61f   : > { %v5748_v58 = vpop.xlane.xlu0 %5747 }
 0x620   : > { %v5752_v55 = vsub.f32 %v24684_v23, %v5748_v58  ;;  %v24750_v23 = vsel %vm1312_vm0, %v6006_v48, %v6406_v15  ;;  %v6516_v58 = vrot.slane %v6038_v3, 4  ;;  %v6054_v15 = vpack.i.b16 %v24705_v10, %v24703_v36 }
 0x621   : > { %v5751_v6 = vpop.xlane.xlu1 %5750  ;;  %v6072_v48 = vshrl.u32 %v21853_v59, 16 }
 0x622   : > { %v5754_v7 = vmul.f32 1.442695, %v5752_v55  ;;  %v5753_v38 = vsub.f32 %v24688_v34, %v5751_v6  ;;  %v24774_v55 = vsel %vm1312_vm0, %v6038_v3, %v6518_v63  ;;  %v24777_v20 = vsel %vm1312_vm0, %v6516_v58, %v6022_v16  ;;  %v21855_v16 = vpop.trf.xlu2 }
 0x623   : > { %v6572_v6 = vrot.slane %v6042_v29, 4  ;;  %v6630_v40 = vrot.slane %v6054_v15, 4  ;;  %v6089_v63 = vshrl.u32 %v24709_v11, 16  ;;  %v6104_v58 = vshrl.u32 %v21855_v16, 16 }
 0x624   : > { %22664 = vpow2.f32 %v5754_v7  ;;  %v5756_v47 = vmul.f32 1.442695, %v5753_v38  ;;  %v24780_v7 = vsel %vm1312_vm0, %v6042_v29, %v6574_v8  ;;  %v6056_v38 = vshrl.u32 %v24703_v36, 16 }
 0x625   : > { %v24783_v53 = vsel %vm1312_vm0, %v6572_v6, %v6026_v31  ;;  %v24794_v60 = vsel %vm1312_vm0, %v6070_v52, %v6630_v40  ;;  %v6088_v31 = vshrl.u32 %v24707_v50, 16  ;;  %v6742_v29 = vrot.slane %v6086_v9, 4 }
 0x626   : > { %22666 = vpow2.f32 %v5756_v47  ;;  %v1586_v47 = vrot.slane %v24599_v4, 4  ;;  %v6058_v35 = vpack.i.b16 %v6057_v44, %v6056_v38  ;;  %v24797_v4 = vsel %vm1312_vm0, %v6628_v24, %v6054_v15 }
 0x627   : > { %v6090_v8 = vpack.i.b16 %v6089_v63, %v6088_v31  ;;  %v6118_v52 = vpack.i.b16 %v24713_v33, %v24711_v19 }
 0x628   : > { %v1587_v25 = vsel %vm1312_vm0, %v24588_v22, %v1586_v47  ;;  %v6686_v26 = vrot.slane %v6058_v35, 4 }
 0x629   : > { %v1595_v54 = vperm.slane %v1587_v25, %v23273_v39  ;;  %v6798_v59 = vrot.slane %v6090_v8, 4 }
 0x62a   : > { %v24752_v12 = vpop.eup %22664  ;;  %v21856_v6 = vpop.trf.xlu2 }
 0x62b   : > { %v5758_v34 = vsel %vm5745_vm1, %v24752_v12, 0.0  ;;  %v1602_v22 = vrot.slane %v1595_v54, 4  ;;  %v1662_v3 = vpack.c.bf16 %v1595_v54, %v1595_v54  ;;  %v6102_v38 = vpack.i.b16 %v21856_v6, %v21855_v16 }
 0x62c   : > { %v24762_v18 = vpop.eup %22666  ;;  %5759 = vadd.xlane.f32.xlu2 %v5758_v34  ;;  %v6073_v34 = vshrl.u32 %v21854_v42, 16  ;;  %v6105_v44 = vshrl.u32 %v21856_v6, 16  ;;  %v6120_v42 = vshrl.u32 %v24711_v19, 16  ;;  %v6854_v54 = vrot.slane %v6118_v52, 4 }
 0x62d   : > { %v5761_v41 = vsel %vm5745_vm1, %v24762_v18, 0.0  ;;  %v1603_v37 = vsel %vm1312_vm0, 0.0, %v1602_v22  ;;  %v6740_v15 = vrot.slane %v6102_v38, 4 }
 0x62e   : > { %5762 = vadd.xlane.f32.xlu1 %v5761_v41  ;;  %v6074_v41 = vpack.i.b16 %v6073_v34, %v6072_v48  ;;  %v1663_v46 = vpack.c.bf16 %v1603_v37, %v1603_v37  ;;  %v6106_v47 = vpack.i.b16 %v6105_v44, %v6104_v58  ;;  %v6150_v58 = vpack.i.b16 %v24729_v30, %v24724_v57 }
 0x62f   : > { %v24814_v40 = vsel %vm1312_vm0, %v6740_v15, %v6086_v9 }
 0x630   : > { %v6684_v36 = vrot.slane %v6074_v41, 4  ;;  %v24800_v10 = vsel %vm1312_vm0, %v6074_v41, %v6686_v26  ;;  %v6796_v25 = vrot.slane %v6106_v47, 4  ;;  %v24817_v50 = vsel %vm1312_vm0, %v6106_v47, %v6798_v59 }
 0x631   : > { %v6121_v26 = vshrl.u32 %v24713_v33, 16  ;;  %v6966_v59 = vrot.slane %v6150_v58, 4 }
 0x632   : > { %v24803_v28 = vsel %vm1312_vm0, %v6684_v36, %v6058_v35  ;;  %v24811_v35 = vsel %vm1312_vm0, %v6102_v38, %v6742_v29  ;;  %v24820_v11 = vsel %vm1312_vm0, %v6796_v25, %v6090_v8  ;;  %v21857_v48 = vpop.trf.xlu2  ;;  %v6153_v29 = vshrl.u32 %v24729_v30, 16 }
 0x633   : > { %v6122_v34 = vpack.i.b16 %v6121_v26, %v6120_v42  ;;  %v6136_v41 = vshrl.u32 %v21857_v48, 16 }
 0x635   : > { %v6910_v36 = vrot.slane %v6122_v34, 4 }
 0x63a   : > { %v21858_v24 = vpop.trf.xlu2 }
 0x63b   : > { %v6134_v22 = vpack.i.b16 %v21858_v24, %v21857_v48  ;;  %v6137_v16 = vshrl.u32 %v21858_v24, 16 }
 0x63d   : > { %v6138_v31 = vpack.i.b16 %v6137_v16, %v6136_v41  ;;  %v6852_v63 = vrot.slane %v6134_v22, 4  ;;  %v24827_v37 = vsel %vm1312_vm0, %v6134_v22, %v6854_v54 }
 0x63f   : > { %v24830_v9 = vsel %vm1312_vm0, %v6852_v63, %v6118_v52  ;;  %v6908_v8 = vrot.slane %v6138_v31, 4 }
 0x640   : > { %29301 = vst [vmem:[#allocation20_spill] sm:$0xff] %v24830_v9 }
 0x641   : > { %v24836_v19 = vsel %vm1312_vm0, %v6908_v8, %v6122_v34 }
 0x642   : > { %29302 = vst [vmem:[#allocation21_spill] sm:$0xff] %v24836_v19  ;;  %v21859_v33 = vpop.trf.xlu2 }
 0x643   : > { %v6168_v38 = vshrl.u32 %v21859_v33, 16 }
 0x64a   : > { %v21860_v44 = vpop.trf.xlu2 }
 0x64b   : > { %v6166_v15 = vpack.i.b16 %v21860_v44, %v21859_v33  ;;  %v6169_v25 = vshrl.u32 %v21860_v44, 16 }
 0x64d   : > { %v6170_v48 = vpack.i.b16 %v6169_v25, %v6168_v38  ;;  %v6964_v42 = vrot.slane %v6166_v15, 4  ;;  %v24843_v26 = vsel %vm1312_vm0, %v6166_v15, %v6966_v59 }
 0x64e   : > { %29303 = vst [vmem:[#allocation39_spill] sm:$0xff] %v24843_v26 }
 0x64f   : > { %v24846_v52 = vsel %vm1312_vm0, %v6964_v42, %v6150_v58  ;;  %v7020_v34 = vrot.slane %v6170_v48, 4 }
 0x650   : > { %29304 = vst [vmem:[#allocation37_spill] sm:$0xff] %v24846_v52 }
 0x655   : > { %21861 = vxpose.binary.xlu0.c.b16.start.end [1/2] (short) %v1663_v46, %v1662_v3, 128  ;;  %v24833_v3 = vsel %vm1312_vm0, %v6138_v31, %v6910_v36  ;;  %v6152_v46 = vshrl.u32 %v24724_v57, 16 }
 0x657   : > { %v6154_v6 = vpack.i.b16 %v6153_v29, %v6152_v46 }
 0x659   : > { %v7022_v47 = vrot.slane %v6154_v6, 4  ;;  %v24852_v57 = vsel %vm1312_vm0, %v7020_v34, %v6154_v6 }
 0x65a   : > { %29306 = vst [vmem:[#allocation23_spill] sm:$0xff] %v24852_v57 }
 0x65b   : > { %v24849_v54 = vsel %vm1312_vm0, %v6170_v48, %v7022_v47 }
 0x65c   : > { %29305 = vst [vmem:[#allocation38_spill] sm:$0xff] %v24849_v54 }
 0x681   : > { %v21828_v30 = vpop.trf.xlu0 }
 0x689   : > { %v21829_v41 = vpop.trf.xlu0 }
 0x691   : > { %v24854_v24 = vpop.trf.xlu0 }
 0x699   : > { %v24856_v36 = vpop.trf.xlu0 }
 0x69f   : > { %v5760_v22 = vpop.xlane.xlu2 %5759 }
 0x6a0   : > { %22668 = vrcp.f32 %v5760_v22  ;;  %v5775_v6 = vand.u32 2147483648, %v5760_v22  ;;  %v5773_v38 = vand.u32 2147483647, %v5760_v22  ;;  %vm5769_vm3 = vweird.f32 %v5760_v22 }
 0x6a1   : > { %v5763_v16 = vpop.xlane.xlu1 %5762  ;;  %v24858_v31 = vpop.trf.xlu0 }
 0x6a2   : > { %22670 = vrcp.f32 %v5763_v16  ;;  %v5790_v47 = vand.u32 2147483648, %v5763_v16  ;;  %v5788_v48 = vand.u32 2147483647, %v5763_v16  ;;  %v5776_v42 = vor.u32 1.1754944e-38, %v5775_v6 }
 0x6a3   : > { %vm5774_vm6 = vcmp.eq.f32.partialorder %v5773_v38, 8.507059e+37  ;;  %vm5784_vm7 = vweird.f32 %v5763_v16 }
 0x6a4   : > { %v5791_v32 = vor.u32 1.1754944e-38, %v5790_v47  ;;  %vm5789_vm9 = vcmp.eq.f32.partialorder %v5788_v48, 8.507059e+37  ;;  %v5934_v48 = vpack.i.b16 %v21829_v41, %v21828_v30 }
 0x6a6   : > { %v22669_v63 = vpop.eup %22668 }
 0x6a7   : > { %v5765_v8 = vmul.f32 %v22669_v63, %v5760_v22  ;;  %vm5770_vm2 = vweird.f32 %v22669_v63 }
 0x6a8   : > { %v22671_v33 = vpop.eup %22670  ;;  %vm5771_vm5 = vmor %vm5769_vm3, %vm5770_vm2 }
 0x6a9   : > { %v5766_v46 = vsub.f32 1.0, %v5765_v8  ;;  %v5780_v29 = vmul.f32 %v22671_v33, %v5763_v16  ;;  %v24860_v58 = vpop.trf.xlu0  ;;  %vm5785_vm4 = vweird.f32 %v22671_v33 }
 0x6aa   : > { %vm5786_vm8 = vmor %vm5784_vm7, %vm5785_vm4 }
 0x6ab   : > { %v5767_v59 = vmul.f32 %v22669_v63, %v5766_v46  ;;  %v5781_v44 = vsub.f32 1.0, %v5780_v29 }
 0x6ad   : > { %v5768_v15 = vadd.f32 %v22669_v63, %v5767_v59  ;;  %v5782_v25 = vmul.f32 %v22671_v33, %v5781_v44 }
 0x6af   : > { %v5783_v34 = vadd.f32 %v22671_v33, %v5782_v25  ;;  %v5772_v8 = vsel %vm5771_vm5, %v22669_v63, %v5768_v15  ;;  %v5936_v25 = vshrl.u32 %v21828_v30, 16 }
 0x6b0   : > { %v5777_v62 = vsel %vm5774_vm6, %v5776_v42, %v5772_v8  ;;  %v6191_v8 = vperm.slane %v24716_v14, %v23267_v21 }
 0x6b1   : > { %v24862_v46 = vpop.trf.xlu0  ;;  %v5778_v29 = vmul.f32 %v24752_v12, %v5777_v62  ;;  %v5787_v22 = vsel %vm5786_vm8, %v22671_v33, %v5783_v34  ;;  %v5937_v33 = vshrl.u32 %v21829_v41, 16  ;;  %v6187_v34 = vperm.slane %v24719_v17, %v23267_v21 }
 0x6b2   : > { %v5792_v45 = vsel %vm5789_vm9, %v5791_v32, %v5787_v22  ;;  %v6194_v22 = vrot.slane %v5934_v48, 4  ;;  %v6218_v17 = vrot.slane %v6191_v8, 4 }
 0x6b3   : > { %v5794_v59 = vpack.c.bf16 %v5778_v29, %v5778_v29  ;;  %v5793_v44 = vmul.f32 %v24762_v18, %v5792_v45  ;;  %v5938_v42 = vpack.i.b16 %v5937_v33, %v5936_v25 }
 0x6b5   : > { %v9805_v27 = vsel %vm5745_vm1, %v5794_v59, 0  ;;  %v5795_v6 = vpack.c.bf16 %v5793_v44, %v5793_v44  ;;  %v6250_v54 = vrot.slane %v5938_v42, 4 }
 0x6b6   : > { %9814 = vmatpush.bf16.xpose.msrb.mxu2 %v9805_v27 }
 0x6b7   : > { %v9881_v16 = vsel %vm5745_vm1, %v5795_v6, 0 }
 0x6b8   : > { %9890 = vmatpush.bf16.xpose.msrb.mxu3 %v9881_v16  ;;  %v6243_v16 = vperm.slane %v24727_v5, %v23267_v21 }
 0x6b9   : > { %v24868_v63 = vpop.trf.xlu0 }
 0x6c1   : > { %v24870_v38 = vpop.trf.xlu0 }
 0x6c9   : > { %v24872_v47 = vpop.trf.xlu0 }
 0x6d1   : > { %v24874_v15 = vpop.trf.xlu0 }
 0x6d9   : > { %v24876_v62 = vpop.trf.xlu0 }
 0x6e1   : > { %v24878_v32 = vpop.trf.xlu0 }
 0x6e9   : > { %v24880_v45 = vpop.trf.xlu0 }
 0x6f1   : > { %v24882_v12 = vpop.trf.xlu0 }
 0x6f2   : > { %29307 = vst [vmem:[#allocation22_spill] sm:$0xff] %v24882_v12 }
 0x6f9   : > { %v24884_v27 = vpop.trf.xlu0 }
 0x6fa   : > { %29308 = vst [vmem:[#allocation24_spill] sm:$0xff] %v24884_v27 }
 0x701   : > { %v21862_v18 = vpop.trf.xlu0 }
 0x702   : > { %v5952_v59 = vshrl.u32 %v21862_v18, 16 }
 0x709   : > { %v21863_v29 = vpop.trf.xlu0 }
 0x70a   : > { %v5950_v44 = vpack.i.b16 %v21863_v29, %v21862_v18  ;;  %v5953_v6 = vshrl.u32 %v21863_v29, 16  ;;  %v6206_v29 = vrot.slane %v6187_v34, 4 }
 0x70c   : > { %v5954_v30 = vpack.i.b16 %v5953_v6, %v5952_v59  ;;  %v6192_v41 = vrot.slane %v5950_v44, 4  ;;  %v6195_v33 = vsel %vm1312_vm0, %v5950_v44, %v6194_v22  ;;  %v6262_v22 = vrot.slane %v6243_v16, 4 }
 0x70d   : > { %v6203_v25 = vperm.slane %v6195_v33, %v23267_v21  ;;  %v6274_v44 = vrot.slane %v6247_v56, 4 }
 0x70e   : > { %v6193_v14 = vsel %vm1312_vm0, %v6192_v41, %v5934_v48  ;;  %v6248_v26 = vrot.slane %v5954_v30, 4  ;;  %v6251_v18 = vsel %vm1312_vm0, %v5954_v30, %v6250_v54  ;;  %v5969_v30 = vshrl.u32 %v24856_v36, 16 }
 0x70f   : > { %v6199_v57 = vperm.slane %v6193_v14, %v23267_v21  ;;  %v6216_v5 = vrot.slane %v6203_v25, 4  ;;  %v6259_v52 = vperm.slane %v6251_v18, %v23267_v21  ;;  %v24901_v2 = vsel %vm1312_vm0, %v6203_v25, %v6218_v17 }
 0x710   : > { %v6249_v59 = vsel %vm1312_vm0, %v6248_v26, %v5938_v42 }
 0x711   : > { %v6204_v6 = vrot.slane %v6199_v57, 4  ;;  %v21864_v33 = vpop.trf.xlu0  ;;  %v6207_v48 = vsel %vm1312_vm0, %v6199_v57, %v6206_v29  ;;  %v6255_v41 = vperm.slane %v6249_v59, %v23267_v21  ;;  %v24907_v54 = vsel %vm1312_vm0, %v6216_v5, %v6191_v8 }
 0x712   : > { %v6272_v14 = vrot.slane %v6259_v52, 4  ;;  %v24913_v26 = vsel %vm1312_vm0, %v6259_v52, %v6274_v44  ;;  %v6215_v42 = vperm.slane %v6207_v48, %v23273_v39  ;;  %v5966_v5 = vpack.i.b16 %v24856_v36, %v24854_v24 }
 0x713   : > { %v6260_v18 = vrot.slane %v6255_v41, 4  ;;  %v6263_v17 = vsel %vm1312_vm0, %v6255_v41, %v6262_v22  ;;  %v6205_v25 = vsel %vm1312_vm0, %v6204_v6, %v6187_v34  ;;  %v5968_v22 = vshrl.u32 %v24854_v24, 16 }
 0x714   : > { %v6271_v57 = vperm.slane %v6263_v17, %v23273_v39  ;;  %v6211_v29 = vperm.slane %v6205_v25, %v23273_v39  ;;  %v6273_v8 = vsel %vm1312_vm0, %v6272_v14, %v6247_v56  ;;  %v5984_v6 = vshrl.u32 %v21864_v33, 16 }
 0x715   : > { %v6261_v59 = vsel %vm1312_vm0, %v6260_v18, %v6243_v16  ;;  %v5970_v44 = vpack.i.b16 %v5969_v30, %v5968_v22  ;;  %v6299_v41 = vperm.slane %v24735_v13, %v23267_v21  ;;  %v6303_v56 = vperm.slane %v24732_v49, %v23267_v21 }
 0x716   : > { %21884 = vxpose.binary.xlu0.c.b16.start.end [1/2] (short) (narrow) %v6271_v57, %v6215_v42, 16  ;;  %v6267_v34 = vperm.slane %v6261_v59, %v23273_v39  ;;  %v6228_v52 = vrot.slane %v6211_v29, 4  ;;  %v6306_v14 = vrot.slane %v5966_v5, 4  ;;  %v6359_v30 = vperm.slane %v24738_v51, %v23267_v21 }
 0x717   : > { %v6355_v25 = vperm.slane %v24741_v43, %v23267_v21  ;;  %v6330_v22 = vrot.slane %v6303_v56, 4 }
 0x718   : > { %21878 = vxpose.binary.xlu2.c.b16.start.end [1/2] (short) (narrow) %v6267_v34, %v6211_v29, 16  ;;  %v6284_v48 = vrot.slane %v6267_v34, 4  ;;  %v6229_v24 = vsel %vm1312_vm0, 0, %v6228_v52  ;;  %v6362_v29 = vrot.slane %v5970_v44, 4 }
 0x719   : > { %v21865_v36 = vpop.trf.xlu0 }
 0x71a   : > { %v5982_v17 = vpack.i.b16 %v21865_v36, %v21864_v33  ;;  %v5985_v16 = vshrl.u32 %v21865_v36, 16  ;;  %v6285_v18 = vsel %vm1312_vm0, 0, %v6284_v48  ;;  %v6318_v36 = vrot.slane %v6299_v41, 4 }
 0x71b   : > { %21881 = vxpose.binary.xlu1.c.b16.start.end [1/2] (short) (narrow) %v6285_v18, %v6229_v24, 16 }
 0x71c   : > { %v5986_v13 = vpack.i.b16 %v5985_v16, %v5984_v6  ;;  %v6304_v59 = vrot.slane %v5982_v17, 4  ;;  %v6307_v49 = vsel %vm1312_vm0, %v5982_v17, %v6306_v14  ;;  %v6374_v14 = vrot.slane %v6355_v25, 4 }
 0x71d   : > { %v6315_v33 = vperm.slane %v6307_v49, %v23267_v21  ;;  %v6386_v17 = vrot.slane %v6359_v30, 4 }
 0x71e   : > { %v6305_v34 = vsel %vm1312_vm0, %v6304_v59, %v5966_v5  ;;  %v6360_v52 = vrot.slane %v5986_v13, 4  ;;  %v6363_v48 = vsel %vm1312_vm0, %v5986_v13, %v6362_v29  ;;  %v6230_v13 = vrot.slane %v6215_v42, 4 }
 0x71f   : > { %v6311_v51 = vperm.slane %v6305_v34, %v23267_v21  ;;  %v6328_v24 = vrot.slane %v6315_v33, 4  ;;  %v6371_v18 = vperm.slane %v6363_v48, %v23267_v21  ;;  %v24941_v43 = vsel %vm1312_vm0, %v6315_v33, %v6330_v22 }
 0x720   : > { %v6361_v6 = vsel %vm1312_vm0, %v6360_v52, %v5970_v44  ;;  %v6286_v34 = vrot.slane %v6271_v57, 4  ;;  %v6231_v42 = vsel %vm1312_vm0, 0, %v6230_v13 }
 0x721   : > { %v6367_v16 = vperm.slane %v6361_v6, %v23267_v21  ;;  %v21866_v49 = vpop.trf.xlu0  ;;  %v6316_v5 = vrot.slane %v6311_v51, 4  ;;  %v24946_v59 = vsel %vm1312_vm0, %v6311_v51, %v6318_v36  ;;  %v24949_v29 = vsel %vm1312_vm0, %v6328_v24, %v6303_v56 }
 0x722   : > { %v6384_v48 = vrot.slane %v6371_v18, 4  ;;  %v24958_v52 = vsel %vm1312_vm0, %v6371_v18, %v6386_v17  ;;  %v6287_v57 = vsel %vm1312_vm0, 0, %v6286_v34  ;;  %v6016_v56 = vshrl.u32 %v21866_v49, 16 }
 0x723   : > { %v24952_v22 = vsel %vm1312_vm0, %v6316_v5, %v6299_v41  ;;  %v6372_v33 = vrot.slane %v6367_v16, 4  ;;  %v24955_v44 = vsel %vm1312_vm0, %v6367_v16, %v6374_v14  ;;  %v6223_v51 = vperm.slane %v24907_v54, %v23273_v39 }
 0x724   : > { %v24961_v6 = vsel %vm1312_vm0, %v6384_v48, %v6359_v30  ;;  %v6279_v24 = vperm.slane %v6273_v8, %v23273_v39  ;;  %v6001_v18 = vshrl.u32 %v24860_v58, 16  ;;  %v6000_v17 = vshrl.u32 %v24858_v31, 16 }
 0x725   : > { %v24964_v36 = vsel %vm1312_vm0, %v6372_v33, %v6355_v25  ;;  %v24974_v25 = vperm.slane %v24757_v61, %v23267_v21  ;;  %v5998_v16 = vpack.i.b16 %v24860_v58, %v24858_v31  ;;  %v24981_v54 = vperm.slane %v24767_v0, %v23267_v21 }
 0x726   : > { %v6002_v8 = vpack.i.b16 %v6001_v18, %v6000_v17 }
 0x727   : > { %v6430_v61 = vrot.slane %v24974_v25, 4  ;;  %v6486_v0 = vrot.slane %v24981_v54, 4 }
 0x728   : > { %21887 = vxpose.binary.xlu2.c.b16.start.end [1/2] (short) (narrow) %v6287_v57, %v6231_v42, 16 }
 0x729   : > { %v21867_v41 = vpop.trf.xlu0 }
 0x72a   : > { %v6014_v14 = vpack.i.b16 %v21867_v41, %v21866_v49  ;;  %v6017_v30 = vshrl.u32 %v21867_v41, 16  ;;  %v6288_v41 = vrot.slane %v6279_v24, 4 }
 0x72b   : > { %21890 = vxpose.binary.xlu1.c.b16.start.end [1/2] (short) (narrow) %v6279_v24, %v6223_v51, 16 }
 0x72c   : > { %v6018_v5 = vpack.i.b16 %v6017_v30, %v6016_v56  ;;  %v6416_v13 = vrot.slane %v6014_v14, 4  ;;  %v6232_v56 = vrot.slane %v6223_v51, 4  ;;  %v6033_v30 = vshrl.u32 %v24868_v63, 16 }
 0x72d   : > { %v6289_v24 = vsel %vm1312_vm0, 0, %v6288_v41 }
 0x72e   : > { %v6417_v49 = vsel %vm1312_vm0, %v6416_v13, %v5998_v16  ;;  %v6472_v34 = vrot.slane %v6018_v5, 4  ;;  %v6233_v51 = vsel %vm1312_vm0, 0, %v6232_v56 }
 0x72f   : > { %v24985_v48 = vperm.slane %v6417_v49, %v23267_v21  ;;  %v6032_v49 = vshrl.u32 %v24862_v46, 16 }
 0x730   : > { %v6473_v33 = vsel %vm1312_vm0, %v6472_v34, %v6002_v8  ;;  %v6030_v34 = vpack.i.b16 %v24868_v63, %v24862_v46  ;;  %v6227_v46 = vperm.slane %v24901_v2, %v23273_v39  ;;  %v6283_v63 = vperm.slane %v24913_v26, %v23273_v39 }
 0x731   : > { %v21868_v42 = vpop.trf.xlu0  ;;  %v6431_v31 = vsel %vm1312_vm0, %v24985_v48, %v6430_v61  ;;  %v24992_v58 = vperm.slane %v6473_v33, %v23267_v21  ;;  %v6034_v33 = vpack.i.b16 %v6033_v30, %v6032_v49  ;;  %v25021_v49 = vperm.slane %v24750_v23, %v23267_v21 }
 0x732   : > { %v24996_v57 = vperm.slane %v6431_v31, %v23273_v39  ;;  %v6048_v31 = vshrl.u32 %v21868_v42, 16  ;;  %v6530_v56 = vrot.slane %v6030_v34, 4  ;;  %v25031_v23 = vperm.slane %v24760_v1, %v23267_v21 }
 0x733   : > { %v6487_v18 = vsel %vm1312_vm0, %v24992_v58, %v6486_v0  ;;  %v6442_v1 = vrot.slane %v25021_v49, 4 }
 0x734   : > { %v6454_v17 = vrot.slane %v24996_v57, 4  ;;  %v25003_v13 = vperm.slane %v6487_v18, %v23273_v39  ;;  %v6527_v18 = vperm.slane %v24774_v55, %v23267_v21  ;;  %v6583_v55 = vperm.slane %v24780_v7, %v23267_v21 }
 0x736   : > { %v6510_v61 = vrot.slane %v25003_v13, 4  ;;  %v6455_v0 = vsel %vm1312_vm0, 0, %v6454_v17  ;;  %v6418_v17 = vrot.slane %v5998_v16, 4 }
 0x738   : > { %21893 = vxpose.binary.xlu2.c.b16.start.end [1/2] (short) (narrow) %v6289_v24, %v6233_v51, 16  ;;  %v6511_v12 = vsel %vm1312_vm0, 0, %v6510_v61  ;;  %v6474_v61 = vrot.slane %v6002_v8, 4  ;;  %v6554_v24 = vrot.slane %v6527_v18, 4  ;;  %v6419_v26 = vsel %vm1312_vm0, %v6014_v14, %v6418_v17 }
 0x739   : > { %21935 = vxpose.binary.xlu0.c.b16.start.end [1/2] (short) (narrow) %v6511_v12, %v6455_v0, 16  ;;  %v21869_v27 = vpop.trf.xlu0  ;;  %v6586_v12 = vrot.slane %v6034_v33, 4  ;;  %v25039_v14 = vperm.slane %v6419_v26, %v23267_v21  ;;  %v6234_v26 = vrot.slane %v6227_v46, 4 }
 0x73a   : > { %v6046_v41 = vpack.i.b16 %v21869_v27, %v21868_v42  ;;  %v6049_v30 = vshrl.u32 %v21869_v27, 16  ;;  %v6475_v42 = vsel %vm1312_vm0, %v6018_v5, %v6474_v61 }
 0x73b   : > { %21896 = vxpose.binary.xlu1.c.b16.start.end [1/2] (short) (narrow) %v6283_v63, %v6227_v46, 16  ;;  %v25042_v5 = vperm.slane %v6475_v42, %v23267_v21  ;;  %v6290_v42 = vrot.slane %v6283_v63, 4 }
 0x73c   : > { %v6050_v51 = vpack.i.b16 %v6049_v30, %v6048_v31  ;;  %v6531_v2 = vsel %vm1312_vm0, %v6046_v41, %v6530_v56  ;;  %v6528_v16 = vrot.slane %v6046_v41, 4  ;;  %v6610_v30 = vrot.slane %v6583_v55, 4 }
 0x73d   : > { %v6539_v27 = vperm.slane %v6531_v2, %v23267_v21  ;;  %v6498_v2 = vrot.slane %v25031_v23, 4  ;;  %v6291_v46 = vsel %vm1312_vm0, 0, %v6290_v42 }
 0x73e   : > { %v6584_v8 = vrot.slane %v6050_v51, 4  ;;  %v6587_v0 = vsel %vm1312_vm0, %v6050_v51, %v6586_v12  ;;  %v6529_v12 = vsel %vm1312_vm0, %v6528_v16, %v6030_v34  ;;  %v6235_v16 = vsel %vm1312_vm0, 0, %v6234_v26 }
 0x73f   : > { %v6552_v7 = vrot.slane %v6539_v27, 4  ;;  %v6595_v31 = vperm.slane %v6587_v0, %v23267_v21  ;;  %v25036_v56 = vsel %vm1312_vm0, %v6539_v27, %v6554_v24  ;;  %v6443_v0 = vsel %vm1312_vm0, %v25039_v14, %v6442_v1 }
 0x740   : > { %v6585_v51 = vsel %vm1312_vm0, %v6584_v8, %v6034_v33  ;;  %v25064_v34 = vperm.slane %v6529_v12, %v23267_v21  ;;  %v25072_v63 = vperm.slane %v6443_v0, %v23273_v39  ;;  %v25093_v12 = vperm.slane %v24783_v53, %v23267_v21 }
 0x741   : > { %v25045_v17 = vpop.trf.xlu0  ;;  %v25048_v41 = vsel %vm1312_vm0, %v6552_v7, %v6527_v18  ;;  %v6608_v61 = vrot.slane %v6595_v31, 4  ;;  %v25054_v24 = vsel %vm1312_vm0, %v6595_v31, %v6610_v30  ;;  %v6499_v18 = vsel %vm1312_vm0, %v25042_v5, %v6498_v2 }
 0x742   : > { %v25067_v33 = vperm.slane %v6585_v51, %v23267_v21  ;;  %v6323_v7 = vperm.slane %v24952_v22, %v23273_v39  ;;  %v6379_v31 = vperm.slane %v24964_v36, %v23273_v39  ;;  %v6540_v30 = vrot.slane %v25064_v34, 4 }
 0x743   : > { %v25057_v27 = vsel %vm1312_vm0, %v6608_v61, %v6583_v55  ;;  %v25075_v55 = vperm.slane %v6499_v18, %v23273_v39  ;;  %v25089_v61 = vperm.slane %v24777_v20, %v23267_v21 }
 0x744   : > { %29309 = vst [vmem:[#allocation40_spill] sm:$0xff] %v25067_v33  ;;  %v6596_v1 = vrot.slane %v25067_v33, 4  ;;  %v6340_v20 = vrot.slane %v6323_v7, 4  ;;  %v6396_v42 = vrot.slane %v6379_v31, 4  ;;  %v6129_v33 = vshrl.u32 %v24880_v45, 16 }
 0x745   : > { %v6541_v51 = vsel %vm1312_vm0, %v6540_v30, %v25089_v61 }
 0x746   : > { %v6597_v22 = vsel %vm1312_vm0, %v6596_v1, %v25093_v12  ;;  %v25100_v36 = vperm.slane %v6541_v51, %v23273_v39  ;;  %v6341_v18 = vsel %vm1312_vm0, 0, %v6340_v20 }
 0x747   : > { %v25103_v2 = vperm.slane %v6597_v22, %v23273_v39  ;;  %v6097_v22 = vshrl.u32 %v24876_v62, 16 }
 0x748   : > { %21899 = vxpose.binary.xlu2.c.b16.start.end [1/2] (short) (narrow) %v6291_v46, %v6235_v16, 16  ;;  %v6564_v0 = vrot.slane %v25100_v36, 4  ;;  %v6397_v16 = vsel %vm1312_vm0, 0, %v6396_v42  ;;  %v6747_v42 = vperm.slane %v24814_v40, %v23267_v21 }
 0x749   : > { %21944 = vxpose.binary.xlu0.c.b16.start.end [1/2] (short) (narrow) %v25075_v55, %v25072_v63, 16  ;;  %v25079_v8 = vpop.trf.xlu0  ;;  %v6620_v53 = vrot.slane %v25103_v2, 4 }
 0x74a   : > { %v6565_v30 = vsel %vm1312_vm0, 0, %v6564_v0  ;;  %v6096_v0 = vshrl.u32 %v24874_v15, 16 }
 0x74b   : > { %21902 = vxpose.binary.xlu1.c.b16.start.end [1/2] (short) (narrow) %v6379_v31, %v6323_v7, 16  ;;  %v6621_v1 = vsel %vm1312_vm0, 0, %v6620_v53  ;;  %v6327_v7 = vperm.slane %v24946_v59, %v23273_v39  ;;  %v6383_v31 = vperm.slane %v24955_v44, %v23273_v39  ;;  %v25123_v53 = vpack.i.b16 %v24876_v62, %v24874_v15 }
 0x74c   : > { %v6803_v44 = vperm.slane %v24820_v11, %v23267_v21 }
 0x74e   : > { %v6822_v11 = vrot.slane %v6803_v44, 4 }
 0x751   : > { %v21872_v26 = vpop.trf.xlu0 }
 0x752   : > { %v6112_v46 = vshrl.u32 %v21872_v26, 16 }
 0x758   : > { %21905 = vxpose.binary.xlu2.c.b16.start.end [1/2] (short) (narrow) %v6397_v16, %v6341_v18, 16 }
 0x759   : > { %21953 = vxpose.binary.xlu0.c.b16.start.end [1/2] (short) (narrow) %v6621_v1, %v6565_v30, 16  ;;  %v21873_v51 = vpop.trf.xlu0  ;;  %v6766_v1 = vrot.slane %v6747_v42, 4 }
 0x75a   : > { %v25116_v19 = vpack.i.b16 %v21873_v51, %v21872_v26  ;;  %v6113_v20 = vshrl.u32 %v21873_v51, 16  ;;  %v25130_v26 = vpack.i.b16 %v6097_v22, %v6096_v0  ;;  %v6342_v22 = vrot.slane %v6327_v7, 4 }
 0x75b   : > { %21908 = vxpose.binary.xlu1.c.b16.start.end [1/2] (short) (narrow) %v6383_v31, %v6327_v7, 16  ;;  %v6398_v0 = vrot.slane %v6383_v31, 4 }
 0x75c   : > { %v25125_v18 = vpack.i.b16 %v6113_v20, %v6112_v46  ;;  %v6752_v59 = vrot.slane %v25116_v19, 4  ;;  %v6343_v7 = vsel %vm1312_vm0, 0, %v6342_v22 }
 0x75d   : > { %v6399_v31 = vsel %vm1312_vm0, 0, %v6398_v0 }
 0x75e   : > { %v6753_v16 = vsel %vm1312_vm0, %v6752_v59, %v25123_v53  ;;  %v6808_v40 = vrot.slane %v25125_v18, 4 }
 0x75f   : > { %v6759_v30 = vperm.slane %v6753_v16, %v23267_v21 }
 0x760   : > { %v6809_v15 = vsel %vm1312_vm0, %v6808_v40, %v25130_v26 }
 0x761   : > { %v6815_v62 = vperm.slane %v6809_v15, %v23267_v21  ;;  %v21874_v46 = vpop.trf.xlu0  ;;  %v6764_v51 = vrot.slane %v6759_v30, 4  ;;  %v25140_v20 = vsel %vm1312_vm0, %v6759_v30, %v6766_v1  ;;  %v6128_v15 = vshrl.u32 %v24878_v32, 16 }
 0x762   : > { %v25155_v30 = vpack.i.b16 %v24880_v45, %v24878_v32  ;;  %v25165_v1 = vperm.slane %v25057_v27, %v23273_v39  ;;  %v6863_v32 = vperm.slane %v24827_v37, %v23267_v21 }
 0x763   : > { %v25143_v59 = vsel %vm1312_vm0, %v6764_v51, %v6747_v42  ;;  %v6820_v9 = vrot.slane %v6815_v62, 4  ;;  %v25146_v16 = vsel %vm1312_vm0, %v6815_v62, %v6822_v11  ;;  %v25161_v42 = vperm.slane %v25048_v41, %v23273_v39 }
 0x764   : > { %29311 = vst [vmem:[#allocation42_spill] sm:$0xff] %v25165_v1  ;;  %v6335_v62 = vperm.slane %v24949_v29, %v23273_v39  ;;  %v6391_v41 = vperm.slane %v24961_v6, %v23273_v39  ;;  %v6866_v27 = vrot.slane %v25155_v30, 4  ;;  %v6919_v11 = vperm.slane %v24833_v3, %v23267_v21 }
 0x765   : > { %v25150_v40 = vsel %vm1312_vm0, %v6820_v9, %v6803_v44  ;;  %29310 = vst [vmem:[#allocation41_spill] sm:$0xff] %v25161_v42  ;;  %v25167_v9 = vpack.i.b16 %v6129_v33, %v6128_v15  ;;  %v6144_v44 = vshrl.u32 %v21874_v46, 16  ;;  %v6890_v29 = vrot.slane %v6863_v32, 4 }
 0x766   : > { %v25196_v3 = vperm.slane %v25036_v56, %v23273_v39 }
 0x767   : > { %v6922_v37 = vrot.slane %v25167_v9, 4 }
 0x768   : > { %21911 = vxpose.binary.xlu2.c.b16.start.end [1/2] (short) (narrow) %v6399_v31, %v6343_v7, 16 }
 0x769   : > { %21962 = vxpose.binary.xlu0.c.b16.start.end [1/2] (short) (narrow) %v25165_v1, %v25161_v42, 16  ;;  %v21875_v45 = vpop.trf.xlu0  ;;  %v6078_v1 = vpack.i.b16 %v25079_v8, %v25045_v17 }
 0x76a   : > { %v25178_v51 = vpack.i.b16 %v21875_v45, %v21874_v46  ;;  %v6145_v33 = vshrl.u32 %v21875_v45, 16  ;;  %v6946_v45 = vrot.slane %v6919_v11, 4 }
 0x76b   : > { %21914 = vxpose.binary.xlu1.c.b16.start.end [1/2] (short) (narrow) %v6391_v41, %v6335_v62, 16 }
 0x76c   : > { %v25183_v22 = vpack.i.b16 %v6145_v33, %v6144_v44  ;;  %v6867_v0 = vsel %vm1312_vm0, %v25178_v51, %v6866_v27  ;;  %v25200_v44 = vperm.slane %v25054_v24, %v23273_v39  ;;  %v6080_v27 = vshrl.u32 %v25045_v17, 16 }
 0x76d   : > { %v6875_v15 = vperm.slane %v6867_v0, %v23267_v21  ;;  %v6081_v33 = vshrl.u32 %v25079_v8, 16  ;;  %v6570_v24 = vrot.slane %v25196_v3, 4  ;;  %v6339_v17 = vperm.slane %v24941_v43, %v23273_v39 }
 0x76e   : > { %v6923_v6 = vsel %vm1312_vm0, %v25183_v22, %v6922_v37  ;;  %v6395_v8 = vperm.slane %v24958_v52, %v23273_v39 }
 0x76f   : > { %v6888_v46 = vrot.slane %v6875_v15, 4  ;;  %v6931_v7 = vperm.slane %v6923_v6, %v23267_v21  ;;  %v25192_v31 = vsel %vm1312_vm0, %v6875_v15, %v6890_v29  ;;  %v6344_v15 = vrot.slane %v6335_v62, 4 }
 0x770   : > { %29312 = vst [vmem:[#allocation43_spill] sm:$0xff] %v25192_v31  ;;  %v6400_v6 = vrot.slane %v6391_v41, 4  ;;  %v6626_v31 = vrot.slane %v25200_v44, 4  ;;  %v6082_v42 = vpack.i.b16 %v6081_v33, %v6080_v27  ;;  %v6064_v62 = vshrl.u32 %v24870_v38, 16 }
 0x771   : > { %v25205_v37 = vsel %vm1312_vm0, %v6888_v46, %v6863_v32  ;;  %v6944_v0 = vrot.slane %v6931_v7, 4  ;;  %v25208_v29 = vsel %vm1312_vm0, %v6931_v7, %v6946_v45  ;;  %v6065_v32 = vshrl.u32 %v24872_v47, 16 }
 0x772   : > { %v6345_v46 = vsel %vm1312_vm0, 0, %v6344_v15  ;;  %v6401_v7 = vsel %vm1312_vm0, 0, %v6400_v6  ;;  %v6571_v41 = vsel %vm1312_vm0, 0, %v6570_v24  ;;  %v6640_v45 = vrot.slane %v6078_v1, 4 }
 0x773   : > { %v25211_v56 = vsel %vm1312_vm0, %v6944_v0, %v6919_v11  ;;  %v6627_v11 = vsel %vm1312_vm0, 0, %v6626_v31  ;;  %v6696_v0 = vrot.slane %v6082_v42, 4  ;;  %v6062_v27 = vpack.i.b16 %v24872_v47, %v24870_v38 }
 0x774   : > { %v6066_v33 = vpack.i.b16 %v6065_v32, %v6064_v62  ;;  %v25231_v15 = vperm.slane %v24797_v4, %v23267_v21  ;;  %v25235_v31 = vperm.slane %v24803_v28, %v23267_v21  ;;  %v6484_v62 = vrot.slane %v24992_v58, 4 }
 0x775   : > { %v6641_v6 = vsel %vm1312_vm0, %v6640_v45, %v6062_v27  ;;  %v6642_v24 = vrot.slane %v6062_v27, 4 }
 0x776   : > { %v6697_v43 = vsel %vm1312_vm0, %v6696_v0, %v6066_v33  ;;  %v25240_v52 = vperm.slane %v6641_v6, %v23267_v21  ;;  %v6654_v47 = vrot.slane %v25231_v15, 4  ;;  %v6710_v4 = vrot.slane %v25235_v31, 4 }
 0x777   : > { %v25243_v38 = vperm.slane %v6697_v43, %v23267_v21  ;;  %v6643_v32 = vsel %vm1312_vm0, %v6078_v1, %v6642_v24  ;;  %v25281_v24 = vperm.slane %v24794_v60, %v23267_v21 }
 0x778   : > { %21917 = vxpose.binary.xlu2.c.b16.start.end [1/2] (short) (narrow) %v6401_v7, %v6345_v46, 16  ;;  %v6698_v46 = vrot.slane %v6066_v33, 4  ;;  %v6428_v7 = vrot.slane %v24985_v48, 4  ;;  %v6655_v45 = vsel %vm1312_vm0, %v25240_v52, %v6654_v47  ;;  %v25256_v27 = vperm.slane %v6643_v32, %v23267_v21 }
 0x779   : > { %21971 = vxpose.binary.xlu0.c.b16.start.end [1/2] (short) (narrow) %v6627_v11, %v6571_v41, 16  ;;  %v6346_v41 = vrot.slane %v6339_v17, 4  ;;  %v6402_v11 = vrot.slane %v6395_v8, 4  ;;  %v6711_v0 = vsel %vm1312_vm0, %v25243_v38, %v6710_v4  ;;  %v6485_v48 = vsel %vm1312_vm0, %v6484_v62, %v24981_v54 }
 0x77a   : > { %v6699_v28 = vsel %vm1312_vm0, %v6082_v42, %v6698_v46  ;;  %v6429_v42 = vsel %vm1312_vm0, %v6428_v7, %v24974_v25  ;;  %v6664_v6 = vrot.slane %v25256_v27, 4  ;;  %v6491_v54 = vperm.slane %v6485_v48, %v23273_v39 }
 0x77b   : > { %21920 = vxpose.binary.xlu1.c.b16.start.end [1/2] (short) (narrow) %v6395_v8, %v6339_v17, 16  ;;  %v25259_v33 = vperm.slane %v6699_v28, %v23267_v21  ;;  %v6347_v58 = vsel %vm1312_vm0, 0, %v6346_v41  ;;  %v6403_v1 = vsel %vm1312_vm0, 0, %v6402_v11  ;;  %v25268_v17 = vperm.slane %v6655_v45, %v23273_v39 }
 0x77c   : > { %v25271_v8 = vperm.slane %v6711_v0, %v23273_v39  ;;  %v6435_v25 = vperm.slane %v6429_v42, %v23273_v39  ;;  %v25285_v46 = vperm.slane %v24800_v10, %v23267_v21  ;;  %v6665_v47 = vsel %vm1312_vm0, %v6664_v6, %v25281_v24 }
 0x77d   : > { %v6720_v43 = vrot.slane %v25259_v33, 4  ;;  %v25292_v32 = vperm.slane %v6665_v47, %v23273_v39  ;;  %v6508_v60 = vrot.slane %v6491_v54, 4  ;;  %v6440_v42 = vrot.slane %v25039_v14, 4 }
 0x77e   : > { %v6452_v7 = vrot.slane %v6435_v25, 4  ;;  %v6496_v48 = vrot.slane %v25042_v5, 4  ;;  %v25315_v14 = vperm.slane %v25143_v59, %v23273_v39  ;;  %v25331_v5 = vperm.slane %v25146_v16, %v23273_v39 }
 0x77f   : > { %v6721_v4 = vsel %vm1312_vm0, %v6720_v43, %v25285_v46  ;;  %v6680_v62 = vrot.slane %v25292_v32, 4  ;;  %v6509_v11 = vsel %vm1312_vm0, 0, %v6508_v60  ;;  %v6458_v59 = vrot.slane %v25072_v63, 4 }
 0x780   : > { %v25295_v28 = vperm.slane %v6721_v4, %v23273_v39  ;;  %v6453_v41 = vsel %vm1312_vm0, 0, %v6452_v7  ;;  %v6846_v4 = vrot.slane %v25331_v5, 4  ;;  %v6754_v63 = vrot.slane %v25123_v53, 4 }
 0x781   : > { %v6681_v45 = vsel %vm1312_vm0, 0, %v6680_v62  ;;  %v6459_v7 = vsel %vm1312_vm0, 0, %v6458_v59  ;;  %v25349_v16 = vperm.slane %v24811_v35, %v23267_v21  ;;  %v6542_v53 = vrot.slane %v25089_v61, 4 }
 0x782   : > { %v6736_v10 = vrot.slane %v25295_v28, 4  ;;  %v6847_v62 = vsel %vm1312_vm0, 0, %v6846_v4 }
 0x783   : > { %v6543_v35 = vsel %vm1312_vm0, %v25064_v34, %v6542_v53  ;;  %v6778_v61 = vrot.slane %v25349_v16, 4 }
 0x784   : > { %v6737_v0 = vsel %vm1312_vm0, 0, %v6736_v10 }
 0x788   : > { %21923 = vxpose.binary.xlu2.c.b16.start.end [1/2] (short) (narrow) %v6403_v1, %v6347_v58, 16  ;;  %v6441_v58 = vsel %vm1312_vm0, %v6440_v42, %v25021_v49  ;;  %v6497_v1 = vsel %vm1312_vm0, %v6496_v48, %v25031_v23  ;;  %v25327_v23 = vperm.slane %v25140_v20, %v23273_v39 }
 0x789   : > { %21980 = vxpose.binary.xlu0.c.b16.start.end [1/2] (short) (narrow) %v25271_v8, %v25268_v17, 16  ;;  %v6447_v6 = vperm.slane %v6441_v58, %v23273_v39 }
 0x78a   : > { %v6790_v47 = vrot.slane %v25327_v23, 4 }
 0x78b   : > { %21926 = vxpose.binary.xlu1.c.b16.start.end [1/2] (short) (narrow) %v6491_v54, %v6435_v25, 16  ;;  %v6503_v25 = vperm.slane %v6497_v1, %v23273_v39  ;;  %v6456_v54 = vrot.slane %v6447_v6, 4 }
 0x78c   : > { %v6791_v20 = vsel %vm1312_vm0, 0, %v6790_v47 }
 0x78d   : > { %v6512_v43 = vrot.slane %v6503_v25, 4 }
 0x78f   : > { %v6513_v49 = vsel %vm1312_vm0, 0, %v6512_v43 }
 0x798   : > { %21929 = vxpose.binary.xlu2.c.b16.start.end [1/2] (short) (narrow) %v6509_v11, %v6453_v41, 16  ;;  %v25353_v41 = vperm.slane %v24817_v50, %v23267_v21  ;;  %v6755_v11 = vsel %vm1312_vm0, %v25116_v19, %v6754_v63 }
 0x799   : > { %21989 = vxpose.binary.xlu0.c.b16.start.end [1/2] (short) (narrow) %v6737_v0, %v6681_v45, 16  ;;  %v29313_v0 = vld [vmem:[#allocation40_spill] sm:$0xff]  ;;  %v25368_v42 = vperm.slane %v6755_v11, %v23267_v21 }
 0x79b   : > { %21932 = vxpose.binary.xlu1.c.b16.start.end [1/2] (short) (narrow) %v25003_v13, %v24996_v57, 16  ;;  %v25319_v57 = vperm.slane %v25150_v40, %v23273_v39  ;;  %v6457_v13 = vsel %vm1312_vm0, 0, %v6456_v54  ;;  %v6514_v40 = vrot.slane %v25075_v55, 4  ;;  %v6810_v55 = vrot.slane %v25130_v26, 4 }
 0x79c   : > { %v6598_v26 = vrot.slane %v25093_v12, 4  ;;  %v6834_v12 = vrot.slane %v25353_v41, 4  ;;  %v6779_v58 = vsel %vm1312_vm0, %v25368_v42, %v6778_v61 }
 0x79d   : > { %v6515_v60 = vsel %vm1312_vm0, 0, %v6514_v40  ;;  %v6811_v45 = vsel %vm1312_vm0, %v25125_v18, %v6810_v55 }
 0x79e   : > { %v6599_v50 = vsel %vm1312_vm0, %v29313_v0, %v6598_v26  ;;  %v25371_v19 = vperm.slane %v6811_v45, %v23267_v21  ;;  %v25423_v26 = vpop.trf.xlu0  ;;  %v29317_v0 = vld [vmem:[#allocation42_spill] sm:$0xff] }
 0x79f   : > { %v6607_v48 = vperm.slane %v6599_v50, %v23273_v39  ;;  %v6624_v50 = vrot.slane %v29317_v0, 4 }
 0x7a0   : > { %v6835_v1 = vsel %vm1312_vm0, %v25371_v19, %v6834_v12 }
 0x7a1   : > { %v6622_v54 = vrot.slane %v6607_v48, 4 }
 0x7a3   : > { %v6623_v4 = vsel %vm1312_vm0, 0, %v6622_v54  ;;  %v6652_v54 = vrot.slane %v25240_v52, 4  ;;  %v25449_v52 = vperm.slane %v25211_v56, %v23273_v39 }
 0x7a8   : > { %21938 = vxpose.binary.xlu2.c.b16.start.end [1/2] (short) (narrow) %v6503_v25, %v6447_v6, 16 }
 0x7a9   : > { %21998 = vxpose.binary.xlu0.c.b16.start.end [1/2] (short) (narrow) %v25319_v57, %v25315_v14, 16 }
 0x7ab   : > { %21941 = vxpose.binary.xlu1.c.b16.start.end [1/2] (short) (narrow) %v6513_v49, %v6457_v13, 16  ;;  %v25397_v13 = vperm.slane %v6835_v1, %v23273_v39 }
 0x7b8   : > { %21947 = vxpose.binary.xlu2.c.b16.start.end [1/2] (short) (narrow) %v6515_v60, %v6459_v7, 16  ;;  %v29314_v7 = vld [vmem:[#allocation20_spill] sm:$0xff] }
 0x7b9   : > { %v25341_v10 = vpop.trf.xlu2  ;;  %22007 = vxpose.binary.xlu0.c.b16.start.end [1/2] (short) (narrow) %v6847_v62, %v6791_v20, 16  ;;  %v25407_v60 = vperm.slane %v29314_v7, %v23267_v21  ;;  %v29315_v20 = vld [vmem:[#allocation21_spill] sm:$0xff] }
 0x7ba   : > { %v25411_v62 = vperm.slane %v29315_v20, %v23267_v21 }
 0x7bb   : > { %21950 = vxpose.binary.xlu1.c.b16.start.end [1/2] (short) (narrow) %v25103_v2, %v25100_v36, 16  ;;  %v6864_v36 = vrot.slane %v25178_v51, 4  ;;  %v6920_v2 = vrot.slane %v25183_v22, 4  ;;  %v6551_v22 = vperm.slane %v6543_v35, %v23273_v39 }
 0x7bd   : > { %v6865_v51 = vsel %vm1312_vm0, %v6864_v36, %v25155_v30  ;;  %v6921_v34 = vsel %vm1312_vm0, %v6920_v2, %v25167_v9  ;;  %v6566_v30 = vrot.slane %v6551_v22, 4  ;;  %v25394_v9 = vperm.slane %v6779_v58, %v23273_v39  ;;  %v29316_v2 = vld [vmem:[#allocation41_spill] sm:$0xff] }
 0x7be   : > { %v25388_v6 = vperm.slane %v6865_v51, %v23267_v21  ;;  %v25391_v25 = vperm.slane %v6921_v34, %v23267_v21  ;;  %v6568_v35 = vrot.slane %v29316_v2, 4 }
 0x7bf   : > { %v6567_v47 = vsel %vm1312_vm0, 0, %v6566_v30  ;;  %v21877_v30 = vpop.trf.xlu0 }
 0x7c0   : > { %v6876_v59 = vrot.slane %v25388_v6, 4  ;;  %v6932_v40 = vrot.slane %v25391_v25, 4  ;;  %v6569_v34 = vsel %vm1312_vm0, 0, %v6568_v35 }
 0x7c1   : > { %v25374_v18 = vpop.trf.xlu2 }
 0x7c2   : > { %v6877_v63 = vsel %vm1312_vm0, %v6876_v59, %v25407_v60  ;;  %v6933_v55 = vsel %vm1312_vm0, %v6932_v40, %v25411_v62  ;;  %v6708_v59 = vrot.slane %v25243_v38, 4 }
 0x7c3   : > { %v25418_v45 = vperm.slane %v6877_v63, %v23273_v39  ;;  %v25421_v53 = vperm.slane %v6933_v55, %v23273_v39 }
 0x7c5   : > { %v6900_v61 = vrot.slane %v25418_v45, 4  ;;  %v6956_v12 = vrot.slane %v25421_v53, 4 }
 0x7c7   : > { %v21882_v43 = vpop.trf.xlu1  ;;  %v6957_v58 = vsel %vm1312_vm0, 0, %v6956_v12  ;;  %v21885_v55 = vpop.trf.xlu0 }
 0x7c8   : > { %21956 = vxpose.binary.xlu2.c.b16.start.end [1/2] (short) (narrow) %v6607_v48, %v6551_v22, 16  ;;  %v6625_v22 = vsel %vm1312_vm0, 0, %v6624_v50  ;;  %v6901_v48 = vsel %vm1312_vm0, 0, %v6900_v61 }
 0x7c9   : > { %v21888_v49 = vpop.trf.xlu2  ;;  %22016 = vxpose.binary.xlu0.c.b16.start.end [1/2] (short) (narrow) %v25397_v13, %v25394_v9, 16 }
 0x7cb   : > { %21959 = vxpose.binary.xlu1.c.b16.start.end [1/2] (short) (narrow) %v6623_v4, %v6567_v47, 16  ;;  %v6653_v47 = vsel %vm1312_vm0, %v6652_v54, %v25231_v15  ;;  %v6709_v4 = vsel %vm1312_vm0, %v6708_v59, %v25235_v31  ;;  %v9130_v15 = vrot.slane %v21888_v49, 4 }
 0x7cc   : > { %v6659_v20 = vperm.slane %v6653_v47, %v23273_v39  ;;  %v6715_v63 = vperm.slane %v6709_v4, %v23273_v39 }
 0x7ce   : > { %v6676_v2 = vrot.slane %v6659_v20, 4  ;;  %v6732_v35 = vrot.slane %v6715_v63, 4 }
 0x7cf   : > { %v21883_v11 = vpop.trf.xlu1  ;;  %v21886_v49 = vpop.trf.xlu0 }
 0x7d0   : > { %v6677_v61 = vsel %vm1312_vm0, 0, %v6676_v2  ;;  %v6733_v12 = vsel %vm1312_vm0, 0, %v6732_v35 }
 0x7d1   : > { %v21889_v36 = vpop.trf.xlu2 }
 0x7d2   : > { %v9168_v0 = vrot.slane %v21889_v36, 4  ;;  %v29318_v36 = vld [vmem:[#allocation43_spill] sm:$0xff] }
 0x7d3   : > { %v25462_v54 = vperm.slane %v29318_v36, %v23273_v39 }
 0x7d7   : > { %v21891_v51 = vpop.trf.xlu1 }
 0x7d8   : > { %21965 = vxpose.binary.xlu2.c.b16.start.end [1/2] (short) (narrow) %v6625_v22, %v6569_v34, 16 }
 0x7d9   : > { %v21894_v1 = vpop.trf.xlu2  ;;  %22025 = vxpose.binary.xlu0.c.b16.start.end [1/2] (short) (narrow) %v6957_v58, %v6901_v48, 16  ;;  %v9124_v48 = vrot.slane %v21885_v55, 4  ;;  %v9169_v58 = vsel %vm1312_vm0, %v9168_v0, %v21883_v11  ;;  %v6177_v55 = vshrl.u32 %v21877_v30, 16 }
 0x7da   : > { %v9173_v11 = vperm.slane %v9169_v58, %v23267_v21 }
 0x7db   : > { %21968 = vxpose.binary.xlu1.c.b16.start.end [1/2] (short) (narrow) %v25200_v44, %v25196_v3, 16  ;;  %v25445_v44 = vperm.slane %v25205_v37, %v23273_v39  ;;  %v9131_v37 = vsel %vm1312_vm0, %v9130_v15, %v21882_v43 }
 0x7dc   : > { %v9135_v59 = vperm.slane %v9131_v37, %v23267_v21 }
 0x7de   : > { %v9148_v0 = vrot.slane %v9135_v59, 4  ;;  %v29320_v59 = vld [vmem:[#allocation22_spill] sm:$0xff] }
 0x7df   : > { %v21892_v40 = vpop.trf.xlu1 }
 0x7e1   : > { %v21895_v7 = vpop.trf.xlu2 }
 0x7e7   : > { %v21897_v3 = vpop.trf.xlu1 }
 0x7e8   : > { %v9136_v38 = vrot.slane %v21897_v3, 4  ;;  %21974 = vxpose.binary.xlu2.c.b16.start.end [1/2] (short) (narrow) %v6715_v63, %v6659_v20, 16  ;;  %v6176_v63 = vshrl.u32 %v25423_v26, 16  ;;  %v9125_v3 = vsel %vm1312_vm0, %v9124_v48, %v25341_v10 }
 0x7e9   : > { %v21900_v31 = vpop.trf.xlu2  ;;  %22034 = vxpose.binary.xlu0.c.b16.start.end [1/2] (short) (narrow) %v25449_v52, %v25445_v44, 16 }
 0x7ea   : > { %v9142_v50 = vrot.slane %v21900_v31, 4  ;;  %v9137_v34 = vsel %vm1312_vm0, %v9136_v38, %v21891_v51  ;;  %v25468_v51 = vperm.slane %v25208_v29, %v23273_v39  ;;  %v6678_v38 = vrot.slane %v25268_v17, 4 }
 0x7eb   : > { %21977 = vxpose.binary.xlu1.c.b16.start.end [1/2] (short) (narrow) %v6733_v12, %v6677_v61, 16  ;;  %v9141_v47 = vperm.slane %v9137_v34, %v23267_v21  ;;  %v6734_v31 = vrot.slane %v25271_v8, 4  ;;  %v6174_v29 = vpack.i.b16 %v21877_v30, %v25423_v26  ;;  %v9129_v17 = vperm.slane %v9125_v3, %v23267_v21  ;;  %v29319_v30 = vld [vmem:[#allocation24_spill] sm:$0xff] }
 0x7ec   : > { %v9143_v56 = vsel %vm1312_vm0, %v9142_v50, %v21894_v1  ;;  %v9162_v1 = vrot.slane %v21886_v49, 4  ;;  %v6906_v50 = vrot.slane %v25462_v54, 4  ;;  %v6962_v61 = vrot.slane %v25468_v51, 4 }
 0x7ed   : > { %v9147_v22 = vperm.slane %v9143_v56, %v23267_v21  ;;  %v6178_v56 = vpack.i.b16 %v6177_v55, %v6176_v63  ;;  %v9186_v8 = vrot.slane %v9173_v11, 4  ;;  %v6161_v49 = vshrl.u32 %v29319_v30, 16 }
 0x7ee   : > { %v9163_v12 = vsel %vm1312_vm0, %v9162_v1, %v25374_v18  ;;  %v6735_v48 = vsel %vm1312_vm0, 0, %v6734_v31  ;;  %v9149_v18 = vsel %vm1312_vm0, %v9148_v0, %v9129_v17  ;;  %v6963_v1 = vsel %vm1312_vm0, 0, %v6962_v61  ;;  %v29321_v0 = vld [vmem:[#allocation37_spill] sm:$0xff] }
 0x7ef   : > { %v9154_v4 = vrot.slane %v9147_v22, 4  ;;  %v21898_v43 = vpop.trf.xlu1  ;;  %v6679_v22 = vsel %vm1312_vm0, 0, %v6678_v38  ;;  %v9167_v58 = vperm.slane %v9163_v12, %v23267_v21  ;;  %v7032_v63 = vrot.slane %v6178_v56, 4 }
 0x7f0   : > { %v9174_v20 = vrot.slane %v21898_v43, 4  ;;  %v6907_v43 = vsel %vm1312_vm0, 0, %v6906_v50  ;;  %v6158_v38 = vpack.i.b16 %v29319_v30, %v29320_v59  ;;  %v25511_v50 = vperm.slane %v29321_v0, %v23267_v21 }
 0x7f1   : > { %v9155_v2 = vsel %vm1312_vm0, %v9154_v4, %v9141_v47  ;;  %v21901_v35 = vpop.trf.xlu2  ;;  %v6160_v47 = vshrl.u32 %v29320_v59, 16  ;;  %v9187_v55 = vsel %vm1312_vm0, %v9186_v8, %v9167_v58  ;;  %v6722_v8 = vrot.slane %v25285_v46, 4 }
 0x7f2   : > { %v9180_v15 = vrot.slane %v21901_v35, 4  ;;  %v9159_v37 = vperm.slane %v9155_v2, %v23273_v39  ;;  %v9175_v34 = vsel %vm1312_vm0, %v9174_v20, %v21892_v40  ;;  %v6976_v20 = vrot.slane %v6174_v29, 4 }
 0x7f3   : > { %v9179_v40 = vperm.slane %v9175_v34, %v23267_v21  ;;  %v9153_v35 = vperm.slane %v9149_v18, %v23273_v39  ;;  %v6162_v31 = vpack.i.b16 %v6161_v49, %v6160_v47  ;;  %v9191_v61 = vperm.slane %v9187_v55, %v23273_v39  ;;  %v29322_v34 = vld [vmem:[#allocation23_spill] sm:$0xff] }
 0x7f4   : > { %v9181_v10 = vsel %vm1312_vm0, %v9180_v15, %v21895_v7  ;;  %v9160_v4 = vrot.slane %v9159_v37, 4  ;;  %v6666_v15 = vrot.slane %v25281_v24, 4  ;;  %v6977_v24 = vsel %vm1312_vm0, %v6976_v20, %v6158_v38 }
 0x7f5   : > { %v9185_v26 = vperm.slane %v9181_v10, %v23267_v21  ;;  %v25517_v10 = vperm.slane %v29322_v34, %v23267_v21  ;;  %v7033_v17 = vsel %vm1312_vm0, %v7032_v63, %v6162_v31  ;;  %v6978_v18 = vrot.slane %v6158_v38, 4 }
 0x7f6   : > { %v9161_v37 = vsel %vm1312_vm0, %v9160_v4, %v9153_v35  ;;  %v7034_v58 = vrot.slane %v6162_v31, 4  ;;  %v25533_v46 = vperm.slane %v7033_v17, %v23267_v21  ;;  %v6990_v59 = vrot.slane %v25511_v50, 4 }
 0x7f7   : > { %v9192_v36 = vrot.slane %v9185_v26, 4  ;;  %v25493_v7 = vpop.trf.xlu1  ;;  %v9735_v49 = vshrl.u32 %v9161_v37, 16  ;;  %v7046_v47 = vrot.slane %v25517_v10, 4  ;;  %v6979_v4 = vsel %vm1312_vm0, %v6174_v29, %v6978_v18 }
 0x7f8   : > { %21983 = vxpose.binary.xlu2.c.b16.start.end [1/2] (short) (narrow) %v6735_v48, %v6679_v22, 16  ;;  %v6723_v48 = vsel %vm1312_vm0, %v25259_v33, %v6722_v8  ;;  %v7035_v33 = vsel %vm1312_vm0, %v6178_v56, %v7034_v58  ;;  %v25550_v55 = vperm.slane %v6979_v4, %v23267_v21  ;;  %v6844_v18 = vrot.slane %v25319_v57, 4 }
 0x7f9   : > { %v9193_v11 = vsel %vm1312_vm0, %v9192_v36, %v9179_v40  ;;  %v25500_v2 = vpop.trf.xlu2  ;;  %22043 = vxpose.binary.xlu0.c.b16.start.end [1/2] (short) (narrow) %v6963_v1, %v6907_v43, 16  ;;  %v25530_v40 = vperm.slane %v6977_v24, %v23267_v21  ;;  %v6731_v1 = vperm.slane %v6723_v48, %v23273_v39  ;;  %v29324_v24 = vld [vmem:[#allocation38_spill] sm:$0xff]  ;;  %v6788_v48 = vrot.slane %v25315_v14, 4 }
 0x7fa   : > { %v9197_v3 = vperm.slane %v9193_v11, %v23273_v39  ;;  %v7047_v63 = vsel %vm1312_vm0, %v25533_v46, %v7046_v47  ;;  %v25553_v11 = vperm.slane %v7035_v33, %v23267_v21  ;;  %v7000_v38 = vrot.slane %v25550_v55, 4 }
 0x7fb   : > { %21986 = vxpose.binary.xlu1.c.b16.start.end [1/2] (short) (narrow) %v25295_v28, %v25292_v32, 16  ;;  %v6667_v28 = vsel %vm1312_vm0, %v25256_v27, %v6666_v15  ;;  %v6991_v20 = vsel %vm1312_vm0, %v25530_v40, %v6990_v59  ;;  %v6738_v56 = vrot.slane %v6731_v1, 4  ;;  %v25561_v15 = vperm.slane %v7047_v63, %v23273_v39 }
 0x7fc   : > { %v9198_v12 = vrot.slane %v9197_v3, 4  ;;  %v6675_v43 = vperm.slane %v6667_v28, %v23273_v39  ;;  %v25558_v3 = vperm.slane %v6991_v20, %v23273_v39  ;;  %v7056_v0 = vrot.slane %v25553_v11, 4 }
 0x7fd   : > { %v25575_v17 = vperm.slane %v29324_v24, %v23267_v21  ;;  %v6789_v47 = vsel %vm1312_vm0, 0, %v6788_v48  ;;  %v6845_v4 = vsel %vm1312_vm0, 0, %v6844_v18  ;;  %v6776_v14 = vrot.slane %v25368_v42, 4 }
 0x7fe   : > { %v9199_v32 = vsel %vm1312_vm0, %v9198_v12, %v9191_v61  ;;  %v6682_v29 = vrot.slane %v6675_v43, 4  ;;  %v6739_v12 = vsel %vm1312_vm0, 0, %v6738_v56  ;;  %v6832_v57 = vrot.slane %v25371_v19, 4 }
 0x7ff   : > { %v25525_v26 = vpop.trf.xlu1  ;;  %v9734_v30 = vpack.i.b16 %v9199_v32, %v9161_v37  ;;  %v9736_v22 = vshrl.u32 %v9199_v32, 16  ;;  %v29323_v37 = vld [vmem:[#allocation39_spill] sm:$0xff]  ;;  %v7057_v32 = vsel %vm1312_vm0, %v7056_v0, %v25575_v17  ;;  %v6777_v63 = vsel %vm1312_vm0, %v6776_v14, %v25349_v16 }
 0x800   : > { %v6683_v61 = vsel %vm1312_vm0, 0, %v6682_v29  ;;  %v25571_v34 = vperm.slane %v29323_v37, %v23267_v21  ;;  %v6833_v29 = vsel %vm1312_vm0, %v6832_v57, %v25353_v41 }
 0x801   : > { %v25535_v36 = vpop.trf.xlu2  ;;  %20520 = vmatmul.msk.bf16.vlgmr.msrb.gmra.mxu2 %vm5745_vm1, %v9734_v30  ;;  %v9737_v27 = vpack.i.b16 %v9736_v22, %v9735_v49  ;;  %v25585_v49 = vperm.slane %v7057_v32, %v23273_v39  ;;  %v6839_v0 = vperm.slane %v6833_v29, %v23273_v39  ;;  %v6794_v29 = vrot.slane %v25394_v9, 4 }
 0x802   : > { %v7001_v8 = vsel %vm1312_vm0, %v7000_v38, %v25571_v34  ;;  %v6783_v38 = vperm.slane %v6777_v63, %v23273_v39 }
 0x803   : > { %20528 = vmatmul.msk.bf16.vlgmr.msrb.gmra.mxu3 %vm5745_vm1, %v9737_v27  ;;  %v25582_v30 = vperm.slane %v7001_v8, %v23273_v39  ;;  %v7072_v27 = vrot.slane %v25585_v49, 4  ;;  %v6795_v9 = vsel %vm1312_vm0, 0, %v6794_v29 }
 0x804   : > { %v6792_v42 = vrot.slane %v6783_v38, 4 }
 0x805   : > { %v7016_v58 = vrot.slane %v25582_v30, 4 }
 0x806   : > { %v6793_v16 = vsel %vm1312_vm0, 0, %v6792_v42 }
 0x807   : > { %v25555_v35 = vpop.trf.xlu1  ;;  %v7017_v33 = vsel %vm1312_vm0, 0, %v7016_v58 }
 0x808   : > { %21992 = vxpose.binary.xlu2.c.b16.start.end [1/2] (short) (narrow) %v6731_v1, %v6675_v43, 16  ;;  %v7073_v43 = vsel %vm1312_vm0, 0, %v7072_v27  ;;  %v9200_v27 = vrot.slane %v25555_v35, 4 }
 0x809   : > { %v21912_v31 = vpop.trf.xlu2  ;;  %22052 = vxpose.binary.xlu0.c.b16.start.end [1/2] (short) (narrow) %v25561_v15, %v25558_v3, 16 }
 0x80a   : > { %v9201_v63 = vsel %vm1312_vm0, %v9200_v27, %v25493_v7 }
 0x80b   : > { %21995 = vxpose.binary.xlu1.c.b16.start.end [1/2] (short) (narrow) %v6739_v12, %v6683_v61, 16  ;;  %v25605_v61 = vpop.trf.xlu0  ;;  %v6848_v12 = vrot.slane %v6839_v0, 4 }
 0x80d   : > { %v6849_v41 = vsel %vm1312_vm0, 0, %v6848_v12 }
 0x80f   : > { %v21910_v28 = vpop.trf.xlu1 }
 0x810   : > { %v9238_v14 = vrot.slane %v21910_v28, 4 }
 0x811   : > { %v21913_v22 = vpop.trf.xlu2 }
 0x812   : > { %v9244_v24 = vrot.slane %v21913_v22, 4 }
 0x813   : > { %v25609_v32 = vpop.trf.xlu0 }
 0x814   : > { %v9245_v22 = vsel %vm1312_vm0, %v9244_v24, %v25535_v36  ;;  %v6850_v36 = vrot.slane %v25397_v13, 4 }
 0x816   : > { %v6851_v13 = vsel %vm1312_vm0, 0, %v6850_v36 }
 0x817   : > { %v21915_v59 = vpop.trf.xlu1 }
 0x818   : > { %22001 = vxpose.binary.xlu2.c.b16.start.end [1/2] (short) (narrow) %v6845_v4, %v6789_v47, 16 }
 0x819   : > { %v21918_v1 = vpop.trf.xlu2  ;;  %22061 = vxpose.binary.xlu0.c.b16.start.end [1/2] (short) (narrow) %v7073_v43, %v7017_v33, 16 }
 0x81b   : > { %22004 = vxpose.binary.xlu1.c.b16.start.end [1/2] (short) (narrow) %v25331_v5, %v25327_v23, 16  ;;  %v9206_v23 = vrot.slane %v21912_v31, 4 }
 0x81d   : > { %v9207_v48 = vsel %vm1312_vm0, %v9206_v23, %v25500_v2  ;;  %v9249_v2 = vperm.slane %v9245_v22, %v23267_v21 }
 0x81e   : > { %v9211_v47 = vperm.slane %v9207_v48, %v23267_v21 }
 0x81f   : > { %v21916_v20 = vpop.trf.xlu1  ;;  %v9262_v23 = vrot.slane %v9249_v2, 4 }
 0x821   : > { %v21919_v56 = vpop.trf.xlu2 }
 0x827   : > { %v21921_v37 = vpop.trf.xlu1 }
 0x828   : > { %v9212_v5 = vrot.slane %v21921_v37, 4  ;;  %22010 = vxpose.binary.xlu2.c.b16.start.end [1/2] (short) (narrow) %v6839_v0, %v6783_v38, 16  ;;  %v9224_v38 = vrot.slane %v9211_v47, 4  ;;  %v9239_v0 = vsel %vm1312_vm0, %v9238_v14, %v25525_v26  ;;  %v9205_v37 = vperm.slane %v9201_v63, %v23267_v21 }
 0x829   : > { %v21924_v19 = vpop.trf.xlu2  ;;  %v6878_v47 = vrot.slane %v25407_v60, 4 }
 0x82a   : > { %v9218_v8 = vrot.slane %v21924_v19, 4  ;;  %v9213_v18 = vsel %vm1312_vm0, %v9212_v5, %v21915_v59  ;;  %v25634_v5 = vpop.trf.xlu0  ;;  %v9243_v19 = vperm.slane %v9239_v0, %v23267_v21 }
 0x82b   : > { %22013 = vxpose.binary.xlu1.c.b16.start.end [1/2] (short) (narrow) %v6849_v41, %v6793_v16, 16  ;;  %v9217_v4 = vperm.slane %v9213_v18, %v23267_v21 }
 0x82c   : > { %v9219_v58 = vsel %vm1312_vm0, %v9218_v8, %v21918_v1  ;;  %v9263_v41 = vsel %vm1312_vm0, %v9262_v23, %v9243_v19  ;;  %v6960_v23 = vrot.slane %v25449_v52, 4  ;;  %v7044_v52 = vrot.slane %v25533_v46, 4 }
 0x82d   : > { %v9223_v31 = vperm.slane %v9219_v58, %v23267_v21  ;;  %v9267_v27 = vperm.slane %v9263_v41, %v23273_v39 }
 0x82f   : > { %v9230_v33 = vrot.slane %v9223_v31, 4  ;;  %v21922_v43 = vpop.trf.xlu1 }
 0x830   : > { %v9250_v57 = vrot.slane %v21922_v43, 4  ;;  %v6879_v43 = vsel %vm1312_vm0, %v25388_v6, %v6878_v47 }
 0x831   : > { %v21925_v59 = vpop.trf.xlu2  ;;  %v9231_v1 = vsel %vm1312_vm0, %v9230_v33, %v9217_v4  ;;  %v6934_v4 = vrot.slane %v25411_v62, 4  ;;  %v6887_v60 = vperm.slane %v6879_v43, %v23273_v39 }
 0x832   : > { %v9256_v35 = vrot.slane %v21925_v59, 4  ;;  %v9251_v28 = vsel %vm1312_vm0, %v9250_v57, %v21916_v20  ;;  %v9235_v12 = vperm.slane %v9231_v1, %v23273_v39 }
 0x833   : > { %v9255_v26 = vperm.slane %v9251_v28, %v23267_v21 }
 0x834   : > { %v9257_v42 = vsel %vm1312_vm0, %v9256_v35, %v21919_v56  ;;  %v9225_v56 = vsel %vm1312_vm0, %v9224_v38, %v9205_v37  ;;  %v9236_v8 = vrot.slane %v9235_v12, 4  ;;  %v6902_v35 = vrot.slane %v6887_v60, 4 }
 0x835   : > { %v9261_v7 = vperm.slane %v9257_v42, %v23267_v21  ;;  %v9229_v18 = vperm.slane %v9225_v56, %v23273_v39  ;;  %v6904_v37 = vrot.slane %v25445_v44, 4  ;;  %v6988_v44 = vrot.slane %v25530_v40, 4 }
 0x837   : > { %v9268_v20 = vrot.slane %v9261_v7, 4  ;;  %v25640_v24 = vpop.trf.xlu1  ;;  %v9237_v31 = vsel %vm1312_vm0, %v9236_v8, %v9229_v18  ;;  %v9320_v8 = vrot.slane %v25609_v32, 4  ;;  %v6989_v40 = vsel %vm1312_vm0, %v6988_v44, %v25511_v50 }
 0x838   : > { %22019 = vxpose.binary.xlu2.c.b16.start.end [1/2] (short) (narrow) %v6851_v13, %v6795_v9, 16  ;;  %v9741_v2 = vshrl.u32 %v9237_v31, 16  ;;  %v6905_v9 = vsel %vm1312_vm0, 0, %v6904_v37  ;;  %v6961_v13 = vsel %vm1312_vm0, 0, %v6960_v23 }
 0x839   : > { %v21930_v16 = vpop.trf.xlu2  ;;  %v9269_v48 = vsel %vm1312_vm0, %v9268_v20, %v9255_v26  ;;  %v9282_v26 = vrot.slane %v25605_v61, 4  ;;  %v9288_v20 = vrot.slane %v25634_v5, 4 }
 0x83a   : > { %v9273_v58 = vperm.slane %v9269_v48, %v23273_v39 }
 0x83b   : > { %22022 = vxpose.binary.xlu1.c.b16.start.end [1/2] (short) (narrow) %v25421_v53, %v25418_v45, 16  ;;  %v6935_v45 = vsel %vm1312_vm0, %v25391_v25, %v6934_v4  ;;  %v21946_v53 = vpop.trf.xlu0  ;;  %v6903_v25 = vsel %vm1312_vm0, 0, %v6902_v35  ;;  %v9283_v48 = vsel %vm1312_vm0, %v9282_v26, %v21930_v16  ;;  %v7045_v16 = vsel %vm1312_vm0, %v7044_v52, %v25517_v10 }
 0x83c   : > { %v9274_v22 = vrot.slane %v9273_v58, 4  ;;  %v6943_v62 = vperm.slane %v6935_v45, %v23273_v39  ;;  %v9326_v4 = vrot.slane %v21946_v53, 4  ;;  %v7051_v45 = vperm.slane %v7045_v16, %v23273_v39 }
 0x83e   : > { %v9275_v33 = vsel %vm1312_vm0, %v9274_v22, %v9267_v27  ;;  %v6958_v6 = vrot.slane %v6943_v62, 4  ;;  %v9287_v27 = vperm.slane %v9283_v48, %v23267_v21 }
 0x83f   : > { %v21928_v14 = vpop.trf.xlu1  ;;  %v9740_v57 = vpack.i.b16 %v9275_v33, %v9237_v31  ;;  %v9742_v59 = vshrl.u32 %v9275_v33, 16 }
 0x840   : > { %v6959_v0 = vsel %vm1312_vm0, 0, %v6958_v6  ;;  %v7068_v6 = vrot.slane %v7051_v45, 4 }
 0x841   : > { %v21931_v1 = vpop.trf.xlu2  ;;  %20521 = vmatmul.msk.bf16.gmra.mxu2 %vm5745_vm1, %v9740_v57  ;;  %v9743_v63 = vpack.i.b16 %v9742_v59, %v9741_v2  ;;  %v6995_v59 = vperm.slane %v6989_v40, %v23273_v39  ;;  %v7070_v40 = vrot.slane %v25561_v15, 4 }
 0x842   : > { %v9321_v31 = vsel %vm1312_vm0, %v9320_v8, %v21931_v1  ;;  %v9300_v1 = vrot.slane %v9287_v27, 4 }
 0x843   : > { %20529 = vmatmul.msk.bf16.gmra.mxu3 %vm5745_vm1, %v9743_v63  ;;  %v25662_v36 = vpop.trf.xlu0  ;;  %v9325_v33 = vperm.slane %v9321_v31, %v23267_v21 }
 0x847   : > { %v21933_v29 = vpop.trf.xlu1 }
 0x848   : > { %22028 = vxpose.binary.xlu2.c.b16.start.end [1/2] (short) (narrow) %v6943_v62, %v6887_v60, 16  ;;  %v9276_v18 = vrot.slane %v21933_v29, 4  ;;  %v9338_v60 = vrot.slane %v9325_v33, 4 }
 0x849   : > { %v21939_v38 = vpop.trf.xlu2 }
 0x84a   : > { %v9289_v58 = vsel %vm1312_vm0, %v9288_v20, %v21939_v38  ;;  %v9277_v47 = vsel %vm1312_vm0, %v9276_v18, %v25640_v24 }
 0x84b   : > { %22031 = vxpose.binary.xlu1.c.b16.start.end [1/2] (short) (narrow) %v6959_v0, %v6903_v25, 16  ;;  %v25666_v42 = vpop.trf.xlu0  ;;  %v9281_v10 = vperm.slane %v9277_v47, %v23267_v21  ;;  %v7002_v47 = vrot.slane %v25571_v34, 4 }
 0x84d   : > { %v9301_v0 = vsel %vm1312_vm0, %v9300_v1, %v9281_v10 }
 0x84e   : > { %v9305_v26 = vperm.slane %v9301_v0, %v23273_v39 }
 0x84f   : > { %v21934_v28 = vpop.trf.xlu1 }
 0x850   : > { %v9314_v32 = vrot.slane %v21934_v28, 4 }
 0x851   : > { %v21940_v12 = vpop.trf.xlu2 }
 0x852   : > { %v9315_v57 = vsel %vm1312_vm0, %v9314_v32, %v21928_v14  ;;  %v9327_v63 = vsel %vm1312_vm0, %v9326_v4, %v21940_v12  ;;  %v7012_v14 = vrot.slane %v6995_v59, 4  ;;  %v7014_v32 = vrot.slane %v25558_v3, 4 }
 0x853   : > { %v25672_v19 = vpop.trf.xlu0  ;;  %v9319_v62 = vperm.slane %v9315_v57, %v23267_v21  ;;  %v9331_v29 = vperm.slane %v9327_v63, %v23267_v21  ;;  %v7058_v4 = vrot.slane %v25575_v17, 4  ;;  %v7003_v3 = vsel %vm1312_vm0, %v25550_v55, %v7002_v47 }
 0x855   : > { %v9339_v23 = vsel %vm1312_vm0, %v9338_v60, %v9319_v62  ;;  %v7059_v15 = vsel %vm1312_vm0, %v25553_v11, %v7058_v4 }
 0x856   : > { %v9343_v8 = vperm.slane %v9339_v23, %v23273_v39 }
 0x857   : > { %v21942_v7 = vpop.trf.xlu1 }
 0x858   : > { %22037 = vxpose.binary.xlu2.c.b16.start.end [1/2] (short) (narrow) %v6961_v13, %v6905_v9, 16  ;;  %v7013_v9 = vsel %vm1312_vm0, 0, %v7012_v14  ;;  %v7069_v13 = vsel %vm1312_vm0, 0, %v7068_v6 }
 0x859   : > { %v21948_v56 = vpop.trf.xlu2 }
 0x85a   : > { %v9294_v41 = vrot.slane %v21948_v56, 4 }
 0x85b   : > { %22040 = vxpose.binary.xlu1.c.b16.start.end [1/2] (short) (narrow) %v25468_v51, %v25462_v54, 16  ;;  %v9293_v54 = vperm.slane %v9289_v58, %v23267_v21  ;;  %v25692_v22 = vpop.trf.xlu0 }
 0x85c   : > { %v9295_v61 = vsel %vm1312_vm0, %v9294_v41, %v21942_v7 }
 0x85d   : > { %v9299_v5 = vperm.slane %v9295_v61, %v23267_v21 }
 0x85f   : > { %v9306_v51 = vrot.slane %v9299_v5, 4  ;;  %v21943_v46 = vpop.trf.xlu1 }
 0x861   : > { %v21949_v43 = vpop.trf.xlu2  ;;  %v9307_v50 = vsel %vm1312_vm0, %v9306_v51, %v9293_v54  ;;  %v7015_v54 = vsel %vm1312_vm0, 0, %v7014_v32  ;;  %v7071_v51 = vsel %vm1312_vm0, 0, %v7070_v40 }
 0x862   : > { %v9332_v2 = vrot.slane %v21949_v43, 4  ;;  %v9311_v53 = vperm.slane %v9307_v50, %v23273_v39 }
 0x863   : > { %v21972_v28 = vpop.trf.xlu0 }
 0x864   : > { %v9333_v24 = vsel %vm1312_vm0, %v9332_v2, %v21943_v46  ;;  %v9312_v12 = vrot.slane %v9311_v53, 4  ;;  %v9370_v33 = vrot.slane %v21972_v28, 4  ;;  %v7011_v2 = vperm.slane %v7003_v3, %v23273_v39 }
 0x865   : > { %v9337_v35 = vperm.slane %v9333_v24, %v23267_v21 }
 0x866   : > { %v9313_v56 = vsel %vm1312_vm0, %v9312_v12, %v9305_v26 }
 0x867   : > { %v9344_v38 = vrot.slane %v9337_v35, 4  ;;  %v25708_v25 = vpop.trf.xlu1  ;;  %v9747_v18 = vshrl.u32 %v9313_v56, 16 }
 0x868   : > { %22046 = vxpose.binary.xlu2.c.b16.start.end [1/2] (short) (narrow) %v7051_v45, %v6995_v59, 16  ;;  %v7067_v59 = vperm.slane %v7059_v15, %v23273_v39  ;;  %v7018_v45 = vrot.slane %v7011_v2, 4 }
 0x869   : > { %v25711_v37 = vpop.trf.xlu2  ;;  %v9345_v7 = vsel %vm1312_vm0, %v9344_v38, %v9331_v29 }
 0x86a   : > { %v9349_v20 = vperm.slane %v9345_v7, %v23273_v39  ;;  %v7074_v1 = vrot.slane %v7067_v59, 4  ;;  %v7019_v6 = vsel %vm1312_vm0, 0, %v7018_v45  ;;  %v9352_v38 = vrot.slane %v25711_v37, 4  ;;  %v29325_v7 = vld [vmem:[#allocation26_spill] sm:$0xff] }
 0x86b   : > { %22049 = vxpose.binary.xlu1.c.b16.start.end [1/2] (short) (narrow) %v7069_v13, %v7013_v9, 16  ;;  %v21973_v61 = vpop.trf.xlu0  ;;  %v1511_v9 = vperm.slane %v29325_v7, %v23273_v39 }
 0x86c   : > { %v9350_v41 = vrot.slane %v9349_v20, 4  ;;  %v9408_v63 = vrot.slane %v21973_v61, 4  ;;  %v7075_v29 = vsel %vm1312_vm0, 0, %v7074_v1 }
 0x86e   : > { %v9351_v44 = vsel %vm1312_vm0, %v9350_v41, %v9343_v8 }
 0x86f   : > { %v25722_v52 = vpop.trf.xlu1  ;;  %v9746_v48 = vpack.i.b16 %v9351_v44, %v9313_v56  ;;  %v9748_v58 = vshrl.u32 %v9351_v44, 16  ;;  %v9353_v56 = vsel %vm1312_vm0, %v9352_v38, %v25708_v25 }
 0x870   : > { %v9357_v40 = vperm.slane %v9353_v56, %v23267_v21 }
 0x871   : > { %v25724_v5 = vpop.trf.xlu2  ;;  %20522 = vmatmul.msk.bf16.gmra.mxu2 %vm5745_vm1, %v9746_v48  ;;  %v9749_v31 = vpack.i.b16 %v9748_v58, %v9747_v18  ;;  %v1528_v58 = vrot.slane %v1511_v9, 4 }
 0x872   : > { %v9390_v13 = vrot.slane %v25724_v5, 4 }
 0x873   : > { %20530 = vmatmul.msk.bf16.gmra.mxu3 %vm5745_vm1, %v9749_v31  ;;  %v25732_v46 = vpop.trf.xlu0 }
 0x874   : > { %v9391_v5 = vsel %vm1312_vm0, %v9390_v13, %v25722_v52  ;;  %v1529_v52 = vsel %vm1312_vm0, 0.0, %v1528_v58 }
 0x875   : > { %v9395_v47 = vperm.slane %v9391_v5, %v23267_v21 }
 0x877   : > { %v21960_v27 = vpop.trf.xlu1 }
 0x878   : > { %22055 = vxpose.binary.xlu2.c.b16.start.end [1/2] (short) (narrow) %v7071_v51, %v7015_v54, 16  ;;  %v9358_v34 = vrot.slane %v21960_v27, 4 }
 0x879   : > { %v21966_v16 = vpop.trf.xlu2 }
 0x87a   : > { %v9359_v60 = vsel %vm1312_vm0, %v9358_v34, %v25662_v36 }
 0x87b   : > { %22058 = vxpose.binary.xlu1.c.b16.start.end [1/2] (short) (narrow) %v25585_v49, %v25582_v30, 16  ;;  %v25742_v50 = vpop.trf.xlu0  ;;  %v9371_v30 = vsel %vm1312_vm0, %v9370_v33, %v21966_v16  ;;  %v9363_v12 = vperm.slane %v9359_v60, %v23267_v21 }
 0x87c   : > { %v9375_v17 = vperm.slane %v9371_v30, %v23267_v21 }
 0x87d   : > { %v9376_v44 = vrot.slane %v9363_v12, 4 }
 0x87e   : > { %v9382_v35 = vrot.slane %v9375_v17, 4 }
 0x87f   : > { %v21961_v43 = vpop.trf.xlu1  ;;  %v9377_v33 = vsel %vm1312_vm0, %v9376_v44, %v9357_v40  ;;  %v9428_v44 = vrot.slane %v25732_v46, 4 }
 0x880   : > { %v9396_v55 = vrot.slane %v21961_v43, 4  ;;  %v1544_v43 = vpack.c.bf16 %v1511_v9, %v1511_v9 }
 0x881   : > { %v21967_v57 = vpop.trf.xlu2 }
 0x882   : > { %v9397_v0 = vsel %vm1312_vm0, %v9396_v55, %v25666_v42  ;;  %v9409_v36 = vsel %vm1312_vm0, %v9408_v63, %v21967_v57 }
 0x883   : > { %v25748_v53 = vpop.trf.xlu0  ;;  %v9401_v37 = vperm.slane %v9397_v0, %v23267_v21  ;;  %v9413_v42 = vperm.slane %v9409_v36, %v23267_v21 }
 0x884   : > { %v9816_v49 = vpop.f32.mrf.mxu2 }
 0x885   : > { %v9414_v27 = vrot.slane %v9401_v37, 4  ;;  %v9420_v54 = vrot.slane %v9413_v42, 4 }
 0x886   : > { %v9892_v10 = vpop.f32.mrf.mxu3 }
 0x887   : > { %v22070_v11 = vpack.i.bf16 %v9892_v10, %v9816_v49  ;;  %v21969_v24 = vpop.trf.xlu1  ;;  %v9415_v57 = vsel %vm1312_vm0, %v9414_v27, %v9395_v47 }
 0x888   : > { %v9364_v62 = vrot.slane %v21969_v24, 4  ;;  %22064 = vxpose.binary.xlu2.c.b16.start.end [1/2] (short) (narrow) %v7067_v59, %v7011_v2, 16  ;;  %v1545_v2 = vpack.c.bf16 %v1529_v52, %v1529_v52  ;;  %v9419_v45 = vperm.slane %v9415_v57, %v23273_v39 }
 0x889   : > { %v25752_v14 = vpop.trf.xlu2  ;;  %22071 = vxpose.xlu0.b32.start [1/16] (narrow) %v22070_v11, 8 }
 0x88a   : > { %v9365_v28 = vsel %vm1312_vm0, %v9364_v62, %v25672_v19  ;;  %v29326_v19 = vld [vmem:[#allocation25_spill] sm:$0xff] }
 0x88b   : > { %v9369_v23 = vperm.slane %v9365_v28, %v23267_v21  ;;  %22067 = vxpose.binary.xlu1.c.b16.start.end [1/2] (short) (narrow) %v7075_v29, %v7019_v6, 16  ;;  %v1515_v20 = vperm.slane %v29326_v19, %v23273_v39  ;;  %v25774_v61 = vpop.trf.xlu0 }
 0x88c   : > { %v9818_v8 = vpop.f32.mrf.mxu2 }
 0x88d   : > { %v9383_v26 = vsel %vm1312_vm0, %v9382_v35, %v9369_v23  ;;  %v1530_v16 = vrot.slane %v1515_v20, 4  ;;  %v1546_v10 = vpack.c.bf16 %v1515_v20, %v1515_v20 }
 0x88e   : > { %v9894_v41 = vpop.f32.mrf.mxu3  ;;  %v9387_v32 = vperm.slane %v9383_v26, %v23273_v39 }
 0x88f   : > { %v22072_v48 = vpack.i.bf16 %v9894_v41, %v9818_v8  ;;  %v21970_v18 = vpop.trf.xlu1  ;;  %v1531_v59 = vsel %vm1312_vm0, 0.0, %v1530_v16 }
 0x890   : > { %v9402_v31 = vrot.slane %v21970_v18, 4  ;;  %v9388_v3 = vrot.slane %v9387_v32, 4  ;;  %v1547_v63 = vpack.c.bf16 %v1531_v59, %v1531_v59  ;;  %v9466_v32 = vrot.slane %v25742_v50, 4 }
 0x891   : > { %v25780_v51 = vpop.trf.xlu2  ;;  %22073 = vxpose.xlu0.b32.cont [2/16] (narrow) %v22072_v48, 8 }
 0x892   : > { %v9403_v25 = vsel %vm1312_vm0, %v9402_v31, %v25692_v22  ;;  %v9381_v22 = vperm.slane %v9377_v33, %v23273_v39 }
 0x893   : > { %v9407_v4 = vperm.slane %v9403_v25, %v23267_v21  ;;  %v25793_v49 = vpop.trf.xlu0  ;;  %v9429_v25 = vsel %vm1312_vm0, %v9428_v44, %v25752_v14 }
 0x894   : > { %v9389_v17 = vsel %vm1312_vm0, %v9388_v3, %v9381_v22  ;;  %v9433_v3 = vperm.slane %v9429_v25, %v23267_v21 }
 0x895   : > { %v9421_v15 = vsel %vm1312_vm0, %v9420_v54, %v9407_v4  ;;  %v9753_v60 = vshrl.u32 %v9389_v17, 16  ;;  %v9467_v4 = vsel %vm1312_vm0, %v9466_v32, %v25780_v51 }
 0x896   : > { %v9425_v30 = vperm.slane %v9421_v15, %v23273_v39  ;;  %v9471_v14 = vperm.slane %v9467_v4, %v23267_v21 }
 0x897   : > { %v21978_v34 = vpop.trf.xlu1 }
 0x898   : > { %22107 = vxpose.binary.xlu2.c.b16.start.end [1/2] (short) %v1545_v2, %v1544_v43, 128  ;;  %v9426_v1 = vrot.slane %v9425_v30, 4 }
 0x899   : > { %v21984_v55 = vpop.trf.xlu2 }
 0x89a   : > { %v9427_v11 = vsel %vm1312_vm0, %v9426_v1, %v9419_v45  ;;  %v9434_v9 = vrot.slane %v21984_v55, 4 }
 0x89b   : > { %22124 = vxpose.binary.xlu1.c.b16.start.end [1/2] (short) %v1547_v63, %v1546_v10, 128  ;;  %v9752_v24 = vpack.i.b16 %v9427_v11, %v9389_v17  ;;  %v9754_v62 = vshrl.u32 %v9427_v11, 16  ;;  %v25800_v29 = vpop.trf.xlu0 }
 0x89c   : > { %v9435_v20 = vsel %vm1312_vm0, %v9434_v9, %v21978_v34 }
 0x89d   : > { %20523 = vmatmul.msk.bf16.gmra.mxu2 %vm5745_vm1, %v9752_v24  ;;  %v9755_v35 = vpack.i.b16 %v9754_v62, %v9753_v60  ;;  %v9439_v18 = vperm.slane %v9435_v20, %v23267_v21 }
 0x89f   : > { %v21979_v6 = vpop.trf.xlu1  ;;  %20531 = vmatmul.msk.bf16.gmra.mxu3 %vm5745_vm1, %v9755_v35  ;;  %v9452_v16 = vrot.slane %v9439_v18, 4 }
 0x8a1   : > { %v21985_v38 = vpop.trf.xlu2  ;;  %v9453_v51 = vsel %vm1312_vm0, %v9452_v16, %v9433_v3 }
 0x8a2   : > { %v9472_v26 = vrot.slane %v21985_v38, 4  ;;  %v9457_v55 = vperm.slane %v9453_v51, %v23273_v39 }
 0x8a3   : > { %v25802_v36 = vpop.trf.xlu0 }
 0x8a4   : > { %v9473_v48 = vsel %vm1312_vm0, %v9472_v26, %v21979_v6 }
 0x8a5   : > { %v9477_v27 = vperm.slane %v9473_v48, %v23267_v21 }
 0x8a7   : > { %v21987_v0 = vpop.trf.xlu1  ;;  %v9490_v15 = vrot.slane %v9477_v27, 4 }
 0x8a9   : > { %v21993_v28 = vpop.trf.xlu2 }
 0x8aa   : > { %v9440_v13 = vrot.slane %v21993_v28, 4 }
 0x8ab   : > { %v25804_v7 = vpop.trf.xlu0 }
 0x8ac   : > { %v9441_v56 = vsel %vm1312_vm0, %v9440_v13, %v21987_v0 }
 0x8ad   : > { %v9445_v58 = vperm.slane %v9441_v56, %v23267_v21 }
 0x8af   : > { %v21988_v12 = vpop.trf.xlu1 }
 0x8b1   : > { %v21994_v23 = vpop.trf.xlu2 }
 0x8b2   : > { %v9478_v40 = vrot.slane %v21994_v23, 4 }
 0x8b3   : > { %v22017_v31 = vpop.trf.xlu0 }
 0x8b4   : > { %v9479_v52 = vsel %vm1312_vm0, %v9478_v40, %v21988_v12  ;;  %v9516_v20 = vrot.slane %v22017_v31, 4 }
 0x8b5   : > { %v9483_v2 = vperm.slane %v9479_v52, %v23267_v21 }
 0x8b7   : > { %v21996_v37 = vpop.trf.xlu1 }
 0x8b8   : > { %v9446_v42 = vrot.slane %v21996_v37, 4 }
 0x8b9   : > { %v25806_v19 = vpop.trf.xlu2 }
 0x8ba   : > { %v9447_v8 = vsel %vm1312_vm0, %v9446_v42, %v25748_v53  ;;  %v9510_v42 = vrot.slane %v25802_v36, 4 }
 0x8bb   : > { %v9451_v41 = vperm.slane %v9447_v8, %v23267_v21  ;;  %v22018_v1 = vpop.trf.xlu0  ;;  %v9548_v8 = vrot.slane %v25804_v7, 4 }
 0x8bc   : > { %v9511_v48 = vsel %vm1312_vm0, %v9510_v42, %v25806_v19  ;;  %v9554_v19 = vrot.slane %v22018_v1, 4 }
 0x8bd   : > { %v9458_v5 = vrot.slane %v9451_v41, 4  ;;  %v9515_v31 = vperm.slane %v9511_v48, %v23267_v21 }
 0x8bf   : > { %v21997_v54 = vpop.trf.xlu1  ;;  %v9459_v53 = vsel %vm1312_vm0, %v9458_v5, %v9445_v58  ;;  %v9528_v52 = vrot.slane %v9515_v31, 4 }
 0x8c0   : > { %v9484_v46 = vrot.slane %v21997_v54, 4  ;;  %v9463_v33 = vperm.slane %v9459_v53, %v23273_v39 }
 0x8c1   : > { %v22003_v47 = vpop.trf.xlu2 }
 0x8c2   : > { %v9485_v50 = vsel %vm1312_vm0, %v9484_v46, %v25774_v61  ;;  %v9464_v30 = vrot.slane %v9463_v33, 4  ;;  %v9491_v61 = vsel %vm1312_vm0, %v9490_v15, %v9471_v14  ;;  %v9549_v40 = vsel %vm1312_vm0, %v9548_v8, %v22003_v47 }
 0x8c3   : > { %v9489_v43 = vperm.slane %v9485_v50, %v23267_v21  ;;  %v9495_v24 = vperm.slane %v9491_v61, %v23273_v39  ;;  %v25842_v37 = vpop.trf.xlu0  ;;  %v9553_v25 = vperm.slane %v9549_v40, %v23267_v21 }
 0x8c4   : > { %v9821_v57 = vpop.f32.mrf.mxu2  ;;  %v9465_v11 = vsel %vm1312_vm0, %v9464_v30, %v9457_v55 }
 0x8c5   : > { %v9496_v59 = vrot.slane %v9489_v43, 4  ;;  %v9759_v6 = vshrl.u32 %v9465_v11, 16 }
 0x8c6   : > { %v9897_v22 = vpop.f32.mrf.mxu3 }
 0x8c7   : > { %v22074_v34 = vpack.i.bf16 %v9897_v22, %v9821_v57  ;;  %v22005_v17 = vpop.trf.xlu1  ;;  %v9497_v45 = vsel %vm1312_vm0, %v9496_v59, %v9483_v2 }
 0x8c8   : > { %v9501_v10 = vperm.slane %v9497_v45, %v23273_v39  ;;  %v9504_v18 = vrot.slane %v22005_v17, 4 }
 0x8c9   : > { %v22011_v63 = vpop.trf.xlu2  ;;  %22075 = vxpose.xlu0.b32.cont [3/16] (narrow) %v22074_v34, 8 }
 0x8ca   : > { %v9502_v60 = vrot.slane %v9501_v10, 4  ;;  %v9517_v58 = vsel %vm1312_vm0, %v9516_v20, %v22011_v63  ;;  %v9505_v53 = vsel %vm1312_vm0, %v9504_v18, %v25793_v49  ;;  %v9566_v49 = vrot.slane %v9553_v25, 4 }
 0x8cb   : > { %v25846_v44 = vpop.trf.xlu0  ;;  %v9521_v7 = vperm.slane %v9517_v58, %v23267_v21  ;;  %v9509_v50 = vperm.slane %v9505_v53, %v23267_v21 }
 0x8cc   : > { %v9503_v62 = vsel %vm1312_vm0, %v9502_v60, %v9495_v24  ;;  %v9823_v0 = vpop.f32.mrf.mxu2 }
 0x8cd   : > { %v9758_v35 = vpack.i.b16 %v9503_v62, %v9465_v11  ;;  %v9760_v38 = vshrl.u32 %v9503_v62, 16  ;;  %v9529_v51 = vsel %vm1312_vm0, %v9528_v52, %v9509_v50 }
 0x8ce   : > { %v9899_v28 = vpop.f32.mrf.mxu3  ;;  %v9533_v61 = vperm.slane %v9529_v51, %v23273_v39 }
 0x8cf   : > { %v22076_v12 = vpack.i.bf16 %v9899_v28, %v9823_v0  ;;  %v22006_v23 = vpop.trf.xlu1  ;;  %20524 = vmatmul.msk.bf16.gmra.mxu2 %vm5745_vm1, %v9758_v35  ;;  %v9761_v9 = vpack.i.b16 %v9760_v38, %v9759_v6 }
 0x8d0   : > { %v9542_v36 = vrot.slane %v22006_v23, 4 }
 0x8d1   : > { %v22012_v13 = vpop.trf.xlu2  ;;  %22077 = vxpose.xlu0.b32.cont [4/16] (narrow) %v22076_v12, 8  ;;  %20532 = vmatmul.msk.bf16.gmra.mxu3 %vm5745_vm1, %v9761_v9 }
 0x8d2   : > { %v9543_v4 = vsel %vm1312_vm0, %v9542_v36, %v25800_v29  ;;  %v9555_v33 = vsel %vm1312_vm0, %v9554_v19, %v22012_v13 }
 0x8d3   : > { %v9547_v43 = vperm.slane %v9543_v4, %v23267_v21  ;;  %v22035_v14 = vpop.trf.xlu0  ;;  %v9559_v2 = vperm.slane %v9555_v33, %v23267_v21 }
 0x8d5   : > { %v9567_v34 = vsel %vm1312_vm0, %v9566_v49, %v9547_v43 }
 0x8d6   : > { %v9571_v55 = vperm.slane %v9567_v34, %v23273_v39 }
 0x8d7   : > { %v22014_v26 = vpop.trf.xlu1 }
 0x8d9   : > { %v22020_v56 = vpop.trf.xlu2 }
 0x8da   : > { %v9522_v41 = vrot.slane %v22020_v56, 4 }
 0x8db   : > { %v22036_v35 = vpop.trf.xlu0 }
 0x8dc   : > { %v9523_v5 = vsel %vm1312_vm0, %v9522_v41, %v22014_v26 }
 0x8dd   : > { %v9527_v32 = vperm.slane %v9523_v5, %v23267_v21 }
 0x8df   : > { %v9534_v27 = vrot.slane %v9527_v32, 4  ;;  %v22015_v54 = vpop.trf.xlu1 }
 0x8e1   : > { %v22021_v46 = vpop.trf.xlu2  ;;  %v9535_v16 = vsel %vm1312_vm0, %v9534_v27, %v9521_v7 }
 0x8e2   : > { %v9560_v47 = vrot.slane %v22021_v46, 4  ;;  %v9539_v15 = vperm.slane %v9535_v16, %v23273_v39 }
 0x8e3   : > { %v22044_v13 = vpop.trf.xlu0 }
 0x8e4   : > { %v9561_v3 = vsel %vm1312_vm0, %v9560_v47, %v22015_v54  ;;  %v9540_v22 = vrot.slane %v9539_v15, 4  ;;  %v9598_v20 = vrot.slane %v22044_v13, 4  ;;  %v29327_v47 = vld [vmem:[#allocation28_spill] sm:$0xff]  ;;  %v29328_v15 = vld [vmem:[#allocation27_spill] sm:$0xff] }
 0x8e5   : > { %v9565_v57 = vperm.slane %v9561_v3, %v23267_v21  ;;  %v1523_v52 = vperm.slane %v29327_v47, %v23273_v39  ;;  %v1527_v49 = vperm.slane %v29328_v15, %v23273_v39 }
 0x8e6   : > { %v9541_v1 = vsel %vm1312_vm0, %v9540_v22, %v9533_v61 }
 0x8e7   : > { %v9572_v59 = vrot.slane %v9565_v57, 4  ;;  %v22023_v29 = vpop.trf.xlu1  ;;  %v9765_v60 = vshrl.u32 %v9541_v1, 16  ;;  %v1550_v13 = vpack.c.bf16 %v1527_v49, %v1527_v49 }
 0x8e9   : > { %v22029_v30 = vpop.trf.xlu2  ;;  %v9573_v17 = vsel %vm1312_vm0, %v9572_v59, %v9559_v2 }
 0x8ea   : > { %v9577_v45 = vperm.slane %v9573_v17, %v23273_v39  ;;  %v9580_v53 = vrot.slane %v22029_v30, 4 }
 0x8eb   : > { %v22045_v18 = vpop.trf.xlu0 }
 0x8ec   : > { %v9578_v10 = vrot.slane %v9577_v45, 4  ;;  %v9636_v40 = vrot.slane %v22045_v18, 4 }
 0x8ee   : > { %v9579_v63 = vsel %vm1312_vm0, %v9578_v10, %v9571_v55 }
 0x8ef   : > { %v22024_v11 = vpop.trf.xlu1  ;;  %v9764_v24 = vpack.i.b16 %v9579_v63, %v9541_v1  ;;  %v9766_v62 = vshrl.u32 %v9579_v63, 16 }
 0x8f1   : > { %v22030_v6 = vpop.trf.xlu2  ;;  %20525 = vmatmul.msk.bf16.gmra.mxu2 %vm5745_vm1, %v9764_v24  ;;  %v9767_v38 = vpack.i.b16 %v9766_v62, %v9765_v60  ;;  %v1548_v24 = vpack.c.bf16 %v1523_v52, %v1523_v52 }
 0x8f3   : > { %20533 = vmatmul.msk.bf16.gmra.mxu3 %vm5745_vm1, %v9767_v38 }
 0x8f4   : > { %v9826_v0 = vpop.f32.mrf.mxu2 }
 0x8f6   : > { %v9902_v28 = vpop.f32.mrf.mxu3 }
 0x8f7   : > { %v22078_v12 = vpack.i.bf16 %v9902_v28, %v9826_v0  ;;  %v22032_v23 = vpop.trf.xlu1 }
 0x8f8   : > { %v9586_v58 = vrot.slane %v22032_v23, 4 }
 0x8f9   : > { %v22038_v9 = vpop.trf.xlu2  ;;  %22079 = vxpose.xlu0.b32.cont [5/16] (narrow) %v22078_v12, 8 }
 0x8fa   : > { %v9599_v48 = vsel %vm1312_vm0, %v9598_v20, %v22038_v9  ;;  %v9587_v31 = vsel %vm1312_vm0, %v9586_v58, %v25842_v37  ;;  %v9618_v37 = vrot.slane %v22030_v6, 4 }
 0x8fb   : > { %v9603_v5 = vperm.slane %v9599_v48, %v23267_v21  ;;  %v9591_v16 = vperm.slane %v9587_v31, %v23267_v21 }
 0x8fc   : > { %v9828_v26 = vpop.f32.mrf.mxu2  ;;  %v9619_v2 = vsel %vm1312_vm0, %v9618_v37, %v22024_v11 }
 0x8fd   : > { %v9610_v27 = vrot.slane %v9603_v5, 4  ;;  %v9604_v43 = vrot.slane %v9591_v16, 4  ;;  %v9623_v45 = vperm.slane %v9619_v2, %v23267_v21 }
 0x8fe   : > { %v9904_v42 = vpop.f32.mrf.mxu3 }
 0x8ff   : > { %v22080_v56 = vpack.i.bf16 %v9904_v42, %v9828_v26  ;;  %v22033_v8 = vpop.trf.xlu1 }
 0x900   : > { %v9624_v32 = vrot.slane %v22033_v8, 4 }
 0x901   : > { %v22039_v41 = vpop.trf.xlu2  ;;  %22081 = vxpose.xlu0.b32.cont [6/16] (narrow) %v22080_v56, 8 }
 0x902   : > { %v9625_v19 = vsel %vm1312_vm0, %v9624_v32, %v25846_v44  ;;  %v9637_v46 = vsel %vm1312_vm0, %v9636_v40, %v22039_v41  ;;  %v9581_v44 = vsel %vm1312_vm0, %v9580_v53, %v22023_v29  ;;  %v1534_v29 = vrot.slane %v1527_v49, 4  ;;  %v22053_v32 = vpop.trf.xlu0 }
 0x903   : > { %v9629_v50 = vperm.slane %v9625_v19, %v23267_v21  ;;  %v9641_v33 = vperm.slane %v9637_v46, %v23267_v21  ;;  %v9585_v22 = vperm.slane %v9581_v44, %v23267_v21 }
 0x904   : > { %v1535_v6 = vsel %vm1312_vm0, 0.0, %v1534_v29 }
 0x905   : > { %v9642_v30 = vrot.slane %v9629_v50, 4  ;;  %v9648_v34 = vrot.slane %v9641_v33, 4  ;;  %v9605_v10 = vsel %vm1312_vm0, %v9604_v43, %v9585_v22  ;;  %v1551_v26 = vpack.c.bf16 %v1535_v6, %v1535_v6 }
 0x906   : > { %v9656_v43 = vrot.slane %v22053_v32, 4 }
 0x907   : > { %v22041_v36 = vpop.trf.xlu1  ;;  %v9643_v60 = vsel %vm1312_vm0, %v9642_v30, %v9623_v45 }
 0x908   : > { %v9592_v7 = vrot.slane %v22041_v36, 4  ;;  %v9647_v12 = vperm.slane %v9643_v60, %v23273_v39 }
 0x909   : > { %v25883_v54 = vpop.trf.xlu2 }
 0x90a   : > { %v9593_v25 = vsel %vm1312_vm0, %v9592_v7, %v22035_v14  ;;  %v1532_v14 = vrot.slane %v1523_v52, 4  ;;  %v22054_v19 = vpop.trf.xlu0  ;;  %v9657_v45 = vsel %vm1312_vm0, %v9656_v43, %v25883_v54 }
 0x90b   : > { %v9597_v4 = vperm.slane %v9593_v25, %v23267_v21 }
 0x90c   : > { %v1533_v55 = vsel %vm1312_vm0, 0.0, %v1532_v14 }
 0x90d   : > { %v9611_v3 = vsel %vm1312_vm0, %v9610_v27, %v9597_v4  ;;  %v1549_v62 = vpack.c.bf16 %v1533_v55, %v1533_v55 }
 0x90e   : > { %v9615_v51 = vperm.slane %v9611_v3, %v23273_v39 }
 0x90f   : > { %v22042_v57 = vpop.trf.xlu1 }
 0x910   : > { %v9630_v59 = vrot.slane %v22042_v57, 4  ;;  %v9616_v63 = vrot.slane %v9615_v51, 4  ;;  %v9694_v51 = vrot.slane %v22054_v19, 4 }
 0x911   : > { %v25902_v17 = vpop.trf.xlu2 }
 0x912   : > { %v9631_v61 = vsel %vm1312_vm0, %v9630_v59, %v22036_v35  ;;  %v9609_v35 = vperm.slane %v9605_v10, %v23273_v39  ;;  %v22062_v16 = vpop.trf.xlu0 }
 0x913   : > { %v9635_v1 = vperm.slane %v9631_v61, %v23267_v21 }
 0x914   : > { %v9617_v28 = vsel %vm1312_vm0, %v9616_v63, %v9609_v35  ;;  %v9695_v63 = vsel %vm1312_vm0, %v9694_v51, %v25902_v17 }
 0x915   : > { %v9649_v11 = vsel %vm1312_vm0, %v9648_v34, %v9635_v1  ;;  %v9771_v56 = vshrl.u32 %v9617_v28, 16  ;;  %v9699_v54 = vperm.slane %v9695_v63, %v23267_v21 }
 0x916   : > { %v9653_v38 = vperm.slane %v9649_v11, %v23273_v39 }
 0x917   : > { %v22050_v0 = vpop.trf.xlu1 }
 0x918   : > { %22141 = vxpose.binary.xlu2.c.b16.start.end [1/2] (short) %v1549_v62, %v1548_v24, 128  ;;  %v9654_v23 = vrot.slane %v9653_v38, 4  ;;  %v9661_v62 = vperm.slane %v9657_v45, %v23267_v21 }
 0x919   : > { %v22056_v9 = vpop.trf.xlu2 }
 0x91a   : > { %v9655_v42 = vsel %vm1312_vm0, %v9654_v23, %v9647_v12  ;;  %v9662_v4 = vrot.slane %v22056_v9, 4  ;;  %v22063_v29 = vpop.trf.xlu0 }
 0x91b   : > { %22158 = vxpose.binary.xlu1.c.b16.start.end [1/2] (short) %v1551_v26, %v1550_v13, 128  ;;  %v9770_v20 = vpack.i.b16 %v9655_v42, %v9617_v28  ;;  %v9772_v8 = vshrl.u32 %v9655_v42, 16 }
 0x91c   : > { %v9663_v3 = vsel %vm1312_vm0, %v9662_v4, %v22050_v0 }
 0x91d   : > { %20526 = vmatmul.msk.bf16.gmra.mxu2 %vm5745_vm1, %v9770_v20  ;;  %v9773_v41 = vpack.i.b16 %v9772_v8, %v9771_v56  ;;  %v9667_v14 = vperm.slane %v9663_v3, %v23267_v21 }
 0x91f   : > { %v22051_v48 = vpop.trf.xlu1  ;;  %20534 = vmatmul.msk.bf16.gmra.mxu3 %vm5745_vm1, %v9773_v41  ;;  %v9680_v55 = vrot.slane %v9667_v14, 4 }
 0x920   : > { %v9831_v18 = vpop.f32.mrf.mxu2 }
 0x921   : > { %v22057_v58 = vpop.trf.xlu2  ;;  %v9681_v28 = vsel %vm1312_vm0, %v9680_v55, %v9661_v62 }
 0x922   : > { %v9907_v5 = vpop.f32.mrf.mxu3  ;;  %v9700_v37 = vrot.slane %v22057_v58, 4  ;;  %v9685_v26 = vperm.slane %v9681_v28, %v23273_v39 }
 0x923   : > { %v22082_v40 = vpack.i.bf16 %v9907_v5, %v9831_v18 }
 0x924   : > { %v9701_v57 = vsel %vm1312_vm0, %v9700_v37, %v22051_v48 }
 0x925   : > { %22083 = vxpose.xlu0.b32.cont [7/16] (narrow) %v22082_v40, 8  ;;  %v9705_v30 = vperm.slane %v9701_v57, %v23267_v21 }
 0x927   : > { %v22059_v36 = vpop.trf.xlu1  ;;  %v9718_v6 = vrot.slane %v9705_v30, 4 }
 0x928   : > { %v9833_v7 = vpop.f32.mrf.mxu2 }
 0x929   : > { %v22065_v31 = vpop.trf.xlu2  ;;  %v9719_v9 = vsel %vm1312_vm0, %v9718_v6, %v9699_v54 }
 0x92a   : > { %v9909_v27 = vpop.f32.mrf.mxu3  ;;  %v9668_v47 = vrot.slane %v22065_v31, 4  ;;  %v9723_v8 = vperm.slane %v9719_v9, %v23273_v39 }
 0x92b   : > { %v22084_v53 = vpack.i.bf16 %v9909_v27, %v9833_v7 }
 0x92c   : > { %v9669_v44 = vsel %vm1312_vm0, %v9668_v47, %v22059_v36 }
 0x92d   : > { %22085 = vxpose.xlu0.b32.cont [8/16] (narrow) %v22084_v53, 8  ;;  %v9673_v2 = vperm.slane %v9669_v44, %v23267_v21 }
 0x92f   : > { %v22060_v25 = vpop.trf.xlu1 }
 0x931   : > { %v22066_v46 = vpop.trf.xlu2 }
 0x932   : > { %v9706_v22 = vrot.slane %v22066_v46, 4 }
 0x934   : > { %v9707_v11 = vsel %vm1312_vm0, %v9706_v22, %v22060_v25 }
 0x935   : > { %v9711_v38 = vperm.slane %v9707_v11, %v23267_v21 }
 0x937   : > { %v22068_v52 = vpop.trf.xlu1 }
 0x938   : > { %v9674_v50 = vrot.slane %v22068_v52, 4 }
 0x939   : > { %v25919_v33 = vpop.trf.xlu2 }
 0x93a   : > { %v9675_v15 = vsel %vm1312_vm0, %v9674_v50, %v22062_v16 }
 0x93b   : > { %v9679_v49 = vperm.slane %v9675_v15, %v23267_v21 }
 0x93d   : > { %v9686_v59 = vrot.slane %v9679_v49, 4 }
 0x93f   : > { %v9687_v34 = vsel %vm1312_vm0, %v9686_v59, %v9673_v2  ;;  %v22069_v61 = vpop.trf.xlu1 }
 0x940   : > { %v9712_v1 = vrot.slane %v22069_v61, 4  ;;  %v9691_v24 = vperm.slane %v9687_v34, %v23273_v39 }
 0x941   : > { %v25932_v10 = vpop.trf.xlu2 }
 0x942   : > { %v9713_v60 = vsel %vm1312_vm0, %v9712_v1, %v22063_v29  ;;  %v9692_v12 = vrot.slane %v9691_v24, 4 }
 0x943   : > { %v9717_v35 = vperm.slane %v9713_v60, %v23267_v21 }
 0x944   : > { %v9693_v56 = vsel %vm1312_vm0, %v9692_v12, %v9685_v26 }
 0x945   : > { %v9724_v0 = vrot.slane %v9717_v35, 4  ;;  %v9777_v18 = vshrl.u32 %v9693_v56, 16 }
 0x947   : > { %v9725_v17 = vsel %vm1312_vm0, %v9724_v0, %v9711_v38  ;;  %v25945_v23 = vpop.trf.xlu1 }
 0x948   : > { %v9729_v13 = vperm.slane %v9725_v17, %v23273_v39 }
 0x949   : > { %v25950_v42 = vpop.trf.xlu2 }
 0x94a   : > { %v9730_v20 = vrot.slane %v9729_v13, 4 }
 0x94c   : > { %v9731_v41 = vsel %vm1312_vm0, %v9730_v20, %v9723_v8  ;;  %v10262_v20 = vshrl.u32 %v25919_v33, 16 }
 0x94d   : > { %v9776_v48 = vpack.i.b16 %v9731_v41, %v9693_v56  ;;  %v9778_v58 = vshrl.u32 %v9731_v41, 16  ;;  %v10263_v56 = vshrl.u32 %v25932_v10, 16 }
 0x94f   : > { %v25955_v5 = vpop.trf.xlu1  ;;  %20527 = vmatmul.msk.bf16.gmra.mxu2 %vm5745_vm1, %v9776_v48  ;;  %v9779_v32 = vpack.i.b16 %v9778_v58, %v9777_v18  ;;  %v10270_v18 = vshrl.u32 %v25945_v23, 16  ;;  %v10294_v58 = vshrl.u32 %v25950_v42, 16 }
 0x951   : > { %v25958_v40 = vpop.trf.xlu2  ;;  %20535 = vmatmul.msk.bf16.gmra.mxu3 %vm5745_vm1, %v9779_v32  ;;  %v10271_v32 = vshrl.u32 %v25955_v5, 16 }
 0x952   : > { %v9836_v36 = vpop.f32.mrf.mxu2 }
 0x954   : > { %v9912_v31 = vpop.f32.mrf.mxu3 }
 0x955   : > { %v22086_v7 = vpack.i.bf16 %v9912_v31, %v9836_v36  ;;  %v10295_v36 = vshrl.u32 %v25958_v40, 16 }
 0x957   : > { %v25961_v27 = vpop.trf.xlu1  ;;  %22087 = vxpose.xlu0.b32.cont [9/16] (narrow) %v22086_v7, 8  ;;  %v10260_v7 = vpack.i.b16 %v25932_v10, %v25919_v33 }
 0x959   : > { %v25963_v53 = vpop.trf.xlu2 }
 0x95a   : > { %v9838_v19 = vpop.f32.mrf.mxu2 }
 0x95c   : > { %v9914_v25 = vpop.f32.mrf.mxu3 }
 0x95d   : > { %v22088_v46 = vpack.i.bf16 %v9914_v25, %v9838_v19  ;;  %v10264_v19 = vpack.i.b16 %v10263_v56, %v10262_v20  ;;  %v10268_v25 = vpack.i.b16 %v25955_v5, %v25945_v23 }
 0x95f   : > { %v25965_v16 = vpop.trf.xlu1  ;;  %22089 = vxpose.xlu0.b32.cont [10/16] (narrow) %v22088_v46, 8 }
 0x960   : > { %v10303_v33 = vshrl.u32 %v25965_v16, 16 }
 0x961   : > { %v25967_v4 = vpop.trf.xlu2 }
 0x967   : > { %v25969_v47 = vpop.trf.xlu1 }
 0x969   : > { %v25971_v52 = vpop.trf.xlu2 }
 0x96f   : > { %v25973_v37 = vpop.trf.xlu1 }
 0x971   : > { %v25975_v50 = vpop.trf.xlu2 }
 0x974   : > { %v9841_v3 = vpop.f32.mrf.mxu2 }
 0x976   : > { %v9917_v44 = vpop.f32.mrf.mxu3 }
 0x977   : > { %v22090_v15 = vpack.i.bf16 %v9917_v44, %v9841_v3  ;;  %v25977_v49 = vpop.trf.xlu1  ;;  %v10272_v44 = vpack.i.b16 %v10271_v32, %v10270_v18 }
 0x979   : > { %v25979_v43 = vpop.trf.xlu2  ;;  %22091 = vxpose.xlu0.b32.cont [11/16] (narrow) %v22090_v15, 8  ;;  %v26027_v15 = vpack.i.b16 %v25958_v40, %v25950_v42 }
 0x97c   : > { %v9843_v57 = vpop.f32.mrf.mxu2 }
 0x97e   : > { %v9919_v14 = vpop.f32.mrf.mxu3 }
 0x97f   : > { %v22092_v2 = vpack.i.bf16 %v9919_v14, %v9843_v57  ;;  %v25981_v59 = vpop.trf.xlu1  ;;  %v26029_v57 = vpack.i.b16 %v10295_v36, %v10294_v58  ;;  %v10516_v14 = vrot.slane %v10260_v7, 4  ;;  %v10327_v58 = vshrl.u32 %v25967_v4, 16 }
 0x981   : > { %v25983_v51 = vpop.trf.xlu2  ;;  %22093 = vxpose.xlu0.b32.cont [12/16] (narrow) %v22092_v2, 8 }
 0x987   : > { %v25985_v22 = vpop.trf.xlu1 }
 0x989   : > { %v25987_v30 = vpop.trf.xlu2 }
 0x98f   : > { %v25989_v34 = vpop.trf.xlu1 }
 0x991   : > { %v25991_v61 = vpop.trf.xlu2 }
 0x997   : > { %v25993_v29 = vpop.trf.xlu1 }
 0x999   : > { %v25995_v45 = vpop.trf.xlu2 }
 0x99f   : > { %v25997_v1 = vpop.trf.xlu1 }
 0x9a0   : > { %v9846_v55 = vpop.f32.mrf.mxu2 }
 0x9a1   : > { %v25999_v63 = vpop.trf.xlu2 }
 0x9a2   : > { %v9922_v11 = vpop.f32.mrf.mxu3 }
 0x9a3   : > { %v22094_v24 = vpack.i.bf16 %v9922_v11, %v9846_v55  ;;  %v10572_v55 = vrot.slane %v10264_v19, 4  ;;  %v10528_v11 = vrot.slane %v10268_v25, 4 }
 0x9a5   : > { %22095 = vxpose.xlu0.b32.cont [13/16] (narrow) %v22094_v24, 8  ;;  %v10302_v24 = vshrl.u32 %v25961_v27, 16 }
 0x9a7   : > { %v26001_v60 = vpop.trf.xlu1 }
 0x9a8   : > { %v9848_v6 = vpop.f32.mrf.mxu2 }
 0x9a9   : > { %v26003_v62 = vpop.trf.xlu2 }
 0x9aa   : > { %v9924_v35 = vpop.f32.mrf.mxu3 }
 0x9ab   : > { %v22096_v54 = vpack.i.bf16 %v9924_v35, %v9848_v6 }
 0x9ad   : > { %22097 = vxpose.xlu0.b32.cont [14/16] (narrow) %v22096_v54, 8  ;;  %v10584_v54 = vrot.slane %v10272_v44, 4 }
 0x9af   : > { %v26005_v38 = vpop.trf.xlu1 }
 0x9b1   : > { %v26007_v0 = vpop.trf.xlu2 }
 0x9b7   : > { %v26009_v28 = vpop.trf.xlu1 }
 0x9b9   : > { %v22142_v12 = vpop.trf.xlu2 }
 0x9ba   : > { %v10278_v13 = vshrl.u32 %v22142_v12, 16 }
 0x9bf   : > { %v26011_v17 = vpop.trf.xlu1 }
 0x9c1   : > { %v22143_v9 = vpop.trf.xlu2 }
 0x9c2   : > { %v10279_v26 = vshrl.u32 %v22143_v9, 16  ;;  %v10276_v41 = vpack.i.b16 %v22143_v9, %v22142_v12  ;;  %v26039_v12 = vpack.i.b16 %v25965_v16, %v25961_v27 }
 0x9c4   : > { %v10280_v48 = vpack.i.b16 %v10279_v26, %v10278_v13  ;;  %v10514_v46 = vrot.slane %v10276_v41, 4  ;;  %v10326_v13 = vshrl.u32 %v25963_v53, 16 }
 0x9c6   : > { %v10570_v3 = vrot.slane %v10280_v48, 4  ;;  %v10515_v23 = vsel %vm1312_vm0, %v10514_v46, %v10260_v7 }
 0x9c7   : > { %v22159_v8 = vpop.trf.xlu1  ;;  %v10521_v32 = vperm.slane %v10515_v23, %v23267_v21 }
 0x9c8   : > { %v10286_v2 = vshrl.u32 %v22159_v8, 16  ;;  %v10571_v5 = vsel %vm1312_vm0, %v10570_v3, %v10264_v19  ;;  %v10640_v3 = vrot.slane %v26039_v12, 4 }
 0x9c9   : > { %v26019_v31 = vpop.trf.xlu2  ;;  %v10577_v36 = vperm.slane %v10571_v5, %v23267_v21  ;;  %v10540_v5 = vrot.slane %v10521_v32, 4 }
 0x9cf   : > { %v22160_v10 = vpop.trf.xlu1 }
 0x9d0   : > { %v10284_v6 = vpack.i.b16 %v22160_v10, %v22159_v8  ;;  %v10287_v35 = vshrl.u32 %v22160_v10, 16  ;;  %v26045_v8 = vpack.i.b16 %v10303_v33, %v10302_v24  ;;  %v10517_v33 = vsel %vm1312_vm0, %v10276_v41, %v10516_v14 }
 0x9d1   : > { %v26041_v9 = vpop.trf.xlu2  ;;  %v10525_v41 = vperm.slane %v10517_v33, %v23267_v21 }
 0x9d2   : > { %v10288_v26 = vpack.i.b16 %v10287_v35, %v10286_v2  ;;  %v10526_v20 = vrot.slane %v10284_v6, 4  ;;  %v10529_v56 = vsel %vm1312_vm0, %v10284_v6, %v10528_v11  ;;  %v9851_v18 = vpop.f32.mrf.mxu2  ;;  %v26056_v2 = vpack.i.b16 %v25967_v4, %v25963_v53 }
 0x9d3   : > { %v10537_v16 = vperm.slane %v10529_v56, %v23267_v21  ;;  %v10696_v53 = vrot.slane %v26045_v8, 4  ;;  %v26065_v4 = vpack.i.b16 %v10327_v58, %v10326_v13  ;;  %v10335_v13 = vshrl.u32 %v25973_v37, 16 }
 0x9d4   : > { %v10527_v27 = vsel %vm1312_vm0, %v10526_v20, %v10268_v25  ;;  %v10582_v7 = vrot.slane %v10288_v26, 4  ;;  %v10585_v19 = vsel %vm1312_vm0, %v10288_v26, %v10584_v54  ;;  %v9927_v46 = vpop.f32.mrf.mxu3  ;;  %v10573_v25 = vsel %vm1312_vm0, %v10280_v48, %v10572_v55 }
 0x9d5   : > { %v10533_v11 = vperm.slane %v10527_v27, %v23267_v21  ;;  %v10593_v24 = vperm.slane %v10585_v19, %v23267_v21  ;;  %v22098_v23 = vpack.i.bf16 %v9927_v46, %v9851_v18  ;;  %v10596_v26 = vrot.slane %v10577_v36, 4 }
 0x9d6   : > { %v10583_v10 = vsel %vm1312_vm0, %v10582_v7, %v10272_v44  ;;  %v10334_v20 = vshrl.u32 %v25969_v47, 16  ;;  %v10550_v56 = vrot.slane %v10537_v16, 4  ;;  %v26075_v18 = vpack.i.b16 %v25973_v37, %v25969_v47 }
 0x9d7   : > { %v10538_v6 = vrot.slane %v10533_v11, 4  ;;  %v10589_v35 = vperm.slane %v10583_v10, %v23267_v21  ;;  %v22161_v54 = vpop.trf.xlu1  ;;  %22099 = vxpose.xlu0.b32.cont [15/16] (narrow) %v22098_v23, 8  ;;  %v10606_v48 = vrot.slane %v10593_v24, 4  ;;  %v10541_v44 = vsel %vm1312_vm0, %v10533_v11, %v10540_v5 }
 0x9d8   : > { %v10581_v58 = vperm.slane %v10573_v25, %v23267_v21  ;;  %v10549_v27 = vperm.slane %v10541_v44, %v23273_v39  ;;  %v10310_v7 = vshrl.u32 %v26019_v31, 16  ;;  %v10308_v19 = vpack.i.b16 %v26041_v9, %v26019_v31 }
 0x9d9   : > { %v26069_v14 = vpop.trf.xlu2  ;;  %v10597_v55 = vsel %vm1312_vm0, %v10589_v35, %v10596_v26  ;;  %v10539_v11 = vsel %vm1312_vm0, %v10538_v6, %v10521_v32  ;;  %v10311_v33 = vshrl.u32 %v26041_v9, 16  ;;  %v10594_v5 = vrot.slane %v10589_v35, 4 }
 0x9da   : > { %v10605_v46 = vperm.slane %v10597_v55, %v23273_v39  ;;  %v9853_v10 = vpop.f32.mrf.mxu2  ;;  %v10564_v23 = vrot.slane %v10549_v27, 4  ;;  %v26087_v37 = vsel %vm1312_vm0, %v10550_v56, %v10525_v41  ;;  %v10552_v25 = vrot.slane %v10525_v41, 4 }
 0x9db   : > { %v26090_v40 = vsel %vm1312_vm0, %v10606_v48, %v10581_v58  ;;  %v10740_v31 = vrot.slane %v26056_v2, 4  ;;  %v26093_v55 = vpack.i.b16 %v10335_v13, %v10334_v20  ;;  %v10318_v32 = vshrl.u32 %v22161_v54, 16 }
 0x9dc   : > { %v9929_v47 = vpop.f32.mrf.mxu3  ;;  %22181 = vxpose.binary.xlu2.c.b16.start.end [1/2] (short) (narrow) %v10605_v46, %v10549_v27, 16  ;;  %v10620_v44 = vrot.slane %v10605_v46, 4  ;;  %v10595_v9 = vsel %vm1312_vm0, %v10594_v5, %v10577_v36  ;;  %v10608_v6 = vrot.slane %v10581_v58, 4  ;;  %v10565_v35 = vsel %vm1312_vm0, 0, %v10564_v23 }
 0x9dd   : > { %v22100_v26 = vpack.i.bf16 %v9929_v47, %v9853_v10  ;;  %v26099_v41 = vsel %vm1312_vm0, %v10537_v16, %v10552_v25  ;;  %v10312_v27 = vpack.i.b16 %v10311_v33, %v10310_v7  ;;  %v10626_v46 = vrot.slane %v10308_v19, 4 }
 0x9de   : > { %v10621_v56 = vsel %vm1312_vm0, 0, %v10620_v44  ;;  %v10796_v20 = vrot.slane %v26065_v4, 4  ;;  %v10358_v13 = vshrl.u32 %v25971_v52, 16  ;;  %v10752_v36 = vrot.slane %v26075_v18, 4 }
 0x9df   : > { %v22162_v42 = vpop.trf.xlu1  ;;  %22184 = vxpose.binary.xlu1.c.b16.start.end [1/2] (short) (narrow) %v10621_v56, %v10565_v35, 16  ;;  %v26105_v47 = vsel %vm1312_vm0, %v10593_v24, %v10608_v6  ;;  %v26109_v16 = vpack.i.b16 %v25975_v50, %v25971_v52  ;;  %v10359_v7 = vshrl.u32 %v25975_v50, 16  ;;  %v29329_v23 = vrot.slane %v26027_v15, 4 }
 0x9e0   : > { %v10316_v48 = vpack.i.b16 %v22162_v42, %v22161_v54  ;;  %v10319_v10 = vshrl.u32 %v22162_v42, 16  ;;  %22101 = vxpose.xlu0.b32.end [16/16] (narrow) %v22100_v26, 8  ;;  %v10808_v54 = vrot.slane %v26093_v55, 4  ;;  %v10627_v52 = vsel %vm1312_vm0, %v10626_v46, %v26027_v15 }
 0x9e1   : > { %v22147_v58 = vpop.trf.xlu2  ;;  %v10629_v5 = vsel %vm1312_vm0, %v10308_v19, %v29329_v23  ;;  %v10682_v26 = vrot.slane %v10312_v27, 4  ;;  %v26128_v19 = vpack.i.b16 %v10359_v7, %v10358_v13  ;;  %v10633_v46 = vperm.slane %v10627_v52, %v23267_v21 }
 0x9e2   : > { %v10320_v33 = vpack.i.b16 %v10319_v10, %v10318_v32  ;;  %v10641_v42 = vsel %vm1312_vm0, %v10316_v48, %v10640_v3  ;;  %v10638_v25 = vrot.slane %v10316_v48, 4  ;;  %v29330_v32 = vrot.slane %v26029_v57, 4 }
 0x9e3   : > { %v10649_v24 = vperm.slane %v10641_v42, %v23267_v21  ;;  %v10340_v56 = vpack.i.b16 %v22147_v58, %v26069_v14  ;;  %v10637_v48 = vperm.slane %v10629_v5, %v23267_v21  ;;  %v10342_v10 = vshrl.u32 %v26069_v14, 16 }
 0x9e4   : > { %v10694_v44 = vrot.slane %v10320_v33, 4  ;;  %v10697_v50 = vsel %vm1312_vm0, %v10320_v33, %v10696_v53  ;;  %v10685_v3 = vsel %vm1312_vm0, %v10312_v27, %v29330_v32  ;;  %v10343_v15 = vshrl.u32 %v22147_v58, 16 }
 0x9e5   : > { %v10662_v6 = vrot.slane %v10649_v24, 4  ;;  %v10705_v35 = vperm.slane %v10697_v50, %v23267_v21  ;;  %v10639_v53 = vsel %vm1312_vm0, %v10638_v25, %v26039_v12  ;;  %v26136_v27 = vperm.slane %v10539_v11, %v23273_v39 }
 0x9e6   : > { %v26139_v42 = vperm.slane %v10595_v9, %v23273_v39  ;;  %v10693_v13 = vperm.slane %v10685_v3, %v23267_v21  ;;  %v10695_v7 = vsel %vm1312_vm0, %v10694_v44, %v26045_v8  ;;  %v10683_v12 = vsel %vm1312_vm0, %v10682_v26, %v26029_v57 }
 0x9e7   : > { %v22163_v33 = vpop.trf.xlu1  ;;  %v10663_v14 = vsel %vm1312_vm0, %v10662_v6, %v10637_v48  ;;  %v10718_v58 = vrot.slane %v10705_v35, 4  ;;  %v10738_v5 = vrot.slane %v10340_v56, 4  ;;  %v10645_v8 = vperm.slane %v10639_v53, %v23267_v21 }
 0x9e8   : > { %22175 = vxpose.binary.xlu0.c.b16.start.end [1/2] (short) (narrow) %v26139_v42, %v26136_v27, 16  ;;  %v10669_v9 = vperm.slane %v10663_v14, %v23273_v39  ;;  %v10344_v52 = vpack.i.b16 %v10343_v15, %v10342_v10  ;;  %v26158_v32 = vperm.slane %v10695_v7, %v23267_v21  ;;  %v10652_v3 = vrot.slane %v10633_v46, 4 }
 0x9e9   : > { %v26150_v11 = vpop.trf.xlu2  ;;  %v10719_v44 = vsel %vm1312_vm0, %v10718_v58, %v10693_v13  ;;  %v10664_v6 = vrot.slane %v10637_v48, 4  ;;  %v26162_v23 = vperm.slane %v10683_v12, %v23267_v21  ;;  %v10720_v14 = vrot.slane %v10693_v13, 4 }
 0x9ea   : > { %v10725_v57 = vperm.slane %v10719_v44, %v23273_v39  ;;  %v10678_v26 = vrot.slane %v10669_v9, 4  ;;  %v10739_v53 = vsel %vm1312_vm0, %v10738_v5, %v26056_v2  ;;  %v10741_v10 = vsel %vm1312_vm0, %v10340_v56, %v10740_v31 }
 0x9eb   : > { %v10562_v7 = vrot.slane %v26136_v27, 4  ;;  %v10794_v58 = vrot.slane %v10344_v52, 4  ;;  %v10350_v44 = vshrl.u32 %v22163_v33, 16  ;;  %v10665_v50 = vsel %vm1312_vm0, %v10649_v24, %v10664_v6 }
 0x9ec   : > { %22211 = vxpose.binary.xlu2.c.b16.start.end [1/2] (short) (narrow) %v10725_v57, %v10669_v9, 16  ;;  %v10734_v15 = vrot.slane %v10725_v57, 4  ;;  %v10650_v48 = vrot.slane %v10645_v8, 4  ;;  %v10679_v12 = vsel %vm1312_vm0, 0, %v10678_v26  ;;  %v10706_v5 = vrot.slane %v26158_v32, 4 }
 0x9ed   : > { %v26175_v2 = vsel %vm1312_vm0, %v10645_v8, %v10652_v3  ;;  %v10749_v31 = vperm.slane %v10741_v10, %v23267_v21  ;;  %v10721_v9 = vsel %vm1312_vm0, %v10705_v35, %v10720_v14  ;;  %v10797_v24 = vsel %vm1312_vm0, %v10344_v52, %v10796_v20 }
 0x9ee   : > { %v10735_v13 = vsel %vm1312_vm0, 0, %v10734_v15  ;;  %v10618_v26 = vrot.slane %v26139_v42, 4  ;;  %v26184_v6 = vsel %vm1312_vm0, %v10650_v48, %v10633_v46  ;;  %v26188_v8 = vsel %vm1312_vm0, %v10706_v5, %v26162_v23 }
 0x9ef   : > { %v22164_v25 = vpop.trf.xlu1  ;;  %22214 = vxpose.binary.xlu1.c.b16.start.end [1/2] (short) (narrow) %v10735_v13, %v10679_v12, 16  ;;  %v10745_v20 = vperm.slane %v10739_v53, %v23267_v21  ;;  %v10795_v42 = vsel %vm1312_vm0, %v10794_v58, %v26065_v4  ;;  %v10776_v52 = vrot.slane %v10749_v31, 4  ;;  %v10374_v53 = vshrl.u32 %v26150_v11, 16 }
 0x9f0   : > { %v10348_v56 = vpack.i.b16 %v22164_v25, %v22163_v33  ;;  %v10351_v27 = vshrl.u32 %v22164_v25, 16  ;;  %v26194_v33 = vperm.slane %v10665_v50, %v23273_v39  ;;  %v26201_v25 = vperm.slane %v10721_v9, %v23273_v39 }
 0x9f1   : > { %v22149_v57 = vpop.trf.xlu2  ;;  %v10805_v50 = vperm.slane %v10797_v24, %v23267_v21 }
 0x9f2   : > { %v10352_v3 = vpack.i.b16 %v10351_v27, %v10350_v44  ;;  %v10750_v10 = vrot.slane %v10348_v56, 4  ;;  %v10753_v35 = vsel %vm1312_vm0, %v10348_v56, %v10752_v36  ;;  %29331 = vst [vmem:[#allocation40_spill] sm:$0xff] %v26201_v25  ;;  %v10680_v48 = vrot.slane %v26194_v33, 4 }
 0x9f3   : > { %v10761_v46 = vperm.slane %v10753_v35, %v23267_v21  ;;  %v10375_v5 = vshrl.u32 %v22149_v57, 16  ;;  %v10736_v27 = vrot.slane %v26201_v25, 4  ;;  %v10372_v24 = vpack.i.b16 %v22149_v57, %v26150_v11 }
 0x9f4   : > { %v10751_v14 = vsel %vm1312_vm0, %v10750_v10, %v26075_v18  ;;  %v10806_v15 = vrot.slane %v10352_v3, 4  ;;  %v10809_v36 = vsel %vm1312_vm0, %v10352_v3, %v10808_v54  ;;  %v10801_v18 = vperm.slane %v10795_v42, %v23267_v21 }
 0x9f5   : > { %v10757_v4 = vperm.slane %v10751_v14, %v23267_v21  ;;  %v10817_v58 = vperm.slane %v10809_v36, %v23267_v21  ;;  %v26217_v12 = vsel %vm1312_vm0, %v10761_v46, %v10776_v52  ;;  %v10774_v9 = vrot.slane %v10761_v46, 4 }
 0x9f6   : > { %v10807_v44 = vsel %vm1312_vm0, %v10806_v15, %v26093_v55  ;;  %v10563_v3 = vsel %vm1312_vm0, 0, %v10562_v7  ;;  %v10619_v55 = vsel %vm1312_vm0, 0, %v10618_v26  ;;  %v10764_v52 = vrot.slane %v10745_v20, 4 }
 0x9f7   : > { %v10762_v13 = vrot.slane %v10757_v4, 4  ;;  %v10813_v54 = vperm.slane %v10807_v44, %v23267_v21  ;;  %v22165_v56 = vpop.trf.xlu1  ;;  %v10830_v10 = vrot.slane %v10817_v58, 4  ;;  %v10364_v14 = vpack.i.b16 %v25981_v59, %v25977_v49 }
 0x9f8   : > { %22178 = vxpose.binary.xlu0.c.b16.start.end [1/2] (short) (narrow) %v10619_v55, %v10563_v3, 16  ;;  %v10681_v36 = vsel %vm1312_vm0, 0, %v10680_v48  ;;  %v10820_v46 = vrot.slane %v10801_v18, 4  ;;  %v10832_v44 = vrot.slane %v10805_v50, 4  ;;  %v10376_v11 = vpack.i.b16 %v10375_v5, %v10374_v53 }
 0x9f9   : > { %v10763_v35 = vsel %vm1312_vm0, %v10762_v13, %v10745_v20  ;;  %v10818_v42 = vrot.slane %v10813_v54, 4  ;;  %v26227_v15 = vpop.trf.xlu2  ;;  %v10737_v7 = vsel %vm1312_vm0, 0, %v10736_v27  ;;  %v10765_v26 = vsel %vm1312_vm0, %v10757_v4, %v10764_v52 }
 0x9fa   : > { %v10850_v3 = vrot.slane %v10372_v24, 4  ;;  %v10821_v20 = vsel %vm1312_vm0, %v10813_v54, %v10820_v46  ;;  %v26238_v55 = vsel %vm1312_vm0, %v10774_v9, %v10749_v31  ;;  %v29333_v48 = vshrl.u32 %v25977_v49, 16 }
 0x9fb   : > { %v10819_v57 = vsel %vm1312_vm0, %v10818_v42, %v10801_v18  ;;  %v29334_v25 = vshrl.u32 %v25981_v59, 16  ;;  %v29335_v5 = vrot.slane %v26109_v16, 4  ;;  %v26248_v4 = vsel %vm1312_vm0, %v10830_v10, %v10805_v50 }
 0x9fc   : > { %v26234_v13 = vperm.slane %v10819_v57, %v23273_v39  ;;  %22220 = vxpose.binary.xlu2.c.b16.start.end [1/2] (short) (narrow) %v10737_v7, %v10681_v36, 16  ;;  %v10382_v27 = vshrl.u32 %v22165_v56, 16  ;;  %v26251_v42 = vperm.slane %v10763_v35, %v23273_v39  ;;  %v26254_v31 = vsel %vm1312_vm0, %v10817_v58, %v10832_v44 }
 0x9fd   : > { %v10368_v53 = vpack.i.b16 %v29334_v25, %v29333_v48  ;;  %v10853_v18 = vsel %vm1312_vm0, %v10372_v24, %v29335_v5  ;;  %v10864_v54 = vrot.slane %v10364_v14, 4  ;;  %v10906_v49 = vrot.slane %v10376_v11, 4 }
 0x9fe   : > { %29332 = vst [vmem:[#allocation20_spill] sm:$0xff] %v26234_v13  ;;  %v10851_v59 = vsel %vm1312_vm0, %v10850_v3, %v26109_v16  ;;  %v10861_v25 = vperm.slane %v10853_v18, %v23267_v21  ;;  %v10908_v10 = vrot.slane %v26128_v19, 4  ;;  %v26265_v46 = vperm.slane %v26087_v37, %v23273_v39 }
 0x9ff   : > { %29336 = vst [vmem:[#allocation21_spill] sm:$0xff] %v26251_v42  ;;  %v22166_v9 = vpop.trf.xlu1  ;;  %22223 = vxpose.binary.xlu1.c.b16.start.end [1/2] (short) (narrow) %v26234_v13, %v26251_v42, 16  ;;  %v10920_v35 = vrot.slane %v10368_v53, 4  ;;  %v10857_v16 = vperm.slane %v10851_v59, %v23267_v21  ;;  %v10907_v44 = vsel %vm1312_vm0, %v10906_v49, %v26128_v19 }
 0xa00   : > { %v10380_v50 = vpack.i.b16 %v22166_v9, %v22165_v56  ;;  %v10383_v24 = vshrl.u32 %v22166_v9, 16  ;;  %v26273_v56 = vperm.slane %v26090_v40, %v23273_v39  ;;  %v10888_v57 = vrot.slane %v10861_v25, 4 }
 0xa01   : > { %v22151_v18 = vpop.trf.xlu2  ;;  %v10909_v37 = vsel %vm1312_vm0, %v10376_v11, %v10908_v10  ;;  %v10913_v49 = vperm.slane %v10907_v44, %v23267_v21  ;;  %v10773_v9 = vperm.slane %v10765_v26, %v23273_v39  ;;  %v10829_v10 = vperm.slane %v10821_v20, %v23273_v39 }
 0xa02   : > { %v10384_v52 = vpack.i.b16 %v10383_v24, %v10382_v27  ;;  %v10862_v36 = vrot.slane %v10380_v50, 4  ;;  %v10865_v58 = vsel %vm1312_vm0, %v10380_v50, %v10864_v54  ;;  %v10406_v27 = vshrl.u32 %v26227_v15, 16 }
 0xa03   : > { %v10873_v7 = vperm.slane %v10865_v58, %v23267_v21  ;;  %v10407_v24 = vshrl.u32 %v22151_v18, 16  ;;  %v26296_v44 = vpack.i.b16 %v22151_v18, %v26227_v15  ;;  %v10844_v20 = vrot.slane %v10829_v10, 4 }
 0xa04   : > { %v10863_v3 = vsel %vm1312_vm0, %v10862_v36, %v10364_v14  ;;  %v10918_v48 = vrot.slane %v10384_v52, 4  ;;  %v10921_v5 = vsel %vm1312_vm0, %v10384_v52, %v10920_v35  ;;  %v10876_v35 = vrot.slane %v10857_v16, 4 }
 0xa05   : > { %v10869_v54 = vperm.slane %v10863_v3, %v23267_v21  ;;  %v10929_v19 = vperm.slane %v10921_v5, %v23267_v21  ;;  %v26285_v14 = vsel %vm1312_vm0, %v10873_v7, %v10888_v57  ;;  %v10917_v52 = vperm.slane %v10909_v37, %v23267_v21 }
 0xa06   : > { %v10919_v40 = vsel %vm1312_vm0, %v10918_v48, %v10368_v53  ;;  %v10886_v36 = vrot.slane %v10873_v7, 4  ;;  %v10788_v57 = vrot.slane %v10773_v9, 4  ;;  %v10932_v3 = vrot.slane %v10913_v49, 4 }
 0xa07   : > { %v10874_v59 = vrot.slane %v10869_v54, 4  ;;  %v10925_v50 = vperm.slane %v10919_v40, %v23267_v21  ;;  %v22167_v11 = vpop.trf.xlu1  ;;  %v10942_v58 = vrot.slane %v10929_v19, 4  ;;  %v26298_v48 = vpack.i.b16 %v10407_v24, %v10406_v27 }
 0xa08   : > { %22187 = vxpose.binary.xlu0.c.b16.start.end [1/2] (short) (narrow) %v26273_v56, %v26265_v46, 16  ;;  %v26304_v7 = vsel %vm1312_vm0, %v10869_v54, %v10876_v35  ;;  %v10390_v37 = vshrl.u32 %v25979_v43, 16  ;;  %v10398_v15 = vshrl.u32 %v25985_v22, 16  ;;  %v10944_v18 = vrot.slane %v10917_v52, 4 }
 0xa09   : > { %v26293_v26 = vsel %vm1312_vm0, %v10874_v59, %v10857_v16  ;;  %v10930_v53 = vrot.slane %v10925_v50, 4  ;;  %v10391_v16 = vshrl.u32 %v25983_v51, 16  ;;  %v26309_v40 = vsel %vm1312_vm0, %v10925_v50, %v10932_v3  ;;  %v26336_v13 = vpop.trf.xlu2 }
 0xa0a   : > { %v26313_v27 = vsel %vm1312_vm0, %v10886_v36, %v10861_v25  ;;  %v10399_v54 = vshrl.u32 %v25989_v34, 16  ;;  %v10962_v59 = vrot.slane %v26296_v44, 4  ;;  %v10414_v24 = vshrl.u32 %v22167_v11, 16 }
 0xa0b   : > { %v26301_v5 = vsel %vm1312_vm0, %v10930_v53, %v10913_v49  ;;  %v26316_v49 = vsel %vm1312_vm0, %v10942_v58, %v10917_v52  ;;  %v10708_v35 = vrot.slane %v26162_v23, 4  ;;  %v11018_v50 = vrot.slane %v26298_v48, 4 }
 0xa0c   : > { %22229 = vxpose.binary.xlu2.c.b16.start.end [1/2] (short) (narrow) %v10829_v10, %v10773_v9, 16  ;;  %v10789_v53 = vsel %vm1312_vm0, 0, %v10788_v57  ;;  %v10845_v3 = vsel %vm1312_vm0, 0, %v10844_v20  ;;  %v26325_v25 = vsel %vm1312_vm0, %v10929_v19, %v10944_v18  ;;  %v10388_v10 = vpack.i.b16 %v25983_v51, %v25979_v43 }
 0xa0d   : > { %v10392_v58 = vpack.i.b16 %v10391_v16, %v10390_v37  ;;  %v26331_v23 = vsel %vm1312_vm0, %v26158_v32, %v10708_v35  ;;  %v10396_v57 = vpack.i.b16 %v25989_v34, %v25985_v22  ;;  %v10400_v42 = vpack.i.b16 %v10399_v54, %v10398_v15 }
 0xa0e   : > { %v10963_v20 = vsel %vm1312_vm0, %v10962_v59, %v10388_v10  ;;  %v10566_v51 = vrot.slane %v26265_v46, 4  ;;  %v26344_v16 = vperm.slane %v26238_v55, %v23273_v39  ;;  %v26348_v22 = vperm.slane %v26248_v4, %v23273_v39 }
 0xa0f   : > { %v22168_v9 = vpop.trf.xlu1  ;;  %22232 = vxpose.binary.xlu1.c.b16.start.end [1/2] (short) (narrow) %v10845_v3, %v10789_v53, 16  ;;  %v11019_v43 = vsel %vm1312_vm0, %v11018_v50, %v10392_v58  ;;  %v10969_v34 = vperm.slane %v10963_v20, %v23267_v21 }
 0xa10   : > { %v10412_v52 = vpack.i.b16 %v22168_v9, %v22167_v11  ;;  %v10415_v36 = vshrl.u32 %v22168_v9, 16  ;;  %v10622_v11 = vrot.slane %v26273_v56, 4  ;;  %29337 = vst [vmem:[#allocation41_spill] sm:$0xff] %v26348_v22  ;;  %v11025_v54 = vperm.slane %v11019_v43, %v23267_v21 }
 0xa11   : > { %v10567_v55 = vsel %vm1312_vm0, 0, %v10566_v51  ;;  %v10790_v4 = vrot.slane %v26344_v16, 4  ;;  %v10846_v50 = vrot.slane %v26348_v22, 4  ;;  %v10988_v53 = vrot.slane %v10969_v34, 4  ;;  %v22153_v43 = vpop.trf.xlu2 }
 0xa12   : > { %v10416_v19 = vpack.i.b16 %v10415_v36, %v10414_v24  ;;  %v10974_v18 = vrot.slane %v10412_v52, 4  ;;  %v10623_v35 = vsel %vm1312_vm0, 0, %v10622_v11  ;;  %v11044_v36 = vrot.slane %v11025_v54, 4 }
 0xa13   : > { %v10791_v51 = vsel %vm1312_vm0, 0, %v10790_v4  ;;  %v10847_v11 = vsel %vm1312_vm0, 0, %v10846_v50  ;;  %v10430_v4 = vshrl.u32 %v25993_v29, 16 }
 0xa14   : > { %v10975_v37 = vsel %vm1312_vm0, %v10974_v18, %v10396_v57  ;;  %v11030_v32 = vrot.slane %v10416_v19, 4 }
 0xa15   : > { %v10981_v15 = vperm.slane %v10975_v37, %v23267_v21 }
 0xa16   : > { %v11031_v46 = vsel %vm1312_vm0, %v11030_v32, %v10400_v42  ;;  %v10964_v32 = vrot.slane %v10388_v10, 4  ;;  %v11020_v10 = vrot.slane %v10392_v58, 4  ;;  %v10431_v58 = vshrl.u32 %v25997_v1, 16 }
 0xa17   : > { %v10986_v56 = vrot.slane %v10981_v15, 4  ;;  %v11037_v59 = vperm.slane %v11031_v46, %v23267_v21  ;;  %v26355_v24 = vpop.trf.xlu1  ;;  %v26368_v18 = vsel %vm1312_vm0, %v10981_v15, %v10988_v53  ;;  %v10976_v46 = vrot.slane %v10396_v57, 4 }
 0xa18   : > { %22190 = vxpose.binary.xlu0.c.b16.start.end [1/2] (short) (narrow) %v10623_v35, %v10567_v55, 16  ;;  %v11032_v15 = vrot.slane %v10400_v42, 4  ;;  %v10422_v57 = vshrl.u32 %v25987_v30, 16 }
 0xa19   : > { %v26362_v3 = vsel %vm1312_vm0, %v10986_v56, %v10969_v34  ;;  %v11042_v9 = vrot.slane %v11037_v59, 4  ;;  %v26373_v37 = vsel %vm1312_vm0, %v11037_v59, %v11044_v36  ;;  %v26377_v34 = vperm.slane %v26217_v12, %v23273_v39 }
 0xa1a   : > { %v10965_v56 = vsel %vm1312_vm0, %v26296_v44, %v10964_v32  ;;  %v10977_v55 = vsel %vm1312_vm0, %v10412_v52, %v10976_v46  ;;  %v10423_v12 = vshrl.u32 %v25991_v61, 16  ;;  %v11033_v59 = vsel %vm1312_vm0, %v10416_v19, %v11032_v15 }
 0xa1b   : > { %v26365_v20 = vsel %vm1312_vm0, %v11042_v9, %v11025_v54  ;;  %29338 = vst [vmem:[#allocation42_spill] sm:$0xff] %v26377_v34  ;;  %v26381_v54 = vperm.slane %v26254_v31, %v23273_v39  ;;  %v10973_v31 = vperm.slane %v10965_v56, %v23267_v21  ;;  %v10985_v42 = vperm.slane %v10977_v55, %v23267_v21 }
 0xa1c   : > { %22238 = vxpose.binary.xlu2.c.b16.start.end [1/2] (short) (narrow) %v10847_v11, %v10791_v51, 16  ;;  %v11021_v44 = vsel %vm1312_vm0, %v26298_v48, %v11020_v10  ;;  %v10420_v52 = vpack.i.b16 %v25991_v61, %v25987_v30  ;;  %v11041_v50 = vperm.slane %v11033_v59, %v23267_v21  ;;  %v10454_v19 = vshrl.u32 %v25995_v45, 16  ;;  %v26410_v51 = vpop.trf.xlu2 }
 0xa1d   : > { %29339 = vst [vmem:[#allocation43_spill] sm:$0xff] %v26381_v54  ;;  %v26400_v53 = vpack.i.b16 %v10423_v12, %v10422_v57  ;;  %v10428_v9 = vpack.i.b16 %v25997_v1, %v25993_v29  ;;  %v26407_v36 = vperm.slane %v26099_v41, %v23273_v39  ;;  %v11000_v48 = vrot.slane %v10973_v31, 4 }
 0xa1e   : > { %v11029_v30 = vperm.slane %v11021_v44, %v23267_v21  ;;  %v10998_v61 = vrot.slane %v10985_v42, 4  ;;  %v26414_v11 = vperm.slane %v26105_v47, %v23273_v39  ;;  %v10438_v32 = vshrl.u32 %v26336_v13, 16 }
 0xa1f   : > { %v22170_v35 = vpop.trf.xlu1  ;;  %22241 = vxpose.binary.xlu1.c.b16.start.end [1/2] (short) (narrow) %v26381_v54, %v26377_v34, 16  ;;  %v10439_v46 = vshrl.u32 %v22153_v43, 16  ;;  %v10881_v29 = vperm.slane %v26293_v26, %v23273_v39  ;;  %v10937_v1 = vperm.slane %v26301_v5, %v23273_v39  ;;  %v10432_v41 = vpack.i.b16 %v10431_v58, %v10430_v4 }
 0xa20   : > { %v10455_v15 = vshrl.u32 %v25999_v63, 16  ;;  %v11054_v56 = vrot.slane %v11041_v50, 4  ;;  %v10436_v55 = vpack.i.b16 %v22153_v43, %v26336_v13  ;;  %v10446_v47 = vshrl.u32 %v26355_v24, 16 }
 0xa21   : > { %v10444_v57 = vpack.i.b16 %v22170_v35, %v26355_v24  ;;  %v10447_v12 = vshrl.u32 %v22170_v35, 16  ;;  %v26430_v26 = vsel %vm1312_vm0, %v10985_v42, %v11000_v48  ;;  %v11076_v5 = vrot.slane %v10420_v52, 4 }
 0xa22   : > { %v26434_v59 = vpack.i.b16 %v25999_v63, %v25995_v45  ;;  %v11056_v44 = vrot.slane %v11029_v30, 4  ;;  %v26437_v13 = vsel %vm1312_vm0, %v10998_v61, %v10973_v31  ;;  %v11132_v43 = vrot.slane %v26400_v53, 4 }
 0xa23   : > { %v10440_v4 = vpack.i.b16 %v10439_v46, %v10438_v32  ;;  %v10898_v24 = vrot.slane %v10881_v29, 4  ;;  %v10954_v35 = vrot.slane %v10937_v1, 4  ;;  %v11088_v58 = vrot.slane %v10428_v9, 4 }
 0xa24   : > { %v11144_v54 = vrot.slane %v10432_v41, 4  ;;  %v26441_v34 = vsel %vm1312_vm0, %v11054_v56, %v11029_v30  ;;  %v26444_v42 = vsel %vm1312_vm0, %v11041_v50, %v11056_v44  ;;  %v26446_v48 = vpack.i.b16 %v10455_v15, %v10454_v19 }
 0xa25   : > { %v11074_v45 = vrot.slane %v10436_v55, 4  ;;  %v10448_v63 = vpack.i.b16 %v10447_v12, %v10446_v47  ;;  %v11086_v22 = vrot.slane %v10444_v57, 4  ;;  %v10462_v61 = vshrl.u32 %v26001_v60, 16 }
 0xa26   : > { %v26452_v32 = vpack.i.b16 %v26005_v38, %v26001_v60  ;;  %v10463_v30 = vshrl.u32 %v26005_v38, 16  ;;  %v11130_v46 = vrot.slane %v10440_v4, 4  ;;  %v11089_v50 = vsel %vm1312_vm0, %v10444_v57, %v11088_v58 }
 0xa27   : > { %v26423_v10 = vpop.trf.xlu1  ;;  %v10899_v19 = vsel %vm1312_vm0, 0, %v10898_v24  ;;  %v10955_v15 = vsel %vm1312_vm0, 0, %v10954_v35  ;;  %v11077_v56 = vsel %vm1312_vm0, %v10436_v55, %v11076_v5  ;;  %v10624_v47 = vrot.slane %v26414_v11, 4 }
 0xa28   : > { %22193 = vxpose.binary.xlu0.c.b16.start.end [1/2] (short) (narrow) %v26414_v11, %v26407_v36, 16  ;;  %v26463_v60 = vperm.slane %v26304_v7, %v23273_v39  ;;  %v11075_v38 = vsel %vm1312_vm0, %v11074_v45, %v10420_v52  ;;  %v11087_v57 = vsel %vm1312_vm0, %v11086_v22, %v10428_v9  ;;  %v11142_v12 = vrot.slane %v10448_v63, 4 }
 0xa29   : > { %v11145_v44 = vsel %vm1312_vm0, %v10448_v63, %v11144_v54  ;;  %v11097_v5 = vperm.slane %v11089_v50, %v23267_v21  ;;  %v26473_v11 = vperm.slane %v26309_v40, %v23273_v39  ;;  %v26475_v7 = vpack.i.b16 %v10463_v30, %v10462_v61 }
 0xa2a   : > { %v11085_v52 = vperm.slane %v11077_v56, %v23267_v21  ;;  %v11131_v22 = vsel %vm1312_vm0, %v11130_v46, %v26400_v53  ;;  %v11133_v54 = vsel %vm1312_vm0, %v10440_v4, %v11132_v43  ;;  %v11200_v9 = vrot.slane %v26452_v32, 4 }
 0xa2b   : > { %29340 = vst [vmem:[#allocation24_spill] sm:$0xff] %v26473_v11  ;;  %v11081_v35 = vperm.slane %v11075_v38, %v23267_v21  ;;  %v11093_v58 = vperm.slane %v11087_v57, %v23267_v21  ;;  %v11153_v45 = vperm.slane %v11145_v44, %v23267_v21  ;;  %v11143_v40 = vsel %vm1312_vm0, %v11142_v12, %v10432_v41 }
 0xa2c   : > { %22247 = vxpose.binary.xlu2.c.b16.start.end [1/2] (short) (narrow) %v10937_v1, %v10881_v29, 16  ;;  %v22155_v29 = vpop.trf.xlu2  ;;  %v10568_v1 = vrot.slane %v26407_v36, 4  ;;  %v10625_v61 = vsel %vm1312_vm0, 0, %v10624_v47  ;;  %v10900_v30 = vrot.slane %v26463_v60, 4  ;;  %v11137_v53 = vperm.slane %v11131_v22, %v23267_v21 }
 0xa2d   : > { %v11141_v43 = vperm.slane %v11133_v54, %v23267_v21  ;;  %v11110_v4 = vrot.slane %v11097_v5, 4  ;;  %v10956_v46 = vrot.slane %v26473_v11, 4  ;;  %v11112_v50 = vrot.slane %v11085_v52, 4 }
 0xa2e   : > { %v10569_v63 = vsel %vm1312_vm0, 0, %v10568_v1  ;;  %v10471_v56 = vshrl.u32 %v22155_v29, 16  ;;  %v11100_v41 = vrot.slane %v11081_v35, 4  ;;  %v11098_v38 = vrot.slane %v11093_v58, 4 }
 0xa2f   : > { %22250 = vxpose.binary.xlu1.c.b16.start.end [1/2] (short) (narrow) %v10955_v15, %v10899_v19, 16  ;;  %v22172_v36 = vpop.trf.xlu1  ;;  %v10470_v19 = vshrl.u32 %v26410_v51, 16  ;;  %v10468_v15 = vpack.i.b16 %v22155_v29, %v26410_v51  ;;  %v11149_v1 = vperm.slane %v11143_v40, %v23267_v21  ;;  %v11166_v47 = vrot.slane %v11153_v45, 4 }
 0xa30   : > { %v10478_v57 = vshrl.u32 %v26423_v10, 16  ;;  %v10476_v12 = vpack.i.b16 %v22172_v36, %v26423_v10  ;;  %v10479_v44 = vshrl.u32 %v22172_v36, 16  ;;  %v26498_v22 = vsel %vm1312_vm0, %v11097_v5, %v11112_v50 }
 0xa31   : > { %v10901_v55 = vsel %vm1312_vm0, 0, %v10900_v30  ;;  %v26504_v51 = vsel %vm1312_vm0, %v11093_v58, %v11100_v41  ;;  %v11156_v29 = vrot.slane %v11137_v53, 4  ;;  %v26507_v40 = vsel %vm1312_vm0, %v11110_v4, %v11085_v52 }
 0xa32   : > { %v11168_v24 = vrot.slane %v11141_v43, 4  ;;  %v10472_v31 = vpack.i.b16 %v10471_v56, %v10470_v19  ;;  %v11186_v11 = vrot.slane %v10468_v15, 4  ;;  %v10957_v10 = vsel %vm1312_vm0, 0, %v10956_v46 }
 0xa33   : > { %v26513_v5 = vsel %vm1312_vm0, %v11098_v38, %v11081_v35  ;;  %v26519_v58 = vsel %vm1312_vm0, %v11166_v47, %v11141_v43  ;;  %v11256_v52 = vrot.slane %v26475_v7, 4  ;;  %v10487_v30 = vshrl.u32 %v26007_v0, 16 }
 0xa34   : > { %v26500_v54 = vpop.trf.xlu2  ;;  %v10480_v4 = vpack.i.b16 %v10479_v44, %v10478_v57  ;;  %v11198_v50 = vrot.slane %v10476_v12, 4  ;;  %v26525_v46 = vperm.slane %v26313_v27, %v23273_v39  ;;  %v26529_v35 = vperm.slane %v26316_v49, %v23273_v39 }
 0xa35   : > { %v26535_v43 = vsel %vm1312_vm0, %v11153_v45, %v11168_v24  ;;  %v11187_v56 = vsel %vm1312_vm0, %v11186_v11, %v26434_v59  ;;  %v29341_v41 = vrot.slane %v26434_v59, 4  ;;  %v11242_v38 = vrot.slane %v10472_v31, 4 }
 0xa36   : > { %v11201_v27 = vsel %vm1312_vm0, %v10476_v12, %v11200_v9  ;;  %v10495_v49 = vshrl.u32 %v26011_v17, 16  ;;  %v11199_v24 = vsel %vm1312_vm0, %v11198_v50, %v26452_v32  ;;  %v11254_v59 = vrot.slane %v10480_v4, 4 }
 0xa37   : > { %v26510_v36 = vpop.trf.xlu1  ;;  %v11257_v11 = vsel %vm1312_vm0, %v10480_v4, %v11256_v52  ;;  %v10484_v9 = vpack.i.b16 %v26007_v0, %v26003_v62  ;;  %v11193_v45 = vperm.slane %v11187_v56, %v23267_v21  ;;  %v11209_v57 = vperm.slane %v11201_v27, %v23267_v21 }
 0xa38   : > { %22196 = vxpose.binary.xlu0.c.b16.start.end [1/2] (short) (narrow) %v10625_v61, %v10569_v63, 16  ;;  %v11154_v63 = vrot.slane %v11149_v1, 4  ;;  %v26516_v61 = vsel %vm1312_vm0, %v11149_v1, %v11156_v29  ;;  %v10494_v1 = vshrl.u32 %v26009_v28, 16  ;;  %v10492_v44 = vpack.i.b16 %v26011_v17, %v26009_v28 }
 0xa39   : > { %v11243_v32 = vsel %vm1312_vm0, %v11242_v38, %v26446_v48  ;;  %v11205_v0 = vperm.slane %v11199_v24, %v23267_v21  ;;  %v26579_v28 = vperm.slane %v26188_v8, %v23273_v39  ;;  %v10897_v17 = vperm.slane %v26285_v14, %v23273_v39 }
 0xa3a   : > { %v26532_v19 = vsel %vm1312_vm0, %v11154_v63, %v11137_v53  ;;  %v29342_v53 = vrot.slane %v26446_v48, 4  ;;  %v11265_v63 = vperm.slane %v11257_v11, %v23267_v21  ;;  %v10953_v48 = vperm.slane %v26325_v25, %v23273_v39 }
 0xa3b   : > { %v11212_v4 = vrot.slane %v11193_v45, 4  ;;  %v11249_v56 = vperm.slane %v11243_v32, %v23267_v21  ;;  %v10502_v38 = vshrl.u32 %v26500_v54, 16  ;;  %v11210_v8 = vrot.slane %v11205_v0, 4 }
 0xa3c   : > { %22256 = vxpose.binary.xlu2.c.b16.start.end [1/2] (short) (narrow) %v10957_v10, %v10901_v55, 16  ;;  %v11189_v55 = vsel %vm1312_vm0, %v10468_v15, %v29341_v41  ;;  %v11245_v47 = vsel %vm1312_vm0, %v10472_v31, %v29342_v53  ;;  %v29343_v31 = vshrl.u32 %v26003_v62, 16  ;;  %v26567_v10 = vpack.i.b16 %v10495_v49, %v10494_v1  ;;  %v22157_v52 = vpop.trf.xlu2 }
 0xa3d   : > { %v11197_v15 = vperm.slane %v11189_v55, %v23267_v21  ;;  %v11253_v29 = vperm.slane %v11245_v47, %v23267_v21  ;;  %v26573_v62 = vperm.slane %v26184_v6, %v23273_v39  ;;  %v11222_v41 = vrot.slane %v11209_v57, 4 }
 0xa3e   : > { %v26560_v12 = vpack.i.b16 %v10487_v30, %v29343_v31  ;;  %v11255_v30 = vsel %vm1312_vm0, %v11254_v59, %v26475_v7  ;;  %v10500_v7 = vpack.i.b16 %v22157_v52, %v26500_v54  ;;  %v10503_v27 = vshrl.u32 %v22157_v52, 16 }
 0xa3f   : > { %22259 = vxpose.binary.xlu1.c.b16.start.end [1/2] (short) (narrow) %v26529_v35, %v26525_v46, 16  ;;  %v11224_v50 = vrot.slane %v11197_v15, 4  ;;  %v22174_v6 = vpop.trf.xlu1  ;;  %v11280_v55 = vrot.slane %v11253_v29, 4  ;;  %v11261_v1 = vperm.slane %v11255_v30, %v23267_v21  ;;  %v11278_v49 = vrot.slane %v11265_v63, 4 }
 0xa40   : > { %v10510_v25 = vshrl.u32 %v26510_v36, 16  ;;  %v10508_v53 = vpack.i.b16 %v22174_v6, %v26510_v36  ;;  %v10511_v47 = vshrl.u32 %v22174_v6, 16  ;;  %v10904_v24 = vrot.slane %v10897_v17, 4 }
 0xa41   : > { %v26590_v14 = vsel %vm1312_vm0, %v11209_v57, %v11224_v50  ;;  %v26597_v59 = vsel %vm1312_vm0, %v11205_v0, %v11212_v4  ;;  %v11268_v54 = vrot.slane %v11249_v56, 4  ;;  %v26600_v11 = vsel %vm1312_vm0, %v11222_v41, %v11197_v15 }
 0xa42   : > { %v26603_v31 = vsel %vm1312_vm0, %v11265_v63, %v11280_v55  ;;  %v10504_v57 = vpack.i.b16 %v10503_v27, %v10502_v38  ;;  %v11298_v32 = vrot.slane %v10500_v7, 4  ;;  %v10960_v52 = vrot.slane %v10953_v48, 4 }
 0xa43   : > { %v26606_v36 = vsel %vm1312_vm0, %v11210_v8, %v11193_v45  ;;  %v11266_v30 = vrot.slane %v11261_v1, 4  ;;  %v26609_v50 = vsel %vm1312_vm0, %v11261_v1, %v11268_v54  ;;  %v26612_v0 = vsel %vm1312_vm0, %v11278_v49, %v11253_v29 }
 0xa44   : > { %v11300_v4 = vrot.slane %v10484_v9, 4  ;;  %v11312_v6 = vrot.slane %v10492_v44, 4  ;;  %v10512_v15 = vpack.i.b16 %v10511_v47, %v10510_v25  ;;  %v11310_v41 = vrot.slane %v10508_v53, 4 }
 0xa45   : > { %v11356_v63 = vrot.slane %v26560_v12, 4  ;;  %v11368_v55 = vrot.slane %v26567_v10, 4  ;;  %v10905_v38 = vsel %vm1312_vm0, 0, %v10904_v24  ;;  %v26618_v45 = vsel %vm1312_vm0, %v11266_v30, %v11249_v56 }
 0xa46   : > { %v11301_v27 = vsel %vm1312_vm0, %v10500_v7, %v11300_v4  ;;  %v11354_v8 = vrot.slane %v10504_v57, 4  ;;  %v11313_v29 = vsel %vm1312_vm0, %v10508_v53, %v11312_v6  ;;  %v10961_v1 = vsel %vm1312_vm0, 0, %v10960_v52 }
 0xa47   : > { %v11299_v49 = vsel %vm1312_vm0, %v11298_v32, %v10484_v9  ;;  %v11366_v25 = vrot.slane %v10512_v15, 4  ;;  %v11369_v47 = vsel %vm1312_vm0, %v10512_v15, %v11368_v55  ;;  %v10674_v56 = vrot.slane %v26573_v62, 4 }
 0xa48   : > { %22199 = vxpose.binary.xlu0.c.b16.start.end [1/2] (short) (narrow) %v26579_v28, %v26573_v62, 16  ;;  %v11309_v24 = vperm.slane %v11301_v27, %v23267_v21  ;;  %v11321_v7 = vperm.slane %v11313_v29, %v23267_v21  ;;  %v10730_v53 = vrot.slane %v26579_v28, 4  ;;  %v26633_v54 = vperm.slane %v26362_v3, %v23273_v39 }
 0xa49   : > { %v11305_v9 = vperm.slane %v11299_v49, %v23267_v21  ;;  %v26641_v62 = vperm.slane %v26365_v20, %v23273_v39  ;;  %v11377_v52 = vperm.slane %v11369_v47, %v23267_v21  ;;  %v11367_v28 = vsel %vm1312_vm0, %v11366_v25, %v26567_v10 }
 0xa4a   : > { %v10675_v3 = vsel %vm1312_vm0, 0, %v10674_v56  ;;  %v11336_v30 = vrot.slane %v11309_v24, 4  ;;  %v11334_v6 = vrot.slane %v11321_v7, 4  ;;  %v11010_v20 = vrot.slane %v26633_v54, 4 }
 0xa4b   : > { %v11324_v15 = vrot.slane %v11305_v9, 4  ;;  %v11390_v27 = vrot.slane %v11377_v52, 4 }
 0xa4c   : > { %22265 = vxpose.binary.xlu2.c.b16.start.end [1/2] (short) (narrow) %v10953_v48, %v10897_v17, 16  ;;  %v11357_v17 = vsel %vm1312_vm0, %v10504_v57, %v11356_v63  ;;  %v11311_v48 = vsel %vm1312_vm0, %v11310_v41, %v10492_v44  ;;  %v11355_v44 = vsel %vm1312_vm0, %v11354_v8, %v26560_v12  ;;  %v10731_v12 = vsel %vm1312_vm0, 0, %v10730_v53 }
 0xa4d   : > { %v11365_v57 = vperm.slane %v11357_v17, %v23267_v21  ;;  %v11317_v32 = vperm.slane %v11311_v48, %v23267_v21  ;;  %v11361_v4 = vperm.slane %v11355_v44, %v23267_v21  ;;  %v11066_v63 = vrot.slane %v26641_v62, 4 }
 0xa4e   : > { %v26654_v10 = vsel %vm1312_vm0, %v11321_v7, %v11336_v30  ;;  %v11011_v17 = vsel %vm1312_vm0, 0, %v11010_v20  ;;  %v26680_v53 = vperm.slane %v26368_v18, %v23273_v39  ;;  %v26684_v44 = vperm.slane %v26373_v37, %v23273_v39 }
 0xa4f   : > { %22268 = vxpose.binary.xlu1.c.b16.start.end [1/2] (short) (narrow) %v10961_v1, %v10905_v38, 16  ;;  %v11392_v41 = vrot.slane %v11365_v57, 4  ;;  %v11322_v55 = vrot.slane %v11317_v32, 4  ;;  %v11373_v38 = vperm.slane %v11367_v28, %v23267_v21  ;;  %v26657_v8 = vsel %vm1312_vm0, %v11317_v32, %v11324_v15 }
 0xa50   : > { %v11380_v29 = vrot.slane %v11361_v4, 4  ;;  %v26660_v1 = vsel %vm1312_vm0, %v11334_v6, %v11309_v24  ;;  %v11067_v48 = vsel %vm1312_vm0, 0, %v11066_v63  ;;  %v26674_v7 = vsel %vm1312_vm0, %v11390_v27, %v11365_v57  ;;  %v26676_v24 = vpop.trf.xlu0 }
 0xa51   : > { %v26663_v49 = vsel %vm1312_vm0, %v11377_v52, %v11392_v41  ;;  %v26668_v25 = vsel %vm1312_vm0, %v11322_v55, %v11305_v9  ;;  %v11378_v47 = vrot.slane %v11373_v38, 4  ;;  %29344 = vst [vmem:[#allocation22_spill] sm:$0xff] %v26676_v24  ;;  %v10661_v57 = vperm.slane %v26175_v2, %v23273_v39 }
 0xa52   : > { %v26671_v56 = vsel %vm1312_vm0, %v11373_v38, %v11380_v29  ;;  %v10717_v32 = vperm.slane %v26331_v23, %v23273_v39  ;;  %v11005_v18 = vperm.slane %v26437_v13, %v23273_v39  ;;  %v11061_v52 = vperm.slane %v26441_v34, %v23273_v39  ;;  %v29345_v38 = vld [vmem:[#allocation40_spill] sm:$0xff] }
 0xa53   : > { %v26687_v9 = vsel %vm1312_vm0, %v11378_v47, %v11361_v4  ;;  %v10676_v4 = vrot.slane %v10661_v57, 4  ;;  %v26703_v23 = vperm.slane %v26430_v26, %v23273_v39  ;;  %v26707_v13 = vperm.slane %v26444_v42, %v23273_v39  ;;  %v29347_v47 = vld [vmem:[#allocation20_spill] sm:$0xff] }
 0xa54   : > { %v11014_v37 = vrot.slane %v11005_v18, 4  ;;  %v11070_v28 = vrot.slane %v11061_v52, 4  ;;  %v10732_v2 = vrot.slane %v10717_v32, 4  ;;  %v26717_v26 = vperm.slane %v26513_v5, %v23273_v39 }
 0xa55   : > { %v10677_v34 = vsel %vm1312_vm0, 0, %v10676_v4  ;;  %v11072_v15 = vrot.slane %v26707_v13, 4  ;;  %v26721_v42 = vperm.slane %v26532_v19, %v23273_v39  ;;  %v11109_v63 = vperm.slane %v26504_v51, %v23273_v39 }
 0xa56   : > { %v11071_v30 = vsel %vm1312_vm0, 0, %v11070_v28  ;;  %v10733_v6 = vsel %vm1312_vm0, 0, %v10732_v2  ;;  %v11165_v55 = vperm.slane %v26516_v61, %v23273_v39  ;;  %v26737_v51 = vperm.slane %v26507_v40, %v23273_v39 }
 0xa57   : > { %v11073_v20 = vsel %vm1312_vm0, 0, %v11072_v15  ;;  %v11124_v27 = vrot.slane %v11109_v63, 4  ;;  %v26741_v61 = vperm.slane %v26519_v58, %v23273_v39  ;;  %v26751_v58 = vperm.slane %v26498_v22, %v23273_v39 }
 0xa58   : > { %22202 = vxpose.binary.xlu0.c.b16.start.end [1/2] (short) (narrow) %v10731_v12, %v10675_v3, 16  ;;  %v11015_v3 = vsel %vm1312_vm0, 0, %v11014_v37  ;;  %v11016_v12 = vrot.slane %v26703_v23, 4  ;;  %v11180_v29 = vrot.slane %v11165_v55, 4  ;;  %v26755_v2 = vperm.slane %v26535_v43, %v23273_v39 }
 0xa59   : > { %v11125_v5 = vsel %vm1312_vm0, 0, %v11124_v27  ;;  %v11182_v37 = vrot.slane %v26741_v61, 4  ;;  %v11217_v22 = vperm.slane %v26606_v36, %v23273_v39  ;;  %v11273_v43 = vperm.slane %v26618_v45, %v23273_v39 }
 0xa5a   : > { %v11017_v41 = vsel %vm1312_vm0, 0, %v11016_v12  ;;  %v11181_v19 = vsel %vm1312_vm0, 0, %v11180_v29  ;;  %v29348_v29 = vld [vmem:[#allocation41_spill] sm:$0xff] }
 0xa5b   : > { %v11183_v40 = vsel %vm1312_vm0, 0, %v11182_v37 }
 0xa5c   : > { %22274 = vxpose.binary.xlu2.c.b16.start.end [1/2] (short) (narrow) %v11067_v48, %v11011_v17, 16  ;;  %v29346_v17 = vld [vmem:[#allocation21_spill] sm:$0xff] }
 0xa5d   : > { %v10786_v48 = vrot.slane %v29346_v17, 4 }
 0xa5f   : > { %22277 = vxpose.binary.xlu1.c.b16.start.end [1/2] (short) (narrow) %v26684_v44, %v26680_v53, 16 }
 0xa68   : > { %22205 = vxpose.binary.xlu0.c.b16.start.end [1/2] (short) (narrow) %v10717_v32, %v10661_v57, 16  ;;  %v10842_v57 = vrot.slane %v29347_v47, 4  ;;  %v10787_v32 = vsel %vm1312_vm0, 0, %v10786_v48  ;;  %v11234_v48 = vrot.slane %v11217_v22, 4  ;;  %v11290_v47 = vrot.slane %v11273_v43, 4 }
 0xa6c   : > { %22283 = vxpose.binary.xlu2.c.b16.start.end [1/2] (short) (narrow) %v11061_v52, %v11005_v18, 16  ;;  %v10843_v18 = vsel %vm1312_vm0, 0, %v10842_v57  ;;  %v11126_v52 = vrot.slane %v26737_v51, 4 }
 0xa6f   : > { %22286 = vxpose.binary.xlu1.c.b16.start.end [1/2] (short) (narrow) %v11071_v30, %v11015_v3, 16  ;;  %v11127_v3 = vsel %vm1312_vm0, 0, %v11126_v52 }
 0xa78   : > { %22208 = vxpose.binary.xlu0.c.b16.start.end [1/2] (short) (narrow) %v10733_v6, %v10677_v34, 16 }
 0xa7c   : > { %22292 = vxpose.binary.xlu2.c.b16.start.end [1/2] (short) (narrow) %v11073_v20, %v11017_v41, 16 }
 0xa7d   : > { %v22182_v28 = vpop.trf.xlu2 }
 0xa7e   : > { %v13458_v34 = vrot.slane %v22182_v28, 4  ;;  %v29349_v28 = vld [vmem:[#allocation42_spill] sm:$0xff] }
 0xa7f   : > { %22295 = vxpose.binary.xlu1.c.b16.start.end [1/2] (short) (narrow) %v26721_v42, %v26717_v26, 16 }
 0xa85   : > { %v22183_v20 = vpop.trf.xlu2 }
 0xa88   : > { %22217 = vxpose.binary.xlu0.c.b16.start.end [1/2] (short) (narrow) %v29345_v38, %v26194_v33, 16 }
 0xa8b   : > { %v22185_v4 = vpop.trf.xlu1 }
 0xa8c   : > { %22301 = vxpose.binary.xlu2.c.b16.start.end [1/2] (short) (narrow) %v11165_v55, %v11109_v63, 16  ;;  %v13464_v6 = vrot.slane %v22185_v4, 4 }
 0xa8f   : > { %22304 = vxpose.binary.xlu1.c.b16.start.end [1/2] (short) (narrow) %v11181_v19, %v11125_v5, 16  ;;  %v13496_v5 = vrot.slane %v22183_v20, 4 }
 0xa93   : > { %v22186_v55 = vpop.trf.xlu1 }
 0xa94   : > { %v22176_v33 = vpop.trf.xlu0  ;;  %v13502_v19 = vrot.slane %v22186_v55, 4 }
 0xa95   : > { %v13459_v15 = vsel %vm1312_vm0, %v13458_v34, %v22176_v33  ;;  %v26789_v34 = vperm.slane %v26609_v50, %v23273_v39  ;;  %v26803_v50 = vperm.slane %v26600_v11, %v23273_v39 }
 0xa96   : > { %v13463_v38 = vperm.slane %v13459_v15, %v23267_v21 }
 0xa97   : > { %v11292_v20 = vrot.slane %v26789_v34, 4 }
 0xa98   : > { %22226 = vxpose.binary.xlu0.c.b16.start.end [1/2] (short) (narrow) %v10843_v18, %v10787_v32, 16  ;;  %v11235_v32 = vsel %vm1312_vm0, 0, %v11234_v48  ;;  %v11291_v18 = vsel %vm1312_vm0, 0, %v11290_v47  ;;  %v10902_v47 = vrot.slane %v26525_v46, 4 }
 0xa9c   : > { %v22177_v30 = vpop.trf.xlu0  ;;  %22310 = vxpose.binary.xlu2.c.b16.start.end [1/2] (short) (narrow) %v11183_v40, %v11127_v3, 16  ;;  %v10792_v3 = vrot.slane %v29349_v28, 4  ;;  %v29350_v40 = vld [vmem:[#allocation43_spill] sm:$0xff]  ;;  %v11341_v28 = vperm.slane %v26660_v1, %v23273_v39  ;;  %v11012_v1 = vrot.slane %v26680_v53, 4 }
 0xa9d   : > { %v13497_v36 = vsel %vm1312_vm0, %v13496_v5, %v22177_v30  ;;  %v10848_v4 = vrot.slane %v29350_v40, 4  ;;  %v26785_v30 = vperm.slane %v26597_v59, %v23273_v39  ;;  %v11293_v59 = vsel %vm1312_vm0, 0, %v11292_v20 }
 0xa9f   : > { %22313 = vxpose.binary.xlu1.c.b16.start.end [1/2] (short) (narrow) %v26755_v2, %v26751_v58, 16  ;;  %v10849_v15 = vsel %vm1312_vm0, 0, %v10848_v4 }
 0xaa4   : > { %v22179_v12 = vpop.trf.xlu0 }
 0xaa5   : > { %v13465_v41 = vsel %vm1312_vm0, %v13464_v6, %v22179_v12  ;;  %v10793_v12 = vsel %vm1312_vm0, 0, %v10792_v3  ;;  %v11397_v3 = vperm.slane %v26674_v7, %v23273_v39  ;;  %v11068_v7 = vrot.slane %v26684_v44, 4 }
 0xaa6   : > { %v13469_v63 = vperm.slane %v13465_v41, %v23267_v21  ;;  %v11236_v41 = vrot.slane %v26785_v30, 4 }
 0xaa7   : > { %v11406_v4 = vrot.slane %v11397_v3, 4 }
 0xaa8   : > { %v13482_v27 = vrot.slane %v13469_v63, 4  ;;  %22235 = vxpose.binary.xlu0.c.b16.start.end [1/2] (short) (narrow) %v29348_v29, %v26344_v16, 16  ;;  %v13501_v16 = vperm.slane %v13497_v36, %v23267_v21  ;;  %v11237_v63 = vsel %vm1312_vm0, 0, %v11236_v41  ;;  %v29351_v29 = vld [vmem:[#allocation24_spill] sm:$0xff]  ;;  %v10903_v36 = vsel %vm1312_vm0, 0, %v10902_v47 }
 0xaa9   : > { %v11407_v41 = vsel %vm1312_vm0, 0, %v11406_v4 }
 0xaaa   : > { %v26770_v17 = vsel %vm1312_vm0, %v13482_v27, %v13463_v38  ;;  %v11233_v38 = vperm.slane %v26590_v14, %v23273_v39  ;;  %v11289_v27 = vperm.slane %v26603_v31, %v23273_v39  ;;  %v26823_v14 = vperm.slane %v26668_v25, %v23273_v39 }
 0xaac   : > { %v22180_v57 = vpop.trf.xlu0  ;;  %22319 = vxpose.binary.xlu2.c.b16.start.end [1/2] (short) (narrow) %v11273_v43, %v11217_v22, 16  ;;  %v26807_v22 = vperm.slane %v26612_v0, %v23273_v39  ;;  %v11240_v5 = vrot.slane %v11233_v38, 4  ;;  %v11296_v11 = vrot.slane %v11289_v27, 4 }
 0xaad   : > { %v13503_v33 = vsel %vm1312_vm0, %v13502_v19, %v22180_v57  ;;  %v10958_v57 = vrot.slane %v26529_v35, 4 }
 0xaae   : > { %v13507_v45 = vperm.slane %v13503_v33, %v23267_v21  ;;  %v11241_v0 = vsel %vm1312_vm0, 0, %v11240_v5  ;;  %v11297_v48 = vsel %vm1312_vm0, 0, %v11296_v11 }
 0xaaf   : > { %22322 = vxpose.binary.xlu1.c.b16.start.end [1/2] (short) (narrow) %v11291_v18, %v11235_v32, 16  ;;  %v10959_v33 = vsel %vm1312_vm0, 0, %v10958_v57  ;;  %v26841_v18 = vperm.slane %v26671_v56, %v23273_v39 }
 0xab0   : > { %v13520_v52 = vrot.slane %v13507_v45, 4  ;;  %v11346_v45 = vrot.slane %v26823_v14, 4 }
 0xab2   : > { %v26779_v37 = vsel %vm1312_vm0, %v13520_v52, %v13501_v16  ;;  %v11347_v46 = vsel %vm1312_vm0, 0, %v11346_v45 }
 0xab4   : > { %v26791_v6 = vpop.trf.xlu0 }
 0xab8   : > { %22244 = vxpose.binary.xlu0.c.b16.start.end [1/2] (short) (narrow) %v10849_v15, %v10793_v12, 16 }
 0xabc   : > { %v26799_v55 = vpop.trf.xlu0  ;;  %22328 = vxpose.binary.xlu2.c.b16.start.end [1/2] (short) (narrow) %v11293_v59, %v11237_v63, 16  ;;  %v26859_v63 = vperm.slane %v26654_v10, %v23273_v39 }
 0xabe   : > { %v11352_v53 = vrot.slane %v26859_v63, 4 }
 0xabf   : > { %22331 = vxpose.binary.xlu1.c.b16.start.end [1/2] (short) (narrow) %v26807_v22, %v26803_v50, 16 }
 0xac0   : > { %v11353_v5 = vsel %vm1312_vm0, 0, %v11352_v53 }
 0xac4   : > { %v22191_v43 = vpop.trf.xlu0 }
 0xac8   : > { %22253 = vxpose.binary.xlu0.c.b16.start.end [1/2] (short) (narrow) %v29351_v29, %v26463_v60, 16  ;;  %v26827_v60 = vperm.slane %v26687_v9, %v23273_v39  ;;  %v26837_v9 = vperm.slane %v26657_v8, %v23273_v39  ;;  %v11350_v8 = vrot.slane %v11341_v28, 4 }
 0xaca   : > { %v11402_v32 = vrot.slane %v26827_v60, 4  ;;  %v11351_v15 = vsel %vm1312_vm0, 0, %v11350_v8 }
 0xacc   : > { %v22192_v19 = vpop.trf.xlu0  ;;  %22337 = vxpose.binary.xlu2.c.b16.start.end [1/2] (short) (narrow) %v11289_v27, %v11233_v38, 16  ;;  %v11403_v35 = vsel %vm1312_vm0, 0, %v11402_v32  ;;  %v11013_v38 = vsel %vm1312_vm0, 0, %v11012_v1  ;;  %v11069_v27 = vsel %vm1312_vm0, 0, %v11068_v7 }
 0xacf   : > { %22340 = vxpose.binary.xlu1.c.b16.start.end [1/2] (short) (narrow) %v11297_v48, %v11241_v0, 16 }
 0xad4   : > { %v22194_v31 = vpop.trf.xlu0 }
 0xad8   : > { %22262 = vxpose.binary.xlu0.c.b16.start.end [1/2] (short) (narrow) %v10959_v33, %v10903_v36, 16  ;;  %v22212_v36 = vpop.trf.xlu2  ;;  %v22215_v33 = vpop.trf.xlu1 }
 0xadc   : > { %v22195_v25 = vpop.trf.xlu0  ;;  %22346 = vxpose.binary.xlu2.c.b16.start.end [1/2] (short) (narrow) %v11403_v35, %v11347_v46, 16 }
 0xadf   : > { %22349 = vxpose.binary.xlu1.c.b16.start.end [1/2] (short) (narrow) %v26841_v18, %v26837_v9, 16 }
 0xae4   : > { %v22197_v16 = vpop.trf.xlu0 }
 0xae5   : > { %v13476_v52 = vrot.slane %v22197_v16, 4 }
 0xae7   : > { %v13477_v40 = vsel %vm1312_vm0, %v13476_v52, %v22191_v43 }
 0xae8   : > { %22271 = vxpose.binary.xlu0.c.b16.start.end [1/2] (short) (narrow) %v26641_v62, %v26633_v54, 16  ;;  %v26863_v54 = vperm.slane %v26663_v49, %v23273_v39  ;;  %v13470_v62 = vrot.slane %v22194_v31, 4  ;;  %v13481_v43 = vperm.slane %v13477_v40, %v23267_v21 }
 0xaea   : > { %v11408_v44 = vrot.slane %v26863_v54, 4  ;;  %v13471_v10 = vsel %vm1312_vm0, %v13470_v62, %v26791_v6  ;;  %v13488_v29 = vrot.slane %v13481_v43, 4  ;;  %v13487_v6 = vperm.slane %v26770_v17, %v23273_v39 }
 0xaeb   : > { %v13475_v49 = vperm.slane %v13471_v10, %v23267_v21  ;;  %v13525_v17 = vperm.slane %v26779_v37, %v23273_v39 }
 0xaec   : > { %v22198_v56 = vpop.trf.xlu0  ;;  %22355 = vxpose.binary.xlu2.c.b16.start.end [1/2] (short) (narrow) %v11397_v3, %v11341_v28, 16  ;;  %v11409_v11 = vsel %vm1312_vm0, 0, %v11408_v44  ;;  %v26892_v28 = vpop.trf.xlu2 }
 0xaed   : > { %v13514_v12 = vrot.slane %v22198_v56, 4  ;;  %v13489_v47 = vsel %vm1312_vm0, %v13488_v29, %v13475_v49  ;;  %v26894_v3 = vpop.trf.xlu1 }
 0xaee   : > { %v13493_v57 = vperm.slane %v13489_v47, %v23273_v39 }
 0xaef   : > { %v13515_v20 = vsel %vm1312_vm0, %v13514_v12, %v22192_v19  ;;  %22358 = vxpose.binary.xlu1.c.b16.start.end [1/2] (short) (narrow) %v11407_v41, %v11351_v15, 16  ;;  %v13508_v19 = vrot.slane %v22195_v25, 4  ;;  %v11178_v41 = vrot.slane %v26721_v42, 4 }
 0xaf0   : > { %v13519_v48 = vperm.slane %v13515_v20, %v23267_v21  ;;  %v13494_v45 = vrot.slane %v13493_v57, 4 }
 0xaf1   : > { %v13509_v31 = vsel %vm1312_vm0, %v13508_v19, %v26799_v55 }
 0xaf2   : > { %v13526_v32 = vrot.slane %v13519_v48, 4  ;;  %v26883_v46 = vsel %vm1312_vm0, %v13494_v45, %v13487_v6  ;;  %v13513_v35 = vperm.slane %v13509_v31, %v23267_v21 }
 0xaf3   : > { %v14070_v4 = vshrl.u32 %v26883_v46, 16 }
 0xaf4   : > { %v22200_v59 = vpop.trf.xlu0  ;;  %v13527_v16 = vsel %vm1312_vm0, %v13526_v32, %v13513_v35  ;;  %v22221_v15 = vpop.trf.xlu2 }
 0xaf5   : > { %v13531_v52 = vperm.slane %v13527_v16, %v23273_v39  ;;  %v13552_v20 = vrot.slane %v22221_v15, 4 }
 0xaf7   : > { %v13532_v55 = vrot.slane %v13531_v52, 4  ;;  %v13553_v62 = vsel %vm1312_vm0, %v13552_v20, %v22215_v33  ;;  %v11128_v33 = vrot.slane %v26751_v58, 4 }
 0xaf8   : > { %22280 = vxpose.binary.xlu0.c.b16.start.end [1/2] (short) (narrow) %v11069_v27, %v11013_v38, 16  ;;  %v11179_v27 = vsel %vm1312_vm0, 0, %v11178_v41  ;;  %v13557_v31 = vperm.slane %v13553_v62, %v23267_v21 }
 0xaf9   : > { %v26897_v40 = vsel %vm1312_vm0, %v13532_v55, %v13525_v17  ;;  %v11129_v52 = vsel %vm1312_vm0, 0, %v11128_v33 }
 0xafa   : > { %v14068_v8 = vpack.i.b16 %v26897_v40, %v26883_v46  ;;  %v14071_v56 = vshrl.u32 %v26897_v40, 16 }
 0xafc   : > { %v22201_v0 = vpop.trf.xlu0  ;;  %22364 = vxpose.binary.xlu2.c.b16.start.end [1/2] (short) (narrow) %v11409_v11, %v11353_v5, 16  ;;  %v26903_v37 = vpack.i.b16 %v14071_v56, %v14070_v4  ;;  %v22222_v53 = vpop.trf.xlu2 }
 0xb04   : > { %v22203_v25 = vpop.trf.xlu0  ;;  %v22230_v42 = vpop.trf.xlu2 }
 0xb05   : > { %v13610_v20 = vrot.slane %v22230_v42, 4 }
 0xb08   : > { %22289 = vxpose.binary.xlu0.c.b16.start.end [1/2] (short) (narrow) %v26707_v13, %v26703_v23, 16  ;;  %v22224_v23 = vpop.trf.xlu1  ;;  %v11122_v13 = vrot.slane %v26717_v26, 4 }
 0xb0a   : > { %v11123_v38 = vsel %vm1312_vm0, 0, %v11122_v13 }
 0xb0c   : > { %v22204_v12 = vpop.trf.xlu0 }
 0xb10   : > { %v26911_v44 = vpop.trf.xlu1 }
 0xb14   : > { %v22206_v1 = vpop.trf.xlu0 }
 0xb15   : > { %v13534_v7 = vrot.slane %v22206_v1, 4 }
 0xb17   : > { %v13535_v43 = vsel %vm1312_vm0, %v13534_v7, %v22200_v59  ;;  %v22231_v59 = vpop.trf.xlu2 }
 0xb18   : > { %22298 = vxpose.binary.xlu0.c.b16.start.end [1/2] (short) (narrow) %v11179_v27, %v11123_v38, 16  ;;  %v22233_v49 = vpop.trf.xlu1  ;;  %v13539_v4 = vperm.slane %v13535_v43, %v23267_v21  ;;  %v13590_v27 = vrot.slane %v22222_v53, 4  ;;  %v13648_v53 = vrot.slane %v22231_v59, 4 }
 0xb19   : > { %v13616_v1 = vrot.slane %v22233_v49, 4 }
 0xb1a   : > { %v13591_v42 = vsel %vm1312_vm0, %v13590_v27, %v26894_v3 }
 0xb1c   : > { %v22207_v10 = vpop.trf.xlu0 }
 0xb1d   : > { %v13572_v29 = vrot.slane %v22207_v10, 4  ;;  %v13611_v10 = vsel %vm1312_vm0, %v13610_v20, %v22224_v23 }
 0xb1f   : > { %v13573_v26 = vsel %vm1312_vm0, %v13572_v29, %v22201_v0  ;;  %v11184_v0 = vrot.slane %v26755_v2, 4  ;;  %v26921_v45 = vpop.trf.xlu2 }
 0xb20   : > { %v22234_v48 = vpop.trf.xlu1  ;;  %v13577_v7 = vperm.slane %v13573_v26, %v23267_v21  ;;  %v13615_v26 = vperm.slane %v13611_v10, %v23267_v21 }
 0xb21   : > { %v11185_v17 = vsel %vm1312_vm0, 0, %v11184_v0 }
 0xb24   : > { %v22209_v5 = vpop.trf.xlu0 }
 0xb25   : > { %v13540_v11 = vrot.slane %v22209_v5, 4 }
 0xb27   : > { %v13541_v19 = vsel %vm1312_vm0, %v13540_v11, %v22203_v25  ;;  %v26932_v56 = vpop.trf.xlu2 }
 0xb28   : > { %22307 = vxpose.binary.xlu0.c.b16.start.end [1/2] (short) (narrow) %v26741_v61, %v26737_v51, 16  ;;  %v26923_v32 = vpop.trf.xlu1  ;;  %v13545_v25 = vperm.slane %v13541_v19, %v23267_v21  ;;  %v13564_v61 = vrot.slane %v13557_v31, 4 }
 0xb2a   : > { %v13558_v58 = vrot.slane %v13545_v25, 4 }
 0xb2c   : > { %v22210_v47 = vpop.trf.xlu0 }
 0xb2d   : > { %v13578_v57 = vrot.slane %v22210_v47, 4  ;;  %v13654_v47 = vrot.slane %v22234_v48, 4 }
 0xb2f   : > { %v13579_v6 = vsel %vm1312_vm0, %v13578_v57, %v22204_v12  ;;  %v26939_v62 = vpop.trf.xlu2  ;;  %v13595_v57 = vperm.slane %v13591_v42, %v23267_v21 }
 0xb30   : > { %v26934_v12 = vpop.trf.xlu1  ;;  %v13583_v13 = vperm.slane %v13579_v6, %v23267_v21 }
 0xb31   : > { %v13602_v25 = vrot.slane %v13595_v57, 4 }
 0xb32   : > { %v13596_v41 = vrot.slane %v13583_v13, 4 }
 0xb34   : > { %v22218_v35 = vpop.trf.xlu0  ;;  %v13597_v5 = vsel %vm1312_vm0, %v13596_v41, %v13577_v7 }
 0xb35   : > { %v13546_v51 = vrot.slane %v22218_v35, 4  ;;  %v13601_v13 = vperm.slane %v13597_v5, %v23273_v39 }
 0xb37   : > { %v13547_v16 = vsel %vm1312_vm0, %v13546_v51, %v22212_v36  ;;  %v13559_v36 = vsel %vm1312_vm0, %v13558_v58, %v13539_v4  ;;  %v26956_v6 = vpop.trf.xlu2 }
 0xb38   : > { %v13551_v55 = vperm.slane %v13547_v16, %v23267_v21  ;;  %22316 = vxpose.binary.xlu0.c.b16.start.end [1/2] (short) (narrow) %v11185_v17, %v11129_v52, 16  ;;  %v26941_v38 = vpop.trf.xlu1  ;;  %v13563_v48 = vperm.slane %v13559_v36, %v23273_v39  ;;  %v11294_v17 = vrot.slane %v26807_v22, 4  ;;  %v13660_v22 = vrot.slane %v26934_v12, 4 }
 0xb3a   : > { %v13565_v2 = vsel %vm1312_vm0, %v13564_v61, %v13551_v55  ;;  %v11295_v20 = vsel %vm1312_vm0, 0, %v11294_v17 }
 0xb3b   : > { %v13569_v0 = vperm.slane %v13565_v2, %v23273_v39 }
 0xb3c   : > { %v22219_v15 = vpop.trf.xlu0 }
 0xb3d   : > { %v13584_v49 = vrot.slane %v22219_v15, 4  ;;  %v13570_v35 = vrot.slane %v13569_v0, 4  ;;  %v13622_v0 = vrot.slane %v26923_v32, 4 }
 0xb3f   : > { %v13585_v3 = vsel %vm1312_vm0, %v13584_v49, %v26892_v28  ;;  %v26971_v28 = vsel %vm1312_vm0, %v13570_v35, %v13563_v48  ;;  %v22257_v55 = vpop.trf.xlu2 }
 0xb40   : > { %v26958_v31 = vpop.trf.xlu1  ;;  %v13589_v51 = vperm.slane %v13585_v3, %v23267_v21  ;;  %v14078_v7 = vshrl.u32 %v26971_v28, 16  ;;  %v11348_v3 = vrot.slane %v26837_v9, 4 }
 0xb42   : > { %v13603_v2 = vsel %vm1312_vm0, %v13602_v25, %v13589_v51  ;;  %v11349_v35 = vsel %vm1312_vm0, 0, %v11348_v3 }
 0xb43   : > { %v13607_v15 = vperm.slane %v13603_v2, %v23273_v39 }
 0xb44   : > { %v22227_v43 = vpop.trf.xlu0 }
 0xb45   : > { %v13617_v29 = vsel %vm1312_vm0, %v13616_v1, %v22227_v43  ;;  %v13608_v36 = vrot.slane %v13607_v15, 4 }
 0xb46   : > { %v13621_v11 = vperm.slane %v13617_v29, %v23267_v21 }
 0xb47   : > { %v22258_v43 = vpop.trf.xlu2 }
 0xb48   : > { %v13634_v19 = vrot.slane %v13621_v11, 4  ;;  %22325 = vxpose.binary.xlu0.c.b16.start.end [1/2] (short) (narrow) %v26789_v34, %v26785_v30, 16  ;;  %v13649_v30 = vsel %vm1312_vm0, %v13648_v53, %v26911_v44  ;;  %v11238_v44 = vrot.slane %v26803_v50, 4  ;;  %v26978_v58 = vpop.trf.xlu1  ;;  %v26986_v50 = vsel %vm1312_vm0, %v13608_v36, %v13601_v13 }
 0xb49   : > { %v13653_v61 = vperm.slane %v13649_v30, %v23267_v21  ;;  %v14076_v1 = vpack.i.b16 %v26986_v50, %v26971_v28  ;;  %v14079_v27 = vshrl.u32 %v26986_v50, 16 }
 0xb4a   : > { %v26953_v23 = vsel %vm1312_vm0, %v13634_v19, %v13615_v26  ;;  %v11239_v41 = vsel %vm1312_vm0, 0, %v11238_v44 }
 0xb4b   : > { %v26995_v29 = vpack.i.b16 %v14079_v27, %v14078_v7  ;;  %v13730_v27 = vrot.slane %v22258_v43, 4 }
 0xb4c   : > { %v22228_v33 = vpop.trf.xlu0 }
 0xb4d   : > { %v13655_v34 = vsel %vm1312_vm0, %v13654_v47, %v22228_v33  ;;  %v11404_v33 = vrot.slane %v26841_v18, 4 }
 0xb4e   : > { %v13659_v59 = vperm.slane %v13655_v34, %v23267_v21 }
 0xb4f   : > { %v22266_v42 = vpop.trf.xlu2  ;;  %v11405_v9 = vsel %vm1312_vm0, 0, %v11404_v33 }
 0xb50   : > { %v13672_v16 = vrot.slane %v13659_v59, 4  ;;  %v26993_v10 = vpop.trf.xlu1 }
 0xb52   : > { %v26974_v52 = vsel %vm1312_vm0, %v13672_v16, %v13653_v61  ;;  %v13692_v61 = vrot.slane %v22257_v55, 4 }
 0xb54   : > { %v22236_v4 = vpop.trf.xlu0  ;;  %v13693_v13 = vsel %vm1312_vm0, %v13692_v61, %v26941_v38 }
 0xb55   : > { %v13623_v18 = vsel %vm1312_vm0, %v13622_v0, %v22236_v4  ;;  %v13639_v4 = vperm.slane %v26953_v23, %v23273_v39  ;;  %v13697_v7 = vperm.slane %v13693_v13, %v23267_v21 }
 0xb56   : > { %v13627_v51 = vperm.slane %v13623_v18, %v23267_v21 }
 0xb57   : > { %v27002_v47 = vpop.trf.xlu2 }
 0xb58   : > { %22334 = vxpose.binary.xlu0.c.b16.start.end [1/2] (short) (narrow) %v11295_v20, %v11239_v41, 16  ;;  %v22269_v49 = vpop.trf.xlu1  ;;  %v13698_v41 = vrot.slane %v22266_v42, 4 }
 0xb59   : > { %v13704_v55 = vrot.slane %v22269_v49, 4 }
 0xb5c   : > { %v22237_v5 = vpop.trf.xlu0 }
 0xb5d   : > { %v13661_v11 = vsel %vm1312_vm0, %v13660_v22, %v22237_v5 }
 0xb5e   : > { %v13665_v22 = vperm.slane %v13661_v11, %v23267_v21  ;;  %v13677_v11 = vperm.slane %v26974_v52, %v23273_v39 }
 0xb5f   : > { %v27010_v48 = vpop.trf.xlu2 }
 0xb60   : > { %v27004_v57 = vpop.trf.xlu1 }
 0xb64   : > { %v22245_v26 = vpop.trf.xlu0 }
 0xb65   : > { %v13628_v19 = vrot.slane %v22245_v26, 4  ;;  %v13699_v26 = vsel %vm1312_vm0, %v13698_v41, %v26978_v58 }
 0xb66   : > { %v13703_v3 = vperm.slane %v13699_v26, %v23267_v21 }
 0xb67   : > { %v13629_v12 = vsel %vm1312_vm0, %v13628_v19, %v26921_v45  ;;  %v27023_v17 = vpop.trf.xlu2 }
 0xb68   : > { %22343 = vxpose.binary.xlu0.c.b16.start.end [1/2] (short) (narrow) %v26827_v60, %v26823_v14, 16  ;;  %v13633_v34 = vperm.slane %v13629_v12, %v23267_v21  ;;  %v27012_v45 = vpop.trf.xlu1  ;;  %v13710_v12 = vrot.slane %v13697_v7, 4 }
 0xb6a   : > { %v13640_v32 = vrot.slane %v13633_v34, 4  ;;  %v13742_v34 = vrot.slane %v27004_v57, 4 }
 0xb6c   : > { %v22246_v53 = vpop.trf.xlu0 }
 0xb6d   : > { %v13666_v14 = vrot.slane %v22246_v53, 4  ;;  %v13731_v53 = vsel %vm1312_vm0, %v13730_v27, %v26958_v31 }
 0xb6e   : > { %v13735_v52 = vperm.slane %v13731_v53, %v23267_v21 }
 0xb6f   : > { %v13667_v25 = vsel %vm1312_vm0, %v13666_v14, %v26932_v56  ;;  %v27039_v19 = vpop.trf.xlu2 }
 0xb70   : > { %v13671_v44 = vperm.slane %v13667_v25, %v23267_v21  ;;  %v22279_v15 = vpop.trf.xlu1  ;;  %v13748_v61 = vrot.slane %v13735_v52, 4 }
 0xb72   : > { %v13678_v36 = vrot.slane %v13671_v44, 4 }
 0xb74   : > { %v22254_v30 = vpop.trf.xlu0  ;;  %v13679_v38 = vsel %vm1312_vm0, %v13678_v36, %v13665_v22  ;;  %v13800_v36 = vrot.slane %v22279_v15, 4 }
 0xb75   : > { %v13686_v59 = vrot.slane %v22254_v30, 4  ;;  %v13683_v49 = vperm.slane %v13679_v38, %v23273_v39  ;;  %v13736_v30 = vrot.slane %v27002_v47, 4 }
 0xb77   : > { %v13687_v60 = vsel %vm1312_vm0, %v13686_v59, %v26939_v62  ;;  %v13641_v62 = vsel %vm1312_vm0, %v13640_v32, %v13627_v51  ;;  %v13684_v0 = vrot.slane %v13683_v49, 4  ;;  %v27069_v32 = vpop.trf.xlu2 }
 0xb78   : > { %22352 = vxpose.binary.xlu0.c.b16.start.end [1/2] (short) (narrow) %v11405_v9, %v11349_v35, 16  ;;  %v13645_v2 = vperm.slane %v13641_v62, %v23273_v39  ;;  %v13691_v43 = vperm.slane %v13687_v60, %v23267_v21  ;;  %v22287_v59 = vpop.trf.xlu1  ;;  %v13737_v9 = vsel %vm1312_vm0, %v13736_v30, %v26993_v10 }
 0xb79   : > { %v27057_v60 = vsel %vm1312_vm0, %v13684_v0, %v13677_v11  ;;  %v13741_v44 = vperm.slane %v13737_v9, %v23267_v21 }
 0xb7a   : > { %v13646_v56 = vrot.slane %v13645_v2, 4  ;;  %v13711_v31 = vsel %vm1312_vm0, %v13710_v12, %v13691_v43 }
 0xb7c   : > { %v22255_v16 = vpop.trf.xlu0  ;;  %v27032_v20 = vsel %vm1312_vm0, %v13646_v56, %v13639_v4 }
 0xb7d   : > { %v13724_v58 = vrot.slane %v22255_v16, 4  ;;  %v14084_v35 = vpack.i.b16 %v27057_v60, %v27032_v20 }
 0xb7f   : > { %v13725_v47 = vsel %vm1312_vm0, %v13724_v58, %v26956_v6  ;;  %v22293_v13 = vpop.trf.xlu2 }
 0xb80   : > { %v13729_v16 = vperm.slane %v13725_v47, %v23267_v21  ;;  %v27077_v2 = vpop.trf.xlu1  ;;  %v13780_v0 = vrot.slane %v22293_v13, 4 }
 0xb82   : > { %v13749_v10 = vsel %vm1312_vm0, %v13748_v61, %v13729_v16 }
 0xb83   : > { %v13753_v12 = vperm.slane %v13749_v10, %v23273_v39 }
 0xb84   : > { %v22263_v5 = vpop.trf.xlu0 }
 0xb85   : > { %v13705_v23 = vsel %vm1312_vm0, %v13704_v55, %v22263_v5  ;;  %v13715_v5 = vperm.slane %v13711_v31, %v23273_v39 }
 0xb86   : > { %v13709_v42 = vperm.slane %v13705_v23, %v23267_v21 }
 0xb87   : > { %v22294_v27 = vpop.trf.xlu2 }
 0xb88   : > { %v13716_v33 = vrot.slane %v13709_v42, 4  ;;  %22361 = vxpose.binary.xlu0.c.b16.start.end [1/2] (short) (narrow) %v26863_v54, %v26859_v63, 16  ;;  %v14086_v63 = vshrl.u32 %v27032_v20, 16  ;;  %v14087_v54 = vshrl.u32 %v27057_v60, 16  ;;  %v22296_v7 = vpop.trf.xlu1  ;;  %v29355_v20 = vld [vmem:[#allocation31_spill] sm:$0xff] }
 0xb8a   : > { %v13717_v14 = vsel %vm1312_vm0, %v13716_v33, %v13703_v3  ;;  %v27071_v25 = vpack.i.b16 %v14087_v54, %v14086_v63  ;;  %v13762_v63 = vrot.slane %v27012_v45, 4 }
 0xb8b   : > { %v13721_v56 = vperm.slane %v13717_v14, %v23273_v39  ;;  %v13781_v14 = vsel %vm1312_vm0, %v13780_v0, %v22287_v59 }
 0xb8c   : > { %v22264_v57 = vpop.trf.xlu0 }
 0xb8d   : > { %v13743_v18 = vsel %vm1312_vm0, %v13742_v34, %v22264_v57  ;;  %v13722_v41 = vrot.slane %v13721_v56, 4 }
 0xb8e   : > { %v13747_v51 = vperm.slane %v13743_v18, %v23267_v21 }
 0xb8f   : > { %v27085_v23 = vsel %vm1312_vm0, %v13722_v41, %v13715_v5  ;;  %v22302_v11 = vpop.trf.xlu2 }
 0xb90   : > { %v13754_v62 = vrot.slane %v13747_v51, 4  ;;  %v22297_v43 = vpop.trf.xlu1  ;;  %v14094_v3 = vshrl.u32 %v27085_v23, 16 }
 0xb92   : > { %v13755_v6 = vsel %vm1312_vm0, %v13754_v62, %v13741_v44 }
 0xb93   : > { %v13759_v26 = vperm.slane %v13755_v6, %v23273_v39 }
 0xb94   : > { %v22272_v4 = vpop.trf.xlu0 }
 0xb95   : > { %v13760_v38 = vrot.slane %v13759_v26, 4  ;;  %v13763_v16 = vsel %vm1312_vm0, %v13762_v63, %v22272_v4  ;;  %v13838_v4 = vrot.slane %v22302_v11, 4  ;;  %v13818_v26 = vrot.slane %v22294_v27, 4 }
 0xb96   : > { %v13767_v6 = vperm.slane %v13763_v16, %v23267_v21 }
 0xb97   : > { %v27091_v53 = vsel %vm1312_vm0, %v13760_v38, %v13753_v12  ;;  %v22303_v52 = vpop.trf.xlu2 }
 0xb98   : > { %v14092_v58 = vpack.i.b16 %v27091_v53, %v27085_v23  ;;  %v14095_v33 = vshrl.u32 %v27091_v53, 16  ;;  %v22305_v31 = vpop.trf.xlu1  ;;  %v29352_v23 = vld [vmem:[#allocation30_spill] sm:$0xff]  ;;  %v29353_v53 = vld [vmem:[#allocation29_spill] sm:$0xff] }
 0xb9a   : > { %v27097_v30 = vpack.i.b16 %v14095_v33, %v14094_v3  ;;  %v13819_v33 = vsel %vm1312_vm0, %v13818_v26, %v27077_v2 }
 0xb9c   : > { %v22273_v55 = vpop.trf.xlu0 }
 0xb9d   : > { %v13801_v22 = vsel %vm1312_vm0, %v13800_v36, %v22273_v55  ;;  %v13844_v55 = vrot.slane %v22305_v31, 4 }
 0xb9e   : > { %v13805_v5 = vperm.slane %v13801_v22, %v23267_v21  ;;  %v13876_v22 = vrot.slane %v22303_v52, 4 }
 0xb9f   : > { %v27103_v9 = vpop.trf.xlu2 }
 0xba0   : > { %v22306_v10 = vpop.trf.xlu1 }
 0xba1   : > { %v13882_v27 = vrot.slane %v22306_v10, 4 }
 0xba4   : > { %v22281_v42 = vpop.trf.xlu0 }
 0xba5   : > { %v13768_v49 = vrot.slane %v22281_v42, 4 }
 0xba7   : > { %v13769_v15 = vsel %vm1312_vm0, %v13768_v49, %v27010_v48  ;;  %v13785_v48 = vperm.slane %v13781_v14, %v23267_v21  ;;  %v27114_v36 = vpop.trf.xlu2 }
 0xba8   : > { %v13773_v47 = vperm.slane %v13769_v15, %v23267_v21  ;;  %v22314_v49 = vpop.trf.xlu1 }
 0xba9   : > { %v13792_v51 = vrot.slane %v13785_v48, 4 }
 0xbaa   : > { %v13786_v44 = vrot.slane %v13773_v47, 4 }
 0xbac   : > { %v22282_v34 = vpop.trf.xlu0 }
 0xbad   : > { %v13806_v18 = vrot.slane %v22282_v34, 4 }
 0xbaf   : > { %v13807_v62 = vsel %vm1312_vm0, %v13806_v18, %v27023_v17  ;;  %v13839_v17 = vsel %vm1312_vm0, %v13838_v4, %v22296_v7  ;;  %v22320_v12 = vpop.trf.xlu2  ;;  %v13823_v7 = vperm.slane %v13819_v33, %v23267_v21 }
 0xbb0   : > { %v13811_v56 = vperm.slane %v13807_v62, %v23267_v21  ;;  %v13843_v11 = vperm.slane %v13839_v17, %v23267_v21  ;;  %v22315_v16 = vpop.trf.xlu1 }
 0xbb2   : > { %v13824_v41 = vrot.slane %v13811_v56, 4 }
 0xbb4   : > { %v22290_v54 = vpop.trf.xlu0  ;;  %v13825_v15 = vsel %vm1312_vm0, %v13824_v41, %v13805_v5 }
 0xbb5   : > { %v13774_v57 = vrot.slane %v22290_v54, 4  ;;  %v13877_v54 = vsel %vm1312_vm0, %v13876_v22, %v22297_v43  ;;  %v13850_v22 = vrot.slane %v22314_v49, 4 }
 0xbb7   : > { %v13775_v61 = vsel %vm1312_vm0, %v13774_v57, %v27039_v19  ;;  %v13787_v19 = vsel %vm1312_vm0, %v13786_v44, %v13767_v6  ;;  %v27134_v47 = vpop.trf.xlu2 }
 0xbb8   : > { %v13779_v59 = vperm.slane %v13775_v61, %v23267_v21  ;;  %v13791_v57 = vperm.slane %v13787_v19, %v23273_v39  ;;  %v22323_v41 = vpop.trf.xlu1 }
 0xbba   : > { %v13793_v45 = vsel %vm1312_vm0, %v13792_v51, %v13779_v59  ;;  %v13830_v51 = vrot.slane %v13823_v7, 4 }
 0xbbb   : > { %v13797_v63 = vperm.slane %v13793_v45, %v23273_v39 }
 0xbbc   : > { %v22291_v13 = vpop.trf.xlu0 }
 0xbbd   : > { %v13812_v0 = vrot.slane %v22291_v13, 4  ;;  %v13798_v18 = vrot.slane %v13797_v63, 4  ;;  %v13829_v13 = vperm.slane %v13825_v15, %v23273_v39 }
 0xbbf   : > { %v13813_v31 = vsel %vm1312_vm0, %v13812_v0, %v27069_v32  ;;  %v13881_v32 = vperm.slane %v13877_v54, %v23267_v21  ;;  %v27141_v44 = vsel %vm1312_vm0, %v13798_v18, %v13791_v57  ;;  %v22329_v10 = vpop.trf.xlu2 }
 0xbc0   : > { %v13817_v61 = vperm.slane %v13813_v31, %v23267_v21 }
 0xbc2   : > { %v13831_v62 = vsel %vm1312_vm0, %v13830_v51, %v13817_v61  ;;  %v13888_v51 = vrot.slane %v22315_v16, 4  ;;  %v13920_v61 = vrot.slane %v22329_v10, 4 }
 0xbc3   : > { %v13835_v6 = vperm.slane %v13831_v62, %v23273_v39 }
 0xbc4   : > { %v22299_v38 = vpop.trf.xlu0 }
 0xbc5   : > { %v13845_v42 = vsel %vm1312_vm0, %v13844_v55, %v22299_v38  ;;  %v13836_v56 = vrot.slane %v13835_v6, 4  ;;  %v14102_v55 = vshrl.u32 %v27141_v44, 16 }
 0xbc6   : > { %v13849_v3 = vperm.slane %v13845_v42, %v23267_v21  ;;  %v27158_v42 = vpop.trf.xlu1 }
 0xbc7   : > { %v27148_v19 = vsel %vm1312_vm0, %v13836_v56, %v13829_v13  ;;  %v27156_v17 = vpop.trf.xlu2 }
 0xbc8   : > { %v13862_v34 = vrot.slane %v13849_v3, 4  ;;  %v14100_v4 = vpack.i.b16 %v27148_v19, %v27141_v44  ;;  %v14103_v5 = vshrl.u32 %v27148_v19, 16 }
 0xbca   : > { %v27126_v14 = vsel %vm1312_vm0, %v13862_v34, %v13843_v11  ;;  %v27154_v26 = vpack.i.b16 %v14103_v5, %v14102_v55 }
 0xbcc   : > { %v22300_v48 = vpop.trf.xlu0 }
 0xbcd   : > { %v13883_v2 = vsel %vm1312_vm0, %v13882_v27, %v22300_v48 }
 0xbce   : > { %v13887_v52 = vperm.slane %v13883_v2, %v23267_v21  ;;  %v22332_v34 = vpop.trf.xlu1 }
 0xbcf   : > { %v22338_v0 = vpop.trf.xlu2 }
 0xbd0   : > { %v13900_v59 = vrot.slane %v13887_v52, 4 }
 0xbd2   : > { %v13901_v43 = vsel %vm1312_vm0, %v13900_v59, %v13881_v32 }
 0xbd4   : > { %v22308_v45 = vpop.trf.xlu0 }
 0xbd5   : > { %v13851_v52 = vsel %vm1312_vm0, %v13850_v22, %v22308_v45  ;;  %v13867_v45 = vperm.slane %v27126_v14, %v23273_v39 }
 0xbd6   : > { %v22333_v2 = vpop.trf.xlu1 }
 0xbd7   : > { %v22339_v7 = vpop.trf.xlu2 }
 0xbdc   : > { %v22309_v38 = vpop.trf.xlu0 }
 0xbdd   : > { %v13889_v6 = vsel %vm1312_vm0, %v13888_v51, %v22309_v38 }
 0xbde   : > { %v22341_v16 = vpop.trf.xlu1  ;;  %v13893_v55 = vperm.slane %v13889_v6, %v23267_v21  ;;  %v13964_v6 = vrot.slane %v22339_v7, 4 }
 0xbdf   : > { %v27170_v62 = vpop.trf.xlu2 }
 0xbe4   : > { %v22317_v15 = vpop.trf.xlu0 }
 0xbe5   : > { %v13856_v3 = vrot.slane %v22317_v15, 4 }
 0xbe7   : > { %v13857_v33 = vsel %vm1312_vm0, %v13856_v3, %v27103_v9  ;;  %v13855_v9 = vperm.slane %v13851_v52, %v23267_v21 }
 0xbe8   : > { %v13861_v31 = vperm.slane %v13857_v33, %v23267_v21 }
 0xbea   : > { %v13868_v57 = vrot.slane %v13861_v31, 4  ;;  %v22342_v31 = vpop.trf.xlu1 }
 0xbec   : > { %v22318_v11 = vpop.trf.xlu0  ;;  %v13869_v59 = vsel %vm1312_vm0, %v13868_v57, %v13855_v9 }
 0xbed   : > { %v13894_v63 = vrot.slane %v22318_v11, 4  ;;  %v27186_v11 = vpop.trf.xlu2 }
 0xbef   : > { %v13895_v18 = vsel %vm1312_vm0, %v13894_v63, %v27114_v36  ;;  %v13921_v36 = vsel %vm1312_vm0, %v13920_v61, %v22323_v41  ;;  %v13905_v41 = vperm.slane %v13901_v43, %v23273_v39  ;;  %v13970_v43 = vrot.slane %v22342_v31, 4 }
 0xbf0   : > { %v13899_v32 = vperm.slane %v13895_v18, %v23267_v21  ;;  %v13925_v5 = vperm.slane %v13921_v36, %v23267_v21  ;;  %v13932_v18 = vrot.slane %v22341_v16, 4  ;;  %v13926_v61 = vrot.slane %v22338_v0, 4 }
 0xbf1   : > { %v13965_v0 = vsel %vm1312_vm0, %v13964_v6, %v22333_v2 }
 0xbf2   : > { %v13906_v56 = vrot.slane %v13899_v32, 4  ;;  %v13938_v14 = vrot.slane %v13925_v5, 4  ;;  %v13969_v7 = vperm.slane %v13965_v0, %v23267_v21 }
 0xbf4   : > { %v22326_v27 = vpop.trf.xlu0  ;;  %v13907_v3 = vsel %vm1312_vm0, %v13906_v56, %v13893_v55  ;;  %v13927_v56 = vsel %vm1312_vm0, %v13926_v61, %v22332_v34 }
 0xbf5   : > { %v13914_v48 = vrot.slane %v22326_v27, 4  ;;  %v13911_v33 = vperm.slane %v13907_v3, %v23273_v39  ;;  %v13931_v3 = vperm.slane %v13927_v56, %v23267_v21 }
 0xbf7   : > { %v13915_v54 = vsel %vm1312_vm0, %v13914_v48, %v22320_v12  ;;  %v13873_v12 = vperm.slane %v13869_v59, %v23273_v39  ;;  %v13912_v22 = vrot.slane %v13911_v33, 4  ;;  %v22356_v59 = vpop.trf.xlu2 }
 0xbf8   : > { %v13919_v38 = vperm.slane %v13915_v54, %v23267_v21 }
 0xbf9   : > { %v13874_v13 = vrot.slane %v13873_v12, 4  ;;  %v27189_v27 = vsel %vm1312_vm0, %v13912_v22, %v13905_v41 }
 0xbfa   : > { %v13939_v48 = vsel %vm1312_vm0, %v13938_v14, %v13919_v38  ;;  %v14111_v57 = vshrl.u32 %v27189_v27, 16 }
 0xbfb   : > { %v27178_v10 = vsel %vm1312_vm0, %v13874_v13, %v13867_v45  ;;  %v13958_v45 = vrot.slane %v27156_v17, 4 }
 0xbfc   : > { %v22327_v49 = vpop.trf.xlu0  ;;  %v14108_v63 = vpack.i.b16 %v27189_v27, %v27178_v10  ;;  %v14110_v52 = vshrl.u32 %v27178_v10, 16 }
 0xbfd   : > { %v13959_v55 = vsel %vm1312_vm0, %v13958_v45, %v27158_v42  ;;  %v13952_v5 = vrot.slane %v22327_v49, 4 }
 0xbfe   : > { %v27196_v9 = vpack.i.b16 %v14111_v57, %v14110_v52  ;;  %v13963_v14 = vperm.slane %v13959_v55, %v23267_v21 }
 0xbff   : > { %v13953_v34 = vsel %vm1312_vm0, %v13952_v5, %v27134_v47  ;;  %v22357_v41 = vpop.trf.xlu2 }
 0xc00   : > { %v13976_v2 = vrot.slane %v13963_v14, 4  ;;  %v13957_v22 = vperm.slane %v13953_v34, %v23267_v21 }
 0xc04   : > { %v22335_v15 = vpop.trf.xlu0 }
 0xc05   : > { %v13933_v51 = vsel %vm1312_vm0, %v13932_v18, %v22335_v15  ;;  %v22350_v15 = vpop.trf.xlu1  ;;  %v13977_v18 = vsel %vm1312_vm0, %v13976_v2, %v13957_v22 }
 0xc06   : > { %v13937_v12 = vperm.slane %v13933_v51, %v23267_v21  ;;  %v13943_v51 = vperm.slane %v13939_v48, %v23273_v39  ;;  %v13990_v22 = vrot.slane %v22350_v15, 4 }
 0xc07   : > { %v22365_v47 = vpop.trf.xlu2 }
 0xc08   : > { %v13944_v16 = vrot.slane %v13937_v12, 4 }
 0xc0a   : > { %v13945_v17 = vsel %vm1312_vm0, %v13944_v16, %v13931_v3  ;;  %v14008_v16 = vrot.slane %v22365_v47, 4 }
 0xc0b   : > { %v13949_v49 = vperm.slane %v13945_v17, %v23273_v39 }
 0xc0c   : > { %v22336_v54 = vpop.trf.xlu0 }
 0xc0d   : > { %v13971_v32 = vsel %vm1312_vm0, %v13970_v43, %v22336_v54  ;;  %v13950_v52 = vrot.slane %v13949_v49, 4  ;;  %v22351_v57 = vpop.trf.xlu1 }
 0xc0e   : > { %v13975_v13 = vperm.slane %v13971_v32, %v23267_v21  ;;  %v13981_v32 = vperm.slane %v13977_v18, %v23273_v39 }
 0xc0f   : > { %v13951_v61 = vsel %vm1312_vm0, %v13950_v52, %v13943_v51  ;;  %v22366_v3 = vpop.trf.xlu2  ;;  %v14028_v51 = vrot.slane %v22351_v57, 4 }
 0xc10   : > { %v13982_v33 = vrot.slane %v13975_v13, 4  ;;  %v14118_v6 = vshrl.u32 %v13951_v61, 16  ;;  %v14046_v17 = vrot.slane %v22366_v3, 4 }
 0xc12   : > { %v13983_v42 = vsel %vm1312_vm0, %v13982_v33, %v13969_v7 }
 0xc13   : > { %v13987_v31 = vperm.slane %v13983_v42, %v23273_v39 }
 0xc14   : > { %v22344_v36 = vpop.trf.xlu0 }
 0xc15   : > { %v13988_v54 = vrot.slane %v13987_v31, 4  ;;  %v22359_v56 = vpop.trf.xlu1  ;;  %v13991_v15 = vsel %vm1312_vm0, %v13990_v22, %v22344_v36 }
 0xc16   : > { %v14009_v0 = vsel %vm1312_vm0, %v14008_v16, %v22359_v56 }
 0xc17   : > { %v13989_v12 = vsel %vm1312_vm0, %v13988_v54, %v13981_v32  ;;  %v14013_v48 = vperm.slane %v14009_v0, %v23267_v21 }
 0xc18   : > { %v14116_v45 = vpack.i.b16 %v13989_v12, %v13951_v61  ;;  %v14119_v13 = vshrl.u32 %v13989_v12, 16 }
 0xc19   : > { %v14020_v2 = vrot.slane %v14013_v48, 4 }
 0xc1a   : > { %v14120_v55 = vpack.i.b16 %v14119_v13, %v14118_v6  ;;  %v13995_v13 = vperm.slane %v13991_v15, %v23267_v21 }
 0xc1c   : > { %v22345_v38 = vpop.trf.xlu0 }
 0xc1d   : > { %v22360_v34 = vpop.trf.xlu1 }
 0xc1e   : > { %v14047_v18 = vsel %vm1312_vm0, %v14046_v17, %v22360_v34 }
 0xc24   : > { %v22353_v43 = vpop.trf.xlu0 }
 0xc25   : > { %v13996_v33 = vrot.slane %v22353_v43, 4 }
 0xc27   : > { %v13997_v42 = vsel %vm1312_vm0, %v13996_v33, %v27170_v62  ;;  %v14051_v62 = vperm.slane %v14047_v18, %v23267_v21 }
 0xc28   : > { %v14001_v54 = vperm.slane %v13997_v42, %v23267_v21 }
 0xc29   : > { %v14058_v16 = vrot.slane %v14051_v62, 4 }
 0xc2a   : > { %v14014_v32 = vrot.slane %v14001_v54, 4 }
 0xc2c   : > { %v22354_v5 = vpop.trf.xlu0  ;;  %v14015_v0 = vsel %vm1312_vm0, %v14014_v32, %v13995_v13 }
 0xc2d   : > { %v14034_v14 = vrot.slane %v22354_v5, 4  ;;  %v14019_v48 = vperm.slane %v14015_v0, %v23273_v39 }
 0xc2f   : > { %v14035_v31 = vsel %vm1312_vm0, %v14034_v14, %v27186_v11  ;;  %v14029_v11 = vsel %vm1312_vm0, %v14028_v51, %v22345_v38  ;;  %v29358_v51 = vld [vmem:[#allocation35_spill] sm:$0xff] }
 0xc30   : > { %v14039_v47 = vperm.slane %v14035_v31, %v23267_v21  ;;  %v14033_v5 = vperm.slane %v14029_v11, %v23267_v21 }
 0xc32   : > { %v14052_v56 = vrot.slane %v14039_v47, 4  ;;  %v1643_v47 = vperm.slane %v29358_v51, %v23273_v39 }
 0xc34   : > { %v22362_v7 = vpop.trf.xlu0  ;;  %v14053_v33 = vsel %vm1312_vm0, %v14052_v56, %v14033_v5  ;;  %v1652_v15 = vrot.slane %v1643_v47, 4 }
 0xc35   : > { %v14002_v49 = vrot.slane %v22362_v7, 4  ;;  %v14057_v7 = vperm.slane %v14053_v33, %v23273_v39 }
 0xc37   : > { %v14003_v52 = vsel %vm1312_vm0, %v14002_v49, %v22356_v59 }
 0xc38   : > { %v14007_v43 = vperm.slane %v14003_v52, %v23267_v21 }
 0xc3a   : > { %v14021_v61 = vsel %vm1312_vm0, %v14020_v2, %v14007_v43 }
 0xc3b   : > { %v14025_v59 = vperm.slane %v14021_v61, %v23273_v39  ;;  %v29359_v61 = vld [vmem:[#allocation36_spill] sm:$0xff] }
 0xc3c   : > { %v22363_v12 = vpop.trf.xlu0  ;;  %v1647_v62 = vperm.slane %v29359_v61, %v23273_v39 }
 0xc3d   : > { %v14040_v6 = vrot.slane %v22363_v12, 4  ;;  %v14026_v36 = vrot.slane %v14025_v59, 4  ;;  %v1653_v12 = vsel %vm1312_vm0, 0.0, %v1652_v15  ;;  %v1668_v59 = vpack.c.bf16 %v1643_v47, %v1643_v47 }
 0xc3e   : > { %v1654_v32 = vrot.slane %v1647_v62, 4  ;;  %v1670_v13 = vpack.c.bf16 %v1647_v62, %v1647_v62 }
 0xc3f   : > { %v14041_v57 = vsel %vm1312_vm0, %v14040_v6, %v22357_v41  ;;  %v14027_v17 = vsel %vm1312_vm0, %v14026_v36, %v14019_v48  ;;  %v1669_v6 = vpack.c.bf16 %v1653_v12, %v1653_v12 }
 0xc40   : > { %v14045_v3 = vperm.slane %v14041_v57, %v23267_v21  ;;  %v14126_v49 = vshrl.u32 %v14027_v17, 16  ;;  %v1655_v11 = vsel %vm1312_vm0, 0.0, %v1654_v32 }
 0xc41   : > { %v1671_v56 = vpack.c.bf16 %v1655_v11, %v1655_v11 }
 0xc42   : > { %v14059_v38 = vsel %vm1312_vm0, %v14058_v16, %v14045_v3  ;;  %v29360_v16 = vld [vmem:[#allocation34_spill] sm:$0xff] }
 0xc43   : > { %v14063_v14 = vperm.slane %v14059_v38, %v23273_v39  ;;  %v1631_v57 = vperm.slane %v29360_v16, %v23273_v39 }
 0xc45   : > { %v14064_v41 = vrot.slane %v14063_v14, 4  ;;  %v1648_v5 = vrot.slane %v1631_v57, 4  ;;  %v1664_v3 = vpack.c.bf16 %v1631_v57, %v1631_v57 }
 0xc47   : > { %v14065_v34 = vsel %vm1312_vm0, %v14064_v41, %v14057_v7  ;;  %v1649_v0 = vsel %vm1312_vm0, 0.0, %v1648_v5 }
 0xc48   : > { %v14124_v42 = vpack.i.b16 %v14065_v34, %v14027_v17  ;;  %v14127_v2 = vshrl.u32 %v14065_v34, 16  ;;  %v1665_v36 = vpack.c.bf16 %v1649_v0, %v1649_v0 }
 0xc4a   : > { %14130 = vmatpush.bf16.msra.mxu0 %v14124_v42  ;;  %v14128_v22 = vpack.i.b16 %v14127_v2, %v14126_v49 }
 0xc4c   : > { %14143 = vmatpush.bf16.msra.mxu1 %v14128_v22 }
 0xc4e   : > { %14131 = vmatpush.bf16.msra.mxu0 %v14116_v45 }
 0xc50   : > { %14144 = vmatpush.bf16.msra.mxu1 %v14120_v55 }
 0xc52   : > { %14132 = vmatpush.bf16.msra.mxu0 %v14108_v63 }
 0xc54   : > { %14145 = vmatpush.bf16.msra.mxu1 %v27196_v9 }
 0xc56   : > { %14133 = vmatpush.bf16.msra.mxu0 %v14100_v4 }
 0xc58   : > { %14146 = vmatpush.bf16.msra.mxu1 %v27154_v26 }
 0xc5a   : > { %14134 = vmatpush.bf16.msra.mxu0 %v14092_v58  ;;  %v29354_v58 = vpack.i.b16 %v29352_v23, %v29353_v53 }
 0xc5c   : > { %14147 = vmatpush.bf16.msra.mxu1 %v27097_v30 }
 0xc5e   : > { %14135 = vmatpush.bf16.msra.mxu0 %v14084_v35 }
 0xc60   : > { %14148 = vmatpush.bf16.msra.mxu1 %v27071_v25 }
 0xc62   : > { %14136 = vmatpush.bf16.msra.mxu0 %v14076_v1  ;;  %v29357_v1 = vld [vmem:[#allocation33_spill] sm:$0xff] }
 0xc64   : > { %14149 = vmatpush.bf16.msra.mxu1 %v26995_v29 }
 0xc66   : > { %14137 = vmatpush.bf16.msra.mxu0 %v14068_v8  ;;  %v29356_v8 = vld [vmem:[#allocation32_spill] sm:$0xff] }
 0xc68   : > { %14150 = vmatpush.bf16.msra.mxu1 %v26903_v37  ;;  %v1626_v37 = vrot.slane %v29356_v8, 4 }
 0xc69   : > { %14138 = vmatmul.bf16.vlgmr.msra.gmra.mxu0 %v29354_v58 }
 0xc6a   : > { %v1627_v29 = vsel %vm1312_vm0, %v29357_v1, %v1626_v37 }
 0xc6b   : > { %14151 = vmatmul.bf16.vlgmr.msra.gmra.mxu1 %v29355_v20  ;;  %v1635_v44 = vperm.slane %v1627_v29, %v23273_v39 }
 0xc6d   : > { %v1650_v19 = vrot.slane %v1635_v44, 4  ;;  %v1666_v26 = vpack.c.bf16 %v1635_v44, %v1635_v44 }
 0xc6f   : > { %v1651_v4 = vsel %vm1312_vm0, 0.0, %v1650_v19 }
 0xc70   : > { %v1667_v10 = vpack.c.bf16 %v1651_v4, %v1651_v4 }
 0xce6   : > { %v14139_v60 = vpop.f32.mrf.mxu0 }
 0xce7   : > { %v14156_v35 = vmul.f32 0.088388346, %v14139_v60 }
 0xce8   : > { %v14152_v25 = vpop.f32.mrf.mxu1 }
 0xce9   : > { %v14157_v30 = vmul.f32 0.088388346, %v14152_v25  ;;  %v14158_v28 = vsel %vm5745_vm1, %v14156_v35, -inf }
 0xcea   : > { %14159 = vmax.xlane.f32.xlu1 %v14158_v28 }
 0xceb   : > { %v14161_v50 = vsel %vm5745_vm1, %v14157_v30, -inf }
 0xcec   : > { %14162 = vmax.xlane.f32.xlu0 %v14161_v50 }
 0xcee   : > { %v14141_v46 = vpop.f32.mrf.mxu0 }
 0xcf0   : > { %v14154_v40 = vpop.f32.mrf.mxu1 }
 0xd15   : > { %22384 = vxpose.binary.xlu0.c.b16.start.end [1/2] (short) %v1667_v10, %v1666_v26, 128 }
 0xd5d   : > { %v14160_v27 = vpop.xlane.xlu1 %14159 }
 0xd5e   : > { %v14164_v63 = vsub.f32 %v14156_v35, %v14160_v27 }
 0xd5f   : > { %v14163_v9 = vpop.xlane.xlu0 %14162 }
 0xd60   : > { %v14166_v45 = vmul.f32 1.442695, %v14164_v63  ;;  %v14165_v55 = vsub.f32 %v14157_v30, %v14163_v9 }
 0xd62   : > { %22672 = vpow2.f32 %v14166_v45  ;;  %v14168_v31 = vmul.f32 1.442695, %v14165_v55 }
 0xd64   : > { %22674 = vpow2.f32 %v14168_v31 }
 0xd68   : > { %v22673_v52 = vpop.eup %22672 }
 0xd69   : > { %v14170_v18 = vsel %vm5745_vm1, %v22673_v52, 0.0 }
 0xd6a   : > { %v27286_v54 = vpop.eup %22674  ;;  %14171 = vadd.xlane.f32.xlu2 %v14170_v18 }
 0xd6b   : > { %v14173_v43 = vsel %vm5745_vm1, %v27286_v54, 0.0 }
 0xd6c   : > { %14174 = vadd.xlane.f32.xlu1 %v14173_v43 }
 0xd93   : > { %22401 = vxpose.binary.xlu2.c.b16.start.end [1/2] (short) %v1669_v6, %v1668_v59, 128 }
 0xd95   : > { %22418 = vxpose.binary.xlu0.c.b16.start.end [1/2] (short) %v1671_v56, %v1670_v13, 128 }
 0xda6   : > { %22367 = vxpose.binary.xlu1.c.b16.start.end [1/2] (short) %v1665_v36, %v1664_v3, 128 }
 0xdc1   : > { %v27299_v33 = vpop.trf.xlu0 }
 0xdc2   : > { %v14348_v12 = vshrl.u32 %v27299_v33, 16 }
 0xdc9   : > { %v27301_v38 = vpop.trf.xlu0 }
 0xdca   : > { %v14346_v11 = vpack.i.b16 %v27301_v38, %v27299_v33  ;;  %v14349_v59 = vshrl.u32 %v27301_v38, 16 }
 0xdcc   : > { %v14350_v5 = vpack.i.b16 %v14349_v59, %v14348_v12  ;;  %v14606_v0 = vrot.slane %v14346_v11, 4 }
 0xdd1   : > { %v27303_v48 = vpop.trf.xlu0 }
 0xdd9   : > { %v27305_v14 = vpop.trf.xlu0 }
 0xddd   : > { %v14172_v17 = vpop.xlane.xlu2 %14171 }
 0xdde   : > { %22676 = vrcp.f32 %v14172_v17  ;;  %v14187_v23 = vand.u32 2147483648, %v14172_v17  ;;  %v14185_v58 = vand.u32 2147483647, %v14172_v17  ;;  %vm14181_vm11 = vweird.f32 %v14172_v17 }
 0xddf   : > { %v14175_v7 = vpop.xlane.xlu1 %14174 }
 0xde0   : > { %22678 = vrcp.f32 %v14175_v7  ;;  %v14202_v35 = vand.u32 2147483648, %v14175_v7  ;;  %v14200_v28 = vand.u32 2147483647, %v14175_v7  ;;  %v14188_v50 = vor.u32 1.1754944e-38, %v14187_v23 }
 0xde1   : > { %v27307_v41 = vpop.trf.xlu0  ;;  %vm14186_vm14 = vcmp.eq.f32.partialorder %v14185_v58, 8.507059e+37  ;;  %vm14196_vm15 = vweird.f32 %v14175_v7 }
 0xde2   : > { %v14203_v8 = vor.u32 1.1754944e-38, %v14202_v35  ;;  %vm14201_vm3 = vcmp.eq.f32.partialorder %v14200_v28, 8.507059e+37 }
 0xde4   : > { %v22677_v34 = vpop.eup %22676 }
 0xde5   : > { %v14177_v42 = vmul.f32 %v22677_v34, %v14172_v17  ;;  %vm14182_vm10 = vweird.f32 %v22677_v34 }
 0xde6   : > { %v22679_v49 = vpop.eup %22678  ;;  %vm14183_vm13 = vmor %vm14181_vm11, %vm14182_vm10 }
 0xde7   : > { %v14178_v2 = vsub.f32 1.0, %v14177_v42  ;;  %v14192_v22 = vmul.f32 %v22679_v49, %v14175_v7  ;;  %vm14197_vm12 = vweird.f32 %v22679_v49  ;;  %v14662_v42 = vrot.slane %v14350_v5, 4 }
 0xde8   : > { %vm14198_vm2 = vmor %vm14196_vm15, %vm14197_vm12 }
 0xde9   : > { %v14179_v53 = vmul.f32 %v22677_v34, %v14178_v2  ;;  %v14193_v20 = vsub.f32 1.0, %v14192_v22  ;;  %v27309_v60 = vpop.trf.xlu0 }
 0xdeb   : > { %v14180_v25 = vadd.f32 %v22677_v34, %v14179_v53  ;;  %v14194_v30 = vmul.f32 %v22679_v49, %v14193_v20 }
 0xded   : > { %v14195_v46 = vadd.f32 %v22679_v49, %v14194_v30  ;;  %v14184_v40 = vsel %vm14183_vm13, %v22677_v34, %v14180_v25 }
 0xdee   : > { %v14189_v37 = vsel %vm14186_vm14, %v14188_v50, %v14184_v40 }
 0xdef   : > { %v14190_v1 = vmul.f32 %v22673_v52, %v14189_v37  ;;  %v14199_v29 = vsel %vm14198_vm2, %v22679_v49, %v14195_v46 }
 0xdf0   : > { %v14204_v44 = vsel %vm14201_vm3, %v14203_v8, %v14199_v29 }
 0xdf1   : > { %v27311_v19 = vpop.trf.xlu0  ;;  %v14206_v4 = vpack.c.bf16 %v14190_v1, %v14190_v1  ;;  %v14205_v26 = vmul.f32 %v27286_v54, %v14204_v44 }
 0xdf3   : > { %v18217_v10 = vsel %vm5745_vm1, %v14206_v4, 0  ;;  %v14207_v27 = vpack.c.bf16 %v14205_v26, %v14205_v26 }
 0xdf4   : > { %18226 = vmatpush.bf16.xpose.msrb.mxu0 %v18217_v10 }
 0xdf5   : > { %v18293_v63 = vsel %vm5745_vm1, %v14207_v27, 0 }
 0xdf6   : > { %18302 = vmatpush.bf16.xpose.msrb.mxu1 %v18293_v63 }
 0xdf9   : > { %v27316_v9 = vpop.trf.xlu0 }
 0xe01   : > { %v27318_v45 = vpop.trf.xlu0 }
 0xe09   : > { %v27320_v55 = vpop.trf.xlu0 }
 0xe11   : > { %v27322_v31 = vpop.trf.xlu0 }
 0xe19   : > { %v27324_v52 = vpop.trf.xlu0 }
 0xe21   : > { %v27326_v18 = vpop.trf.xlu0 }
 0xe29   : > { %v27328_v54 = vpop.trf.xlu0 }
 0xe31   : > { %v27330_v43 = vpop.trf.xlu0 }
 0xe34   : > { %v22402_v51 = vpop.trf.xlu2 }
 0xe35   : > { %v14356_v3 = vshrl.u32 %v22402_v51, 16 }
 0xe39   : > { %v27332_v47 = vpop.trf.xlu0 }
 0xe3a   : > { %29361 = vst [vmem:[#allocation37_spill] sm:$0xff] %v27332_v47 }
 0xe3c   : > { %v22403_v61 = vpop.trf.xlu2 }
 0xe3d   : > { %v14354_v36 = vpack.i.b16 %v22403_v61, %v22402_v51  ;;  %v14357_v17 = vshrl.u32 %v22403_v61, 16 }
 0xe3f   : > { %v14358_v2 = vpack.i.b16 %v14357_v17, %v14356_v3  ;;  %v14592_v22 = vrot.slane %v14354_v36, 4 }
 0xe41   : > { %v22419_v62 = vpop.trf.xlu0  ;;  %v14648_v8 = vrot.slane %v14358_v2, 4 }
 0xe42   : > { %v14364_v56 = vshrl.u32 %v22419_v62, 16 }
 0xe44   : > { %v27334_v15 = vpop.trf.xlu2 }
 0xe49   : > { %v22420_v32 = vpop.trf.xlu0 }
 0xe4a   : > { %v14362_v16 = vpack.i.b16 %v22420_v32, %v22419_v62  ;;  %v14365_v57 = vshrl.u32 %v22420_v32, 16 }
 0xe4c   : > { %v27340_v6 = vpop.trf.xlu2  ;;  %v14366_v7 = vpack.i.b16 %v14365_v57, %v14364_v56  ;;  %v14607_v34 = vsel %vm1312_vm0, %v14362_v16, %v14606_v0  ;;  %v14604_v33 = vrot.slane %v14362_v16, 4 }
 0xe4d   : > { %v14615_v38 = vperm.slane %v14607_v34, %v23267_v21 }
 0xe4e   : > { %v14660_v53 = vrot.slane %v14366_v7, 4  ;;  %v14663_v30 = vsel %vm1312_vm0, %v14366_v7, %v14662_v42  ;;  %v14605_v40 = vsel %vm1312_vm0, %v14604_v33, %v14346_v11 }
 0xe4f   : > { %v14628_v1 = vrot.slane %v14615_v38, 4  ;;  %v14671_v4 = vperm.slane %v14663_v30, %v23267_v21  ;;  %v14611_v63 = vperm.slane %v14605_v40, %v23267_v21 }
 0xe50   : > { %v14661_v29 = vsel %vm1312_vm0, %v14660_v53, %v14350_v5 }
 0xe51   : > { %v27343_v49 = vpop.trf.xlu0  ;;  %v14667_v61 = vperm.slane %v14661_v29, %v23267_v21  ;;  %v14684_v57 = vrot.slane %v14671_v4, 4 }
 0xe52   : > { %v22368_v13 = vpop.trf.xlu1 }
 0xe53   : > { %v14340_v58 = vshrl.u32 %v22368_v13, 16 }
 0xe54   : > { %v27346_v25 = vpop.trf.xlu2 }
 0xe59   : > { %v27363_v11 = vpop.trf.xlu0 }
 0xe5a   : > { %v22369_v23 = vpop.trf.xlu1 }
 0xe5b   : > { %v14338_v20 = vpack.i.b16 %v22369_v23, %v22368_v13  ;;  %v14341_v35 = vshrl.u32 %v22369_v23, 16 }
 0xe5d   : > { %v14342_v28 = vpack.i.b16 %v14341_v35, %v14340_v58  ;;  %v14593_v50 = vsel %vm1312_vm0, %v14592_v22, %v14338_v20  ;;  %v14594_v46 = vrot.slane %v14338_v20, 4 }
 0xe5e   : > { %v14599_v37 = vperm.slane %v14593_v50, %v23267_v21 }
 0xe5f   : > { %v14595_v44 = vsel %vm1312_vm0, %v14354_v36, %v14594_v46  ;;  %v14649_v27 = vsel %vm1312_vm0, %v14648_v8, %v14342_v28  ;;  %v14650_v51 = vrot.slane %v14342_v28, 4  ;;  %v22407_v36 = vpop.trf.xlu2 }
 0xe60   : > { %v14603_v26 = vperm.slane %v14595_v44, %v23267_v21  ;;  %v14618_v10 = vrot.slane %v14599_v37, 4  ;;  %v14655_v62 = vperm.slane %v14649_v27, %v23267_v21  ;;  %v14616_v44 = vrot.slane %v14611_v63, 4 }
 0xe61   : > { %v14651_v13 = vsel %vm1312_vm0, %v14358_v2, %v14650_v51  ;;  %v22423_v8 = vpop.trf.xlu0 }
 0xe62   : > { %v27360_v32 = vpop.trf.xlu1  ;;  %v14629_v12 = vsel %vm1312_vm0, %v14628_v1, %v14603_v26  ;;  %v14630_v59 = vrot.slane %v14603_v26, 4  ;;  %v14619_v16 = vsel %vm1312_vm0, %v14611_v63, %v14618_v10  ;;  %v14659_v5 = vperm.slane %v14651_v13, %v23267_v21 }
 0xe63   : > { %v27367_v56 = vperm.slane %v14629_v12, %v23273_v39  ;;  %v14674_v0 = vrot.slane %v14655_v62, 4  ;;  %v27372_v3 = vperm.slane %v14619_v16, %v23273_v39  ;;  %v14617_v26 = vsel %vm1312_vm0, %v14616_v44, %v14599_v37 }
 0xe64   : > { %v14685_v17 = vsel %vm1312_vm0, %v14684_v57, %v14659_v5  ;;  %v14686_v34 = vrot.slane %v14659_v5, 4  ;;  %v14631_v22 = vsel %vm1312_vm0, %v14615_v38, %v14630_v59  ;;  %v14672_v12 = vrot.slane %v14667_v61, 4 }
 0xe65   : > { %v14675_v7 = vsel %vm1312_vm0, %v14667_v61, %v14674_v0  ;;  %v14644_v42 = vrot.slane %v27367_v56, 4  ;;  %v27378_v33 = vperm.slane %v14685_v17, %v23273_v39  ;;  %v14642_v23 = vrot.slane %v27372_v3, 4 }
 0xe66   : > { %v27381_v2 = vperm.slane %v14675_v7, %v23273_v39  ;;  %v14687_v53 = vsel %vm1312_vm0, %v14671_v4, %v14686_v34  ;;  %v27389_v30 = vperm.slane %v14631_v22, %v23273_v39  ;;  %v14420_v59 = vshrl.u32 %v27346_v25, 16 }
 0xe67   : > { %v14700_v58 = vrot.slane %v27378_v33, 4  ;;  %v27392_v28 = vperm.slane %v14687_v53, %v23273_v39  ;;  %v14645_v50 = vsel %vm1312_vm0, 0, %v14644_v42  ;;  %v14643_v40 = vsel %vm1312_vm0, 0, %v14642_v23  ;;  %v27400_v4 = vpop.trf.xlu2 }
 0xe68   : > { %v14698_v20 = vrot.slane %v27381_v2, 4  ;;  %v14646_v1 = vrot.slane %v27389_v30, 4  ;;  %v14421_v13 = vshrl.u32 %v22407_v36, 16  ;;  %v27407_v16 = vperm.slane %v14617_v26, %v23273_v39 }
 0xe69   : > { %v14701_v46 = vsel %vm1312_vm0, 0, %v14700_v58  ;;  %v14702_v29 = vrot.slane %v27392_v28, 4  ;;  %v14418_v57 = vpack.i.b16 %v22407_v36, %v27346_v25  ;;  %v14673_v63 = vsel %vm1312_vm0, %v14672_v12, %v14655_v62  ;;  %v22424_v17 = vpop.trf.xlu0 }
 0xe6a   : > { %v22371_v35 = vpop.trf.xlu1  ;;  %v14699_v38 = vsel %vm1312_vm0, 0, %v14698_v20  ;;  %22441 = vxpose.binary.xlu0.c.b16.start.end [1/2] (short) (narrow) %v14701_v46, %v14645_v50, 16  ;;  %v14647_v10 = vsel %vm1312_vm0, 0, %v14646_v1  ;;  %v14412_v5 = vshrl.u32 %v27307_v41, 16  ;;  %v14413_v37 = vshrl.u32 %v27309_v60, 16 }
 0xe6b   : > { %22438 = vxpose.binary.xlu2.c.b16.start.end [1/2] (short) (narrow) %v14699_v38, %v14643_v40, 16  ;;  %v14703_v27 = vsel %vm1312_vm0, 0, %v14702_v29  ;;  %v27414_v0 = vperm.slane %v14673_v63, %v23273_v39  ;;  %v14422_v7 = vpack.i.b16 %v14421_v13, %v14420_v59  ;;  %v14640_v61 = vrot.slane %v27407_v16, 4 }
 0xe6c   : > { %22435 = vxpose.binary.xlu1.c.b16.start.end [1/2] (short) (narrow) %v14703_v27, %v14647_v10, 16  ;;  %v14816_v22 = vrot.slane %v14418_v57, 4  ;;  %v27422_v25 = vpack.i.b16 %v27309_v60, %v27307_v41  ;;  %v27424_v62 = vpack.i.b16 %v14413_v37, %v14412_v5  ;;  %v14372_v36 = vshrl.u32 %v27360_v32, 16 }
 0xe6d   : > { %v14696_v34 = vrot.slane %v27414_v0, 4  ;;  %v14373_v53 = vshrl.u32 %v22371_v35, 16  ;;  %v14428_v20 = vshrl.u32 %v22423_v8, 16  ;;  %v14429_v50 = vshrl.u32 %v22424_v17, 16 }
 0xe6e   : > { %v27427_v40 = vpack.i.b16 %v22424_v17, %v22423_v8  ;;  %v14872_v1 = vrot.slane %v14422_v7, 4  ;;  %v14641_v29 = vsel %vm1312_vm0, 0, %v14640_v61  ;;  %v27432_v41 = vpack.i.b16 %v22371_v35, %v27360_v32 }
 0xe6f   : > { %v27418_v23 = vpop.trf.xlu2  ;;  %v14697_v44 = vsel %vm1312_vm0, 0, %v14696_v34  ;;  %v14380_v27 = vshrl.u32 %v27303_v48, 16  ;;  %v14381_v8 = vshrl.u32 %v27305_v14, 16  ;;  %v14830_v12 = vrot.slane %v27422_v25, 4 }
 0xe70   : > { %v27442_v59 = vpack.i.b16 %v14429_v50, %v14428_v20  ;;  %v14388_v32 = vshrl.u32 %v27334_v15, 16  ;;  %v14389_v35 = vshrl.u32 %v27340_v6, 16  ;;  %v14886_v37 = vrot.slane %v27424_v62, 4 }
 0xe71   : > { %v14831_v17 = vsel %vm1312_vm0, %v27427_v40, %v14830_v12  ;;  %v14706_v61 = vrot.slane %v27432_v41, 4  ;;  %v22425_v34 = vpop.trf.xlu0  ;;  %v14397_v20 = vshrl.u32 %v27363_v11, 16  ;;  %v27493_v12 = vpack.i.b16 %v27363_v11, %v27343_v49 }
 0xe72   : > { %v22372_v51 = vpop.trf.xlu1  ;;  %v14887_v50 = vsel %vm1312_vm0, %v27442_v59, %v14886_v37 }
 0xe73   : > { %v14404_v42 = vshrl.u32 %v22372_v51, 16 }
 0xe7a   : > { %v22373_v58 = vpop.trf.xlu1 }
 0xe7b   : > { %v14402_v46 = vpack.i.b16 %v22373_v58, %v22372_v51  ;;  %v14405_v38 = vshrl.u32 %v22373_v58, 16  ;;  %22447 = vxpose.binary.xlu2.c.b16.start.end [1/2] (short) (narrow) %v14697_v44, %v14641_v29, 16  ;;  %v27438_v51 = vpack.i.b16 %v14373_v53, %v14372_v36  ;;  %v14396_v58 = vshrl.u32 %v27343_v49, 16 }
 0xe7c   : > { %22444 = vxpose.binary.xlu1.c.b16.start.end [1/2] (short) (narrow) %v27392_v28, %v27389_v30, 16  ;;  %v27480_v29 = vpack.i.b16 %v27305_v14, %v27303_v48  ;;  %v27482_v44 = vpack.i.b16 %v14381_v8, %v14380_v27  ;;  %v14895_v30 = vperm.slane %v14887_v50, %v23267_v21  ;;  %v14452_v27 = vshrl.u32 %v27400_v4, 16 }
 0xe7d   : > { %v14406_v60 = vpack.i.b16 %v14405_v38, %v14404_v42  ;;  %v27435_v26 = vsel %vm1312_vm0, %v14816_v22, %v14402_v46  ;;  %v14818_v10 = vrot.slane %v14402_v46, 4  ;;  %v14762_v22 = vrot.slane %v27438_v51, 4  ;;  %v27470_v38 = vpop.trf.xlu2 }
 0xe7e   : > { %v27495_v48 = vpack.i.b16 %v14397_v20, %v14396_v58  ;;  %v14453_v8 = vshrl.u32 %v27418_v23, 16  ;;  %v14718_v11 = vrot.slane %v27480_v29, 4  ;;  %v14450_v50 = vpack.i.b16 %v27418_v23, %v27400_v4 }
 0xe7f   : > { %v14819_v13 = vsel %vm1312_vm0, %v14418_v57, %v14818_v10  ;;  %v27451_v5 = vsel %vm1312_vm0, %v14872_v1, %v14406_v60  ;;  %v14874_v42 = vrot.slane %v14406_v60, 4  ;;  %v27459_v57 = vpack.i.b16 %v27340_v6, %v27334_v15 }
 0xe80   : > { %v27448_v63 = vperm.slane %v14819_v13, %v23267_v21  ;;  %v27472_v15 = vpack.i.b16 %v14389_v35, %v14388_v32  ;;  %v27475_v6 = vperm.slane %v14831_v17, %v23267_v21  ;;  %v14774_v17 = vrot.slane %v27482_v44, 4 }
 0xe81   : > { %v14875_v46 = vsel %vm1312_vm0, %v14422_v7, %v14874_v42  ;;  %v14707_v7 = vsel %vm1312_vm0, %v27459_v57, %v14706_v61  ;;  %v22426_v42 = vpop.trf.xlu0  ;;  %v14719_v58 = vsel %vm1312_vm0, %v27493_v12, %v14718_v11  ;;  %v14928_v23 = vrot.slane %v14450_v50, 4 }
 0xe82   : > { %v14854_v36 = vrot.slane %v27448_v63, 4  ;;  %v22374_v53 = vpop.trf.xlu1  ;;  %v14883_v1 = vperm.slane %v14875_v46, %v23267_v21  ;;  %v14763_v28 = vsel %vm1312_vm0, %v27472_v15, %v14762_v22  ;;  %v27498_v14 = vperm.slane %v14707_v7, %v23267_v21 }
 0xe83   : > { %v27504_v32 = vperm.slane %v14763_v28, %v23267_v21  ;;  %v14436_v35 = vshrl.u32 %v22374_v53, 16  ;;  %v14775_v20 = vsel %vm1312_vm0, %v27495_v48, %v14774_v17  ;;  %v14454_v46 = vpack.i.b16 %v14453_v8, %v14452_v27 }
 0xe84   : > { %v14855_v60 = vsel %vm1312_vm0, %v27475_v6, %v14854_v36  ;;  %v14910_v10 = vrot.slane %v14883_v1, 4  ;;  %v14742_v7 = vrot.slane %v27498_v14, 4  ;;  %v14461_v11 = vshrl.u32 %v22426_v42, 16 }
 0xe85   : > { %v27507_v37 = vperm.slane %v14855_v60, %v23273_v39  ;;  %v27532_v17 = vperm.slane %v14775_v20, %v23267_v21  ;;  %v14984_v27 = vrot.slane %v14454_v46, 4  ;;  %v14908_v24 = vrot.slane %v14895_v30, 4 }
 0xe86   : > { %v14911_v13 = vsel %vm1312_vm0, %v14895_v30, %v14910_v10  ;;  %v27525_v10 = vpop.trf.xlu2 }
 0xe87   : > { %v27510_v49 = vperm.slane %v14911_v13, %v23273_v39  ;;  %v14460_v13 = vshrl.u32 %v22425_v34, 16 }
 0xe89   : > { %22492 = vxpose.binary.xlu0.c.b16.start.end [1/2] (short) (narrow) %v27510_v49, %v27507_v37, 16 }
 0xe8a   : > { %v22375_v61 = vpop.trf.xlu1 }
 0xe8b   : > { %v14434_v22 = vpack.i.b16 %v22375_v61, %v22374_v53  ;;  %v14437_v36 = vshrl.u32 %v22375_v61, 16  ;;  %22453 = vxpose.binary.xlu2.c.b16.start.end [1/2] (short) (narrow) %v27378_v33, %v27367_v56, 16  ;;  %v14798_v53 = vrot.slane %v27504_v32, 4  ;;  %v27529_v61 = vperm.slane %v14719_v58, %v23267_v21 }
 0xe8c   : > { %v27544_v58 = vpack.i.b16 %v14461_v11, %v14460_v13  ;;  %22450 = vxpose.binary.xlu1.c.b16.start.end [1/2] (short) (narrow) %v27381_v2, %v27372_v3, 16  ;;  %v27570_v3 = vpack.i.b16 %v27316_v9, %v27311_v19 }
 0xe8d   : > { %v14438_v28 = vpack.i.b16 %v14437_v36, %v14436_v35  ;;  %v14930_v60 = vrot.slane %v14434_v22, 4  ;;  %v14743_v33 = vsel %vm1312_vm0, %v27529_v61, %v14742_v7  ;;  %v14799_v8 = vsel %vm1312_vm0, %v27532_v17, %v14798_v53 }
 0xe8e   : > { %v14444_v35 = vshrl.u32 %v27311_v19, 16  ;;  %v27542_v36 = vpack.i.b16 %v22426_v42, %v22425_v34  ;;  %v14929_v7 = vsel %vm1312_vm0, %v14928_v23, %v14434_v22  ;;  %v27558_v42 = vperm.slane %v14743_v33, %v23273_v39  ;;  %v27580_v11 = vpop.trf.xlu2 }
 0xe8f   : > { %v27535_v4 = vsel %vm1312_vm0, %v14450_v50, %v14930_v60  ;;  %v14986_v56 = vrot.slane %v14438_v28, 4  ;;  %v14445_v60 = vshrl.u32 %v27316_v9, 16  ;;  %v14852_v50 = vrot.slane %v27475_v6, 4 }
 0xe90   : > { %v14985_v34 = vsel %vm1312_vm0, %v14984_v27, %v14438_v28  ;;  %v27561_v53 = vperm.slane %v14799_v8, %v23273_v39  ;;  %v14940_v13 = vrot.slane %v27542_v36, 4  ;;  %v14996_v6 = vrot.slane %v27544_v58, 4  ;;  %v27600_v8 = vpop.trf.xlu0 }
 0xe91   : > { %v27551_v47 = vsel %vm1312_vm0, %v14454_v46, %v14986_v56  ;;  %v14853_v30 = vsel %vm1312_vm0, %v14852_v50, %v27448_v63  ;;  %v14909_v46 = vsel %vm1312_vm0, %v14908_v24, %v14883_v1  ;;  %v27572_v2 = vpack.i.b16 %v14445_v60, %v14444_v35 }
 0xe92   : > { %v27546_v20 = vpop.trf.xlu1  ;;  %v27575_v22 = vperm.slane %v14929_v7, %v23267_v21  ;;  %v27578_v28 = vperm.slane %v14985_v34, %v23267_v21  ;;  %v14704_v23 = vrot.slane %v27459_v57, 4  ;;  %v14760_v63 = vrot.slane %v27472_v15, 4 }
 0xe93   : > { %v14758_v24 = vrot.slane %v27558_v42, 4  ;;  %v14814_v1 = vrot.slane %v27561_v53, 4  ;;  %v14716_v19 = vrot.slane %v27493_v12, 4  ;;  %v27588_v9 = vperm.slane %v14853_v30, %v23273_v39 }
 0xe94   : > { %v27591_v27 = vperm.slane %v14909_v46, %v23273_v39  ;;  %v14941_v56 = vsel %vm1312_vm0, %v14940_v13, %v27570_v3  ;;  %v14997_v57 = vsel %vm1312_vm0, %v14996_v6, %v27572_v2  ;;  %v14828_v15 = vrot.slane %v27427_v40, 4 }
 0xe95   : > { %v14954_v12 = vrot.slane %v27575_v22, 4  ;;  %v15010_v35 = vrot.slane %v27578_v28, 4  ;;  %v14705_v60 = vsel %vm1312_vm0, %v14704_v23, %v27432_v41  ;;  %v14761_v50 = vsel %vm1312_vm0, %v14760_v63, %v27438_v51 }
 0xe96   : > { %29362 = vst [vmem:[#allocation23_spill] sm:$0xff] %v27591_v27  ;;  %v14759_v7 = vsel %vm1312_vm0, 0, %v14758_v24  ;;  %v14815_v34 = vsel %vm1312_vm0, 0, %v14814_v1  ;;  %v14717_v40 = vsel %vm1312_vm0, %v14716_v19, %v27480_v29  ;;  %v27615_v13 = vperm.slane %v14941_v56, %v23267_v21 }
 0xe97   : > { %v27618_v6 = vperm.slane %v14997_v57, %v23267_v21  ;;  %v14740_v30 = vrot.slane %v27529_v61, 4  ;;  %v14772_v41 = vrot.slane %v27495_v48, 4  ;;  %v14796_v51 = vrot.slane %v27532_v17, 4  ;;  %v22413_v17 = vpop.trf.xlu2 }
 0xe98   : > { %v14884_v46 = vrot.slane %v27442_v59, 4  ;;  %v27625_v23 = vperm.slane %v14705_v60, %v23267_v21  ;;  %v27628_v29 = vperm.slane %v14761_v50, %v23267_v21  ;;  %v14955_v63 = vsel %vm1312_vm0, %v27615_v13, %v14954_v12 }
 0xe99   : > { %22501 = vxpose.binary.xlu0.c.b16.start.end [1/2] (short) (narrow) %v27591_v27, %v27588_v9, 16  ;;  %v15011_v24 = vsel %vm1312_vm0, %v27618_v6, %v15010_v35  ;;  %v14829_v61 = vsel %vm1312_vm0, %v14828_v15, %v27422_v25  ;;  %v14823_v48 = vperm.slane %v27435_v26, %v23267_v21  ;;  %v14517_v35 = vshrl.u32 %v22413_v17, 16 }
 0xe9a   : > { %v27597_v33 = vpop.trf.xlu1  ;;  %v27640_v59 = vperm.slane %v27451_v5, %v23267_v21  ;;  %v14741_v1 = vsel %vm1312_vm0, %v14740_v30, %v27498_v14  ;;  %v14797_v19 = vsel %vm1312_vm0, %v14796_v51, %v27504_v32  ;;  %v14723_v56 = vperm.slane %v14717_v40, %v23267_v21  ;;  %v27671_v40 = vpop.trf.xlu0 }
 0xe9b   : > { %22459 = vxpose.binary.xlu2.c.b16.start.end [1/2] (short) (narrow) %v14815_v34, %v14759_v7, 16  ;;  %v14773_v57 = vsel %vm1312_vm0, %v14772_v41, %v27482_v44  ;;  %v27650_v15 = vperm.slane %v14955_v63, %v23273_v39  ;;  %v27653_v26 = vperm.slane %v15011_v24, %v23273_v39  ;;  %v14730_v12 = vrot.slane %v27625_v23, 4 }
 0xe9c   : > { %v14835_v5 = vperm.slane %v14829_v61, %v23267_v21  ;;  %v14885_v14 = vsel %vm1312_vm0, %v14884_v46, %v27424_v62  ;;  %v14786_v32 = vrot.slane %v27628_v29, 4  ;;  %22456 = vxpose.binary.xlu1.c.b16.start.end [1/2] (short) (narrow) %v27414_v0, %v27407_v16, 16  ;;  %v14516_v44 = vshrl.u32 %v27580_v11, 16 }
 0xe9d   : > { %29363 = vst [vmem:[#allocation39_spill] sm:$0xff] %v27650_v15  ;;  %v27664_v60 = vperm.slane %v14741_v1, %v23273_v39  ;;  %v27667_v50 = vperm.slane %v14797_v19, %v23273_v39  ;;  %v14779_v7 = vperm.slane %v14773_v57, %v23267_v21  ;;  %v14842_v34 = vrot.slane %v14823_v48, 4 }
 0xe9e   : > { %29364 = vst [vmem:[#allocation38_spill] sm:$0xff] %v27653_v26  ;;  %v14898_v62 = vrot.slane %v27640_v59, 4  ;;  %v27674_v30 = vpack.i.b16 %v22413_v17, %v27580_v11  ;;  %v14978_v16 = vrot.slane %v27650_v15, 4  ;;  %v15034_v0 = vrot.slane %v27653_v26, 4 }
 0xe9f   : > { %v27679_v41 = vperm.slane %v14885_v14, %v23267_v21  ;;  %v14731_v51 = vsel %vm1312_vm0, %v14723_v56, %v14730_v12  ;;  %v14787_v46 = vsel %vm1312_vm0, %v14779_v7, %v14786_v32  ;;  %v14840_v63 = vrot.slane %v14835_v5, 4 }
 0xea0   : > { %v27683_v24 = vpack.i.b16 %v14517_v35, %v14516_v44  ;;  %v14756_v61 = vrot.slane %v27664_v60, 4  ;;  %v14812_v1 = vrot.slane %v27667_v50, 4  ;;  %v15152_v17 = vrot.slane %v27674_v30, 4 }
 0xea1   : > { %v27689_v19 = vsel %vm1312_vm0, %v14835_v5, %v14842_v34  ;;  %v27693_v57 = vsel %vm1312_vm0, %v27679_v41, %v14898_v62  ;;  %v14979_v14 = vsel %vm1312_vm0, 0, %v14978_v16  ;;  %v15035_v12 = vsel %vm1312_vm0, 0, %v15034_v0 }
 0xea2   : > { %v22378_v25 = vpop.trf.xlu1  ;;  %29365 = vst [vmem:[#allocation26_spill] sm:$0xff] %v27683_v24  ;;  %v27698_v44 = vperm.slane %v14731_v51, %v23273_v39  ;;  %v27701_v35 = vperm.slane %v14787_v46, %v23273_v39  ;;  %v14942_v26 = vrot.slane %v27570_v3, 4  ;;  %v15208_v62 = vrot.slane %v27683_v24, 4 }
 0xea3   : > { %v14500_v11 = vshrl.u32 %v22378_v25, 16  ;;  %29366 = vst [vmem:[#allocation25_spill] sm:$0xff] %v27689_v19  ;;  %v14757_v15 = vsel %vm1312_vm0, 0, %v14756_v61  ;;  %v14813_v16 = vsel %vm1312_vm0, 0, %v14812_v1  ;;  %v27710_v0 = vsel %vm1312_vm0, %v14840_v63, %v14823_v48  ;;  %v27724_v63 = vpop.trf.xlu0 }
 0xea4   : > { %29367 = vst [vmem:[#allocation28_spill] sm:$0xff] %v27693_v57  ;;  %v14952_v51 = vrot.slane %v27615_v13, 4  ;;  %v14943_v61 = vsel %vm1312_vm0, %v27542_v36, %v14942_v26  ;;  %v14754_v1 = vrot.slane %v27698_v44, 4  ;;  %v14810_v48 = vrot.slane %v27701_v35, 4 }
 0xea5   : > { %29368 = vst [vmem:[#allocation27_spill] sm:$0xff] %v27710_v0  ;;  %v14951_v26 = vperm.slane %v14943_v61, %v23267_v21  ;;  %v14485_v0 = vshrl.u32 %v27525_v10, 16 }
 0xea6   : > { %v14953_v13 = vsel %vm1312_vm0, %v14952_v51, %v27575_v22  ;;  %v14477_v51 = vshrl.u32 %v27320_v55, 16 }
 0xea9   : > { %22510 = vxpose.binary.xlu0.c.b16.start.end [1/2] (short) (narrow) %v15035_v12, %v14979_v14, 16  ;;  %v14728_v14 = vrot.slane %v14723_v56, 4  ;;  %v27734_v56 = vpop.trf.xlu2 }
 0xeaa   : > { %v22379_v32 = vpop.trf.xlu1 }
 0xeab   : > { %v27704_v5 = vpack.i.b16 %v22379_v32, %v22378_v25  ;;  %v14501_v34 = vshrl.u32 %v22379_v32, 16  ;;  %22465 = vxpose.binary.xlu2.c.b16.start.end [1/2] (short) (narrow) %v14813_v16, %v14757_v15, 16  ;;  %v15008_v25 = vrot.slane %v27618_v6, 4  ;;  %v14729_v36 = vsel %vm1312_vm0, %v14728_v14, %v27625_v23  ;;  %v22430_v19 = vpop.trf.xlu0 }
 0xeac   : > { %v27746_v32 = vperm.slane %v14953_v13, %v23273_v39  ;;  %v14998_v23 = vrot.slane %v27572_v2, 4  ;;  %v27762_v16 = vpack.i.b16 %v27320_v55, %v27318_v45  ;;  %v14964_v14 = vrot.slane %v14951_v26, 4 }
 0xead   : > { %v27713_v46 = vpack.i.b16 %v14501_v34, %v14500_v11  ;;  %v27717_v3 = vsel %vm1312_vm0, %v15152_v17, %v27704_v5  ;;  %v15009_v15 = vsel %vm1312_vm0, %v15008_v25, %v27578_v28  ;;  %v14784_v11 = vrot.slane %v14779_v7, 4 }
 0xeae   : > { %v14939_v17 = vperm.slane %v27535_v4, %v23267_v21  ;;  %v14755_v28 = vsel %vm1312_vm0, 0, %v14754_v1  ;;  %v14811_v7 = vsel %vm1312_vm0, 0, %v14810_v48  ;;  %v27749_v34 = vperm.slane %v15009_v15, %v23273_v39 }
 0xeaf   : > { %v27732_v6 = vsel %vm1312_vm0, %v15208_v62, %v27713_v46  ;;  %v14785_v22 = vsel %vm1312_vm0, %v14784_v11, %v27628_v29  ;;  %v14476_v62 = vshrl.u32 %v27318_v45, 16  ;;  %v27755_v4 = vpack.i.b16 %v27671_v40, %v27600_v8  ;;  %22462 = vxpose.binary.xlu1.c.b16.start.end [1/2] (short) (narrow) %v14811_v7, %v14755_v28, 16 }
 0xeb0   : > { %v27758_v29 = vperm.slane %v14729_v36, %v23273_v39  ;;  %v14466_v25 = vpack.i.b16 %v27597_v33, %v27546_v20  ;;  %v27768_v2 = vperm.slane %v14785_v22, %v23273_v39  ;;  %v14966_v61 = vrot.slane %v14939_v17, 4 }
 0xeb1   : > { %v14484_v1 = vshrl.u32 %v27470_v38, 16  ;;  %v14482_v48 = vpack.i.b16 %v27525_v10, %v27470_v38  ;;  %v14468_v13 = vshrl.u32 %v27546_v20, 16  ;;  %v14469_v45 = vshrl.u32 %v27597_v33, 16 }
 0xeb2   : > { %v22380_v12 = vpop.trf.xlu1  ;;  %29369 = vst [vmem:[#allocation40_spill] sm:$0xff] %v27758_v29  ;;  %v14976_v15 = vrot.slane %v27746_v32, 4  ;;  %v15032_v55 = vrot.slane %v27749_v34, 4  ;;  %v14999_v11 = vsel %vm1312_vm0, %v27544_v58, %v14998_v23  ;;  %v14492_v36 = vshrl.u32 %v27600_v8, 16  ;;  %v22415_v23 = vpop.trf.xlu2 }
 0xeb3   : > { %29370 = vst [vmem:[#allocation21_spill] sm:$0xff] %v27768_v2  ;;  %v15052_v22 = vrot.slane %v27755_v4, 4  ;;  %v14752_v28 = vrot.slane %v27758_v29, 4  ;;  %v15042_v7 = vrot.slane %v14466_v25, 4  ;;  %v14808_v38 = vrot.slane %v27768_v2, 4 }
 0xeb4   : > { %v14896_v20 = vrot.slane %v27679_v41, 4  ;;  %v27785_v33 = vsel %vm1312_vm0, %v14964_v14, %v14939_v17  ;;  %v15040_v57 = vrot.slane %v14482_v48, 4  ;;  %v14532_v27 = vshrl.u32 %v22380_v12, 16 }
 0xeb5   : > { %v27789_v58 = vsel %vm1312_vm0, %v14951_v26, %v14966_v61  ;;  %v27791_v8 = vpack.i.b16 %v14469_v45, %v14468_v13  ;;  %v14977_v29 = vsel %vm1312_vm0, 0, %v14976_v15  ;;  %v15033_v2 = vsel %vm1312_vm0, 0, %v15032_v55 }
 0xeb6   : > { %v27797_v41 = vsel %vm1312_vm0, %v14896_v20, %v27640_v59  ;;  %v14493_v10 = vshrl.u32 %v27671_v40, 16  ;;  %v15053_v17 = vsel %vm1312_vm0, %v15052_v22, %v27762_v16  ;;  %v15043_v61 = vsel %vm1312_vm0, %v14482_v48, %v15042_v7 }
 0xeb7   : > { %v14548_v13 = vshrl.u32 %v27734_v56, 16  ;;  %v14753_v45 = vsel %vm1312_vm0, 0, %v14752_v28  ;;  %v14809_v15 = vsel %vm1312_vm0, 0, %v14808_v38  ;;  %v27809_v59 = vpack.i.b16 %v22415_v23, %v27734_v56 }
 0xeb8   : > { %v14549_v55 = vshrl.u32 %v22415_v23, 16  ;;  %v27818_v48 = vperm.slane %v15053_v17, %v23267_v21  ;;  %v14995_v22 = vperm.slane %v27551_v47, %v23267_v21  ;;  %v14494_v28 = vpack.i.b16 %v14493_v10, %v14492_v36 }
 0xeb9   : > { %22519 = vxpose.binary.xlu0.c.b16.start.end [1/2] (short) (narrow) %v15033_v2, %v14977_v29, 16  ;;  %v15098_v2 = vrot.slane %v27791_v8, 4  ;;  %v14486_v7 = vpack.i.b16 %v14485_v0, %v14484_v1  ;;  %v15051_v38 = vperm.slane %v15043_v61, %v23267_v21  ;;  %v14524_v47 = vshrl.u32 %v27724_v63, 16 }
 0xeba   : > { %v22381_v24 = vpop.trf.xlu1  ;;  %v14525_v17 = vshrl.u32 %v22430_v19, 16  ;;  %v27838_v0 = vpack.i.b16 %v22430_v19, %v27724_v63  ;;  %v15022_v1 = vrot.slane %v14995_v22, 4  ;;  %v15108_v61 = vrot.slane %v14494_v28, 4 }
 0xebb   : > { %v27802_v26 = vpack.i.b16 %v22381_v24, %v22380_v12  ;;  %v14533_v14 = vshrl.u32 %v22381_v24, 16  ;;  %22471 = vxpose.binary.xlu2.c.b16.start.end [1/2] (short) (narrow) %v14809_v15, %v14753_v45, 16  ;;  %v15007_v12 = vperm.slane %v14999_v11, %v23267_v21  ;;  %v15041_v24 = vsel %vm1312_vm0, %v15040_v57, %v14466_v25 }
 0xebc   : > { %v15054_v11 = vrot.slane %v27762_v16, 4  ;;  %v27829_v57 = vperm.slane %v15041_v24, %v23267_v21  ;;  %v27831_v25 = vpack.i.b16 %v14549_v55, %v14548_v13  ;;  %v15078_v13 = vrot.slane %v15051_v38, 4 }
 0xebd   : > { %v27811_v40 = vpack.i.b16 %v14533_v14, %v14532_v27  ;;  %v15266_v29 = vrot.slane %v27802_v26, 4  ;;  %v14478_v27 = vpack.i.b16 %v14477_v51, %v14476_v62  ;;  %v15020_v23 = vrot.slane %v15007_v12, 4  ;;  %v27840_v51 = vpop.trf.xlu0 }
 0xebe   : > { %v15099_v14 = vsel %vm1312_vm0, %v14486_v7, %v15098_v2  ;;  %v15064_v62 = vrot.slane %v27818_v48, 4  ;;  %v15055_v10 = vsel %vm1312_vm0, %v27755_v4, %v15054_v11  ;;  %v27852_v19 = vsel %vm1312_vm0, %v15007_v12, %v15022_v1 }
 0xebf   : > { %v27824_v56 = vsel %vm1312_vm0, %v27809_v59, %v15266_v29  ;;  %v15322_v20 = vrot.slane %v27811_v40, 4  ;;  %22468 = vxpose.binary.xlu1.c.b16.start.end [1/2] (short) (narrow) %v27561_v53, %v27558_v42, 16  ;;  %v15110_v36 = vrot.slane %v14478_v27, 4  ;;  %v15107_v45 = vperm.slane %v15099_v14, %v23267_v21 }
 0xec0   : > { %v27855_v63 = vsel %vm1312_vm0, %v15020_v23, %v14995_v22  ;;  %v27859_v15 = vsel %vm1312_vm0, %v15064_v62, %v27829_v57  ;;  %v15096_v53 = vrot.slane %v14486_v7, 4  ;;  %v27862_v55 = vpack.i.b16 %v14525_v17, %v14524_v47 }
 0xec1   : > { %v27844_v16 = vsel %vm1312_vm0, %v27831_v25, %v15322_v20  ;;  %v15111_v42 = vsel %vm1312_vm0, %v14494_v28, %v15110_v36  ;;  %v15063_v4 = vperm.slane %v15055_v10, %v23267_v21  ;;  %v15164_v29 = vrot.slane %v27838_v0, 4 }
 0xec2   : > { %v14508_v24 = vshrl.u32 %v27322_v31, 16  ;;  %v14509_v12 = vshrl.u32 %v27324_v52, 16  ;;  %v15109_v2 = vsel %vm1312_vm0, %v15108_v61, %v14478_v27  ;;  %v27871_v22 = vpack.i.b16 %v27324_v52, %v27322_v31 }
 0xec3   : > { %v15119_v11 = vperm.slane %v15111_v42, %v23267_v21  ;;  %v27875_v28 = vsel %vm1312_vm0, %v15063_v4, %v15078_v13  ;;  %v15134_v7 = vrot.slane %v15107_v45, 4  ;;  %v15220_v20 = vrot.slane %v27862_v55, 4 }
 0xec4   : > { %v15097_v23 = vsel %vm1312_vm0, %v15096_v53, %v27791_v8  ;;  %v27881_v47 = vperm.slane %v15109_v2, %v23267_v21  ;;  %v15165_v27 = vsel %vm1312_vm0, %v15164_v29, %v27871_v22  ;;  %v27887_v31 = vpack.i.b16 %v14509_v12, %v14508_v24 }
 0xec5   : > { %v27890_v52 = vsel %vm1312_vm0, %v15119_v11, %v15134_v7  ;;  %v15076_v17 = vrot.slane %v15063_v4, 4  ;;  %v15132_v14 = vrot.slane %v15119_v11, 4  ;;  %v27893_v62 = vperm.slane %v15097_v23, %v23267_v21  ;;  %v22432_v8 = vpop.trf.xlu0 }
 0xec6   : > { %v15171_v1 = vperm.slane %v15165_v27, %v23267_v21  ;;  %v15221_v36 = vsel %vm1312_vm0, %v15220_v20, %v27887_v31  ;;  %v15120_v61 = vrot.slane %v27881_v47, 4  ;;  %v15215_v42 = vperm.slane %v27732_v6, %v23267_v21 }
 0xec7   : > { %v15133_v10 = vsel %vm1312_vm0, %v15132_v14, %v15107_v45  ;;  %v15227_v13 = vperm.slane %v15221_v36, %v23267_v21  ;;  %v14540_v45 = vshrl.u32 %v27326_v18, 16  ;;  %v14541_v4 = vshrl.u32 %v27328_v54, 16  ;;  %v27942_v36 = vpop.trf.xlu2 }
 0xec8   : > { %v15234_v6 = vrot.slane %v15215_v42, 4  ;;  %v14556_v11 = vshrl.u32 %v27840_v51, 16  ;;  %v14557_v7 = vshrl.u32 %v22432_v8, 16  ;;  %v14870_v27 = vrot.slane %v27507_v37, 4 }
 0xec9   : > { %22528 = vxpose.binary.xlu0.c.b16.start.end [1/2] (short) (narrow) %v27749_v34, %v27746_v32, 16  ;;  %v15159_v32 = vperm.slane %v27717_v3, %v23267_v21  ;;  %v15077_v34 = vsel %vm1312_vm0, %v15076_v17, %v15051_v38  ;;  %v27916_v3 = vperm.slane %v15133_v10, %v23273_v39  ;;  %v15176_v38 = vrot.slane %v15171_v1, 4 }
 0xeca   : > { %v15232_v24 = vrot.slane %v15227_v13, 4  ;;  %v14926_v17 = vrot.slane %v27510_v49, 4  ;;  %v27940_v14 = vpack.i.b16 %v14541_v4, %v14540_v45  ;;  %v14871_v49 = vsel %vm1312_vm0, 0, %v14870_v27  ;;  %v29372_v27 = vld [vmem:[#allocation26_spill] sm:$0xff] }
 0xecb   : > { %22477 = vxpose.binary.xlu2.c.b16.start.end [1/2] (short) (narrow) %v27667_v50, %v27664_v60, 16  ;;  %v27910_v60 = vsel %vm1312_vm0, %v15120_v61, %v27893_v62  ;;  %v27913_v50 = vperm.slane %v15077_v34, %v23273_v39  ;;  %v15178_v53 = vrot.slane %v15159_v32, 4  ;;  %v27923_v29 = vsel %vm1312_vm0, %v15176_v38, %v15159_v32 }
 0xecc   : > { %v15148_v2 = vrot.slane %v27916_v3, 4  ;;  %v27945_v32 = vsel %vm1312_vm0, %v15227_v13, %v15234_v6  ;;  %v14927_v61 = vsel %vm1312_vm0, 0, %v14926_v17  ;;  %v15334_v13 = vrot.slane %v27940_v14, 4 }
 0xecd   : > { %v15092_v12 = vrot.slane %v27913_v50, 4  ;;  %v22433_v20 = vpop.trf.xlu0  ;;  %v27929_v23 = vsel %vm1312_vm0, %v15171_v1, %v15178_v53  ;;  %v27948_v1 = vpack.i.b16 %v22432_v8, %v27840_v51  ;;  %v15166_v8 = vrot.slane %v27871_v22, 4 }
 0xece   : > { %v15149_v10 = vsel %vm1312_vm0, 0, %v15148_v2  ;;  %v15154_v38 = vrot.slane %v27704_v5, 4  ;;  %v15210_v53 = vrot.slane %v27713_v46, 4  ;;  %v15222_v45 = vrot.slane %v27887_v31, 4 }
 0xecf   : > { %22474 = vxpose.binary.xlu1.c.b16.start.end [1/2] (short) (narrow) %v27701_v35, %v27698_v44, 16  ;;  %v27932_v44 = vsel %vm1312_vm0, %v15232_v24, %v15215_v42  ;;  %v27936_v35 = vpack.i.b16 %v27328_v54, %v27326_v18  ;;  %v15093_v34 = vsel %vm1312_vm0, 0, %v15092_v12  ;;  %v27952_v18 = vpack.i.b16 %v14557_v7, %v14556_v11  ;;  %v27954_v54 = vpop.trf.xlu1  ;;  %v29371_v12 = vld [vmem:[#allocation37_spill] sm:$0xff] }
 0xed0   : > { %v14572_v4 = vshrl.u32 %v27330_v43, 16  ;;  %v15066_v6 = vrot.slane %v27829_v57, 4  ;;  %v15122_v24 = vrot.slane %v27893_v62, 4  ;;  %v27973_v2 = vpack.i.b16 %v29371_v12, %v27330_v43 }
 0xed1   : > { %v15278_v37 = vrot.slane %v27936_v35, 4  ;;  %v15335_v42 = vsel %vm1312_vm0, %v27952_v18, %v15334_v13  ;;  %v14573_v22 = vshrl.u32 %v29371_v12, 16  ;;  %v15275_v5 = vperm.slane %v27824_v56, %v23267_v21  ;;  %v29375_v56 = vld [vmem:[#allocation23_spill] sm:$0xff] }
 0xed2   : > { %v15167_v46 = vsel %vm1312_vm0, %v27838_v0, %v15166_v8  ;;  %v15343_v31 = vperm.slane %v15335_v42, %v23267_v21  ;;  %v14580_v57 = vshrl.u32 %v27942_v36, 16  ;;  %v14868_v62 = vrot.slane %v27588_v9, 4 }
 0xed3   : > { %v15279_v51 = vsel %vm1312_vm0, %v27948_v1, %v15278_v37  ;;  %v15155_v43 = vsel %vm1312_vm0, %v27674_v30, %v15154_v38  ;;  %v15211_v17 = vsel %vm1312_vm0, %v29372_v27, %v15210_v53  ;;  %v29373_v37 = vld [vmem:[#allocation40_spill] sm:$0xff]  ;;  %v15123_v9 = vsel %vm1312_vm0, %v27881_v47, %v15122_v24  ;;  %v29376_v53 = vld [vmem:[#allocation25_spill] sm:$0xff] }
 0xed4   : > { %v15287_v11 = vperm.slane %v15279_v51, %v23267_v21  ;;  %v15067_v51 = vsel %vm1312_vm0, %v27818_v48, %v15066_v6  ;;  %v15302_v8 = vrot.slane %v15275_v5, 4  ;;  %v15331_v42 = vperm.slane %v27844_v16, %v23267_v21 }
 0xed5   : > { %v22434_v7 = vpop.trf.xlu0  ;;  %v28001_v12 = vperm.slane %v29376_v53, %v23273_v39  ;;  %v15356_v27 = vrot.slane %v15343_v31, 4  ;;  %v28008_v6 = vperm.slane %v15211_v17, %v23267_v21  ;;  %v28011_v47 = vperm.slane %v15067_v51, %v23273_v39 }
 0xed6   : > { %v27991_v0 = vpack.i.b16 %v22434_v7, %v22433_v20  ;;  %v14589_v13 = vshrl.u32 %v22434_v7, 16  ;;  %v15300_v30 = vrot.slane %v15287_v11, 4  ;;  %v28014_v16 = vperm.slane %v15123_v9, %v23273_v39 }
 0xed7   : > { %v22383_v38 = vpop.trf.xlu1  ;;  %v28023_v17 = vsel %vm1312_vm0, %v15287_v11, %v15302_v8  ;;  %v28026_v51 = vsel %vm1312_vm0, %v15356_v27, %v15331_v42  ;;  %v15223_v9 = vsel %vm1312_vm0, %v27862_v55, %v15222_v45  ;;  %v15246_v11 = vrot.slane %v28008_v6, 4 }
 0xed8   : > { %v28017_v24 = vsel %vm1312_vm0, %v15300_v30, %v15275_v5  ;;  %29377 = vst [vmem:[#allocation20_spill] sm:$0xff] %v28026_v51  ;;  %v28047_v27 = vperm.slane %v15223_v9, %v23267_v21 }
 0xed9   : > { %22537 = vxpose.binary.xlu0.c.b16.start.end [1/2] (short) (narrow) %v15149_v10, %v15093_v34, 16  ;;  %v14588_v34 = vshrl.u32 %v22433_v20, 16  ;;  %v22417_v10 = vpop.trf.xlu2  ;;  %v28004_v20 = vperm.slane %v15155_v43, %v23267_v21  ;;  %v14564_v43 = vshrl.u32 %v27954_v54, 16 }
 0xeda   : > { %v14578_v7 = vpack.i.b16 %v22417_v10, %v27942_v36  ;;  %v14581_v48 = vshrl.u32 %v22417_v10, 16  ;;  %v14562_v36 = vpack.i.b16 %v22383_v38, %v27954_v54  ;;  %v15358_v10 = vrot.slane %v15331_v42, 4 }
 0xedb   : > { %22483 = vxpose.binary.xlu2.c.b16.start.end [1/2] (short) (narrow) %v14927_v61, %v14871_v49, 16  ;;  %v29374_v49 = vld [vmem:[#allocation21_spill] sm:$0xff]  ;;  %v14924_v61 = vrot.slane %v29375_v56, 4  ;;  %v14565_v56 = vshrl.u32 %v22383_v38, 16  ;;  %v15190_v53 = vrot.slane %v28004_v20, 4  ;;  %v14869_v54 = vsel %vm1312_vm0, 0, %v14868_v62 }
 0xedc   : > { %v14582_v5 = vpack.i.b16 %v14581_v48, %v14580_v57  ;;  %v15376_v30 = vrot.slane %v14578_v7, 4  ;;  %v28038_v8 = vsel %vm1312_vm0, %v15343_v31, %v15358_v10  ;;  %v28044_v38 = vperm.slane %v15167_v46, %v23267_v21 }
 0xedd   : > { %v14566_v57 = vpack.i.b16 %v14565_v56, %v14564_v43  ;;  %v14925_v42 = vsel %vm1312_vm0, 0, %v14924_v61  ;;  %v15378_v48 = vrot.slane %v14562_v36, 4  ;;  %v14866_v62 = vrot.slane %v28001_v12, 4 }
 0xede   : > { %v15432_v31 = vrot.slane %v14582_v5, 4  ;;  %v15377_v10 = vsel %vm1312_vm0, %v15376_v30, %v14562_v36  ;;  %v15191_v61 = vsel %vm1312_vm0, %v28044_v38, %v15190_v53  ;;  %v15247_v46 = vsel %vm1312_vm0, %v28047_v27, %v15246_v11 }
 0xedf   : > { %22480 = vxpose.binary.xlu1.c.b16.start.end [1/2] (short) (narrow) %v29374_v49, %v29373_v37, 16  ;;  %v14590_v37 = vpack.i.b16 %v14589_v13, %v14588_v34  ;;  %v15388_v49 = vrot.slane %v27991_v0, 4  ;;  %v29378_v34 = vld [vmem:[#allocation28_spill] sm:$0xff]  ;;  %v15434_v56 = vrot.slane %v14566_v57, 4  ;;  %v15379_v9 = vsel %vm1312_vm0, %v14578_v7, %v15378_v48 }
 0xee0   : > { %v14907_v13 = vperm.slane %v29378_v34, %v23273_v39  ;;  %v14574_v34 = vpack.i.b16 %v14573_v22, %v14572_v4  ;;  %v28061_v4 = vperm.slane %v15377_v10, %v23267_v21  ;;  %v14867_v22 = vsel %vm1312_vm0, 0, %v14866_v62 }
 0xee1   : > { %v15389_v55 = vsel %vm1312_vm0, %v15388_v49, %v27973_v2  ;;  %v15444_v45 = vrot.slane %v14590_v37, 4  ;;  %v15433_v36 = vsel %vm1312_vm0, %v15432_v31, %v14566_v57  ;;  %v15255_v53 = vperm.slane %v15247_v46, %v23273_v39 }
 0xee2   : > { %v14922_v51 = vrot.slane %v14907_v13, 4  ;;  %v28052_v49 = vperm.slane %v15389_v55, %v23267_v21  ;;  %v15390_v7 = vrot.slane %v27973_v2, 4  ;;  %v15435_v57 = vsel %vm1312_vm0, %v14582_v5, %v15434_v56 }
 0xee3   : > { %v15445_v43 = vsel %vm1312_vm0, %v15444_v45, %v14574_v34  ;;  %v15446_v45 = vrot.slane %v14574_v34, 4  ;;  %v15262_v2 = vrot.slane %v15255_v53, 4  ;;  %v28088_v34 = vperm.slane %v15435_v57, %v23267_v21 }
 0xee4   : > { %v14923_v30 = vsel %vm1312_vm0, 0, %v14922_v51  ;;  %v15400_v11 = vrot.slane %v28052_v49, 4  ;;  %v28070_v55 = vperm.slane %v15445_v43, %v23267_v21  ;;  %v28078_v51 = vperm.slane %v15433_v36, %v23267_v21 }
 0xee5   : > { %v15391_v62 = vsel %vm1312_vm0, %v27991_v0, %v15390_v7  ;;  %v15447_v31 = vsel %vm1312_vm0, %v14590_v37, %v15446_v45  ;;  %v15470_v56 = vrot.slane %v28088_v34, 4 }
 0xee6   : > { %v28082_v48 = vsel %vm1312_vm0, %v15400_v11, %v28061_v4  ;;  %v28093_v46 = vperm.slane %v15391_v62, %v23267_v21  ;;  %v28096_v43 = vperm.slane %v15447_v31, %v23267_v21 }
 0xee8   : > { %v28115_v7 = vsel %vm1312_vm0, %v28096_v43, %v15470_v56  ;;  %v15264_v56 = vrot.slane %v27809_v59, 4 }
 0xee9   : > { %22546 = vxpose.binary.xlu0.c.b16.start.end [1/2] (short) (narrow) %v28014_v16, %v28011_v47, 16 }
 0xeeb   : > { %22489 = vxpose.binary.xlu2.c.b16.start.end [1/2] (short) (narrow) %v14925_v42, %v14869_v54, 16  ;;  %v15199_v54 = vperm.slane %v15191_v61, %v23273_v39  ;;  %v28074_v42 = vperm.slane %v15379_v9, %v23267_v21  ;;  %v15456_v61 = vrot.slane %v28070_v55, 4  ;;  %v15263_v9 = vsel %vm1312_vm0, 0, %v15262_v2 }
 0xeed   : > { %v15206_v10 = vrot.slane %v15199_v54, 4  ;;  %v15414_v5 = vrot.slane %v28074_v42, 4  ;;  %v28101_v0 = vsel %vm1312_vm0, %v15456_v61, %v28078_v51 }
 0xeef   : > { %22486 = vxpose.binary.xlu1.c.b16.start.end [1/2] (short) (narrow) %v14923_v30, %v14867_v22, 16  ;;  %v15207_v37 = vsel %vm1312_vm0, 0, %v15206_v10  ;;  %v29379_v22 = vld [vmem:[#allocation27_spill] sm:$0xff]  ;;  %v14903_v30 = vperm.slane %v27797_v41, %v23273_v39  ;;  %v28111_v11 = vsel %vm1312_vm0, %v28093_v46, %v15414_v5  ;;  %v14975_v41 = vperm.slane %v27789_v58, %v23273_v39 }
 0xef0   : > { %v14847_v36 = vperm.slane %v29379_v22, %v23273_v39  ;;  %v15031_v10 = vperm.slane %v27852_v19, %v23273_v39  ;;  %v15188_v58 = vrot.slane %v28044_v38, 4  ;;  %v15265_v19 = vsel %vm1312_vm0, %v15264_v56, %v27802_v26 }
 0xef1   : > { %v14920_v57 = vrot.slane %v14903_v30, 4  ;;  %v14982_v2 = vrot.slane %v14975_v41, 4  ;;  %v15332_v22 = vrot.slane %v27952_v18, 4  ;;  %v15271_v38 = vperm.slane %v15265_v19, %v23267_v21 }
 0xef2   : > { %v14864_v45 = vrot.slane %v14847_v36, 4  ;;  %v15038_v61 = vrot.slane %v15031_v10, 4  ;;  %v15189_v59 = vsel %vm1312_vm0, %v15188_v58, %v28004_v20  ;;  %v14971_v20 = vperm.slane %v27785_v33, %v23273_v39 }
 0xef3   : > { %v14921_v31 = vsel %vm1312_vm0, 0, %v14920_v57  ;;  %v14983_v5 = vsel %vm1312_vm0, 0, %v14982_v2  ;;  %v28147_v26 = vperm.slane %v15189_v59, %v23273_v39  ;;  %v15333_v18 = vsel %vm1312_vm0, %v15332_v22, %v27940_v14 }
 0xef4   : > { %v14865_v62 = vsel %vm1312_vm0, 0, %v14864_v45 }
 0xef9   : > { %22555 = vxpose.binary.xlu0.c.b16.start.end [1/2] (short) (narrow) %v15263_v9, %v15207_v37, 16  ;;  %v15320_v37 = vrot.slane %v27831_v25, 4  ;;  %v15244_v9 = vrot.slane %v28047_v27, 4 }
 0xefb   : > { %22498 = vxpose.binary.xlu2.c.b16.start.end [1/2] (short) (narrow) %v14907_v13, %v28001_v12, 16  ;;  %v15039_v12 = vsel %vm1312_vm0, 0, %v15038_v61  ;;  %v15245_v25 = vsel %vm1312_vm0, %v15244_v9, %v28008_v6  ;;  %v15027_v6 = vperm.slane %v27855_v63, %v23273_v39 }
 0xefd   : > { %v15036_v14 = vrot.slane %v15027_v6, 4 }
 0xeff   : > { %22495 = vxpose.binary.xlu1.c.b16.start.end [1/2] (short) (narrow) %v14921_v31, %v14865_v62, 16  ;;  %v15339_v62 = vperm.slane %v15333_v18, %v23267_v21  ;;  %v14980_v31 = vrot.slane %v14971_v20, 4 }
 0xf01   : > { %v14981_v63 = vsel %vm1312_vm0, 0, %v14980_v31  ;;  %v29381_v31 = vld [vmem:[#allocation38_spill] sm:$0xff] }
 0xf09   : > { %22564 = vxpose.binary.xlu0.c.b16.start.end [1/2] (short) (narrow) %v15255_v53, %v15199_v54, 16  ;;  %v15321_v54 = vsel %vm1312_vm0, %v15320_v37, %v27811_v40  ;;  %v15276_v53 = vrot.slane %v27948_v1, 4  ;;  %v28150_v40 = vperm.slane %v15245_v25, %v23273_v39 }
 0xf0a   : > { %v15327_v27 = vperm.slane %v15321_v54, %v23267_v21 }
 0xf0b   : > { %22507 = vxpose.binary.xlu2.c.b16.start.end [1/2] (short) (narrow) %v15039_v12, %v14983_v5, 16  ;;  %v15277_v1 = vsel %vm1312_vm0, %v15276_v53, %v27936_v35  ;;  %v15037_v5 = vsel %vm1312_vm0, 0, %v15036_v14  ;;  %v15344_v53 = vrot.slane %v15339_v62, 4 }
 0xf0c   : > { %v28126_v13 = vpop.trf.xlu2  ;;  %v15283_v57 = vperm.slane %v15277_v1, %v23267_v21 }
 0xf0d   : > { %v15345_v1 = vsel %vm1312_vm0, %v15344_v53, %v15327_v27 }
 0xf0e   : > { %v15288_v54 = vrot.slane %v15283_v57, 4 }
 0xf0f   : > { %22504 = vxpose.binary.xlu1.c.b16.start.end [1/2] (short) (narrow) %v14903_v30, %v14847_v36, 16  ;;  %v15290_v36 = vrot.slane %v15271_v38, 4  ;;  %v15346_v30 = vrot.slane %v15327_v27, 4  ;;  %v15087_v27 = vperm.slane %v27875_v28, %v23273_v39  ;;  %v28204_v28 = vperm.slane %v27859_v15, %v23273_v39 }
 0xf10   : > { %v15289_v25 = vsel %vm1312_vm0, %v15288_v54, %v15271_v38 }
 0xf11   : > { %v15291_v33 = vsel %vm1312_vm0, %v15283_v57, %v15290_v36  ;;  %v15347_v61 = vsel %vm1312_vm0, %v15339_v62, %v15346_v30  ;;  %v15295_v18 = vperm.slane %v15289_v25, %v23273_v39  ;;  %v15351_v36 = vperm.slane %v15345_v1, %v23273_v39  ;;  %v29380_v30 = vld [vmem:[#allocation39_spill] sm:$0xff] }
 0xf12   : > { %v28171_v12 = vperm.slane %v15291_v33, %v23273_v39  ;;  %v28174_v56 = vperm.slane %v15347_v61, %v23273_v39  ;;  %v15143_v62 = vperm.slane %v27890_v52, %v23273_v39  ;;  %v28208_v52 = vperm.slane %v27910_v60, %v23273_v39 }
 0xf13   : > { %v15312_v33 = vrot.slane %v15295_v18, 4  ;;  %v15368_v61 = vrot.slane %v15351_v36, 4 }
 0xf14   : > { %v28138_v45 = vpop.trf.xlu2  ;;  %v15370_v37 = vrot.slane %v28174_v56, 4 }
 0xf15   : > { %v15313_v57 = vsel %vm1312_vm0, 0, %v15312_v33  ;;  %v15369_v38 = vsel %vm1312_vm0, 0, %v15368_v61  ;;  %v17542_v33 = vrot.slane %v28126_v13, 4 }
 0xf16   : > { %v15371_v19 = vsel %vm1312_vm0, 0, %v15370_v37 }
 0xf18   : > { %v22436_v2 = vpop.trf.xlu1 }
 0xf19   : > { %22573 = vxpose.binary.xlu0.c.b16.start.end [1/2] (short) (narrow) %v28150_v40, %v28147_v26, 16  ;;  %v17554_v25 = vrot.slane %v22436_v2, 4 }
 0xf1b   : > { %22516 = vxpose.binary.xlu2.c.b16.start.end [1/2] (short) (narrow) %v15031_v10, %v14975_v41, 16  ;;  %v15314_v10 = vrot.slane %v28171_v12, 4 }
 0xf1c   : > { %v28164_v35 = vpop.trf.xlu2 }
 0xf1d   : > { %v15315_v9 = vsel %vm1312_vm0, 0, %v15314_v10  ;;  %v17543_v2 = vsel %vm1312_vm0, %v17542_v33, %v28164_v35 }
 0xf1f   : > { %22513 = vxpose.binary.xlu1.c.b16.start.end [1/2] (short) (narrow) %v15037_v5, %v14981_v63, 16 }
 0xf20   : > { %v22437_v58 = vpop.trf.xlu1 }
 0xf21   : > { %v17592_v61 = vrot.slane %v22437_v58, 4 }
 0xf24   : > { %v28176_v41 = vpop.trf.xlu2 }
 0xf28   : > { %v22445_v59 = vpop.trf.xlu1 }
 0xf29   : > { %22582 = vxpose.binary.xlu0.c.b16.start.end [1/2] (short) (narrow) %v15371_v19, %v15315_v9, 16  ;;  %v22442_v9 = vpop.trf.xlu0 }
 0xf2a   : > { %v17555_v15 = vsel %vm1312_vm0, %v17554_v25, %v22442_v9 }
 0xf2b   : > { %22525 = vxpose.binary.xlu2.c.b16.start.end [1/2] (short) (narrow) %v15027_v6, %v14971_v20, 16  ;;  %v15090_v20 = vrot.slane %v28011_v47, 4  ;;  %v15146_v6 = vrot.slane %v28014_v16, 4  ;;  %v15094_v47 = vrot.slane %v15087_v27, 4  ;;  %v15150_v16 = vrot.slane %v15143_v62, 4 }
 0xf2c   : > { %v22454_v22 = vpop.trf.xlu2 }
 0xf2d   : > { %v15091_v5 = vsel %vm1312_vm0, 0, %v15090_v20  ;;  %v15147_v10 = vsel %vm1312_vm0, 0, %v15146_v6  ;;  %v15095_v54 = vsel %vm1312_vm0, 0, %v15094_v47  ;;  %v15151_v53 = vsel %vm1312_vm0, 0, %v15150_v16 }
 0xf2e   : > { %v17548_v20 = vrot.slane %v22445_v59, 4  ;;  %v15144_v6 = vrot.slane %v28208_v52, 4  ;;  %v15468_v59 = vrot.slane %v28096_v43, 4  ;;  %v17559_v47 = vperm.slane %v17555_v15, %v23267_v21 }
 0xf2f   : > { %22522 = vxpose.binary.xlu1.c.b16.start.end [1/2] (short) (narrow) %v29381_v31, %v29380_v30, 16  ;;  %v15088_v31 = vrot.slane %v28204_v28, 4  ;;  %v17547_v16 = vperm.slane %v17543_v2, %v23267_v21 }
 0xf30   : > { %v22446_v63 = vpop.trf.xlu1  ;;  %v17549_v13 = vsel %vm1312_vm0, %v17548_v20, %v22454_v22  ;;  %v15145_v58 = vsel %vm1312_vm0, 0, %v15144_v6 }
 0xf31   : > { %v15089_v60 = vsel %vm1312_vm0, 0, %v15088_v31  ;;  %v17553_v9 = vperm.slane %v17549_v13, %v23267_v21  ;;  %v17560_v33 = vrot.slane %v17547_v16, 4 }
 0xf34   : > { %v22455_v14 = vpop.trf.xlu2 }
 0xf38   : > { %v22451_v19 = vpop.trf.xlu1 }
 0xf39   : > { %22591 = vxpose.binary.xlu0.c.b16.start.end [1/2] (short) (narrow) %v15369_v38, %v15313_v57, 16  ;;  %v22443_v57 = vpop.trf.xlu0  ;;  %v17586_v38 = vrot.slane %v22446_v63, 4  ;;  %v17580_v63 = vrot.slane %v28138_v45, 4 }
 0xf3b   : > { %22534 = vxpose.binary.xlu2.c.b16.start.end [1/2] (short) (narrow) %v15147_v10, %v15091_v5, 16  ;;  %v15412_v5 = vrot.slane %v28093_v46, 4  ;;  %v17593_v10 = vsel %vm1312_vm0, %v17592_v61, %v22443_v57  ;;  %v17587_v46 = vsel %vm1312_vm0, %v17586_v38, %v22455_v14 }
 0xf3c   : > { %v28198_v37 = vpop.trf.xlu2  ;;  %v17597_v22 = vperm.slane %v17593_v10, %v23267_v21  ;;  %v17591_v14 = vperm.slane %v17587_v46, %v23267_v21 }
 0xf3d   : > { %v15413_v35 = vsel %vm1312_vm0, %v15412_v5, %v28074_v42  ;;  %v17581_v42 = vsel %vm1312_vm0, %v17580_v63, %v28176_v41 }
 0xf3e   : > { %v28242_v25 = vperm.slane %v15413_v35, %v23273_v39  ;;  %v17604_v61 = vrot.slane %v17597_v22, 4  ;;  %v17585_v20 = vperm.slane %v17581_v42, %v23267_v21 }
 0xf3f   : > { %22531 = vxpose.binary.xlu1.c.b16.start.end [1/2] (short) (narrow) %v15151_v53, %v15095_v54, 16  ;;  %v15469_v54 = vsel %vm1312_vm0, %v15468_v59, %v28088_v34  ;;  %v17566_v53 = vrot.slane %v17559_v47, 4 }
 0xf40   : > { %v22452_v30 = vpop.trf.xlu1  ;;  %v28245_v31 = vperm.slane %v15469_v54, %v23273_v39  ;;  %v17605_v6 = vsel %vm1312_vm0, %v17604_v61, %v17591_v14  ;;  %v15428_v5 = vrot.slane %v28242_v25, 4  ;;  %v17598_v13 = vrot.slane %v17585_v20, 4 }
 0xf41   : > { %v17567_v34 = vsel %vm1312_vm0, %v17566_v53, %v17553_v9  ;;  %v17574_v41 = vrot.slane %v22452_v30, 4  ;;  %v17609_v10 = vperm.slane %v17605_v6, %v23273_v39  ;;  %v15402_v14 = vrot.slane %v28061_v4, 4 }
 0xf42   : > { %v17571_v15 = vperm.slane %v17567_v34, %v23273_v39  ;;  %v15429_v47 = vsel %vm1312_vm0, 0, %v15428_v5  ;;  %v15204_v61 = vrot.slane %v28147_v26, 4  ;;  %v15260_v4 = vrot.slane %v28150_v40, 4 }
 0xf43   : > { %v17610_v46 = vrot.slane %v17609_v10, 4 }
 0xf44   : > { %v28210_v1 = vpop.trf.xlu2  ;;  %v17572_v59 = vrot.slane %v17571_v15, 4  ;;  %v15261_v26 = vsel %vm1312_vm0, 0, %v15260_v4 }
 0xf48   : > { %v22457_v43 = vpop.trf.xlu1 }
 0xf49   : > { %22600 = vxpose.binary.xlu0.c.b16.start.end [1/2] (short) (narrow) %v15351_v36, %v15295_v18, 16  ;;  %v17536_v18 = vrot.slane %v22451_v19, 4 }
 0xf4b   : > { %22543 = vxpose.binary.xlu2.c.b16.start.end [1/2] (short) (narrow) %v15145_v58, %v15089_v60, 16  ;;  %v17537_v45 = vsel %vm1312_vm0, %v17536_v18, %v22457_v43  ;;  %v15484_v60 = vrot.slane %v28245_v31, 4 }
 0xf4c   : > { %v28227_v36 = vpop.trf.xlu2  ;;  %v17541_v19 = vperm.slane %v17537_v45, %v23267_v21 }
 0xf4d   : > { %v15485_v30 = vsel %vm1312_vm0, 0, %v15484_v60  ;;  %v15183_v60 = vperm.slane %v27923_v29, %v23273_v39  ;;  %v15367_v29 = vperm.slane %v28038_v8, %v23273_v39 }
 0xf4e   : > { %v17561_v57 = vsel %vm1312_vm0, %v17560_v33, %v17541_v19  ;;  %v15458_v19 = vrot.slane %v28078_v51, 4 }
 0xf4f   : > { %22540 = vxpose.binary.xlu1.c.b16.start.end [1/2] (short) (narrow) %v15143_v62, %v15087_v27, 16  ;;  %v17565_v27 = vperm.slane %v17561_v57, %v23273_v39  ;;  %v28298_v57 = vpop.trf.xlu0 }
 0xf50   : > { %v22458_v2 = vpop.trf.xlu1  ;;  %v15459_v42 = vsel %vm1312_vm0, %v28070_v55, %v15458_v19  ;;  %v15205_v55 = vsel %vm1312_vm0, 0, %v15204_v61 }
 0xf51   : > { %v17575_v62 = vsel %vm1312_vm0, %v17574_v41, %v22458_v2  ;;  %v17573_v18 = vsel %vm1312_vm0, %v17572_v59, %v17565_v27  ;;  %v15239_v2 = vperm.slane %v27932_v44, %v23273_v39  ;;  %v15200_v27 = vrot.slane %v15183_v60, 4 }
 0xf52   : > { %v17579_v58 = vperm.slane %v17575_v62, %v23267_v21  ;;  %v18147_v9 = vshrl.u32 %v17573_v18, 16  ;;  %v17630_v44 = vrot.slane %v28198_v37, 4 }
 0xf53   : > { %v15256_v62 = vrot.slane %v15239_v2, 4 }
 0xf54   : > { %v28252_v38 = vpop.trf.xlu2  ;;  %v17599_v63 = vsel %vm1312_vm0, %v17598_v13, %v17579_v58  ;;  %v15201_v58 = vsel %vm1312_vm0, 0, %v15200_v27 }
 0xf55   : > { %v17603_v35 = vperm.slane %v17599_v63, %v23273_v39  ;;  %v15257_v59 = vsel %vm1312_vm0, 0, %v15256_v62 }
 0xf57   : > { %v17611_v16 = vsel %vm1312_vm0, %v17610_v46, %v17603_v35  ;;  %v28302_v5 = vpop.trf.xlu0  ;;  %v17668_v35 = vrot.slane %v28210_v1, 4 }
 0xf58   : > { %v18148_v43 = vshrl.u32 %v17611_v16, 16  ;;  %v18146_v45 = vpack.i.b16 %v17611_v16, %v17573_v18 }
 0xf59   : > { %22609 = vxpose.binary.xlu0.c.b16.start.end [1/2] (short) (narrow) %v15485_v30, %v15429_v47, 16  ;;  %v15311_v47 = vperm.slane %v28023_v17, %v23273_v39  ;;  %v17669_v8 = vsel %vm1312_vm0, %v17668_v35, %v28252_v38  ;;  %v15307_v35 = vperm.slane %v28017_v24, %v23273_v39 }
 0xf5a   : > { %20536 = vmatmul.msk.bf16.vlgmr.msrb.gmra.mxu0 %vm5745_vm1, %v18146_v45  ;;  %v18149_v53 = vpack.i.b16 %v18148_v43, %v18147_v9  ;;  %v15374_v43 = vrot.slane %v15367_v29, 4  ;;  %v17631_v45 = vsel %vm1312_vm0, %v17630_v44, %v28227_v36  ;;  %v17673_v38 = vperm.slane %v17669_v8, %v23267_v21 }
 0xf5b   : > { %22552 = vxpose.binary.xlu2.c.b16.start.end [1/2] (short) (narrow) %v28208_v52, %v28204_v28, 16  ;;  %v22463_v54 = vpop.trf.xlu1  ;;  %v15403_v52 = vsel %vm1312_vm0, %v28052_v49, %v15402_v14  ;;  %v15243_v49 = vperm.slane %v27945_v32, %v23273_v39  ;;  %v15318_v18 = vrot.slane %v15311_v47, 4  ;;  %v17635_v1 = vperm.slane %v17631_v45, %v23267_v21 }
 0xf5c   : > { %v22472_v22 = vpop.trf.xlu2  ;;  %20544 = vmatmul.msk.bf16.vlgmr.msrb.gmra.mxu1 %vm5745_vm1, %v18149_v53  ;;  %v28285_v51 = vperm.slane %v15403_v52, %v23273_v39  ;;  %v17618_v16 = vrot.slane %v22463_v54, 4  ;;  %v15375_v19 = vsel %vm1312_vm0, 0, %v15374_v43 }
 0xf5d   : > { %v15258_v20 = vrot.slane %v15243_v49, 4  ;;  %v15319_v53 = vsel %vm1312_vm0, 0, %v15318_v18 }
 0xf5e   : > { %v17619_v37 = vsel %vm1312_vm0, %v17618_v16, %v22472_v22  ;;  %v29382_v16 = vld [vmem:[#allocation20_spill] sm:$0xff] }
 0xf5f   : > { %22549 = vxpose.binary.xlu1.c.b16.start.end [1/2] (short) (narrow) %v27916_v3, %v27913_v50, 16  ;;  %v28288_v50 = vperm.slane %v15459_v42, %v23273_v39  ;;  %v15187_v3 = vperm.slane %v27929_v23, %v23273_v39  ;;  %v15259_v23 = vsel %vm1312_vm0, 0, %v15258_v20  ;;  %v28314_v30 = vpop.trf.xlu0  ;;  %v17623_v22 = vperm.slane %v17619_v37, %v23267_v21 }
 0xf60   : > { %v15316_v37 = vrot.slane %v15307_v35, 4 }
 0xf61   : > { %v15202_v34 = vrot.slane %v15187_v3, 4  ;;  %v17636_v20 = vrot.slane %v17623_v22, 4 }
 0xf63   : > { %v28280_v33 = vpop.trf.xlu1  ;;  %v15203_v15 = vsel %vm1312_vm0, 0, %v15202_v34  ;;  %v17680_v34 = vrot.slane %v17673_v38, 4  ;;  %v15317_v38 = vsel %vm1312_vm0, 0, %v15316_v37 }
 0xf64   : > { %v28274_v28 = vpop.trf.xlu2  ;;  %v17656_v52 = vrot.slane %v28280_v33, 4 }
 0xf66   : > { %v17657_v33 = vsel %vm1312_vm0, %v17656_v52, %v28274_v28 }
 0xf67   : > { %v28331_v54 = vpop.trf.xlu0 }
 0xf69   : > { %22618 = vxpose.binary.xlu0.c.b16.start.end [1/2] (short) (narrow) %v28288_v50, %v28285_v51, 16 }
 0xf6b   : > { %22561 = vxpose.binary.xlu2.c.b16.start.end [1/2] (short) (narrow) %v15261_v26, %v15205_v55, 16  ;;  %v22469_v6 = vpop.trf.xlu1  ;;  %v17642_v55 = vrot.slane %v17635_v1, 4 }
 0xf6c   : > { %v22478_v40 = vpop.trf.xlu2  ;;  %v17624_v9 = vrot.slane %v22469_v6, 4 }
 0xf6e   : > { %v17625_v14 = vsel %vm1312_vm0, %v17624_v9, %v22478_v40  ;;  %v15363_v9 = vperm.slane %v29382_v16, %v23273_v39 }
 0xf6f   : > { %22558 = vxpose.binary.xlu1.c.b16.start.end [1/2] (short) (narrow) %v15259_v23, %v15203_v15, 16  ;;  %v17629_v4 = vperm.slane %v17625_v14, %v23267_v21  ;;  %v17661_v15 = vperm.slane %v17657_v33, %v23267_v21 }
 0xf70   : > { %v15372_v14 = vrot.slane %v15363_v9, 4 }
 0xf71   : > { %v17643_v6 = vsel %vm1312_vm0, %v17642_v55, %v17629_v4 }
 0xf72   : > { %v17647_v27 = vperm.slane %v17643_v6, %v23273_v39  ;;  %v15373_v22 = vsel %vm1312_vm0, 0, %v15372_v14 }
 0xf73   : > { %v22470_v41 = vpop.trf.xlu1 }
 0xf74   : > { %v22479_v32 = vpop.trf.xlu2  ;;  %v17662_v17 = vrot.slane %v22470_v41, 4  ;;  %v28349_v41 = vpop.trf.xlu0  ;;  %v17648_v18 = vrot.slane %v17647_v27, 4 }
 0xf76   : > { %v17663_v36 = vsel %vm1312_vm0, %v17662_v17, %v22479_v32 }
 0xf77   : > { %v17667_v26 = vperm.slane %v17663_v36, %v23267_v21 }
 0xf79   : > { %v17681_v23 = vsel %vm1312_vm0, %v17680_v34, %v17667_v26 }
 0xf7a   : > { %v17685_v28 = vperm.slane %v17681_v23, %v23273_v39  ;;  %v15482_v23 = vrot.slane %v28288_v50, 4 }
 0xf7b   : > { %22570 = vxpose.binary.xlu2.c.b16.start.end [1/2] (short) (narrow) %v15243_v49, %v15187_v3, 16  ;;  %v22475_v13 = vpop.trf.xlu1 }
 0xf7c   : > { %v28308_v10 = vpop.trf.xlu2  ;;  %v17612_v42 = vrot.slane %v22475_v13, 4  ;;  %v17686_v43 = vrot.slane %v17685_v28, 4  ;;  %v28364_v36 = vpop.trf.xlu0 }
 0xf7d   : > { %v17706_v26 = vrot.slane %v28308_v10, 4 }
 0xf7f   : > { %22567 = vxpose.binary.xlu1.c.b16.start.end [1/2] (short) (narrow) %v15257_v59, %v15201_v58, 16 }
 0xf83   : > { %v22476_v46 = vpop.trf.xlu1 }
 0xf84   : > { %v28319_v63 = vpop.trf.xlu2  ;;  %v17650_v62 = vrot.slane %v22476_v46, 4  ;;  %v28372_v4 = vpop.trf.xlu0 }
 0xf8b   : > { %22579 = vxpose.binary.xlu2.c.b16.start.end [1/2] (short) (narrow) %v15375_v19, %v15319_v53, 16  ;;  %v22481_v3 = vpop.trf.xlu1 }
 0xf8c   : > { %v28335_v61 = vpop.trf.xlu2  ;;  %v17613_v49 = vsel %vm1312_vm0, %v17612_v42, %v22481_v3  ;;  %v28378_v55 = vpop.trf.xlu0 }
 0xf8d   : > { %v17617_v40 = vperm.slane %v17613_v49, %v23267_v21  ;;  %v17707_v6 = vsel %vm1312_vm0, %v17706_v26, %v28335_v61 }
 0xf8f   : > { %22576 = vxpose.binary.xlu1.c.b16.start.end [1/2] (short) (narrow) %v15239_v2, %v15183_v60, 16  ;;  %v17637_v32 = vsel %vm1312_vm0, %v17636_v20, %v17617_v40  ;;  %v17674_v60 = vrot.slane %v17661_v15, 4  ;;  %v17744_v40 = vrot.slane %v28319_v63, 4  ;;  %v17700_v20 = vrot.slane %v28298_v57, 4 }
 0xf90   : > { %v17641_v59 = vperm.slane %v17637_v32, %v23273_v39  ;;  %v15426_v15 = vrot.slane %v28285_v51, 4  ;;  %v28397_v32 = vperm.slane %v28115_v7, %v23273_v39  ;;  %v17711_v57 = vperm.slane %v17707_v6, %v23267_v21 }
 0xf91   : > { %v17701_v51 = vsel %vm1312_vm0, %v17700_v20, %v28314_v30 }
 0xf92   : > { %v17649_v17 = vsel %vm1312_vm0, %v17648_v18, %v17641_v59  ;;  %v15427_v61 = vsel %vm1312_vm0, 0, %v15426_v15  ;;  %v15486_v30 = vrot.slane %v28397_v32, 4  ;;  %v17718_v28 = vrot.slane %v17711_v57, 4 }
 0xf93   : > { %v22482_v58 = vpop.trf.xlu1  ;;  %v18153_v52 = vshrl.u32 %v17649_v17, 16  ;;  %v17705_v59 = vperm.slane %v17701_v51, %v23267_v21 }
 0xf94   : > { %v22491_v13 = vpop.trf.xlu2  ;;  %v17651_v44 = vsel %vm1312_vm0, %v17650_v62, %v22482_v58  ;;  %v28406_v27 = vpop.trf.xlu0 }
 0xf95   : > { %v17655_v2 = vperm.slane %v17651_v44, %v23267_v21  ;;  %v17745_v10 = vsel %vm1312_vm0, %v17744_v40, %v22491_v13 }
 0xf97   : > { %v17675_v46 = vsel %vm1312_vm0, %v17674_v60, %v17655_v2 }
 0xf98   : > { %v17679_v45 = vperm.slane %v17675_v46, %v23273_v39 }
 0xf9a   : > { %v17687_v53 = vsel %vm1312_vm0, %v17686_v43, %v17679_v45  ;;  %v15487_v43 = vsel %vm1312_vm0, 0, %v15486_v30  ;;  %v17719_v45 = vsel %vm1312_vm0, %v17718_v28, %v17705_v59  ;;  %v17770_v30 = vrot.slane %v28349_v41, 4 }
 0xf9b   : > { %22588 = vxpose.binary.xlu2.c.b16.start.end [1/2] (short) (narrow) %v15367_v29, %v15311_v47, 16  ;;  %v22487_v19 = vpop.trf.xlu1  ;;  %v18152_v1 = vpack.i.b16 %v17687_v53, %v17649_v17  ;;  %v18154_v24 = vshrl.u32 %v17687_v53, 16  ;;  %v15407_v53 = vperm.slane %v28082_v48, %v23273_v39 }
 0xf9c   : > { %v22499_v8 = vpop.trf.xlu2  ;;  %v17694_v63 = vrot.slane %v22487_v19, 4 }
 0xf9d   : > { %20537 = vmatmul.msk.bf16.gmra.mxu0 %vm5745_vm1, %v18152_v1  ;;  %v18155_v42 = vpack.i.b16 %v18154_v24, %v18153_v52  ;;  %v17688_v62 = vrot.slane %v22499_v8, 4  ;;  %v15463_v8 = vperm.slane %v28101_v0, %v23273_v39  ;;  %v17723_v1 = vperm.slane %v17719_v45, %v23273_v39 }
 0xf9f   : > { %22585 = vxpose.binary.xlu1.c.b16.start.end [1/2] (short) (narrow) %v15373_v22, %v15317_v38, 16  ;;  %v15424_v38 = vrot.slane %v15407_v53, 4  ;;  %v28432_v22 = vpop.trf.xlu0 }
 0xfa0   : > { %20545 = vmatmul.msk.bf16.gmra.mxu1 %vm5745_vm1, %v18155_v42 }
 0xfa3   : > { %v22488_v29 = vpop.trf.xlu1 }
 0xfa4   : > { %v28370_v47 = vpop.trf.xlu2  ;;  %v17732_v2 = vrot.slane %v22488_v29, 4 }
 0xfa5   : > { %v17726_v52 = vrot.slane %v28370_v47, 4  ;;  %v15425_v47 = vsel %vm1312_vm0, 0, %v15424_v38 }
 0xfab   : > { %22597 = vxpose.binary.xlu2.c.b16.start.end [1/2] (short) (narrow) %v15363_v9, %v15307_v35, 16  ;;  %v22496_v49 = vpop.trf.xlu1 }
 0xfac   : > { %v28374_v3 = vpop.trf.xlu2  ;;  %v17695_v50 = vsel %vm1312_vm0, %v17694_v63, %v22496_v49  ;;  %v15480_v49 = vrot.slane %v15463_v8, 4 }
 0xfad   : > { %v17699_v44 = vperm.slane %v17695_v50, %v23267_v21 }
 0xfaf   : > { %22594 = vxpose.binary.xlu1.c.b16.start.end [1/2] (short) (narrow) %v28174_v56, %v28171_v12, 16  ;;  %v28391_v12 = vperm.slane %v28111_v11, %v23273_v39  ;;  %v17738_v56 = vrot.slane %v28302_v5, 4  ;;  %v15483_v11 = vsel %vm1312_vm0, 0, %v15482_v23  ;;  %v17749_v5 = vperm.slane %v17745_v10, %v23267_v21 }
 0xfb0   : > { %v17712_v17 = vrot.slane %v17699_v44, 4  ;;  %v15481_v23 = vsel %vm1312_vm0, 0, %v15480_v49 }
 0xfb1   : > { %v17739_v7 = vsel %vm1312_vm0, %v17738_v56, %v28331_v54  ;;  %v15430_v58 = vrot.slane %v28391_v12, 4  ;;  %v17756_v35 = vrot.slane %v17749_v5, 4  ;;  %v28445_v5 = vpop.trf.xlu0 }
 0xfb2   : > { %v17743_v16 = vperm.slane %v17739_v7, %v23267_v21 }
 0xfb3   : > { %v22497_v34 = vpop.trf.xlu1  ;;  %v15431_v46 = vsel %vm1312_vm0, 0, %v15430_v58  ;;  %v17782_v58 = vrot.slane %v28374_v3, 4 }
 0xfb4   : > { %v28382_v33 = vpop.trf.xlu2  ;;  %v17733_v9 = vsel %vm1312_vm0, %v17732_v2, %v22497_v34  ;;  %v17757_v37 = vsel %vm1312_vm0, %v17756_v35, %v17743_v16  ;;  %v17724_v34 = vrot.slane %v17723_v1, 4  ;;  %v17808_v16 = vrot.slane %v28364_v36, 4 }
 0xfb5   : > { %v17737_v14 = vperm.slane %v17733_v9, %v23267_v21  ;;  %v17761_v48 = vperm.slane %v17757_v37, %v23273_v39  ;;  %v17820_v28 = vrot.slane %v28382_v33, 4 }
 0xfb6   : > { %v17809_v36 = vsel %vm1312_vm0, %v17808_v16, %v28378_v55 }
 0xfb7   : > { %v17750_v26 = vrot.slane %v17737_v14, 4  ;;  %v17762_v6 = vrot.slane %v17761_v48, 4 }
 0xfbb   : > { %22606 = vxpose.binary.xlu2.c.b16.start.end [1/2] (short) (narrow) %v15483_v11, %v15427_v61, 16  ;;  %v22505_v60 = vpop.trf.xlu1 }
 0xfbc   : > { %v28410_v13 = vpop.trf.xlu2  ;;  %v17689_v18 = vsel %vm1312_vm0, %v17688_v62, %v22505_v60  ;;  %v28455_v60 = vpop.trf.xlu0 }
 0xfbd   : > { %v17693_v54 = vperm.slane %v17689_v18, %v23267_v21  ;;  %v17776_v59 = vrot.slane %v28410_v13, 4 }
 0xfbf   : > { %22603 = vxpose.binary.xlu1.c.b16.start.end [1/2] (short) (narrow) %v15487_v43, %v15431_v46, 16  ;;  %v17713_v19 = vsel %vm1312_vm0, %v17712_v17, %v17693_v54 }
 0xfc0   : > { %v17717_v29 = vperm.slane %v17713_v19, %v23273_v39 }
 0xfc2   : > { %v17725_v56 = vsel %vm1312_vm0, %v17724_v34, %v17717_v29 }
 0xfc3   : > { %v22506_v42 = vpop.trf.xlu1  ;;  %v18159_v50 = vshrl.u32 %v17725_v56, 16 }
 0xfc4   : > { %v22518_v24 = vpop.trf.xlu2  ;;  %v17727_v0 = vsel %vm1312_vm0, %v17726_v52, %v22506_v42  ;;  %v22547_v52 = vpop.trf.xlu0 }
 0xfc5   : > { %v17731_v40 = vperm.slane %v17727_v0, %v23267_v21  ;;  %v17814_v2 = vrot.slane %v22518_v24, 4 }
 0xfc7   : > { %v17751_v20 = vsel %vm1312_vm0, %v17750_v26, %v17731_v40 }
 0xfc8   : > { %v17755_v15 = vperm.slane %v17751_v20, %v23273_v39 }
 0xfca   : > { %v17763_v10 = vsel %vm1312_vm0, %v17762_v6, %v17755_v15 }
 0xfcb   : > { %22615 = vxpose.binary.xlu2.c.b16.start.end [1/2] (short) (narrow) %v15481_v23, %v15425_v47, 16  ;;  %v22514_v57 = vpop.trf.xlu1  ;;  %v18158_v51 = vpack.i.b16 %v17763_v10, %v17725_v56  ;;  %v18160_v61 = vshrl.u32 %v17763_v10, 16 }
 0xfcc   : > { %v22526_v63 = vpop.trf.xlu2  ;;  %v17783_v44 = vsel %vm1312_vm0, %v17782_v58, %v22514_v57  ;;  %v22548_v57 = vpop.trf.xlu0 }
 0xfcd   : > { %20538 = vmatmul.msk.bf16.gmra.mxu0 %vm5745_vm1, %v18158_v51  ;;  %v18161_v11 = vpack.i.b16 %v18160_v61, %v18159_v50  ;;  %v17777_v3 = vsel %vm1312_vm0, %v17776_v59, %v22526_v63 }
 0xfce   : > { %v17781_v45 = vperm.slane %v17777_v3, %v23267_v21 }
 0xfcf   : > { %22612 = vxpose.binary.xlu1.c.b16.start.end [1/2] (short) (narrow) %v28397_v32, %v28391_v12, 16  ;;  %v17787_v12 = vperm.slane %v17783_v44, %v23267_v21  ;;  %v17771_v32 = vsel %vm1312_vm0, %v17770_v30, %v28372_v4 }
 0xfd0   : > { %20546 = vmatmul.msk.bf16.gmra.mxu1 %vm5745_vm1, %v18161_v11  ;;  %v17775_v46 = vperm.slane %v17771_v32, %v23267_v21 }
 0xfd1   : > { %v17794_v43 = vrot.slane %v17787_v12, 4 }
 0xfd2   : > { %v17788_v19 = vrot.slane %v17775_v46, 4 }
 0xfd3   : > { %v22515_v62 = vpop.trf.xlu1  ;;  %v17795_v1 = vsel %vm1312_vm0, %v17794_v43, %v17781_v45  ;;  %v17878_v45 = vrot.slane %v22548_v57, 4 }
 0xfd4   : > { %v22527_v7 = vpop.trf.xlu2  ;;  %v17821_v18 = vsel %vm1312_vm0, %v17820_v28, %v22515_v62  ;;  %v17799_v29 = vperm.slane %v17795_v1, %v23273_v39  ;;  %v28493_v58 = vpop.trf.xlu0 }
 0xfd5   : > { %v17825_v33 = vperm.slane %v17821_v18, %v23267_v21  ;;  %v17815_v54 = vsel %vm1312_vm0, %v17814_v2, %v22527_v7 }
 0xfd6   : > { %v17819_v37 = vperm.slane %v17815_v54, %v23267_v21  ;;  %v17800_v47 = vrot.slane %v17799_v29, 4 }
 0xfd7   : > { %v18228_v13 = vpop.f32.mrf.mxu0 }
 0xfd9   : > { %v18304_v17 = vpop.f32.mrf.mxu1 }
 0xfdb   : > { %22624 = vxpose.binary.xlu2.c.b16.start.end [1/2] (short) (narrow) %v15463_v8, %v15407_v53, 16  ;;  %v22523_v35 = vpop.trf.xlu1  ;;  %v22627_v53 = vpack.i.bf16 %v18304_v17, %v18228_v13  ;;  %v17832_v8 = vrot.slane %v17825_v33, 4 }
 0xfdc   : > { %v28462_v41 = vpop.trf.xlu2  ;;  %v17764_v9 = vrot.slane %v22523_v35, 4  ;;  %v28495_v59 = vpop.trf.xlu0  ;;  %v17840_v35 = vrot.slane %v22547_v52, 4 }
 0xfdd   : > { %22628 = vxpose.xlu0.b32.start [1/16] (narrow) %v22627_v53, 8  ;;  %v17833_v42 = vsel %vm1312_vm0, %v17832_v8, %v17819_v37  ;;  %v17846_v32 = vrot.slane %v28462_v41, 4 }
 0xfde   : > { %v17765_v4 = vsel %vm1312_vm0, %v17764_v9, %v28406_v27  ;;  %v17813_v27 = vperm.slane %v17809_v36, %v23267_v21  ;;  %v17837_v55 = vperm.slane %v17833_v42, %v23273_v39 }
 0xfdf   : > { %v17769_v14 = vperm.slane %v17765_v4, %v23267_v21  ;;  %22621 = vxpose.binary.xlu1.c.b16.start.end [1/2] (short) (narrow) %v28245_v31, %v28242_v25, 16  ;;  %v18230_v25 = vpop.f32.mrf.mxu0 }
 0xfe0   : > { %v17826_v34 = vrot.slane %v17813_v27, 4  ;;  %v17838_v15 = vrot.slane %v17837_v55, 4 }
 0xfe1   : > { %v17789_v48 = vsel %vm1312_vm0, %v17788_v19, %v17769_v14  ;;  %v18306_v31 = vpop.f32.mrf.mxu1 }
 0xfe2   : > { %v22629_v26 = vpack.i.bf16 %v18306_v31, %v18230_v25  ;;  %v17793_v40 = vperm.slane %v17789_v48, %v23273_v39 }
 0xfe3   : > { %v22524_v38 = vpop.trf.xlu1 }
 0xfe4   : > { %v22536_v24 = vpop.trf.xlu2  ;;  %v17802_v0 = vrot.slane %v22524_v38, 4  ;;  %v17801_v56 = vsel %vm1312_vm0, %v17800_v47, %v17793_v40  ;;  %v28501_v33 = vpop.trf.xlu0 }
 0xfe5   : > { %22630 = vxpose.xlu0.b32.cont [2/16] (narrow) %v22629_v26, 8  ;;  %v18165_v50 = vshrl.u32 %v17801_v56, 16  ;;  %v17884_v13 = vrot.slane %v22536_v24, 4 }
 0xfe6   : > { %v17803_v49 = vsel %vm1312_vm0, %v17802_v0, %v28432_v22 }
 0xfe7   : > { %v17807_v20 = vperm.slane %v17803_v49, %v23267_v21 }
 0xfe9   : > { %v17827_v6 = vsel %vm1312_vm0, %v17826_v34, %v17807_v20 }
 0xfea   : > { %v17831_v10 = vperm.slane %v17827_v6, %v23273_v39 }
 0xfeb   : > { %v22532_v63 = vpop.trf.xlu1 }
 0xfec   : > { %v22544_v23 = vpop.trf.xlu2  ;;  %v17839_v22 = vsel %vm1312_vm0, %v17838_v15, %v17831_v10  ;;  %v17858_v44 = vrot.slane %v22532_v63, 4  ;;  %v22566_v29 = vpop.trf.xlu0 }
 0xfed   : > { %v18164_v51 = vpack.i.b16 %v17839_v22, %v17801_v56  ;;  %v18166_v61 = vshrl.u32 %v17839_v22, 16  ;;  %v17847_v43 = vsel %vm1312_vm0, %v17846_v32, %v22544_v23 }
 0xfee   : > { %v17859_v12 = vsel %vm1312_vm0, %v17858_v44, %v28445_v5  ;;  %v17851_v37 = vperm.slane %v17847_v43, %v23267_v21 }
 0xfef   : > { %20539 = vmatmul.msk.bf16.gmra.mxu0 %vm5745_vm1, %v18164_v51  ;;  %v18167_v11 = vpack.i.b16 %v18166_v61, %v18165_v50  ;;  %v17863_v3 = vperm.slane %v17859_v12, %v23267_v21 }
 0xff0   : > { %v17864_v42 = vrot.slane %v17851_v37, 4 }
 0xff1   : > { %20547 = vmatmul.msk.bf16.gmra.mxu1 %vm5745_vm1, %v18167_v11  ;;  %v17870_v4 = vrot.slane %v17863_v3, 4 }
 0xff3   : > { %v22533_v62 = vpop.trf.xlu1 }
 0xff4   : > { %v22545_v7 = vpop.trf.xlu2  ;;  %v17896_v16 = vrot.slane %v22533_v62, 4  ;;  %v22574_v51 = vpop.trf.xlu0 }
 0xff5   : > { %v17885_v53 = vsel %vm1312_vm0, %v17884_v13, %v22545_v7 }
 0xff6   : > { %v17897_v41 = vsel %vm1312_vm0, %v17896_v16, %v28455_v60  ;;  %v17889_v1 = vperm.slane %v17885_v53, %v23267_v21  ;;  %v17972_v16 = vrot.slane %v28495_v59, 4 }
 0xff7   : > { %v17901_v19 = vperm.slane %v17897_v41, %v23267_v21 }
 0xff8   : > { %v17902_v31 = vrot.slane %v17889_v1, 4 }
 0xff9   : > { %v17908_v25 = vrot.slane %v17901_v19, 4 }
 0xffb   : > { %v22541_v28 = vpop.trf.xlu1 }
 0xffc   : > { %v22553_v30 = vpop.trf.xlu2  ;;  %v17852_v54 = vrot.slane %v22541_v28, 4  ;;  %v22575_v12 = vpop.trf.xlu0 }
 0xffd   : > { %v17841_v8 = vsel %vm1312_vm0, %v17840_v35, %v22553_v30  ;;  %v17934_v35 = vrot.slane %v28493_v58, 4 }
 0xffe   : > { %v17845_v52 = vperm.slane %v17841_v8, %v23267_v21 }
0x1000   : > { %v17865_v55 = vsel %vm1312_vm0, %v17864_v42, %v17845_v52 }
0x1001   : > { %v17869_v20 = vperm.slane %v17865_v55, %v23273_v39 }
0x1003   : > { %v22542_v18 = vpop.trf.xlu1 }
0x1004   : > { %v22554_v2 = vpop.trf.xlu2  ;;  %v17890_v24 = vrot.slane %v22542_v18, 4  ;;  %v28534_v13 = vpop.trf.xlu0 }
0x1005   : > { %v17879_v36 = vsel %vm1312_vm0, %v17878_v45, %v22554_v2  ;;  %v17928_v45 = vrot.slane %v28501_v33, 4 }
0x1006   : > { %v17883_v38 = vperm.slane %v17879_v36, %v23267_v21 }
0x1007   : > { %v17929_v53 = vsel %vm1312_vm0, %v17928_v45, %v22574_v51 }
0x1008   : > { %v17903_v40 = vsel %vm1312_vm0, %v17902_v31, %v17883_v38  ;;  %v17933_v36 = vperm.slane %v17929_v53, %v23267_v21 }
0x1009   : > { %v17907_v6 = vperm.slane %v17903_v40, %v23273_v39 }
0x100b   : > { %v22550_v46 = vpop.trf.xlu1 }
0x100c   : > { %v28503_v9 = vpop.trf.xlu2  ;;  %v17853_v17 = vsel %vm1312_vm0, %v17852_v54, %v22550_v46  ;;  %v28548_v8 = vpop.trf.xlu0 }
0x100d   : > { %v17857_v5 = vperm.slane %v17853_v17, %v23267_v21  ;;  %v17935_v43 = vsel %vm1312_vm0, %v17934_v35, %v28503_v9 }
0x100e   : > { %v17939_v41 = vperm.slane %v17935_v43, %v23267_v21 }
0x100f   : > { %v17871_v14 = vsel %vm1312_vm0, %v17870_v4, %v17857_v5  ;;  %v17966_v4 = vrot.slane %v22566_v29, 4 }
0x1010   : > { %v17875_v27 = vperm.slane %v17871_v14, %v23273_v39  ;;  %v17946_v33 = vrot.slane %v17939_v41, 4 }
0x1011   : > { %v17967_v14 = vsel %vm1312_vm0, %v17966_v4, %v22575_v12 }
0x1012   : > { %v17876_v26 = vrot.slane %v17875_v27, 4 }
0x1013   : > { %v22551_v48 = vpop.trf.xlu1 }
0x1014   : > { %v22563_v60 = vpop.trf.xlu2  ;;  %v17891_v0 = vsel %vm1312_vm0, %v17890_v24, %v22551_v48  ;;  %v17877_v56 = vsel %vm1312_vm0, %v17876_v26, %v17869_v20  ;;  %v17947_v48 = vsel %vm1312_vm0, %v17946_v33, %v17933_v36 }
0x1015   : > { %v17895_v49 = vperm.slane %v17891_v0, %v23267_v21  ;;  %v18171_v61 = vshrl.u32 %v17877_v56, 16  ;;  %v17973_v17 = vsel %vm1312_vm0, %v17972_v16, %v22563_v60  ;;  %v17971_v60 = vperm.slane %v17967_v14, %v23267_v21 }
0x1016   : > { %v17977_v59 = vperm.slane %v17973_v17, %v23267_v21  ;;  %v17951_v55 = vperm.slane %v17947_v48, %v23273_v39  ;;  %v17998_v16 = vrot.slane %v28534_v13, 4 }
0x1017   : > { %v17909_v34 = vsel %vm1312_vm0, %v17908_v25, %v17895_v49 }
0x1018   : > { %v17913_v47 = vperm.slane %v17909_v34, %v23273_v39  ;;  %v17984_v27 = vrot.slane %v17977_v59, 4  ;;  %v22592_v34 = vpop.trf.xlu0 }
0x101a   : > { %v17914_v15 = vrot.slane %v17913_v47, 4  ;;  %v18233_v10 = vpop.f32.mrf.mxu0  ;;  %v17985_v0 = vsel %vm1312_vm0, %v17984_v27, %v17971_v60 }
0x101b   : > { %v22559_v63 = vpop.trf.xlu1  ;;  %v17989_v20 = vperm.slane %v17985_v0, %v23273_v39 }
0x101c   : > { %v22571_v23 = vpop.trf.xlu2  ;;  %v17915_v57 = vsel %vm1312_vm0, %v17914_v15, %v17907_v6  ;;  %v17922_v5 = vrot.slane %v22559_v63, 4 }
0x101d   : > { %v18309_v22 = vpop.f32.mrf.mxu1  ;;  %v18170_v50 = vpack.i.b16 %v17915_v57, %v17877_v56  ;;  %v18172_v11 = vshrl.u32 %v17915_v57, 16  ;;  %v17916_v37 = vrot.slane %v22571_v23, 4  ;;  %v17952_v56 = vrot.slane %v17951_v55, 4 }
0x101e   : > { %v22631_v7 = vpack.i.bf16 %v18309_v22, %v18233_v10  ;;  %v17990_v63 = vrot.slane %v17989_v20, 4 }
0x101f   : > { %20540 = vmatmul.msk.bf16.gmra.mxu0 %vm5745_vm1, %v18170_v50  ;;  %v18173_v62 = vpack.i.b16 %v18172_v11, %v18171_v61 }
0x1020   : > { %22632 = vxpose.xlu0.b32.cont [3/16] (narrow) %v22631_v7, 8 }
0x1021   : > { %20548 = vmatmul.msk.bf16.gmra.mxu1 %vm5745_vm1, %v18173_v62 }
0x1022   : > { %v18235_v44 = vpop.f32.mrf.mxu0 }
0x1023   : > { %v22560_v28 = vpop.trf.xlu1 }
0x1024   : > { %v22572_v30 = vpop.trf.xlu2  ;;  %v17960_v52 = vrot.slane %v22560_v28, 4 }
0x1025   : > { %v18311_v2 = vpop.f32.mrf.mxu1  ;;  %v17954_v49 = vrot.slane %v22572_v30, 4 }
0x1026   : > { %v22633_v18 = vpack.i.bf16 %v18311_v2, %v18235_v44  ;;  %v22593_v2 = vpop.trf.xlu0 }
0x1028   : > { %22634 = vxpose.xlu0.b32.cont [4/16] (narrow) %v22633_v18, 8 }
0x102b   : > { %v22568_v3 = vpop.trf.xlu1 }
0x102c   : > { %v28532_v32 = vpop.trf.xlu2  ;;  %v17923_v58 = vsel %vm1312_vm0, %v17922_v5, %v22568_v3 }
0x102d   : > { %v17927_v19 = vperm.slane %v17923_v58, %v23267_v21  ;;  %v18010_v35 = vrot.slane %v28532_v32, 4  ;;  %v17999_v32 = vsel %vm1312_vm0, %v17998_v16, %v22592_v34 }
0x102e   : > { %v22601_v41 = vpop.trf.xlu0 }
0x102f   : > { %v17940_v29 = vrot.slane %v17927_v19, 4 }
0x1033   : > { %v22569_v46 = vpop.trf.xlu1 }
0x1034   : > { %v28538_v54 = vpop.trf.xlu2  ;;  %v17961_v38 = vsel %vm1312_vm0, %v17960_v52, %v22569_v46 }
0x1035   : > { %v17965_v25 = vperm.slane %v17961_v38, %v23267_v21  ;;  %v18048_v45 = vrot.slane %v28538_v54, 4 }
0x1037   : > { %v17978_v15 = vrot.slane %v17965_v25, 4 }
0x103b   : > { %v22577_v1 = vpop.trf.xlu1 }
0x103c   : > { %v28551_v9 = vpop.trf.xlu2  ;;  %v17917_v24 = vsel %vm1312_vm0, %v17916_v37, %v22577_v1  ;;  %v18003_v1 = vperm.slane %v17999_v32, %v23267_v21 }
0x103d   : > { %v17921_v42 = vperm.slane %v17917_v24, %v23267_v21  ;;  %v18004_v17 = vrot.slane %v28551_v9, 4  ;;  %v18036_v9 = vrot.slane %v28548_v8, 4 }
0x103e   : > { %v18016_v48 = vrot.slane %v18003_v1, 4 }
0x103f   : > { %v17941_v31 = vsel %vm1312_vm0, %v17940_v29, %v17921_v42  ;;  %v18037_v38 = vsel %vm1312_vm0, %v18036_v9, %v22593_v2  ;;  %v22602_v29 = vpop.trf.xlu0 }
0x1040   : > { %v17945_v47 = vperm.slane %v17941_v31, %v23273_v39  ;;  %v18041_v0 = vperm.slane %v18037_v38, %v23267_v21 }
0x1042   : > { %v17953_v22 = vsel %vm1312_vm0, %v17952_v56, %v17945_v47 }
0x1043   : > { %v22578_v40 = vpop.trf.xlu1  ;;  %v18177_v62 = vshrl.u32 %v17953_v22, 16 }
0x1044   : > { %v22590_v26 = vpop.trf.xlu2  ;;  %v17955_v6 = vsel %vm1312_vm0, %v17954_v49, %v22578_v40 }
0x1045   : > { %v17959_v23 = vperm.slane %v17955_v6, %v23267_v21  ;;  %v18042_v53 = vrot.slane %v22590_v26, 4  ;;  %v18054_v6 = vrot.slane %v18041_v0, 4 }
0x1047   : > { %v17979_v10 = vsel %vm1312_vm0, %v17978_v15, %v17959_v23 }
0x1048   : > { %v17983_v57 = vperm.slane %v17979_v10, %v23273_v39 }
0x104a   : > { %v17991_v51 = vsel %vm1312_vm0, %v17990_v63, %v17983_v57  ;;  %v18238_v61 = vpop.f32.mrf.mxu0 }
0x104b   : > { %v22586_v11 = vpop.trf.xlu1  ;;  %v18176_v7 = vpack.i.b16 %v17991_v51, %v17953_v22  ;;  %v18178_v30 = vshrl.u32 %v17991_v51, 16  ;;  %v22610_v51 = vpop.trf.xlu0 }
0x104c   : > { %v22598_v50 = vpop.trf.xlu2  ;;  %v18011_v4 = vsel %vm1312_vm0, %v18010_v35, %v22586_v11 }
0x104d   : > { %v18314_v28 = vpop.f32.mrf.mxu1  ;;  %20541 = vmatmul.msk.bf16.gmra.mxu0 %vm5745_vm1, %v18176_v7  ;;  %v18179_v44 = vpack.i.b16 %v18178_v30, %v18177_v62  ;;  %v18015_v59 = vperm.slane %v18011_v4, %v23267_v21  ;;  %v18005_v13 = vsel %vm1312_vm0, %v18004_v17, %v22598_v50 }
0x104e   : > { %v22635_v18 = vpack.i.bf16 %v18314_v28, %v18238_v61  ;;  %v18009_v52 = vperm.slane %v18005_v13, %v23267_v21 }
0x104f   : > { %20549 = vmatmul.msk.bf16.gmra.mxu1 %vm5745_vm1, %v18179_v44  ;;  %v18022_v19 = vrot.slane %v18015_v59, 4 }
0x1050   : > { %22636 = vxpose.xlu0.b32.cont [5/16] (narrow) %v22635_v18, 8 }
0x1051   : > { %v18023_v8 = vsel %vm1312_vm0, %v18022_v19, %v18009_v52 }
0x1052   : > { %v18240_v46 = vpop.f32.mrf.mxu0  ;;  %v18027_v49 = vperm.slane %v18023_v8, %v23273_v39 }
0x1053   : > { %v22587_v3 = vpop.trf.xlu1 }
0x1054   : > { %v22599_v12 = vpop.trf.xlu2  ;;  %v18049_v58 = vsel %vm1312_vm0, %v18048_v45, %v22587_v3  ;;  %v18028_v23 = vrot.slane %v18027_v49, 4 }
0x1055   : > { %v18316_v43 = vpop.f32.mrf.mxu1  ;;  %v18053_v37 = vperm.slane %v18049_v58, %v23267_v21  ;;  %v18043_v33 = vsel %vm1312_vm0, %v18042_v53, %v22599_v12  ;;  %v22611_v12 = vpop.trf.xlu0 }
0x1056   : > { %v22637_v5 = vpack.i.bf16 %v18316_v43, %v18240_v46  ;;  %v18047_v60 = vperm.slane %v18043_v33, %v23267_v21 }
0x1057   : > { %v18060_v27 = vrot.slane %v18053_v37, 4 }
0x1058   : > { %22638 = vxpose.xlu0.b32.cont [6/16] (narrow) %v22637_v5, 8 }
0x1059   : > { %v18061_v25 = vsel %vm1312_vm0, %v18060_v27, %v18047_v60 }
0x105a   : > { %v18065_v34 = vperm.slane %v18061_v25, %v23273_v39 }
0x105b   : > { %v22595_v14 = vpop.trf.xlu1 }
0x105c   : > { %v28584_v54 = vpop.trf.xlu2  ;;  %v17992_v36 = vrot.slane %v22595_v14, 4  ;;  %v18066_v10 = vrot.slane %v18065_v34, 4 }
0x105d   : > { %v22619_v45 = vpop.trf.xlu0  ;;  %v18074_v53 = vrot.slane %v28584_v54, 4 }
0x105e   : > { %v17993_v24 = vsel %vm1312_vm0, %v17992_v36, %v22601_v41  ;;  %v18068_v14 = vrot.slane %v22619_v45, 4  ;;  %v20610_v45 = vld [vmem:[%s23078_s26 + $0x70] sm:$0xf] }
0x105f   : > { %v17997_v42 = vperm.slane %v17993_v24, %v23267_v21 }
0x1061   : > { %v18017_v31 = vsel %vm1312_vm0, %v18016_v48, %v17997_v42 }
0x1062   : > { %v18021_v20 = vperm.slane %v18017_v31, %v23273_v39 }
0x1063   : > { %v22596_v55 = vpop.trf.xlu1 }
0x1064   : > { %v18030_v26 = vrot.slane %v22596_v55, 4  ;;  %v22608_v40 = vpop.trf.xlu2  ;;  %v18029_v57 = vsel %vm1312_vm0, %v18028_v23, %v18021_v20 }
0x1065   : > { %v18183_v7 = vshrl.u32 %v18029_v57, 16  ;;  %v22620_v59 = vpop.trf.xlu0  ;;  %v18112_v32 = vrot.slane %v22608_v40, 4 }
0x1066   : > { %v18031_v47 = vsel %vm1312_vm0, %v18030_v26, %v22602_v29  ;;  %v18106_v36 = vrot.slane %v22620_v59, 4  ;;  %v20602_v59 = vld [vmem:[%s23078_s26 + $0x60] sm:$0xf] }
0x1067   : > { %v18035_v15 = vperm.slane %v18031_v47, %v23267_v21 }
0x1069   : > { %v18055_v56 = vsel %vm1312_vm0, %v18054_v6, %v18035_v15 }
0x106a   : > { %v18059_v63 = vperm.slane %v18055_v56, %v23273_v39 }
0x106b   : > { %v22604_v22 = vpop.trf.xlu1 }
0x106c   : > { %v18243_v50 = vpop.f32.mrf.mxu0  ;;  %v18067_v61 = vsel %vm1312_vm0, %v18066_v10, %v18059_v63  ;;  %v22616_v28 = vpop.trf.xlu2  ;;  %v18086_v17 = vrot.slane %v22604_v22, 4 }
0x106d   : > { %v18182_v11 = vpack.i.b16 %v18067_v61, %v18029_v57  ;;  %v18184_v62 = vshrl.u32 %v18067_v61, 16  ;;  %v18075_v33 = vsel %vm1312_vm0, %v18074_v53, %v22616_v28  ;;  %v21328_v53 = vld [vmem:[%s23078_s26 + $0xf4] sm:$0xf0] }
0x106e   : > { %v18319_v30 = vpop.f32.mrf.mxu1  ;;  %v18087_v41 = vsel %vm1312_vm0, %v18086_v17, %v22610_v51  ;;  %v18079_v42 = vperm.slane %v18075_v33, %v23267_v21  ;;  %v21312_v17 = vld [vmem:[%s23078_s26 + $0x74] sm:$0xf0] }
0x106f   : > { %v22639_v44 = vpack.i.bf16 %v18319_v30, %v18243_v50  ;;  %20542 = vmatmul.msk.bf16.gmra.mxu0 %vm5745_vm1, %v18182_v11  ;;  %v18185_v2 = vpack.i.b16 %v18184_v62, %v18183_v7  ;;  %v18091_v58 = vperm.slane %v18087_v41, %v23267_v21  ;;  %v20674_v41 = vld [vmem:[%s23078_s26 + $0xf0] sm:$0xf]  ;;  %v21308_v33 = vld [vmem:[%s23078_s26 + $0x54] sm:$0xf0] }
0x1070   : > { %v18092_v55 = vrot.slane %v18079_v42, 4 }
0x1071   : > { %20550 = vmatmul.msk.bf16.gmra.mxu1 %vm5745_vm1, %v18185_v2  ;;  %22640 = vxpose.xlu0.b32.cont [7/16] (narrow) %v22639_v44, 8  ;;  %v18098_v1 = vrot.slane %v18091_v58, 4  ;;  %v20675_v58 = vor.u32 %v21328_v53, %v20674_v41 }
0x1073   : > { %v22605_v18 = vpop.trf.xlu1  ;;  %18710 = vmatpush.bf16.msra.mxu3 %v20675_v58 }
0x1074   : > { %v18245_v3 = vpop.f32.mrf.mxu0  ;;  %v22617_v46 = vpop.trf.xlu2  ;;  %v18124_v13 = vrot.slane %v22605_v18, 4 }
0x1075   : > { %v18113_v54 = vsel %vm1312_vm0, %v18112_v32, %v22617_v46  ;;  %v21310_v32 = vld [vmem:[%s23078_s26 + $0x64] sm:$0xf0] }
0x1076   : > { %v18321_v35 = vpop.f32.mrf.mxu1  ;;  %v18125_v27 = vsel %vm1312_vm0, %v18124_v13, %v22611_v12  ;;  %v18117_v29 = vperm.slane %v18113_v54, %v23267_v21  ;;  %v20666_v13 = vld [vmem:[%s23078_s26 + $0xe0] sm:$0xf] }
0x1077   : > { %v22641_v16 = vpack.i.bf16 %v18321_v35, %v18245_v3  ;;  %v18129_v8 = vperm.slane %v18125_v27, %v23267_v21 }
0x1078   : > { %v18130_v20 = vrot.slane %v18117_v29, 4  ;;  %v21306_v29 = vld [vmem:[%s23078_s26 + $0x44] sm:$0xf0] }
0x1079   : > { %22642 = vxpose.xlu0.b32.cont [8/16] (narrow) %v22641_v16, 8  ;;  %v18136_v34 = vrot.slane %v18129_v8, 4  ;;  %v20586_v8 = vld [vmem:[%s23078_s26 + $0x40] sm:$0xf] }
0x107b   : > { %v22613_v43 = vpop.trf.xlu1 }
0x107c   : > { %v22625_v4 = vpop.trf.xlu2  ;;  %v18080_v37 = vrot.slane %v22613_v43, 4 }
0x107d   : > { %v18069_v60 = vsel %vm1312_vm0, %v18068_v14, %v22625_v4  ;;  %v21326_v14 = vld [vmem:[%s23078_s26 + $0xe4] sm:$0xf0] }
0x107e   : > { %v18073_v0 = vperm.slane %v18069_v60, %v23267_v21 }
0x1080   : > { %v18093_v47 = vsel %vm1312_vm0, %v18092_v55, %v18073_v0  ;;  %v20587_v0 = vor.u32 %v21306_v29, %v20586_v8  ;;  %v21309_v29 = vld [vmem:[%s23078_s26 + $0x64] sm:$0xf] }
0x1081   : > { %v18097_v10 = vperm.slane %v18093_v47, %v23273_v39  ;;  %v20570_v47 = vld [vmem:[%s23078_s26 + $0x20] sm:$0xf] }
0x1083   : > { %v22614_v5 = vpop.trf.xlu1 }
0x1084   : > { %v22626_v52 = vpop.trf.xlu2  ;;  %v18118_v25 = vrot.slane %v22614_v5, 4  ;;  %v20611_v5 = vor.u32 %v21312_v17, %v20610_v45 }
0x1085   : > { %v18107_v48 = vsel %vm1312_vm0, %v18106_v36, %v22626_v52  ;;  %v20667_v36 = vor.u32 %v21326_v14, %v20666_v13  ;;  %v21316_v13 = vld [vmem:[%s23078_s26 + $0x94] sm:$0xf0] }
0x1086   : > { %v18111_v49 = vperm.slane %v18107_v48, %v23267_v21  ;;  %18696 = vmatpush.bf16.msra.mxu2 %v20611_v5 }
0x1087   : > { %18711 = vmatpush.bf16.msra.mxu3 %v20667_v36  ;;  %v20676_v36 = vld [vmem:[%s23078_s26 + $0xf8] sm:$0xf0] }
0x1088   : > { %v18131_v23 = vsel %vm1312_vm0, %v18130_v20, %v18111_v49  ;;  %v20578_v49 = vld [vmem:[%s23078_s26 + $0x30] sm:$0xf]  ;;  %v21320_v20 = vld [vmem:[%s23078_s26 + $0xb4] sm:$0xf0] }
0x1089   : > { %v18135_v57 = vperm.slane %v18131_v23, %v23273_v39  ;;  %v20634_v23 = vld [vmem:[%s23078_s26 + $0xa0] sm:$0xf] }
0x108b   : > { %v22622_v9 = vpop.trf.xlu1 }
0x108c   : > { %v18081_v19 = vsel %vm1312_vm0, %v18080_v37, %v22622_v9  ;;  %v20603_v37 = vor.u32 %v21310_v32, %v20602_v59  ;;  %v20594_v9 = vld [vmem:[%s23078_s26 + $0x50] sm:$0xf] }
0x108d   : > { %v18085_v24 = vperm.slane %v18081_v19, %v23267_v21  ;;  %v20658_v19 = vld [vmem:[%s23078_s26 + $0xd0] sm:$0xf]  ;;  %v20595_v52 = vor.u32 %v21308_v33, %v20594_v9  ;;  %v21314_v9 = vld [vmem:[%s23078_s26 + $0x84] sm:$0xf0]  ;;  %v21327_v33 = vld [vmem:[%s23078_s26 + $0xf4] sm:$0xf] }
0x108e   : > { %18697 = vmatpush.bf16.msra.mxu2 %v20603_v37  ;;  %v20626_v32 = vld [vmem:[%s23078_s26 + $0x90] sm:$0xf]  ;;  %v20618_v37 = vld [vmem:[%s23078_s26 + $0x80] sm:$0xf] }
0x108f   : > { %v18099_v38 = vsel %vm1312_vm0, %v18098_v1, %v18085_v24  ;;  %v21324_v1 = vld [vmem:[%s23078_s26 + $0xd4] sm:$0xf0]  ;;  %v20627_v14 = vor.u32 %v21316_v13, %v20626_v32  ;;  %v21301_v13 = vld [vmem:[%s23078_s26 + $0x24] sm:$0xf] }
0x1090   : > { %v18103_v31 = vperm.slane %v18099_v38, %v23273_v39  ;;  %v20659_v24 = vor.u32 %v21324_v1, %v20658_v19  ;;  %v20554_v1 = vld [vmem:[%s23078_s26] sm:$0xf] }
0x1092   : > { %v18104_v15 = vrot.slane %v18103_v31, 4  ;;  %18698 = vmatpush.bf16.msra.mxu2 %v20595_v52  ;;  %18712 = vmatpush.bf16.msra.mxu3 %v20659_v24  ;;  %v21322_v31 = vld [vmem:[%s23078_s26 + $0xc4] sm:$0xf0]  ;;  %v21311_v24 = vld [vmem:[%s23078_s26 + $0x74] sm:$0xf] }
0x1093   : > { %v22623_v26 = vpop.trf.xlu1  ;;  %v21298_v52 = vld [vmem:[%s23078_s26 + $0x4] sm:$0xf0] }
0x1094   : > { %v18119_v40 = vsel %vm1312_vm0, %v18118_v25, %v22623_v26  ;;  %v18105_v51 = vsel %vm1312_vm0, %v18104_v15, %v18097_v10  ;;  %v20650_v25 = vld [vmem:[%s23078_s26 + $0xc0] sm:$0xf]  ;;  %v21304_v26 = vld [vmem:[%s23078_s26 + $0x34] sm:$0xf0] }
0x1095   : > { %v18123_v6 = vperm.slane %v18119_v40, %v23267_v21  ;;  %v18189_v7 = vshrl.u32 %v18105_v51, 16  ;;  %v20651_v55 = vor.u32 %v21322_v31, %v20650_v25  ;;  %v20642_v40 = vld [vmem:[%s23078_s26 + $0xb0] sm:$0xf] }
0x1096   : > { %18699 = vmatpush.bf16.msra.mxu2 %v20587_v0  ;;  %v20643_v15 = vor.u32 %v21320_v20, %v20642_v40  ;;  %v20604_v0 = vld [vmem:[%s23078_s26 + $0x68] sm:$0xf0]  ;;  %v21307_v20 = vld [vmem:[%s23078_s26 + $0x54] sm:$0xf] }
0x1097   : > { %v18137_v56 = vsel %vm1312_vm0, %v18136_v34, %v18123_v6  ;;  %18713 = vmatpush.bf16.msra.mxu3 %v20651_v55  ;;  %v20579_v34 = vor.u32 %v21304_v26, %v20578_v49  ;;  %v21302_v6 = vld [vmem:[%s23078_s26 + $0x24] sm:$0xf0]  ;;  %v21325_v55 = vld [vmem:[%s23078_s26 + $0xe4] sm:$0xf]  ;;  %v20668_v49 = vld [vmem:[%s23078_s26 + $0xe8] sm:$0xf0]  ;;  %v20607_v26 = vor.u32 %v21309_v29, %v20604_v0 }
0x1098   : > { %v18141_v63 = vperm.slane %v18137_v56, %v23273_v39  ;;  %v21318_v56 = vld [vmem:[%s23078_s26 + $0xa4] sm:$0xf0]  ;;  %v20571_v10 = vor.u32 %v21302_v6, %v20570_v47  ;;  %v20596_v47 = vld [vmem:[%s23078_s26 + $0x58] sm:$0xf0] }
0x109a   : > { %v18142_v22 = vrot.slane %v18141_v63, 4  ;;  %18700 = vmatpush.bf16.msra.mxu2 %v20579_v34  ;;  %v20562_v63 = vld [vmem:[%s23078_s26 + $0x10] sm:$0xf] }
0x109b   : > { %18714 = vmatpush.bf16.msra.mxu3 %v20643_v15  ;;  %v20671_v15 = vor.u32 %v21325_v55, %v20668_v49 }
0x109c   : > { %v18248_v50 = vpop.f32.mrf.mxu0  ;;  %v18143_v61 = vsel %vm1312_vm0, %v18142_v22, %v18135_v57  ;;  %v21300_v57 = vld [vmem:[%s23078_s26 + $0x14] sm:$0xf0]  ;;  %v20635_v22 = vor.u32 %v21318_v56, %v20634_v23  ;;  %v21323_v56 = vld [vmem:[%s23078_s26 + $0xd4] sm:$0xf] }
0x109d   : > { %v18188_v11 = vpack.i.b16 %v18143_v61, %v18105_v51  ;;  %v18190_v62 = vshrl.u32 %v18143_v61, 16  ;;  %v20563_v51 = vor.u32 %v21300_v57, %v20562_v63  ;;  %v20599_v57 = vor.u32 %v21307_v20, %v20596_v47 }
0x109e   : > { %v18324_v30 = vpop.f32.mrf.mxu1  ;;  %18701 = vmatpush.bf16.msra.mxu2 %v20571_v10  ;;  %v20660_v10 = vld [vmem:[%s23078_s26 + $0xd8] sm:$0xf0] }
0x109f   : > { %v22643_v28 = vpack.i.bf16 %v18324_v30, %v18248_v50  ;;  %20543 = vmatmul.msk.bf16.gmra.mxu0 %vm5745_vm1, %v18188_v11  ;;  %v18191_v44 = vpack.i.b16 %v18190_v62, %v18189_v7  ;;  %18715 = vmatpush.bf16.msra.mxu3 %v20635_v22 }
0x10a1   : > { %20551 = vmatmul.msk.bf16.gmra.mxu1 %vm5745_vm1, %v18191_v44  ;;  %22644 = vxpose.xlu0.b32.cont [9/16] (narrow) %v22643_v28, 8  ;;  %v29383_v28 = vld [vmem:[#allocation22_spill] sm:$0xff] }
0x10a2   : > { %18702 = vmatpush.bf16.msra.mxu2 %v20563_v51  ;;  %v22103_v44 = vunpack.i.l.bf16 %v29383_v28  ;;  %v21305_v51 = vld [vmem:[%s23078_s26 + $0x44] sm:$0xf] }
0x10a3   : > { %18716 = vmatpush.bf16.msra.mxu3 %v20627_v14 }
0x10a4   : > { %v18250_v2 = vpop.f32.mrf.mxu0 }
0x10a6   : > { %v18326_v18 = vpop.f32.mrf.mxu1 }
0x10a7   : > { %v22645_v12 = vpack.i.bf16 %v18326_v18, %v18250_v2  ;;  %v22106_v2 = vunpack.i.h.bf16 %v29383_v28  ;;  %v9996_v18 = vrot.slane %v22103_v44, 4 }
0x10a9   : > { %22646 = vxpose.xlu0.b32.cont [10/16] (narrow) %v22645_v12, 8  ;;  %v10006_v12 = vrot.slane %v22106_v2, 4 }
0x10ca   : > { %v18253_v3 = vpop.f32.mrf.mxu0 }
0x10cc   : > { %v18329_v35 = vpop.f32.mrf.mxu1 }
0x10cd   : > { %v22647_v16 = vpack.i.bf16 %v18329_v35, %v18253_v3  ;;  %v10001_v3 = vperm.slane %v22103_v44, %v23267_v21  ;;  %v9997_v35 = vsel %vm1312_vm0, 0.0, %v9996_v18 }
0x10ce   : > { %v10005_v45 = vperm.slane %v9997_v35, %v23267_v21  ;;  %v20580_v35 = vld [vmem:[%s23078_s26 + $0x38] sm:$0xf0] }
0x10cf   : > { %22648 = vxpose.xlu0.b32.cont [11/16] (narrow) %v22647_v16, 8  ;;  %v10007_v16 = vsel %vm1312_vm0, 0.0, %v10006_v12 }
0x10d0   : > { %v10015_v17 = vperm.slane %v10007_v16, %v23267_v21  ;;  %v10030_v41 = vrot.slane %v10005_v45, 4 }
0x10d2   : > { %v18255_v46 = vpop.f32.mrf.mxu0  ;;  %v10028_v53 = vrot.slane %v10015_v17, 4  ;;  %v10031_v19 = vsel %vm1312_vm0, %v10015_v17, %v10030_v41  ;;  %v21319_v41 = vld [vmem:[%s23078_s26 + $0xb4] sm:$0xf] }
0x10d3   : > { %v10039_v31 = vperm.slane %v10031_v19, %v23273_v39 }
0x10d4   : > { %v18331_v43 = vpop.f32.mrf.mxu1  ;;  %v10029_v25 = vsel %vm1312_vm0, %v10028_v53, %v10005_v45  ;;  %v20644_v53 = vld [vmem:[%s23078_s26 + $0xb8] sm:$0xf0] }
0x10d5   : > { %v22649_v4 = vpack.i.bf16 %v18331_v43, %v18255_v46  ;;  %v10011_v46 = vperm.slane %v22106_v2, %v23267_v21  ;;  %v10018_v43 = vrot.slane %v10001_v3, 4  ;;  %v28697_v6 = vperm.slane %v10029_v25, %v23273_v39 }
0x10d6   : > { %v10046_v23 = vrot.slane %v10039_v31, 4 }
0x10d7   : > { %22650 = vxpose.xlu0.b32.cont [12/16] (narrow) %v22649_v4, 8  ;;  %v10016_v4 = vrot.slane %v10011_v46, 4  ;;  %v10019_v5 = vsel %vm1312_vm0, %v10011_v46, %v10018_v43 }
0x10d8   : > { %v10027_v58 = vperm.slane %v10019_v5, %v23273_v39  ;;  %v10059_v31 = vsel %vm1312_vm0, %v10046_v23, %v28697_v6 }
0x10d9   : > { %v10017_v59 = vsel %vm1312_vm0, %v10016_v4, %v10001_v3  ;;  %v21303_v3 = vld [vmem:[%s23078_s26 + $0x34] sm:$0xf] }
0x10da   : > { %v20583_v32 = vor.u32 %v21303_v3, %v20580_v35 }
0x10ec   : > { %v18258_v27 = vpop.f32.mrf.mxu0 }
0x10ee   : > { %v18334_v54 = vpop.f32.mrf.mxu1 }
0x10ef   : > { %v22651_v60 = vpack.i.bf16 %v18334_v54, %v18258_v27  ;;  %v10023_v27 = vperm.slane %v10017_v59, %v23273_v39  ;;  %v10042_v54 = vrot.slane %v10027_v58, 4 }
0x10f1   : > { %22652 = vxpose.xlu0.b32.cont [13/16] (narrow) %v22651_v60, 8  ;;  %v20619_v60 = vor.u32 %v21314_v9, %v20618_v37  ;;  %v10040_v40 = vrot.slane %v10023_v27, 4  ;;  %v10043_v34 = vsel %vm1312_vm0, 0.0, %v10042_v54  ;;  %v10048_v58 = vsel %vm1312_vm0, %v10042_v54, %v10023_v27  ;;  %v20572_v37 = vld [vmem:[%s23078_s26 + $0x28] sm:$0xf0] }
0x10f2   : > { %v10053_v63 = vrot.slane %v10043_v34, 4  ;;  %v21317_v27 = vld [vmem:[%s23078_s26 + $0xa4] sm:$0xf]  ;;  %v20636_v54 = vld [vmem:[%s23078_s26 + $0xa8] sm:$0xf0] }
0x10f3   : > { %18717 = vmatpush.bf16.msra.mxu3 %v20619_v60  ;;  %v10041_v22 = vsel %vm1312_vm0, 0.0, %v10040_v40  ;;  %v10052_v60 = vperm.slane %v10048_v58, %v23267_v21  ;;  %v21299_v40 = vld [vmem:[%s23078_s26 + $0x14] sm:$0xf]  ;;  %v20564_v34 = vld [vmem:[%s23078_s26 + $0x18] sm:$0xf0] }
0x10f4   : > { %v18260_v42 = vpop.f32.mrf.mxu0  ;;  %v10054_v28 = vsel %vm1312_vm0, %v10053_v63, %v10041_v22  ;;  %v10063_v22 = vperm.slane %v10059_v31, %v23267_v21 }
0x10f5   : > { %v10058_v59 = vperm.slane %v10054_v28, %v23267_v21 }
0x10f6   : > { %v18336_v38 = vpop.f32.mrf.mxu1 }
0x10f7   : > { %v22653_v48 = vpack.i.bf16 %v18336_v38, %v18260_v42  ;;  %v20555_v42 = vor.u32 %v21298_v52, %v20554_v1  ;;  %v20612_v38 = vld [vmem:[%s23078_s26 + $0x78] sm:$0xf0]  ;;  %v10070_v49 = vrot.slane %v10058_v59, 4 }
0x10f8   : > { %v20615_v8 = vor.u32 %v21311_v24, %v20612_v38  ;;  %v20647_v24 = vor.u32 %v21319_v41, %v20644_v53 }
0x10f9   : > { %22654 = vxpose.xlu0.b32.cont [14/16] (narrow) %v22653_v48, 8  ;;  %v20679_v48 = vor.u32 %v21327_v33, %v20676_v36  ;;  %18703 = vmatpush.bf16.msra.mxu2 %v20555_v42 }
0x10fb   : > { %18738 = vmatpush.bf16.msrb.mxu3 %v20679_v48  ;;  %v20575_v48 = vor.u32 %v21301_v13, %v20572_v37 }
0x10fd   : > { %18724 = vmatpush.bf16.msrb.mxu2 %v20615_v8 }
0x10ff   : > { %18739 = vmatpush.bf16.msrb.mxu3 %v20671_v15 }
0x1101   : > { %18725 = vmatpush.bf16.msrb.mxu2 %v20607_v26  ;;  %v20639_v26 = vor.u32 %v21317_v27, %v20636_v54 }
0x1105   : > { %18726 = vmatpush.bf16.msrb.mxu2 %v20599_v57 }
0x111c   : > { %v18263_v50 = vpop.f32.mrf.mxu0 }
0x111e   : > { %v18339_v61 = vpop.f32.mrf.mxu1 }
0x111f   : > { %v22655_v11 = vpack.i.bf16 %v18339_v61, %v18263_v50  ;;  %v20588_v50 = vld [vmem:[%s23078_s26 + $0x48] sm:$0xf0]  ;;  %v10044_v61 = vrot.slane %v28697_v6, 4  ;;  %v21315_v6 = vld [vmem:[%s23078_s26 + $0x94] sm:$0xf] }
0x1120   : > { %v20591_v2 = vor.u32 %v21305_v51, %v20588_v50  ;;  %v20567_v51 = vor.u32 %v21299_v40, %v20564_v34  ;;  %v21297_v50 = vld [vmem:[%s23078_s26 + $0x4] sm:$0xf] }
0x1121   : > { %22656 = vxpose.xlu0.b32.cont [15/16] (narrow) %v22655_v11, 8  ;;  %v20663_v11 = vor.u32 %v21323_v56, %v20660_v10  ;;  %v10045_v16 = vsel %vm1312_vm0, 0.0, %v10044_v61 }
0x1122   : > { %18727 = vmatpush.bf16.msrb.mxu2 %v20591_v2 }
0x1123   : > { %18740 = vmatpush.bf16.msrb.mxu3 %v20663_v11 }
0x1124   : > { %v18265_v7 = vpop.f32.mrf.mxu0 }
0x1126   : > { %v18341_v62 = vpop.f32.mrf.mxu1  ;;  %18728 = vmatpush.bf16.msrb.mxu2 %v20583_v32 }
0x1127   : > { %v22657_v30 = vpack.i.bf16 %v18341_v62, %v18265_v7  ;;  %v10047_v7 = vsel %vm1312_vm0, 0.0, %v10046_v23  ;;  %v21321_v62 = vld [vmem:[%s23078_s26 + $0xc4] sm:$0xf]  ;;  %v20628_v23 = vld [vmem:[%s23078_s26 + $0x98] sm:$0xf0] }
0x1128   : > { %v10064_v46 = vrot.slane %v10047_v7, 4  ;;  %v20631_v2 = vor.u32 %v21315_v6, %v20628_v23  ;;  %v22692_v23 = vld [vmem:[#allocation2] sm:$0xff] }
0x1129   : > { %22658 = vxpose.xlu0.b32.end [16/16] (narrow) %v22657_v30, 8  ;;  %v20652_v30 = vld [vmem:[%s23078_s26 + $0xc8] sm:$0xf0] }
0x112a   : > { %v20655_v43 = vor.u32 %v21321_v62, %v20652_v30  ;;  %v10065_v52 = vsel %vm1312_vm0, %v10064_v46, %v10045_v16  ;;  %18729 = vmatpush.bf16.msrb.mxu2 %v20575_v48  ;;  %v20556_v30 = vld [vmem:[%s23078_s26 + $0x8] sm:$0xf0] }
0x112b   : > { %v10069_v55 = vperm.slane %v10065_v52, %v23267_v21 }
0x112c   : > { %18741 = vmatpush.bf16.msrb.mxu3 %v20655_v43 }
0x112d   : > { %v10076_v62 = vrot.slane %v10069_v55, 4 }
0x112e   : > { %18730 = vmatpush.bf16.msrb.mxu2 %v20567_v51 }
0x1130   : > { %18742 = vmatpush.bf16.msrb.mxu3 %v20647_v24 }
0x1134   : > { %18743 = vmatpush.bf16.msrb.mxu3 %v20639_v26 }
0x1138   : > { %18744 = vmatpush.bf16.msrb.mxu3 %v20631_v2 }
0x1155   : > { %v22659_v44 = vpop.trf.xlu0 }
0x1156   : > { %v22663_v18 = vunpack.i.h.bf16 %v22659_v44  ;;  %v22660_v12 = vunpack.i.l.bf16 %v22659_v44  ;;  %v10071_v44 = vsel %vm1312_vm0, %v10070_v49, %v10052_v60  ;;  %v28777_v49 = vld [vmem:[%s23107_s0 + $0x8] sm:$0x3f] }
0x1157   : > { %v18535_v40 = vperm.slane %v28777_v49, 0 }
0x1158   : > { %v18418_v45 = vrot.slane %v22663_v18, 4  ;;  %v18423_v17 = vperm.slane %v22663_v18, %v23267_v21  ;;  %v18408_v4 = vrot.slane %v22660_v12, 4  ;;  %v18413_v5 = vperm.slane %v22660_v12, %v23267_v21  ;;  %v21313_v18 = vld [vmem:[%s23078_s26 + $0x84] sm:$0xf]  ;;  %v20620_v12 = vld [vmem:[%s23078_s26 + $0x88] sm:$0xf0] }
0x1159   : > { %v20623_v41 = vor.u32 %v21313_v18, %v20620_v12  ;;  %v22917_v18 = vmov 256.0  }
0x115a   : > { %v18419_v14 = vsel %vm1312_vm0, 0.0, %v18418_v45  ;;  %v18428_v9 = vrot.slane %v18423_v17, 4  ;;  %v18409_v33 = vsel %vm1312_vm0, 0.0, %v18408_v4  ;;  %v18430_v36 = vrot.slane %v18413_v5, 4 }
0x115b   : > { %v18427_v19 = vperm.slane %v18419_v14, %v23267_v21  ;;  %v18417_v1 = vperm.slane %v18409_v33, %v23267_v21  ;;  %v20559_v45 = vor.u32 %v21297_v50, %v20556_v30  ;;  %v10075_v4 = vperm.slane %v10071_v44, %v23273_v39  ;;  %18745 = vmatpush.bf16.msrb.mxu3 %v20623_v41 }
0x115c   : > { %v18429_v42 = vsel %vm1312_vm0, %v18428_v9, %v18413_v5  ;;  %v18431_v38 = vsel %vm1312_vm0, %v18423_v17, %v18430_v36  ;;  %v10077_v5 = vsel %vm1312_vm0, %v10076_v62, %v10063_v22  ;;  %v22693_v62 = vld [vmem:[#allocation2 + $0x18] sm:$0xff]  ;;  %22680 = vrcp.f32 %v22917_v18 }
0x115d   : > { %v18440_v8 = vrot.slane %v18427_v19, 4  ;;  %v18435_v29 = vperm.slane %v18429_v42, %v23273_v39  ;;  %v18439_v0 = vperm.slane %v18431_v38, %v23273_v39  ;;  %v18442_v25 = vrot.slane %v18417_v1, 4  ;;  %18731 = vmatpush.bf16.msrb.mxu2 %v20559_v45 }
0x115e   : > { %v10081_v37 = vperm.slane %v10077_v5, %v23273_v39  ;;  %v21355_v5 = vld [vmem:[%s23084_s21 + $0xcc] sm:$0xf0] }
0x115f   : > { %v18441_v20 = vsel %vm1312_vm0, %v18440_v8, %v18417_v1  ;;  %v18443_v47 = vsel %vm1312_vm0, %v18427_v19, %v18442_v25  ;;  %v18452_v15 = vrot.slane %v18435_v29, 4  ;;  %v18454_v56 = vrot.slane %v18439_v0, 4 }
0x1160   : > { %v18447_v10 = vperm.slane %v18441_v20, %v23273_v39  ;;  %v18451_v63 = vperm.slane %v18443_v47, %v23273_v39  ;;  %v10084_v19 = vrot.slane %v10075_v4, 4  ;;  %v10082_v27 = vrot.slane %v10081_v37, 4 }
0x1161   : > { %v18455_v57 = vsel %vm1312_vm0, 0.0, %v18454_v56  ;;  %v18453_v28 = vsel %vm1312_vm0, 0.0, %v18452_v15  ;;  %v18460_v35 = vsel %vm1312_vm0, %v18454_v56, %v18435_v29 }
0x1162   : > { %v18456_v61 = vrot.slane %v18447_v10, 4  ;;  %v18458_v11 = vrot.slane %v18451_v63, 4  ;;  %v18465_v7 = vrot.slane %v18455_v57, 4  ;;  %v18464_v53 = vperm.slane %v18460_v35, %v23267_v21  ;;  %v22681_v12 = vpop.eup %22680 }
0x1163   : > { %v10085_v54 = vsel %vm1312_vm0, %v10081_v37, %v10084_v19  ;;  %v21351_v37 = vld [vmem:[%s23084_s21 + $0xac] sm:$0xf0] }
0x1164   : > { %v18459_v3 = vsel %vm1312_vm0, 0.0, %v18458_v11  ;;  %v18466_v16 = vsel %vm1312_vm0, %v18465_v7, %v18453_v28  ;;  %v18457_v17 = vsel %vm1312_vm0, 0.0, %v18456_v61  ;;  %v18471_v58 = vsel %vm1312_vm0, %v18458_v11, %v18447_v10  ;;  %v22691_v10 = vld [vmem:[#allocation2 + $0x10] sm:$0xff]  ;;  %v22694_v28 = vld [vmem:[#allocation2 + $0x8] sm:$0xff] }
0x1165   : > { %v18470_v46 = vperm.slane %v18466_v16, %v23267_v21  ;;  %v18476_v43 = vrot.slane %v18459_v3, 4  ;;  %v18475_v9 = vperm.slane %v18471_v58, %v23267_v21  ;;  %v18763_v3 = vmul.f32 256.0, %v22681_v12  ;;  %v20794_v16 = vld [vmem:[%s23084_s21 + $0xe0] sm:$0xf]  ;;  %v21387_v58 = vld [vmem:[%s23084_s21 + $0x1cc] sm:$0xf0] }
0x1167   : > { %v18482_v59 = vrot.slane %v18470_v46, 4  ;;  %v18477_v32 = vsel %vm1312_vm0, %v18476_v43, %v18457_v17  ;;  %v18764_v35 = vsub.f32 1.0, %v18763_v3  ;;  %v21359_v46 = vld [vmem:[%s23084_s21 + $0xec] sm:$0xf0]  ;;  %v20922_v43 = vld [vmem:[%s23084_s21 + $0x1e0] sm:$0xf] }
0x1168   : > { %v18481_v13 = vperm.slane %v18477_v32, %v23267_v21  ;;  %v10083_v21 = vsel %vm1312_vm0, %v10082_v27, %v10075_v4  ;;  %v20795_v45 = vor.u32 %v21359_v46, %v20794_v16  ;;  %v21391_v17 = vld [vmem:[%s23084_s21 + $0x1ec] sm:$0xf0]  ;;  %v20778_v4 = vld [vmem:[%s23084_s21 + $0xc0] sm:$0xf] }
0x1169   : > { %v18483_v14 = vsel %vm1312_vm0, %v18482_v59, %v18464_v53  ;;  %v20923_v41 = vor.u32 %v21391_v17, %v20922_v43  ;;  %v20906_v53 = vld [vmem:[%s23084_s21 + $0x1c0] sm:$0xf]  ;;  %v20779_v59 = vor.u32 %v21355_v5, %v20778_v4  ;;  %v21349_v4 = vld [vmem:[%s23084_s21 + $0xa4] sm:$0xf]  ;;  %v20764_v5 = vld [vmem:[%s23084_s21 + $0xb0] sm:$0xf0] }
0x116a   : > { %v18487_v33 = vperm.slane %v18483_v14, %v23273_v39  ;;  %v18488_v36 = vrot.slane %v18481_v13, 4  ;;  %19221 = vmatpush.bf16.msra.mxu0 %v20795_v45  ;;  %v20907_v32 = vor.u32 %v21387_v58, %v20906_v53  ;;  %v20762_v13 = vld [vmem:[%s23084_s21 + $0xa0] sm:$0xf]  ;;  %v18765_v14 = vmul.f32 %v22681_v12, %v18764_v35  ;;  %v20892_v58 = vld [vmem:[%s23084_s21 + $0x1b0] sm:$0xf0] }
0x116b   : > { %19235 = vmatpush.bf16.msra.mxu1 %v20923_v41  ;;  %v20763_v19 = vor.u32 %v21351_v37, %v20762_v13  ;;  %v21381_v41 = vld [vmem:[%s23084_s21 + $0x1a4] sm:$0xf]  ;;  %v20767_v53 = vor.u32 %v21349_v4, %v20764_v5  ;;  %v20876_v13 = vld [vmem:[%s23084_s21 + $0x190] sm:$0xf0] }
0x116c   : > { %v18489_v1 = vsel %vm1312_vm0, %v18488_v36, %v18475_v9  ;;  %v18496_v52 = vrot.slane %v18487_v33, 4  ;;  %v20890_v9 = vld [vmem:[%s23084_s21 + $0x1a0] sm:$0xf]  ;;  %v20812_v4 = vld [vmem:[%s23084_s21 + $0x110] sm:$0xf0] }
0x116d   : > { %v18493_v24 = vperm.slane %v18489_v1, %v23273_v39  ;;  %v28773_v39 = vld [vmem:[%s23107_s0] sm:$0x3f]  ;;  %v21347_v1 = vld [vmem:[%s23084_s21 + $0x8c] sm:$0xf0] }
0x116e   : > { %v18534_v55 = vperm.slane %v28773_v39, 0  ;;  %v20746_v36 = vld [vmem:[%s23084_s21 + $0x80] sm:$0xf]  ;;  %19222 = vmatpush.bf16.msra.mxu0 %v20779_v59  ;;  %v20748_v59 = vld [vmem:[%s23084_s21 + $0x90] sm:$0xf0] }
0x116f   : > { %v18497_v60 = vsel %vm1312_vm0, %v18493_v24, %v18496_v52  ;;  %v18494_v42 = vrot.slane %v18493_v24, 4  ;;  %v21357_v52 = vld [vmem:[%s23084_s21 + $0xe4] sm:$0xf]  ;;  %v20796_v24 = vld [vmem:[%s23084_s21 + $0xf0] sm:$0xf0]  ;;  %19236 = vmatpush.bf16.msra.mxu1 %v20907_v32 }
0x1170   : > { %v18499_v38 = vpack.c.bf16 %v18497_v60, %v10085_v54  ;;  %v20874_v54 = vld [vmem:[%s23084_s21 + $0x180] sm:$0xf]  ;;  %v20799_v60 = vor.u32 %v21357_v52, %v20796_v24  ;;  %v21377_v32 = vld [vmem:[%s23084_s21 + $0x184] sm:$0xf] }
0x1171   : > { %v18495_v48 = vsel %vm1312_vm0, %v18494_v42, %v18487_v33  ;;  %v21383_v33 = vld [vmem:[%s23084_s21 + $0x1ac] sm:$0xf0]  ;;  %v21389_v42 = vld [vmem:[%s23084_s21 + $0x1e4] sm:$0xf]  ;;  %vm18767_vm0 = vweird.f32 %v22681_v12 }
0x1172   : > { %18718 = vmatmul.bf16.vlgmr.msra.gmra.mxu3 %v18499_v38  ;;  %v18498_v8 = vpack.c.bf16 %v18495_v48, %v10083_v21  ;;  %v20891_v27 = vor.u32 %v21383_v33, %v20890_v9  ;;  %v18766_v21 = vadd.f32 %v22681_v12, %v18765_v14  ;;  %v21379_v48 = vld [vmem:[%s23084_s21 + $0x18c] sm:$0xf0]  ;;  %19223 = vmatpush.bf16.msra.mxu0 %v20763_v19  ;;  %v20698_v19 = vld [vmem:[%s23084_s21 + $0x20] sm:$0xf]  ;;  %v21341_v24 = vld [vmem:[%s23084_s21 + $0x64] sm:$0xf] }
0x1173   : > { %v20879_v14 = vor.u32 %v21377_v32, %v20876_v13  ;;  %v20786_v32 = vld [vmem:[%s23084_s21 + $0xc8] sm:$0xf] }
0x1174   : > { %18704 = vmatmul.bf16.vlgmr.msra.gmra.mxu2 %v18498_v8  ;;  %19237 = vmatpush.bf16.msra.mxu1 %v20891_v27  ;;  %v20732_v27 = vld [vmem:[%s23084_s21 + $0x70] sm:$0xf0] }
0x1175   : > { %19249 = vmatpush.bf16.msra.mxu2 %v20799_v60  ;;  %v20735_v60 = vor.u32 %v21341_v24, %v20732_v27  ;;  %v21354_v24 = vld [vmem:[%s23084_s21 + $0xcc] sm:$0xf]  ;;  %v20788_v27 = vld [vmem:[%s23084_s21 + $0xd8] sm:$0xf0] }
0x1182   : > { %18746 = vmatmul.bf16.vlgmr.msrb.gmra.mxu3 %v18499_v38  ;;  %v20924_v38 = vld [vmem:[%s23084_s21 + $0x1f0] sm:$0xf0] }
0x1184   : > { %18732 = vmatmul.bf16.vlgmr.msrb.gmra.mxu2 %v18498_v8  ;;  %v20927_v8 = vor.u32 %v21389_v42, %v20924_v38  ;;  %v20860_v42 = vld [vmem:[%s23084_s21 + $0x170] sm:$0xf0]  ;;  %v20826_v38 = vld [vmem:[%s23084_s21 + $0x120] sm:$0xf] }
0x1186   : > { %19263 = vmatpush.bf16.msra.mxu3 %v20927_v8 }
0x11f5   : > { %v18719_v29 = vpop.f32.mrf.mxu3 }
0x11f7   : > { %v18705_v0 = vpop.f32.mrf.mxu2 }
0x11f8   : > { %v18706_v26 = vadd.f32 %v18705_v0, %v18534_v55  ;;  %v20780_v0 = vld [vmem:[%s23084_s21 + $0xd0] sm:$0xf0] }
0x11fa   : > { %v18720_v47 = vadd.f32 %v18719_v29, %v18706_v26  ;;  %v21353_v29 = vld [vmem:[%s23084_s21 + $0xc4] sm:$0xf]  ;;  %v20747_v26 = vor.u32 %v21347_v1, %v20746_v36  ;;  %v21335_v1 = vld [vmem:[%s23084_s21 + $0x2c] sm:$0xf0] }
0x11fb   : > { %v20699_v52 = vor.u32 %v21335_v1, %v20698_v19 }
0x11fc   : > { %v28780_v63 = vadd.f32 %v22691_v10, %v18720_v47  ;;  %v21343_v47 = vld [vmem:[%s23084_s21 + $0x6c] sm:$0xf0]  ;;  %19224 = vmatpush.bf16.msra.mxu0 %v20747_v26  ;;  %v21333_v26 = vld [vmem:[%s23084_s21 + $0x24] sm:$0xf] }
0x11fd   : > { %v18721_v25 = vpop.f32.mrf.mxu3  ;;  %v21375_v10 = vld [vmem:[%s23084_s21 + $0x16c] sm:$0xf0] }
0x11ff   : > { %v18707_v31 = vpop.f32.mrf.mxu2 }
0x1200   : > { %v18708_v6 = vadd.f32 %v18707_v31, %v18534_v55  ;;  %v21385_v31 = vld [vmem:[%s23084_s21 + $0x1c4] sm:$0xf]  ;;  %v20908_v55 = vld [vmem:[%s23084_s21 + $0x1d0] sm:$0xf0] }
0x1202   : > { %v18722_v50 = vadd.f32 %v18721_v25, %v18708_v6  ;;  %v20783_v25 = vor.u32 %v21353_v29, %v20780_v0  ;;  %v21337_v29 = vld [vmem:[%s23084_s21 + $0x44] sm:$0xf]  ;;  %v20716_v0 = vld [vmem:[%s23084_s21 + $0x50] sm:$0xf0] }
0x1204   : > { %v28786_v30 = vadd.f32 %v22693_v62, %v18722_v50  ;;  %19250 = vmatpush.bf16.msra.mxu2 %v20783_v25  ;;  %v20714_v50 = vld [vmem:[%s23084_s21 + $0x40] sm:$0xf]  ;;  %v21369_v25 = vld [vmem:[%s23084_s21 + $0x144] sm:$0xf] }
0x1205   : > { %v18747_v34 = vpop.f32.mrf.mxu3 }
0x1207   : > { %v18733_v20 = vpop.f32.mrf.mxu2 }
0x1208   : > { %v18734_v15 = vadd.f32 %v18733_v20, %v18535_v40  ;;  %v20730_v20 = vld [vmem:[%s23084_s21 + $0x60] sm:$0xf]  ;;  %19251 = vmatpush.bf16.msra.mxu2 %v20767_v53  ;;  %v21358_v53 = vld [vmem:[%s23084_s21 + $0xec] sm:$0xf] }
0x120a   : > { %v18748_v56 = vadd.f32 %v18747_v34, %v18734_v15  ;;  %v20875_v34 = vor.u32 %v21379_v48, %v20874_v54  ;;  %v28818_v15 = vsel %vm18767_vm0, %v22681_v12, %v18766_v21  ;;  %v21373_v54 = vld [vmem:[%s23084_s21 + $0x164] sm:$0xf]  ;;  %v21367_v21 = vld [vmem:[%s23084_s21 + $0x12c] sm:$0xf0] }
0x120b   : > { %v20863_v48 = vor.u32 %v21373_v54, %v20860_v42  ;;  %v20827_v8 = vor.u32 %v21367_v21, %v20826_v38  ;;  %v21386_v42 = vld [vmem:[%s23084_s21 + $0x1cc] sm:$0xf]  ;;  %v20916_v38 = vld [vmem:[%s23084_s21 + $0x1d8] sm:$0xf0]  ;;  %v20770_v21 = vld [vmem:[%s23084_s21 + $0xa8] sm:$0xf] }
0x120c   : > { %v28782_v57 = vadd.f32 %v22692_v23, %v18748_v56  ;;  %v20858_v56 = vld [vmem:[%s23084_s21 + $0x160] sm:$0xf]  ;;  %v20731_v23 = vor.u32 %v21343_v47, %v20730_v20  ;;  %19238 = vmatpush.bf16.msra.mxu1 %v20875_v34  ;;  %v21365_v47 = vld [vmem:[%s23084_s21 + $0x124] sm:$0xf] }
0x120d   : > { %v18749_v11 = vpop.f32.mrf.mxu3 }
0x120e   : > { %v18756_v22 = vadd.f32 %v28782_v57, %v28780_v63  ;;  %19225 = vmatpush.bf16.msra.mxu0 %v20731_v23  ;;  %v21331_v23 = vld [vmem:[%s23084_s21 + $0xc] sm:$0xf0] }
0x120f   : > { %v18735_v51 = vpop.f32.mrf.mxu2 }
0x1210   : > { %v18736_v61 = vadd.f32 %v18735_v51, %v18535_v40  ;;  %18757 = vadd.xlane.f32.xlu1 %v18756_v22  ;;  %v20911_v40 = vor.u32 %v21385_v31, %v20908_v55  ;;  %v20859_v51 = vor.u32 %v21375_v10, %v20858_v56  ;;  %v20719_v31 = vor.u32 %v21337_v29, %v20716_v0  ;;  %v20844_v55 = vld [vmem:[%s23084_s21 + $0x150] sm:$0xf0]  ;;  %v20682_v10 = vld [vmem:[%s23084_s21] sm:$0xf]  ;;  %v20898_v29 = vld [vmem:[%s23084_s21 + $0x1a8] sm:$0xf] }
0x1211   : > { %v20847_v20 = vor.u32 %v21369_v25, %v20844_v55  ;;  %v20828_v56 = vld [vmem:[%s23084_s21 + $0x130] sm:$0xf0] }
0x1212   : > { %v18750_v7 = vadd.f32 %v18749_v11, %v18736_v61  ;;  %19264 = vmatpush.bf16.msra.mxu3 %v20911_v40  ;;  %v21339_v61 = vld [vmem:[%s23084_s21 + $0x4c] sm:$0xf0]  ;;  %v20842_v11 = vld [vmem:[%s23084_s21 + $0x140] sm:$0xf]  ;;  %19239 = vmatpush.bf16.msra.mxu1 %v20859_v51  ;;  %v20700_v40 = vld [vmem:[%s23084_s21 + $0x30] sm:$0xf0] }
0x1213   : > { %v21363_v51 = vld [vmem:[%s23084_s21 + $0x10c] sm:$0xf0] }
0x1214   : > { %v28788_v44 = vadd.f32 %v22694_v28, %v18750_v7  ;;  %v21371_v7 = vld [vmem:[%s23084_s21 + $0x14c] sm:$0xf0] }
0x1215   : > { %v20843_v3 = vor.u32 %v21371_v7, %v20842_v11  ;;  %v21329_v11 = vld [vmem:[%s23084_s21 + $0x4] sm:$0xf]  ;;  %v20684_v7 = vld [vmem:[%s23084_s21 + $0x10] sm:$0xf0] }
0x1216   : > { %v18759_v2 = vadd.f32 %v28788_v44, %v28786_v30  ;;  %v20687_v13 = vor.u32 %v21329_v11, %v20684_v7 }
0x1217   : > { %19240 = vmatpush.bf16.msra.mxu1 %v20843_v3  ;;  %v21361_v3 = vld [vmem:[%s23084_s21 + $0x104] sm:$0xf] }
0x1218   : > { %18760 = vadd.xlane.f32.xlu2 %v18759_v2  ;;  %v20715_v2 = vor.u32 %v21339_v61, %v20714_v50  ;;  %v20683_v50 = vor.u32 %v21331_v23, %v20682_v10  ;;  %v20815_v19 = vor.u32 %v21361_v3, %v20812_v4  ;;  %v20772_v10 = vld [vmem:[%s23084_s21 + $0xb8] sm:$0xf0]  ;;  %v21348_v23 = vld [vmem:[%s23084_s21 + $0x94] sm:$0xf0]  ;;  %v21378_v4 = vld [vmem:[%s23084_s21 + $0x18c] sm:$0xf] }
0x121a   : > { %19226 = vmatpush.bf16.msra.mxu0 %v20715_v2 }
0x121b   : > { %19241 = vmatpush.bf16.msra.mxu1 %v20827_v8  ;;  %v21352_v8 = vld [vmem:[%s23084_s21 + $0xb4] sm:$0xf0] }
0x121c   : > { %v20771_v25 = vor.u32 %v21352_v8, %v20770_v21 }
0x121e   : > { %19227 = vmatpush.bf16.msra.mxu0 %v20699_v52 }
0x1222   : > { %19228 = vmatpush.bf16.msra.mxu0 %v20683_v50  ;;  %v20882_v50 = vld [vmem:[%s23084_s21 + $0x188] sm:$0xf] }
0x1283   : > { %v18758_v6 = vpop.xlane.xlu1 %18757 }
0x1284   : > { %v18769_v22 = vmul.f32 %v28818_v15, %v18758_v6 }
0x1286   : > { %v28828_v62 = vsub.f32 %v28780_v63, %v18769_v22  ;;  %v28831_v28 = vsub.f32 %v28782_v57, %v18769_v22  ;;  %v20810_v22 = vld [vmem:[%s23084_s21 + $0x100] sm:$0xf] }
0x1287   : > { %v20811_v61 = vor.u32 %v21363_v51, %v20810_v22  ;;  %v20900_v51 = vld [vmem:[%s23084_s21 + $0x1b8] sm:$0xf0] }
0x1288   : > { %v18775_v18 = vmul.f32 %v28828_v62, %v28828_v62  ;;  %v18776_v12 = vmul.f32 %v28831_v28, %v28831_v28 }
0x1289   : > { %19242 = vmatpush.bf16.msra.mxu1 %v20811_v61  ;;  %v21380_v61 = vld [vmem:[%s23084_s21 + $0x194] sm:$0xf0] }
0x128a   : > { %v18779_v35 = vadd.f32 %v18776_v12, %v18775_v18  ;;  %v20703_v12 = vor.u32 %v21333_v26, %v20700_v40  ;;  %v20791_v40 = vor.u32 %v21354_v24, %v20788_v27  ;;  %v18819_v24 = vperm.slane %v28773_v39, 2  ;;  %v20724_v26 = vld [vmem:[%s23084_s21 + $0x58] sm:$0xf0] }
0x128b   : > { %v18761_v63 = vpop.xlane.xlu2 %18760  ;;  %v18820_v27 = vperm.slane %v28777_v49, 2 }
0x128c   : > { %v18770_v57 = vmul.f32 %v28818_v15, %v18761_v63  ;;  %18780 = vadd.xlane.f32.xlu1 %v18779_v35  ;;  %v20802_v35 = vld [vmem:[%s23084_s21 + $0xe8] sm:$0xf] }
0x128e   : > { %v28839_v16 = vsub.f32 %v28786_v30, %v18770_v57  ;;  %v28842_v46 = vsub.f32 %v28788_v44, %v18770_v57  ;;  %v21345_v30 = vld [vmem:[%s23084_s21 + $0x84] sm:$0xf]  ;;  %v20895_v44 = vor.u32 %v21381_v41, %v20892_v58  ;;  %v20831_v57 = vor.u32 %v21365_v47, %v20828_v56  ;;  %v20804_v58 = vld [vmem:[%s23084_s21 + $0xf8] sm:$0xf0] }
0x128f   : > { %v20751_v37 = vor.u32 %v21345_v30, %v20748_v59  ;;  %v21390_v59 = vld [vmem:[%s23084_s21 + $0x1ec] sm:$0xf]  ;;  %v20807_v1 = vor.u32 %v21358_v53, %v20804_v58  ;;  %v20919_v47 = vor.u32 %v21386_v42, %v20916_v38  ;;  %v20866_v58 = vld [vmem:[%s23084_s21 + $0x168] sm:$0xf]  ;;  %v21372_v38 = vld [vmem:[%s23084_s21 + $0x154] sm:$0xf0] }
0x1290   : > { %v18777_v43 = vmul.f32 %v28839_v16, %v28839_v16  ;;  %v18778_v45 = vmul.f32 %v28842_v46, %v28842_v46  ;;  %19265 = vmatpush.bf16.msra.mxu3 %v20895_v44  ;;  %v20932_v44 = vld [vmem:[%s23084_s21 + $0x1f8] sm:$0xf0]  ;;  %v20850_v42 = vld [vmem:[%s23084_s21 + $0x148] sm:$0xf] }
0x1291   : > { %19252 = vmatpush.bf16.msra.mxu2 %v20751_v37  ;;  %v21356_v37 = vld [vmem:[%s23084_s21 + $0xd4] sm:$0xf0]  ;;  %v20935_v54 = vor.u32 %v21390_v59, %v20932_v44  ;;  %v18814_v59 = vperm.slane %v28777_v49, 1 }
0x1292   : > { %v18782_v17 = vadd.f32 %v18778_v45, %v18777_v43  ;;  %v21360_v43 = vld [vmem:[%s23084_s21 + $0xf4] sm:$0xf0]  ;;  %v20930_v45 = vld [vmem:[%s23084_s21 + $0x1e8] sm:$0xf]  ;;  %v20787_v52 = vor.u32 %v21356_v37, %v20786_v32  ;;  %v21342_v37 = vld [vmem:[%s23084_s21 + $0x6c] sm:$0xf] }
0x1293   : > { %v20803_v5 = vor.u32 %v21360_v43, %v20802_v35 }
0x1294   : > { %18783 = vadd.xlane.f32.xlu1 %v18782_v17  ;;  %19266 = vmatpush.bf16.msra.mxu3 %v20879_v14  ;;  %v21392_v17 = vld [vmem:[%s23084_s21 + $0x1f4] sm:$0xf0]  ;;  %v20914_v14 = vld [vmem:[%s23084_s21 + $0x1c8] sm:$0xf] }
0x1295   : > { %19253 = vmatpush.bf16.msra.mxu2 %v20735_v60  ;;  %v20931_v41 = vor.u32 %v21392_v17, %v20930_v45  ;;  %19277 = vmatpush.bf16.msrb.mxu0 %v20803_v5  ;;  %v20883_v45 = vor.u32 %v21380_v61, %v20882_v50  ;;  %v20756_v17 = vld [vmem:[%s23084_s21 + $0x98] sm:$0xf0]  ;;  %v18813_v5 = vperm.slane %v28773_v39, 1  ;;  %v21334_v61 = vld [vmem:[%s23084_s21 + $0x2c] sm:$0xf] }
0x1297   : > { %19291 = vmatpush.bf16.msrb.mxu1 %v20931_v41 }
0x1298   : > { %19267 = vmatpush.bf16.msra.mxu3 %v20863_v48 }
0x1299   : > { %19254 = vmatpush.bf16.msra.mxu2 %v20719_v31  ;;  %19278 = vmatpush.bf16.msrb.mxu0 %v20787_v52  ;;  %v21384_v31 = vld [vmem:[%s23084_s21 + $0x1b4] sm:$0xf0]  ;;  %v20868_v52 = vld [vmem:[%s23084_s21 + $0x178] sm:$0xf0] }
0x129a   : > { %v20899_v56 = vor.u32 %v21384_v31, %v20898_v29  ;;  %v20851_v31 = vor.u32 %v21372_v38, %v20850_v42 }
0x129c   : > { %19268 = vmatpush.bf16.msra.mxu3 %v20847_v20  ;;  %v20754_v20 = vld [vmem:[%s23084_s21 + $0x88] sm:$0xf] }
0x129d   : > { %19255 = vmatpush.bf16.msra.mxu2 %v20703_v12  ;;  %19279 = vmatpush.bf16.msrb.mxu0 %v20771_v25  ;;  %v20755_v7 = vor.u32 %v21348_v23, %v20754_v20  ;;  %v21346_v12 = vld [vmem:[%s23084_s21 + $0x8c] sm:$0xf] }
0x12a0   : > { %19269 = vmatpush.bf16.msra.mxu3 %v20831_v57  ;;  %v21344_v57 = vld [vmem:[%s23084_s21 + $0x74] sm:$0xf0] }
0x12a1   : > { %19256 = vmatpush.bf16.msra.mxu2 %v20687_v13  ;;  %19280 = vmatpush.bf16.msrb.mxu0 %v20755_v7  ;;  %v21366_v7 = vld [vmem:[%s23084_s21 + $0x12c] sm:$0xf] }
0x12a4   : > { %19270 = vmatpush.bf16.msra.mxu3 %v20815_v19  ;;  %v20740_v19 = vld [vmem:[%s23084_s21 + $0x78] sm:$0xf0] }
0x12a5   : > { %19305 = vmatpush.bf16.msrb.mxu2 %v20807_v1  ;;  %v21374_v1 = vld [vmem:[%s23084_s21 + $0x16c] sm:$0xf]  ;;  %v20743_v49 = vor.u32 %v21342_v37, %v20740_v19  ;;  %v21050_v19 = vld [vmem:[%s23086_s19 + $0xe0] sm:$0xf] }
0x12a6   : > { %v20871_v29 = vor.u32 %v21374_v1, %v20868_v52  ;;  %v21422_v1 = vld [vmem:[%s23086_s19 + $0xe4] sm:$0xf0]  ;;  %v21456_v52 = vld [vmem:[%s23086_s19 + $0x1f4] sm:$0xf0] }
0x12a8   : > { %19319 = vmatpush.bf16.msrb.mxu3 %v20935_v54 }
0x12a9   : > { %19306 = vmatpush.bf16.msrb.mxu2 %v20791_v40  ;;  %v20706_v40 = vld [vmem:[%s23084_s21 + $0x28] sm:$0xf] }
0x12ac   : > { %19320 = vmatpush.bf16.msrb.mxu3 %v20919_v47 }
0x12ff   : > { %v18781_v9 = vpop.xlane.xlu1 %18780 }
0x1300   : > { %v18785_v33 = vmul.f32 %v18781_v9, %v28818_v15  ;;  %v21388_v9 = vld [vmem:[%s23084_s21 + $0x1d4] sm:$0xf0] }
0x1301   : > { %v20915_v60 = vor.u32 %v21388_v9, %v20914_v14  ;;  %v20722_v14 = vld [vmem:[%s23084_s21 + $0x48] sm:$0xf]  ;;  %v21340_v9 = vld [vmem:[%s23084_s21 + $0x54] sm:$0xf0] }
0x1302   : > { %v28857_v36 = vadd.f32 1e-05, %v18785_v33  ;;  %v20723_v39 = vor.u32 %v21340_v9, %v20722_v14  ;;  %v21122_v9 = vld [vmem:[%s23086_s19 + $0x170] sm:$0xf] }
0x1303   : > { %19292 = vmatpush.bf16.msrb.mxu1 %v20915_v60 }
0x1304   : > { %22682 = vrsqrt.f32 %v28857_v36  ;;  %vm18795_vm4 = vweird.f32 %v28857_v36 }
0x1307   : > { %v18784_v34 = vpop.xlane.xlu1 %18783  ;;  %19293 = vmatpush.bf16.msrb.mxu1 %v20899_v56  ;;  %v21336_v56 = vld [vmem:[%s23084_s21 + $0x34] sm:$0xf0] }
0x1308   : > { %v18786_v6 = vmul.f32 %v18784_v34, %v28818_v15  ;;  %v21350_v34 = vld [vmem:[%s23084_s21 + $0xac] sm:$0xf] }
0x1309   : > { %v20775_v35 = vor.u32 %v21350_v34, %v20772_v10  ;;  %v20834_v10 = vld [vmem:[%s23084_s21 + $0x128] sm:$0xf] }
0x130a   : > { %v28883_v2 = vpop.eup %22682  ;;  %v28885_v18 = vadd.f32 1e-05, %v18786_v6  ;;  %v21382_v6 = vld [vmem:[%s23084_s21 + $0x1ac] sm:$0xf] }
0x130b   : > { %v18790_v63 = vmul.f32 %v28883_v2, %v28857_v36  ;;  %vm18796_vm1 = vweird.f32 %v28883_v2  ;;  %v20903_v43 = vor.u32 %v21382_v6, %v20900_v51  ;;  %19307 = vmatpush.bf16.msrb.mxu2 %v20775_v35  ;;  %19294 = vmatpush.bf16.msrb.mxu1 %v20883_v45  ;;  %v21368_v6 = vld [vmem:[%s23084_s21 + $0x134] sm:$0xf0]  ;;  %v20836_v35 = vld [vmem:[%s23084_s21 + $0x138] sm:$0xf0] }
0x130c   : > { %22684 = vrsqrt.f32 %v28885_v18  ;;  %vm28920_vm5 = vmor %vm18795_vm4, %vm18796_vm1  ;;  %vm18805_vm7 = vweird.f32 %v28885_v18  ;;  %v21364_v45 = vld [vmem:[%s23084_s21 + $0x114] sm:$0xf0] }
0x130d   : > { %v18791_v30 = vmul.f32 %v28883_v2, %v18790_v63  ;;  %v20738_v63 = vld [vmem:[%s23084_s21 + $0x68] sm:$0xf]  ;;  %19321 = vmatpush.bf16.msrb.mxu3 %v20903_v43 }
0x130e   : > { %v20818_v43 = vld [vmem:[%s23084_s21 + $0x108] sm:$0xf] }
0x130f   : > { %v18792_v33 = vmul.f32 0.5, %v18791_v30  ;;  %v21376_v30 = vld [vmem:[%s23084_s21 + $0x174] sm:$0xf0]  ;;  %v20819_v32 = vor.u32 %v21364_v45, %v20818_v43  ;;  %v21018_v43 = vld [vmem:[%s23086_s19 + $0xa0] sm:$0xf] }
0x1310   : > { %v21414_v45 = vld [vmem:[%s23086_s19 + $0xa4] sm:$0xf0] }
0x1311   : > { %v18793_v48 = vsub.f32 1.5, %v18792_v33  ;;  %v20867_v33 = vor.u32 %v21376_v30, %v20866_v58  ;;  %v21330_v58 = vld [vmem:[%s23084_s21 + $0xc] sm:$0xf]  ;;  %v20692_v30 = vld [vmem:[%s23084_s21 + $0x18] sm:$0xf0] }
0x1312   : > { %v28913_v0 = vpop.eup %22684 }
0x1313   : > { %v18794_v55 = vmul.f32 %v28883_v2, %v18793_v48  ;;  %v18800_v36 = vmul.f32 %v28913_v0, %v28885_v18  ;;  %vm18806_vm6 = vweird.f32 %v28913_v0  ;;  %v20759_v18 = vor.u32 %v21346_v12, %v20756_v17  ;;  %19295 = vmatpush.bf16.msrb.mxu1 %v20867_v33  ;;  %v20994_v17 = vld [vmem:[%s23086_s19 + $0x70] sm:$0xf] }
0x1314   : > { %vm28954_vm8 = vmor %vm18805_vm7, %vm18806_vm6  ;;  %v20707_v12 = vor.u32 %v21336_v56, %v20706_v40  ;;  %v21186_v33 = vld [vmem:[%s23086_s19 + $0x1f0] sm:$0xf]  ;;  %v20970_v40 = vld [vmem:[%s23086_s19 + $0x40] sm:$0xf] }
0x1315   : > { %v18801_v22 = vmul.f32 %v28913_v0, %v18800_v36  ;;  %v18798_v11 = vsel %vm28920_vm5, %v28883_v2, %v18794_v55  ;;  %v20884_v2 = vld [vmem:[%s23084_s21 + $0x198] sm:$0xf0]  ;;  %19308 = vmatpush.bf16.msrb.mxu2 %v20759_v18  ;;  %v21338_v55 = vld [vmem:[%s23084_s21 + $0x4c] sm:$0xf]  ;;  %v21406_v18 = vld [vmem:[%s23086_s19 + $0x64] sm:$0xf0]  ;;  %v21187_v42 = vor.u32 %v21456_v52, %v21186_v33 }
0x1316   : > { %v18809_v41 = vmul.f32 %v18798_v11, %v28828_v62  ;;  %v18810_v44 = vmul.f32 %v18798_v11, %v28831_v28  ;;  %v20739_v62 = vor.u32 %v21344_v57, %v20738_v63  ;;  %v20887_v28 = vor.u32 %v21378_v4, %v20884_v2  ;;  %v21370_v36 = vld [vmem:[%s23084_s21 + $0x14c] sm:$0xf]  ;;  %v20708_v11 = vld [vmem:[%s23084_s21 + $0x38] sm:$0xf0]  ;;  %v20690_v63 = vld [vmem:[%s23084_s21 + $0x8] sm:$0xf] }
0x1317   : > { %v18802_v3 = vmul.f32 0.5, %v18801_v22  ;;  %v20727_v23 = vor.u32 %v21338_v55, %v20724_v26  ;;  %19296 = vmatpush.bf16.msrb.mxu1 %v20851_v31  ;;  %v21332_v57 = vld [vmem:[%s23084_s21 + $0x14] sm:$0xf0]  ;;  %v21058_v2 = vld [vmem:[%s23086_s19 + $0xf0] sm:$0xf] }
0x1318   : > { %v18815_v54 = vmul.f32 %v18813_v5, %v18809_v41  ;;  %v18816_v21 = vmul.f32 %v18814_v59, %v18810_v44  ;;  %19281 = vmatpush.bf16.msrb.mxu0 %v20739_v62  ;;  %19322 = vmatpush.bf16.msrb.mxu3 %v20887_v28  ;;  %v21408_v4 = vld [vmem:[%s23086_s19 + $0x74] sm:$0xf0]  ;;  %v20711_v41 = vor.u32 %v21334_v61, %v20708_v11  ;;  %v20820_v62 = vld [vmem:[%s23084_s21 + $0x118] sm:$0xf0]  ;;  %v21106_v26 = vld [vmem:[%s23086_s19 + $0x150] sm:$0xf] }
0x1319   : > { %v18803_v53 = vsub.f32 1.5, %v18802_v3  ;;  %19309 = vmatpush.bf16.msrb.mxu2 %v20743_v49  ;;  %v20835_v3 = vor.u32 %v21368_v6, %v20834_v10  ;;  %v20691_v44 = vor.u32 %v21332_v57, %v20690_v63  ;;  %v20995_v37 = vor.u32 %v21408_v4, %v20994_v17  ;;  %v21440_v28 = vld [vmem:[%s23086_s19 + $0x174] sm:$0xf0]  ;;  %v20978_v49 = vld [vmem:[%s23086_s19 + $0x50] sm:$0xf] }
0x131a   : > { %v28981_v34 = vadd.f32 %v18820_v27, %v18816_v21  ;;  %v21051_v21 = vor.u32 %v21422_v1, %v21050_v19  ;;  %v21402_v10 = vld [vmem:[%s23086_s19 + $0x44] sm:$0xf0]  ;;  %v21034_v6 = vld [vmem:[%s23086_s19 + $0xc0] sm:$0xf]  ;;  %v20962_v11 = vld [vmem:[%s23086_s19 + $0x30] sm:$0xf]  ;;  %v21019_v4 = vor.u32 %v21414_v45, %v21018_v43 }
0x131b   : > { %v18804_v13 = vmul.f32 %v28913_v0, %v18803_v53  ;;  %v20839_v53 = vor.u32 %v21366_v7, %v20836_v35  ;;  %19297 = vmatpush.bf16.msrb.mxu1 %v20835_v3  ;;  %v20971_v61 = vor.u32 %v21402_v10, %v20970_v40  ;;  %v21026_v3 = vld [vmem:[%s23086_s19 + $0xb0] sm:$0xf]  ;;  %v21416_v35 = vld [vmem:[%s23086_s19 + $0xb4] sm:$0xf0]  ;;  %v21398_v57 = vld [vmem:[%s23086_s19 + $0x24] sm:$0xf0] }
0x131c   : > { %19282 = vmatpush.bf16.msrb.mxu0 %v20723_v39  ;;  %19323 = vmatpush.bf16.msrb.mxu3 %v20871_v29  ;;  %v21454_v39 = vld [vmem:[%s23086_s19 + $0x1e4] sm:$0xf0]  ;;  %v21404_v29 = vld [vmem:[%s23086_s19 + $0x54] sm:$0xf0]  ;;  %v21090_v19 = vld [vmem:[%s23086_s19 + $0x130] sm:$0xf] }
0x131d   : > { %v18808_v60 = vsel %vm28954_vm8, %v28913_v0, %v18804_v13  ;;  %19310 = vmatpush.bf16.msrb.mxu2 %v20727_v23  ;;  %v20986_v13 = vld [vmem:[%s23086_s19 + $0x60] sm:$0xf]  ;;  %v21418_v23 = vld [vmem:[%s23086_s19 + $0xc4] sm:$0xf0]  ;;  %v21452_v33 = vld [vmem:[%s23086_s19 + $0x1d4] sm:$0xf0] }
0x131e   : > { %v18811_v48 = vmul.f32 %v18808_v60, %v28839_v16  ;;  %v18812_v8 = vmul.f32 %v18808_v60, %v28842_v46  ;;  %v20852_v16 = vld [vmem:[%s23084_s21 + $0x158] sm:$0xf0]  ;;  %v28979_v46 = vadd.f32 %v18819_v24, %v18815_v54  ;;  %v21123_v54 = vor.u32 %v21440_v28, %v21122_v9  ;;  %v21114_v60 = vld [vmem:[%s23086_s19 + $0x160] sm:$0xf]  ;;  %v21170_v9 = vld [vmem:[%s23086_s19 + $0x1d0] sm:$0xf] }
0x131f   : > { %v20855_v50 = vor.u32 %v21370_v36, %v20852_v16  ;;  %19298 = vmatpush.bf16.msrb.mxu1 %v20819_v32  ;;  %v20987_v38 = vor.u32 %v21406_v18, %v20986_v13  ;;  %v21436_v36 = vld [vmem:[%s23086_s19 + $0x154] sm:$0xf0]  ;;  %v20979_v16 = vor.u32 %v21404_v29, %v20978_v49  ;;  %v21035_v7 = vor.u32 %v21418_v23, %v21034_v6  ;;  %v21407_v32 = vld [vmem:[%s23086_s19 + $0x74] sm:$0xf]  ;;  %v21060_v29 = vld [vmem:[%s23086_s19 + $0xf8] sm:$0xf0] }
0x1320   : > { %v18817_v25 = vmul.f32 %v18813_v5, %v18811_v48  ;;  %v18818_v0 = vmul.f32 %v18814_v59, %v18812_v8  ;;  %v21424_v5 = vld [vmem:[%s23086_s19 + $0xf4] sm:$0xf0]  ;;  %v21362_v59 = vld [vmem:[%s23084_s21 + $0x10c] sm:$0xf]  ;;  %19283 = vmatpush.bf16.msrb.mxu0 %v20707_v12  ;;  %v21438_v48 = vld [vmem:[%s23086_s19 + $0x164] sm:$0xf0]  ;;  %v21171_v52 = vor.u32 %v21452_v33, %v21170_v9 }
0x1321   : > { %19324 = vmatpush.bf16.msrb.mxu3 %v20855_v50  ;;  %v21059_v14 = vor.u32 %v21424_v5, %v21058_v2  ;;  %19311 = vmatpush.bf16.msrb.mxu2 %v20711_v41  ;;  %v21178_v8 = vld [vmem:[%s23086_s19 + $0x1e0] sm:$0xf]  ;;  %v21115_v31 = vor.u32 %v21438_v48, %v21114_v60  ;;  %v21107_v50 = vor.u32 %v21436_v36, %v21106_v26  ;;  %v21400_v12 = vld [vmem:[%s23086_s19 + $0x34] sm:$0xf0]  ;;  %v20946_v2 = vld [vmem:[%s23086_s19 + $0x10] sm:$0xf] }
0x1322   : > { %v28983_v20 = vadd.f32 %v18819_v24, %v18817_v25  ;;  %v28985_v47 = vadd.f32 %v18820_v27, %v18818_v0  ;;  %v20695_v24 = vor.u32 %v21330_v58, %v20692_v30  ;;  %v20823_v27 = vor.u32 %v21362_v59, %v20820_v62  ;;  %v21042_v25 = vld [vmem:[%s23086_s19 + $0xd0] sm:$0xf]  ;;  %v21420_v0 = vld [vmem:[%s23086_s19 + $0xd4] sm:$0xf0]  ;;  %v21394_v58 = vld [vmem:[%s23086_s19 + $0x4] sm:$0xf0] }
0x1323   : > { %v21179_v55 = vor.u32 %v21454_v39, %v21178_v8  ;;  %v21043_v56 = vor.u32 %v21420_v0, %v21042_v25  ;;  %v20963_v63 = vor.u32 %v21400_v12, %v20962_v11  ;;  %v21396_v5 = vld [vmem:[%s23086_s19 + $0x14] sm:$0xf0]  ;;  %v21098_v30 = vld [vmem:[%s23086_s19 + $0x140] sm:$0xf]  ;;  %v20996_v62 = vld [vmem:[%s23086_s19 + $0x78] sm:$0xf0] }
0x1324   : > { %v28992_v22 = vpack.c.bf16 %v28983_v20, %v28979_v46  ;;  %v28996_v51 = vpack.c.bf16 %v28985_v47, %v28981_v34  ;;  %19284 = vmatpush.bf16.msrb.mxu0 %v20691_v44  ;;  %v20947_v41 = vor.u32 %v21396_v5, %v20946_v2  ;;  %v21434_v44 = vld [vmem:[%s23086_s19 + $0x144] sm:$0xf0]  ;;  %v20999_v18 = vor.u32 %v21407_v32, %v20996_v62  ;;  %v21432_v1 = vld [vmem:[%s23086_s19 + $0x134] sm:$0xf0]  ;;  %v21002_v60 = vld [vmem:[%s23086_s19 + $0x80] sm:$0xf] }
0x1325   : > { %19325 = vmatpush.bf16.msrb.mxu3 %v20839_v53  ;;  %19312 = vmatpush.bf16.msrb.mxu2 %v20695_v24  ;;  %v20938_v53 = vld [vmem:[%s23086_s19] sm:$0xf]  ;;  %v21099_v13 = vor.u32 %v21434_v44, %v21098_v30  ;;  %v21091_v24 = vor.u32 %v21432_v1, %v21090_v19  ;;  %v21450_v48 = vld [vmem:[%s23086_s19 + $0x1c4] sm:$0xf0]  ;;  %v21423_v49 = vld [vmem:[%s23086_s19 + $0xf4] sm:$0xf] }
0x1326   : > { %19229 = vmatmul.bf16.vlgmr.msra.gmra.mxu0 %v28992_v22  ;;  %19243 = vmatmul.bf16.vlgmr.msra.gmra.mxu1 %v28996_v51  ;;  %v20939_v59 = vor.u32 %v21394_v58, %v20938_v53  ;;  %v21082_v25 = vld [vmem:[%s23086_s19 + $0x120] sm:$0xf]  ;;  %v21063_v0 = vor.u32 %v21423_v49, %v21060_v29  ;;  %v20980_v26 = vld [vmem:[%s23086_s19 + $0x58] sm:$0xf0]  ;;  %v21154_v40 = vld [vmem:[%s23086_s19 + $0x1b0] sm:$0xf] }
0x1327   : > { %19257 = vmatmul.bf16.vlgmr.msra.gmra.mxu2 %v28992_v22  ;;  %19271 = vmatmul.bf16.vlgmr.msra.gmra.mxu3 %v28996_v51  ;;  %v21421_v10 = vld [vmem:[%s23086_s19 + $0xe4] sm:$0xf]  ;;  %v21052_v23 = vld [vmem:[%s23086_s19 + $0xe8] sm:$0xf0]  ;;  %v21044_v43 = vld [vmem:[%s23086_s19 + $0xd8] sm:$0xf0] }
0x1328   : > { %19731 = vmatpush.bf16.msra.mxu0 %v20995_v37  ;;  %19745 = vmatpush.bf16.msra.mxu1 %v21059_v14  ;;  %v21010_v37 = vld [vmem:[%s23086_s19 + $0x90] sm:$0xf]  ;;  %v21412_v14 = vld [vmem:[%s23086_s19 + $0x94] sm:$0xf0]  ;;  %v21055_v11 = vor.u32 %v21421_v10, %v21052_v23  ;;  %v21401_v12 = vld [vmem:[%s23086_s19 + $0x44] sm:$0xf] }
0x1329   : > { %19326 = vmatpush.bf16.msrb.mxu3 %v20823_v27  ;;  %19759 = vmatpush.bf16.msra.mxu2 %v21123_v54  ;;  %v21011_v28 = vor.u32 %v21412_v14, %v21010_v37  ;;  %v21405_v27 = vld [vmem:[%s23086_s19 + $0x64] sm:$0xf]  ;;  %v20988_v54 = vld [vmem:[%s23086_s19 + $0x68] sm:$0xf0]  ;;  %v21066_v45 = vld [vmem:[%s23086_s19 + $0x100] sm:$0xf] }
0x132a   : > { %v21399_v5 = vld [vmem:[%s23086_s19 + $0x34] sm:$0xf]  ;;  %v21124_v30 = vld [vmem:[%s23086_s19 + $0x178] sm:$0xf0]  ;;  %v21444_v44 = vld [vmem:[%s23086_s19 + $0x194] sm:$0xf0] }
0x132b   : > { %v21439_v53 = vld [vmem:[%s23086_s19 + $0x174] sm:$0xf]  ;;  %v29099_v32 = vld [vmem:[%s23097_s14] sm:$0xf]  ;;  %v21036_v37 = vld [vmem:[%s23086_s19 + $0xc8] sm:$0xf0] }
0x132c   : > { %19732 = vmatpush.bf16.msra.mxu0 %v20987_v38  ;;  %19746 = vmatpush.bf16.msra.mxu1 %v21051_v21  ;;  %v21410_v38 = vld [vmem:[%s23086_s19 + $0x84] sm:$0xf0]  ;;  %v21162_v21 = vld [vmem:[%s23086_s19 + $0x1c0] sm:$0xf]  ;;  %v21127_v62 = vor.u32 %v21439_v53, %v21124_v30  ;;  %v21397_v9 = vld [vmem:[%s23086_s19 + $0x24] sm:$0xf] }
0x132d   : > { %19773 = vmatpush.bf16.msra.mxu3 %v21187_v42  ;;  %19760 = vmatpush.bf16.msra.mxu2 %v21115_v31  ;;  %v20991_v42 = vor.u32 %v21405_v27, %v20988_v54  ;;  %v21003_v8 = vor.u32 %v21410_v38, %v21002_v60  ;;  %v21163_v39 = vor.u32 %v21450_v48, %v21162_v21  ;;  %v21430_v31 = vld [vmem:[%s23086_s19 + $0x124] sm:$0xf0]  ;;  %v21437_v33 = vld [vmem:[%s23086_s19 + $0x164] sm:$0xf]  ;;  %v21116_v1 = vld [vmem:[%s23086_s19 + $0x168] sm:$0xf0] }
0x132e   : > { %v21083_v36 = vor.u32 %v21430_v31, %v21082_v25  ;;  %v18893_v27 = vperm.slane %v29099_v32, 0  ;;  %v21119_v54 = vor.u32 %v21437_v33, %v21116_v1  ;;  %v21028_v38 = vld [vmem:[%s23086_s19 + $0xb8] sm:$0xf0]  ;;  %v21455_v21 = vld [vmem:[%s23086_s19 + $0x1f4] sm:$0xf] }
0x132f   : > { %v21188_v49 = vld [vmem:[%s23086_s19 + $0x1f8] sm:$0xf0]  ;;  %v21395_v29 = vld [vmem:[%s23086_s19 + $0x14] sm:$0xf]  ;;  %v21180_v10 = vld [vmem:[%s23086_s19 + $0x1e8] sm:$0xf0] }
0x1330   : > { %19733 = vmatpush.bf16.msra.mxu0 %v20979_v16  ;;  %19747 = vmatpush.bf16.msra.mxu1 %v21043_v56  ;;  %v21448_v56 = vld [vmem:[%s23086_s19 + $0x1b4] sm:$0xf0]  ;;  %v20948_v25 = vld [vmem:[%s23086_s19 + $0x18] sm:$0xf0]  ;;  %v21429_v33 = vld [vmem:[%s23086_s19 + $0x124] sm:$0xf] }
0x1331   : > { %19774 = vmatpush.bf16.msra.mxu3 %v21179_v55  ;;  %19761 = vmatpush.bf16.msra.mxu2 %v21107_v50  ;;  %v21403_v55 = vld [vmem:[%s23086_s19 + $0x54] sm:$0xf]  ;;  %v21155_v6 = vor.u32 %v21448_v56, %v21154_v40  ;;  %v21074_v50 = vld [vmem:[%s23086_s19 + $0x110] sm:$0xf]  ;;  %v20951_v31 = vor.u32 %v21395_v29, %v20948_v25  ;;  %v21020_v40 = vld [vmem:[%s23086_s19 + $0xa8] sm:$0xf0] }
0x1332   : > { %v20983_v16 = vor.u32 %v21403_v55, %v20980_v26  ;;  %v21435_v55 = vld [vmem:[%s23086_s19 + $0x154] sm:$0xf]  ;;  %v21108_v26 = vld [vmem:[%s23086_s19 + $0x158] sm:$0xf0]  ;;  %v21453_v56 = vld [vmem:[%s23086_s19 + $0x1e4] sm:$0xf] }
0x1333   : > { %v21183_v23 = vor.u32 %v21453_v56, %v21180_v10  ;;  %v21425_v56 = vld [vmem:[%s23086_s19 + $0x104] sm:$0xf]  ;;  %v21068_v10 = vld [vmem:[%s23086_s19 + $0x108] sm:$0xf0] }
0x1334   : > { %19734 = vmatpush.bf16.msra.mxu0 %v20971_v61  ;;  %19748 = vmatpush.bf16.msra.mxu1 %v21035_v7  ;;  %v21428_v61 = vld [vmem:[%s23086_s19 + $0x114] sm:$0xf0] }
0x1335   : > { %19762 = vmatpush.bf16.msra.mxu2 %v21099_v13  ;;  %19775 = vmatpush.bf16.msra.mxu3 %v21171_v52  ;;  %v21075_v7 = vor.u32 %v21428_v61, %v21074_v50  ;;  %v21130_v52 = vld [vmem:[%s23086_s19 + $0x180] sm:$0xf]  ;;  %v18894_v61 = vperm.slane %v29099_v32, 1 }
0x1336   : > { %19285 = vmatmul.bf16.vlgmr.msrb.gmra.mxu0 %v28992_v22  ;;  %19299 = vmatmul.bf16.vlgmr.msrb.gmra.mxu1 %v28996_v51 }
0x1337   : > { %19313 = vmatmul.bf16.vlgmr.msrb.gmra.mxu2 %v28992_v22  ;;  %19327 = vmatmul.bf16.vlgmr.msrb.gmra.mxu3 %v28996_v51  ;;  %v20954_v22 = vld [vmem:[%s23086_s19 + $0x20] sm:$0xf]  ;;  %v21027_v51 = vor.u32 %v21416_v35, %v21026_v3  ;;  %v20972_v3 = vld [vmem:[%s23086_s19 + $0x48] sm:$0xf0] }
0x1338   : > { %19735 = vmatpush.bf16.msra.mxu0 %v20963_v63  ;;  %v20955_v17 = vor.u32 %v21398_v57, %v20954_v22  ;;  %v21146_v35 = vld [vmem:[%s23086_s19 + $0x1a0] sm:$0xf]  ;;  %v20975_v63 = vor.u32 %v21401_v12, %v20972_v3  ;;  %v21446_v22 = vld [vmem:[%s23086_s19 + $0x1a4] sm:$0xf0]  ;;  %v21433_v12 = vld [vmem:[%s23086_s19 + $0x144] sm:$0xf] }
0x1339   : > { %19749 = vmatpush.bf16.msra.mxu1 %v21027_v51  ;;  %19763 = vmatpush.bf16.msra.mxu2 %v21091_v24  ;;  %v21419_v51 = vld [vmem:[%s23086_s19 + $0xd4] sm:$0xf]  ;;  %v21147_v57 = vor.u32 %v21446_v22, %v21146_v35  ;;  %v21442_v24 = vld [vmem:[%s23086_s19 + $0x184] sm:$0xf0]  ;;  %v21100_v22 = vld [vmem:[%s23086_s19 + $0x148] sm:$0xf0] }
0x133a   : > { %19776 = vmatpush.bf16.msra.mxu3 %v21163_v39  ;;  %v21131_v60 = vor.u32 %v21442_v24, %v21130_v52  ;;  %v21447_v52 = vld [vmem:[%s23086_s19 + $0x1b4] sm:$0xf]  ;;  %v21156_v24 = vld [vmem:[%s23086_s19 + $0x1b8] sm:$0xf0] }
0x133c   : > { %19736 = vmatpush.bf16.msra.mxu0 %v20955_v17  ;;  %v21426_v17 = vld [vmem:[%s23086_s19 + $0x104] sm:$0xf0] }
0x133d   : > { %19750 = vmatpush.bf16.msra.mxu1 %v21019_v4  ;;  %19764 = vmatpush.bf16.msra.mxu2 %v21083_v36  ;;  %v21047_v4 = vor.u32 %v21419_v51, %v21044_v43  ;;  %v21067_v2 = vor.u32 %v21426_v17, %v21066_v45  ;;  %v21413_v36 = vld [vmem:[%s23086_s19 + $0xa4] sm:$0xf]  ;;  %v21411_v51 = vld [vmem:[%s23086_s19 + $0x94] sm:$0xf]  ;;  %v21103_v17 = vor.u32 %v21433_v12, %v21100_v22  ;;  %v18896_v22 = vperm.slane %v29099_v32, 3 }
0x133e   : > { %19777 = vmatpush.bf16.msra.mxu3 %v21155_v6  ;;  %v21023_v6 = vor.u32 %v21413_v36, %v21020_v40  ;;  %v21071_v12 = vor.u32 %v21425_v56, %v21068_v10 }
0x1340   : > { %19737 = vmatpush.bf16.msra.mxu0 %v20947_v41  ;;  %v20964_v41 = vld [vmem:[%s23086_s19 + $0x38] sm:$0xf0] }
0x1341   : > { %19751 = vmatpush.bf16.msra.mxu1 %v21011_v28  ;;  %19765 = vmatpush.bf16.msra.mxu2 %v21075_v7  ;;  %v20967_v58 = vor.u32 %v21399_v5, %v20964_v41  ;;  %v20956_v28 = vld [vmem:[%s23086_s19 + $0x28] sm:$0xf0]  ;;  %v21172_v5 = vld [vmem:[%s23086_s19 + $0x1d8] sm:$0xf0]  ;;  %v21431_v41 = vld [vmem:[%s23086_s19 + $0x134] sm:$0xf] }
0x1342   : > { %19778 = vmatpush.bf16.msra.mxu3 %v21147_v57  ;;  %v20959_v19 = vor.u32 %v21397_v9, %v20956_v28  ;;  %v20940_v7 = vld [vmem:[%s23086_s19 + $0x8] sm:$0xf0]  ;;  %v21012_v57 = vld [vmem:[%s23086_s19 + $0x98] sm:$0xf0] }
0x1344   : > { %19738 = vmatpush.bf16.msra.mxu0 %v20939_v59  ;;  %v21138_v59 = vld [vmem:[%s23086_s19 + $0x190] sm:$0xf] }
0x1345   : > { %19752 = vmatpush.bf16.msra.mxu1 %v21003_v8  ;;  %19766 = vmatpush.bf16.msra.mxu2 %v21067_v2  ;;  %v21139_v13 = vor.u32 %v21444_v44, %v21138_v59  ;;  %v21451_v2 = vld [vmem:[%s23086_s19 + $0x1d4] sm:$0xf]  ;;  %v21092_v59 = vld [vmem:[%s23086_s19 + $0x138] sm:$0xf0]  ;;  %v21409_v44 = vld [vmem:[%s23086_s19 + $0x84] sm:$0xf] }
0x1346   : > { %v21175_v30 = vor.u32 %v21451_v2, %v21172_v5 }
0x1347   : > { %19779 = vmatpush.bf16.msra.mxu3 %v21139_v13  ;;  %v21095_v13 = vor.u32 %v21431_v41, %v21092_v59 }
0x1348   : > { %19787 = vmatpush.bf16.msrb.mxu0 %v20999_v18  ;;  %v21417_v18 = vld [vmem:[%s23086_s19 + $0xc4] sm:$0xf] }
0x1349   : > { %19801 = vmatpush.bf16.msrb.mxu1 %v21063_v0  ;;  %v21039_v14 = vor.u32 %v21417_v18, %v21036_v37  ;;  %19815 = vmatpush.bf16.msrb.mxu2 %v21127_v62  ;;  %v21191_v0 = vor.u32 %v21455_v21, %v21188_v49  ;;  %v21004_v62 = vld [vmem:[%s23086_s19 + $0x88] sm:$0xf0]  ;;  %v21449_v18 = vld [vmem:[%s23086_s19 + $0x1c4] sm:$0xf] }
0x134a   : > { %v21164_v37 = vld [vmem:[%s23086_s19 + $0x1c8] sm:$0xf0]  ;;  %v21007_v9 = vor.u32 %v21409_v44, %v21004_v62 }
0x134b   : > { %19780 = vmatpush.bf16.msra.mxu3 %v21131_v60  ;;  %v21167_v28 = vor.u32 %v21449_v18, %v21164_v37 }
0x134c   : > { %19788 = vmatpush.bf16.msrb.mxu0 %v20991_v42  ;;  %v21415_v42 = vld [vmem:[%s23086_s19 + $0xb4] sm:$0xf] }
0x134d   : > { %19802 = vmatpush.bf16.msrb.mxu1 %v21055_v11  ;;  %v21031_v39 = vor.u32 %v21415_v42, %v21028_v38  ;;  %19816 = vmatpush.bf16.msrb.mxu2 %v21119_v54  ;;  %v21393_v11 = vld [vmem:[%s23086_s19 + $0x4] sm:$0xf] }
0x134f   : > { %19829 = vmatpush.bf16.msrb.mxu3 %v21191_v0 }
0x1350   : > { %19789 = vmatpush.bf16.msrb.mxu0 %v20983_v16  ;;  %v21111_v16 = vor.u32 %v21435_v55, %v21108_v26  ;;  %v21148_v55 = vld [vmem:[%s23086_s19 + $0x1a8] sm:$0xf0]  ;;  %v18895_v26 = vperm.slane %v29099_v32, 2 }
0x1351   : > { %19803 = vmatpush.bf16.msrb.mxu1 %v21047_v4  ;;  %v21015_v4 = vor.u32 %v21411_v51, %v21012_v57  ;;  %v21441_v57 = vld [vmem:[%s23086_s19 + $0x184] sm:$0xf] }
0x1352   : > { %19817 = vmatpush.bf16.msrb.mxu2 %v21111_v16 }
0x1353   : > { %19830 = vmatpush.bf16.msrb.mxu3 %v21183_v23 }
0x1354   : > { %19790 = vmatpush.bf16.msrb.mxu0 %v20975_v63  ;;  %v20943_v63 = vor.u32 %v21393_v11, %v20940_v7 }
0x1355   : > { %19804 = vmatpush.bf16.msrb.mxu1 %v21039_v14 }
0x1356   : > { %19818 = vmatpush.bf16.msrb.mxu2 %v21103_v17 }
0x1357   : > { %19831 = vmatpush.bf16.msrb.mxu3 %v21175_v30 }
0x1358   : > { %19791 = vmatpush.bf16.msrb.mxu0 %v20967_v58 }
0x1359   : > { %19805 = vmatpush.bf16.msrb.mxu1 %v21031_v39  ;;  %v21076_v39 = vld [vmem:[%s23086_s19 + $0x118] sm:$0xf0] }
0x135a   : > { %19819 = vmatpush.bf16.msrb.mxu2 %v21095_v13 }
0x135b   : > { %19832 = vmatpush.bf16.msrb.mxu3 %v21167_v28 }
0x135c   : > { %19792 = vmatpush.bf16.msrb.mxu0 %v20959_v19  ;;  %v21084_v19 = vld [vmem:[%s23086_s19 + $0x128] sm:$0xf0] }
0x135d   : > { %19806 = vmatpush.bf16.msrb.mxu1 %v21023_v6  ;;  %v21087_v60 = vor.u32 %v21429_v33, %v21084_v19 }
0x135f   : > { %19820 = vmatpush.bf16.msrb.mxu2 %v21087_v60 }
0x1360   : > { %19793 = vmatpush.bf16.msrb.mxu0 %v20951_v31  ;;  %v21445_v31 = vld [vmem:[%s23086_s19 + $0x1a4] sm:$0xf] }
0x1361   : > { %19807 = vmatpush.bf16.msrb.mxu1 %v21015_v4  ;;  %v21151_v40 = vor.u32 %v21445_v31, %v21148_v55 }
0x1364   : > { %19794 = vmatpush.bf16.msrb.mxu0 %v20943_v63 }
0x1365   : > { %19808 = vmatpush.bf16.msrb.mxu1 %v21007_v9 }
0x13a3   : > { %v19230_v48 = vpop.f32.mrf.mxu0  ;;  %v19244_v8 = vpop.f32.mrf.mxu1 }
0x13a4   : > { %v19231_v50 = vadd.f32 %v19230_v48, %v18893_v27  ;;  %v21159_v48 = vor.u32 %v21447_v52, %v21156_v24 }
0x13a6   : > { %v19245_v53 = vadd.f32 %v19244_v8, %v19231_v50  ;;  %v21427_v8 = vld [vmem:[%s23086_s19 + $0x114] sm:$0xf]  ;;  %19833 = vmatpush.bf16.msrb.mxu3 %v21159_v48 }
0x13a7   : > { %v21079_v16 = vor.u32 %v21427_v8, %v21076_v39  ;;  %v21443_v50 = vld [vmem:[%s23086_s19 + $0x194] sm:$0xf] }
0x13a9   : > { %19821 = vmatpush.bf16.msrb.mxu2 %v21079_v16 }
0x13aa   : > { %v19258_v3 = vpop.f32.mrf.mxu2  ;;  %v19272_v35 = vpop.f32.mrf.mxu3  ;;  %19834 = vmatpush.bf16.msrb.mxu3 %v21151_v40 }
0x13ab   : > { %v19232_v43 = vpop.f32.mrf.mxu0  ;;  %v19246_v45 = vpop.f32.mrf.mxu1  ;;  %v19259_v1 = vadd.f32 %v19258_v3, %v18894_v61 }
0x13ac   : > { %v19233_v58 = vadd.f32 %v19232_v43, %v18893_v27  ;;  %v19333_v27 = vmax.f32 %v19245_v53, 0.0  ;;  %v21132_v43 = vld [vmem:[%s23086_s19 + $0x188] sm:$0xf0] }
0x13ad   : > { %v19273_v49 = vadd.f32 %v19272_v35, %v19259_v1  ;;  %19822 = vmatpush.bf16.msrb.mxu2 %v21071_v12  ;;  %v21135_v5 = vor.u32 %v21441_v57, %v21132_v43 }
0x13ae   : > { %v19247_v14 = vadd.f32 %v19246_v45, %v19233_v58 }
0x13af   : > { %v19334_v6 = vmax.f32 %v19273_v49, 0.0 }
0x13b0   : > { %v19337_v54 = vmax.f32 %v19247_v14, 0.0 }
0x13b2   : > { %v19341_v42 = vpack.c.bf16 %v19337_v54, %v19333_v27  ;;  %v19260_v38 = vpop.f32.mrf.mxu2  ;;  %v19274_v21 = vpop.f32.mrf.mxu3  ;;  %v29154_v27 = vld [vmem:[%s23107_s0] sm:$0x3f] }
0x13b3   : > { %v19261_v29 = vadd.f32 %v19260_v38, %v18894_v61  ;;  %v19286_v25 = vpop.f32.mrf.mxu0  ;;  %v19300_v0 = vpop.f32.mrf.mxu1  ;;  %v21140_v61 = vld [vmem:[%s23086_s19 + $0x198] sm:$0xf0]  ;;  %v19409_v54 = vperm.slane %v29154_v27, 3 }
0x13b4   : > { %19739 = vmatmul.bf16.vlgmr.msra.gmra.mxu0 %v19341_v42  ;;  %v19287_v11 = vadd.f32 %v19286_v25, %v18895_v26  ;;  %v21143_v63 = vor.u32 %v21443_v50, %v21140_v61 }
0x13b5   : > { %v19275_v36 = vadd.f32 %v19274_v21, %v19261_v29 }
0x13b6   : > { %v19301_v45 = vadd.f32 %v19300_v0, %v19287_v11  ;;  %19835 = vmatpush.bf16.msrb.mxu3 %v21143_v63 }
0x13b7   : > { %v19338_v23 = vmax.f32 %v19275_v36, 0.0 }
0x13b8   : > { %v19335_v53 = vmax.f32 %v19301_v45, 0.0 }
0x13b9   : > { %v19342_v7 = vpack.c.bf16 %v19338_v23, %v19334_v6 }
0x13ba   : > { %v19314_v3 = vpop.f32.mrf.mxu2  ;;  %v19328_v35 = vpop.f32.mrf.mxu3  ;;  %19836 = vmatpush.bf16.msrb.mxu3 %v21135_v5 }
0x13bb   : > { %19753 = vmatmul.bf16.vlgmr.msra.gmra.mxu1 %v19342_v7  ;;  %v19288_v51 = vpop.f32.mrf.mxu0  ;;  %v19302_v4 = vpop.f32.mrf.mxu1  ;;  %v19315_v41 = vadd.f32 %v19314_v3, %v18896_v22 }
0x13bc   : > { %v19289_v17 = vadd.f32 %v19288_v51, %v18895_v26 }
0x13bd   : > { %v19329_v44 = vadd.f32 %v19328_v35, %v19315_v41 }
0x13be   : > { %v19303_v2 = vadd.f32 %v19302_v4, %v19289_v17 }
0x13bf   : > { %v19336_v18 = vmax.f32 %v19329_v44, 0.0 }
0x13c0   : > { %v19339_v58 = vmax.f32 %v19303_v2, 0.0 }
0x13c2   : > { %v19343_v30 = vpack.c.bf16 %v19339_v58, %v19335_v53  ;;  %v19316_v59 = vpop.f32.mrf.mxu2  ;;  %v19330_v32 = vpop.f32.mrf.mxu3 }
0x13c3   : > { %v19317_v62 = vadd.f32 %v19316_v59, %v18896_v22 }
0x13c4   : > { %19767 = vmatmul.bf16.vlgmr.msra.gmra.mxu2 %v19343_v30  ;;  %19795 = vmatmul.bf16.vlgmr.msrb.gmra.mxu0 %v19341_v42  ;;  %v29158_v42 = vld [vmem:[%s23107_s0 + $0x8] sm:$0x3f] }
0x13c5   : > { %v19331_v13 = vadd.f32 %v19330_v32, %v19317_v62  ;;  %v19410_v38 = vperm.slane %v29158_v42, 3 }
0x13c7   : > { %v19340_v37 = vmax.f32 %v19331_v13, 0.0 }
0x13c9   : > { %v19344_v14 = vpack.c.bf16 %v19340_v37, %v19336_v18 }
0x13cb   : > { %19781 = vmatmul.bf16.vlgmr.msra.gmra.mxu3 %v19344_v14  ;;  %19809 = vmatmul.bf16.vlgmr.msrb.gmra.mxu1 %v19342_v7 }
0x13d4   : > { %19823 = vmatmul.bf16.vlgmr.msrb.gmra.mxu2 %v19343_v30 }
0x13db   : > { %19837 = vmatmul.bf16.vlgmr.msrb.gmra.mxu3 %v19344_v14 }
0x1431   : > { %v19740_v9 = vpop.f32.mrf.mxu0 }
0x1432   : > { %v19741_v8 = vadd.f32 %v19740_v9, %v19409_v54 }
0x1438   : > { %v19754_v28 = vpop.f32.mrf.mxu1 }
0x1439   : > { %v19742_v19 = vpop.f32.mrf.mxu0  ;;  %v19755_v49 = vadd.f32 %v19754_v28, %v19741_v8 }
0x143a   : > { %v19743_v16 = vadd.f32 %v19742_v19, %v19409_v54  ;;  %v19897_v54 = vperm.slane %v29154_v27, 4 }
0x1440   : > { %v19756_v1 = vpop.f32.mrf.mxu1 }
0x1441   : > { %v19796_v60 = vpop.f32.mrf.mxu0  ;;  %v19757_v10 = vadd.f32 %v19756_v1, %v19743_v16 }
0x1442   : > { %v19797_v29 = vadd.f32 %v19796_v60, %v19410_v38  ;;  %v19898_v60 = vperm.slane %v29158_v42, 4 }
0x1447   : > { %v19768_v33 = vpop.f32.mrf.mxu2 }
0x1448   : > { %v19810_v21 = vpop.f32.mrf.mxu1  ;;  %v19769_v25 = vadd.f32 %v19768_v33, %v19755_v49 }
0x1449   : > { %v19811_v0 = vadd.f32 %v19810_v21, %v19797_v29  ;;  %v19798_v26 = vpop.f32.mrf.mxu0 }
0x144a   : > { %v19799_v6 = vadd.f32 %v19798_v26, %v19410_v38 }
0x144e   : > { %v19782_v52 = vpop.f32.mrf.mxu3 }
0x144f   : > { %v19770_v24 = vpop.f32.mrf.mxu2  ;;  %v19783_v31 = vadd.f32 %v19782_v52, %v19769_v25 }
0x1450   : > { %v19812_v56 = vpop.f32.mrf.mxu1  ;;  %v19771_v11 = vadd.f32 %v19770_v24, %v19757_v10 }
0x1451   : > { %v19843_v23 = vadd.f32 %v19783_v31, %v28979_v46  ;;  %v19813_v7 = vadd.f32 %v19812_v56, %v19799_v6 }
0x1456   : > { %v19784_v48 = vpop.f32.mrf.mxu3 }
0x1457   : > { %v19824_v39 = vpop.f32.mrf.mxu2  ;;  %v19785_v3 = vadd.f32 %v19784_v48, %v19771_v11  ;;  %v19904_v48 = vperm.slane %v29158_v42, 5 }
0x1458   : > { %v19825_v55 = vadd.f32 %v19824_v39, %v19811_v0 }
0x1459   : > { %v19845_v51 = vadd.f32 %v19785_v3, %v28983_v20 }
0x145e   : > { %v19838_v36 = vpop.f32.mrf.mxu3 }
0x145f   : > { %v19839_v40 = vadd.f32 %v19838_v36, %v19825_v55  ;;  %v19826_v61 = vpop.f32.mrf.mxu2 }
0x1460   : > { %v19827_v35 = vadd.f32 %v19826_v61, %v19813_v7 }
0x1461   : > { %v19844_v50 = vadd.f32 %v19839_v40, %v28981_v34 }
0x1463   : > { %v19847_v12 = vadd.f32 %v19844_v50, %v19843_v23 }
0x1465   : > { %19848 = vadd.xlane.f32.xlu1 %v19847_v12 }
0x1466   : > { %v19840_v63 = vpop.f32.mrf.mxu3 }
0x1467   : > { %v19841_v22 = vadd.f32 %v19840_v63, %v19827_v35 }
0x1469   : > { %v19846_v57 = vadd.f32 %v19841_v22, %v28985_v47 }
0x146b   : > { %v19850_v43 = vadd.f32 %v19846_v57, %v19845_v51 }
0x146d   : > { %19851 = vadd.xlane.f32.xlu2 %v19850_v43 }
0x14d8   : > { %v19849_v45 = vpop.xlane.xlu1 %19848 }
0x14d9   : > { %v19853_v46 = vmul.f32 %v19849_v45, %v28818_v15 }
0x14db   : > { %v19855_v17 = vsub.f32 %v19843_v23, %v19853_v46  ;;  %v19856_v34 = vsub.f32 %v19844_v50, %v19853_v46 }
0x14dd   : > { %v19859_v4 = vmul.f32 %v19855_v17, %v19855_v17  ;;  %v19860_v2 = vmul.f32 %v19856_v34, %v19856_v34 }
0x14df   : > { %v19863_v5 = vadd.f32 %v19860_v2, %v19859_v4 }
0x14e0   : > { %v19852_v41 = vpop.xlane.xlu2 %19851 }
0x14e1   : > { %v19854_v53 = vmul.f32 %v19852_v41, %v28818_v15  ;;  %19864 = vadd.xlane.f32.xlu1 %v19863_v5 }
0x14e3   : > { %v19857_v58 = vsub.f32 %v19845_v51, %v19854_v53  ;;  %v19858_v30 = vsub.f32 %v19846_v57, %v19854_v53 }
0x14e5   : > { %v19861_v59 = vmul.f32 %v19857_v58, %v19857_v58  ;;  %v19862_v20 = vmul.f32 %v19858_v30, %v19858_v30 }
0x14e7   : > { %v19866_v44 = vadd.f32 %v19862_v20, %v19861_v59 }
0x14e9   : > { %19867 = vadd.xlane.f32.xlu2 %v19866_v44 }
0x1554   : > { %v19865_v47 = vpop.xlane.xlu1 %19864 }
0x1555   : > { %v19869_v62 = vmul.f32 %v19865_v47, %v28818_v15 }
0x1557   : > { %v19871_v32 = vadd.f32 1e-05, %v19869_v62 }
0x1559   : > { %22686 = vrsqrt.f32 %v19871_v32  ;;  %vm19879_vm10 = vweird.f32 %v19871_v32 }
0x155c   : > { %v19868_v13 = vpop.xlane.xlu2 %19867 }
0x155d   : > { %v19870_v18 = vmul.f32 %v19868_v13, %v28818_v15  ;;  %v19903_v15 = vperm.slane %v29154_v27, 5 }
0x155f   : > { %v22687_v37 = vpop.eup %22686  ;;  %v19872_v14 = vadd.f32 1e-05, %v19870_v18 }
0x1560   : > { %v19874_v9 = vmul.f32 %v22687_v37, %v19871_v32  ;;  %vm19880_vm9 = vweird.f32 %v22687_v37 }
0x1561   : > { %22688 = vrsqrt.f32 %v19872_v14  ;;  %vm19881_vm11 = vmor %vm19879_vm10, %vm19880_vm9  ;;  %vm19889_vm13 = vweird.f32 %v19872_v14 }
0x1562   : > { %v19875_v28 = vmul.f32 %v22687_v37, %v19874_v9 }
0x1564   : > { %v19876_v33 = vmul.f32 0.5, %v19875_v28 }
0x1566   : > { %v19877_v19 = vsub.f32 1.5, %v19876_v33 }
0x1567   : > { %v22689_v1 = vpop.eup %22688 }
0x1568   : > { %v19878_v52 = vmul.f32 %v22687_v37, %v19877_v19  ;;  %v19884_v24 = vmul.f32 %v22689_v1, %v19872_v14  ;;  %vm19890_vm12 = vweird.f32 %v22689_v1 }
0x1569   : > { %vm19891_vm14 = vmor %vm19889_vm13, %vm19890_vm12 }
0x156a   : > { %v19882_v38 = vsel %vm19881_vm11, %v22687_v37, %v19878_v52  ;;  %v19885_v21 = vmul.f32 %v22689_v1, %v19884_v24 }
0x156b   : > { %v19893_v8 = vmul.f32 %v19882_v38, %v19855_v17  ;;  %v19894_v39 = vmul.f32 %v19882_v38, %v19856_v34 }
0x156c   : > { %v19886_v49 = vmul.f32 0.5, %v19885_v21 }
0x156d   : > { %v19899_v29 = vmul.f32 %v19897_v54, %v19893_v8  ;;  %v19900_v25 = vmul.f32 %v19898_v60, %v19894_v39 }
0x156e   : > { %v19887_v0 = vsub.f32 1.5, %v19886_v49 }
0x156f   : > { %v19905_v31 = vadd.f32 %v19903_v15, %v19899_v29  ;;  %v19906_v55 = vadd.f32 %v19904_v48, %v19900_v25 }
0x1570   : > { %v19888_v26 = vmul.f32 %v22689_v1, %v19887_v0 }
0x1571   : > { %19909 = vst [vmem:[#allocation2 + $0x10] sm:$0xff] %v19905_v31 }
0x1572   : > { %19910 = vst [vmem:[#allocation2] sm:$0xff] %v19906_v55  ;;  %v19892_v36 = vsel %vm19891_vm14, %v22689_v1, %v19888_v26 }
0x1573   : > { %v19895_v16 = vmul.f32 %v19892_v36, %v19857_v58  ;;  %v19896_v40 = vmul.f32 %v19892_v36, %v19858_v30 }
0x1575   : > { %v19901_v27 = vmul.f32 %v19897_v54, %v19895_v16  ;;  %v19902_v56 = vmul.f32 %v19898_v60, %v19896_v40 }
0x1576   : > { %19916 = sbr.rel (%p21192_p1) target bundleno = 5503 (0x157f), region = 76 }
0x1577   : > { %v19907_v42 = vadd.f32 %v19903_v15, %v19901_v27  ;;  %v19908_v10 = vadd.f32 %v19904_v48, %v19902_v56 }
0x1579   : > { %19911 = vst [vmem:[#allocation2 + $0x18] sm:$0xff] %v19907_v42 }
0x157a   : > { %19912 = vst [vmem:[#allocation2 + $0x8] sm:$0xff] %v19908_v10 }
0x157b   : > { %v19917_v6 = vpack.c.bf16 %v19906_v55, %v19905_v31  ;;  %v19918_v23 = vpack.c.bf16 %v19908_v10, %v19907_v42 }
0x157d   : > { %19919 = vst [vmem:[#allocation11] sm:$0xff] %v19917_v6 }
0x157e   : > { %19920 = vst [vmem:[#allocation11 + $0x8] sm:$0xff] %v19918_v23 }
0x157f PF: > { %p21487_p2 = scmp.eq.s32.totalorder %s22995_s11, 1  ;;  %s29388_s21 = sld [smem:[#allocation47_spill]] }
0x1580   : > { %s22918_s16 = smov [#allocation11]   ;;  %s22919_s8 = smov 128  }
0x1581   : > { %s19930_s14 = sshll.u32 %s22918_s16, 4  ;;  %s22920_s10 = smov 8   ;;  %s19931_s14 = int_to_ptr.vmem [resolvable:$true] %s19930_s14 }
0x1585   : > { %s19932_s19 = sshll.u32 %s29388_s21, 4  ;;  %s19933_s19 = int_to_ptr.hbm [resolvable:$true] %s19932_s19 }
0x1586   : > { %21470 = dma.vmem_to_hbm [thread:$0]  (%p21487_p2), %s19931_s14, 256, %s19933_s19, [#allocation5], %s22919_s8, %s22919_s8, %s22920_s10  }
0x1587   : > { %22882 = dma.done.wait (%p21487_p2), [#allocation5], 256  }
0x1588   : > { %22884 = vsyncadd (%p21487_p2), [#allocation5], 4294967040 }
0x1589 PF: > { %s29389_s30 = sld [smem:[#allocation17_spill]]  ;;  %s29393_s27 = smov %s22891_s28 }
0x158a   : > { %s29390_s13 = sld [smem:[#allocation16_spill]] }
0x158b   : > { %s29391_s29 = sld [smem:[#allocation19_spill]] }
0x158c   : > { %s29392_s11 = sld [smem:[#allocation18_spill]] }
0x158f   : > { %s28_s10 = sadd.s32 1, %s29389_s30   ;;  %s29395_s30 = smov %s22903_s9 }
0x1590   : > { %p25_p3 = scmp.ge.s32.totalorder %s28_s10, 4   ;;  %s29394_s28 = smov %s29390_s13 }
0x1592   : > { %s29396_s9 = smov %s29392_s11  ;;  %27 = sbr.rel (!%p25_p3) target bundleno = 14 (0xe), region = 147 }
0x1597   :  { %19949 = vsyncpa [#allocation4], 1 }
0x1598   :  { %19951 = vsyncpa [#allocation4 + $0x1], 1 }
0x1599   :  { %19952 = vsyncpa [#allocation7], 1 }
0x159a   :  { %19954 = vsyncpa [#allocation7 + $0x1], 1 }
0x159b   :  { %19955 = vsyncpa [#allocation10], 1 }
0x159c   :  { %19957 = vsyncpa [#allocation10 + $0x1], 1 }
0x159d   :  { %19958 = vsyncpa [#allocation5], 1 }
0x159e   :  { %19960 = vsyncpa [#allocation5 + $0x1], 1 }

</bundles_post_ra>
